<compile_context>
chip_gen: v6e
topology: v6e:2x2x1
jax: 0.10.0
libtpu: 0.0.40
codegen_flags: <defaults>
</compile_context>

<pallas_src>
import random
from functools import partial

import numpy as np
import jax
import jax.numpy as jnp
from jax import lax
from jax.experimental import pallas as pl
from jax.experimental.pallas import tpu as pltpu

# ----------------------------- configuration -------------------------------
N = 2            # batch per stream
IMG = 16         # image size (power of two, depth = log2(IMG) = 4)
CHANNELS = 3
DENSITY = 8
Z = 24           # latent dim (Z % CLUSTERS == 0)
CLUSTERS = 3
GROUP = Z // CLUSTERS
STREAMS = 4
HIDDEN = 32
CLASSES = 16
DOMAINS = 5
BN_EPS = 1e-5
LRELU_SLOPE = 0.2

F_IMG = IMG * IMG * CHANNELS            # 768  flattened NHWC image
F_E2 = (IMG // 4) ** 2 * 2 * DENSITY    # 256  4x4x2D  (encoder conv2 / decoder d1)
F_D2 = (IMG // 2) ** 2 * DENSITY        # 512  8x8xD   (decoder d2)
HEAD_PAD = 256                          # lane-aligned merged mean|logvar head width
LOGVAR_COL = 128                        # logvar half starts at lane 128


# ------------------- weight -> dense operator preprocessing -----------------
# Pure numpy, weight-only.  Runs ONCE (per weight update), NOT per forward.
def _conv_indices(in_hw, k, stride, pad, cin, cout, transpose):
    """Index arrays that scatter conv weights into a dense [Fin,Fout] matrix."""
    hi, wi = in_hw
    if transpose:
        ho = (hi - 1) * stride - 2 * pad + k
        wo = (wi - 1) * stride - 2 * pad + k
    else:
        ho = (hi + 2 * pad - k) // stride + 1
        wo = (wi + 2 * pad - k) // stride + 1
    trips = []  # (input position, output position, kernel tap)
    for ih in range(hi):
        for iw in range(wi):
            for i in range(k):
                for j in range(k):
                    if transpose:
                        # PyTorch ConvTranspose2d:  oh = ih*s - p + kh
                        oh = ih * stride - pad + i
                        ow = iw * stride - pad + j
                    else:
                        # PyTorch Conv2d:  ih = oh*s - p + kh
                        if (ih + pad - i) % stride or (iw + pad - j) % stride:
                            continue
                        oh = (ih + pad - i) // stride
                        ow = (iw + pad - j) // stride
                    if 0 <= oh < ho and 0 <= ow < wo:
                        trips.append((ih * wi + iw, oh * wo + ow, i * k + j))
    trips = np.asarray(trips, np.int64)
    t_in = trips[:, 0][:, None, None]
    t_out = trips[:, 1][:, None, None]
    t_tap = trips[:, 2][:, None, None]
    a = np.arange(cin)[None, :, None]
    b = np.arange(cout)[None, None, :]
    full = (len(trips), cin, cout)
    rows = np.broadcast_to(t_in * cin + a, full).reshape(-1)
    cols = np.broadcast_to(t_out * cout + b, full).reshape(-1)
    widx = np.broadcast_to((t_tap * cin + a) * cout + b, full).reshape(-1)
    return rows, cols, widx, (ho, wo)


def build_dense_operators(params):
    """Dense [Fin, Fout] operators + packed constant slabs (numpy -> device).

    Activations are flattened NHWC row vectors, so y_flat = x_flat @ T
    reproduces each conv / conv-transpose layer.  Call once per weight update.
    """
    p = {k: np.asarray(v, np.float32) for k, v in params.items()}

    def conv_mat(w, in_hw, stride, pad, transpose=False):
        k, k2, cin, cout = w.shape
        assert k == k2
        rows, cols, widx, out_hw = _conv_indices(in_hw, k, stride, pad,
                                                 cin, cout, transpose)
        fin = in_hw[0] * in_hw[1] * cin
        fout = out_hw[0] * out_hw[1] * cout
        t = np.zeros((fin, fout), np.float32)
        np.add.at(t, (rows, cols), w.reshape(-1)[widx])
        return t, out_hw

    # encoder
    t_e1, hw = conv_mat(p["w_e1"], (IMG, IMG), 2, 1)              # 16 -> 8
    t_e2, hw = conv_mat(p["w_e2"], hw, 2, 1)                      # 8 -> 4
    t_mean, _ = conv_mat(p["w_mean"], hw, 1, 0)                   # 4 -> 1
    t_logv, _ = conv_mat(p["w_logvar"], hw, 1, 0)
    t_hd = np.zeros((F_E2, HEAD_PAD), np.float32)                 # lane-aligned head
    t_hd[:, 0:Z] = t_mean
    t_hd[:, LOGVAR_COL:LOGVAR_COL + Z] = t_logv
    # decoder
    t_d1, hw = conv_mat(p["w_d1"], (1, 1), 1, 0, transpose=True)  # 1 -> 4
    t_d2, hw = conv_mat(p["w_d2"], hw, 2, 1, transpose=True)      # 4 -> 8
    t_d3, hw = conv_mat(p["w_d3"], hw, 2, 1, transpose=True)      # 8 -> 16

    # RelationPrediction: class|domain branches merged; w1 pre-split by rows
    w1 = np.concatenate([p["fc1"], p["fd1"]], axis=1)             # [2Z, 2H]
    w2 = np.zeros((2 * HIDDEN, 2 * HIDDEN), np.float32)
    w2[:HIDDEN, :HIDDEN] = p["fc2"]
    w2[HIDDEN:, HIDDEN:] = p["fd2"]
    w3 = np.zeros((2 * HIDDEN, CLASSES + DOMAINS), np.float32)
    w3[:HIDDEN, :CLASSES] = p["fc3"]
    w3[HIDDEN:, CLASSES:] = p["fd3"]
    # one bf16 FC slab, row offsets aligned to bf16 sublane tiles (16)
    fcw = np.zeros((192, 2 * HIDDEN), np.float32)
    fcw[0:2 * HIDDEN, :] = w2                                     # rows   0: 64
    fcw[2 * HIDDEN:4 * HIDDEN, 0:CLASSES + DOMAINS] = w3          # rows  64:128
    fcw[128:128 + Z, :] = w1[0:Z, :]                              # rows 128:152 (w1a)
    fcw[160:160 + Z, :] = w1[Z:2 * Z, :]                          # rows 160:184 (w1b)

    # one f32 bias slab
    bias = np.zeros((4, HEAD_PAD), np.float32)
    bias[0, 0:Z] = p["b_mean"]
    bias[0, LOGVAR_COL:LOGVAR_COL + Z] = p["b_logvar"]
    bias[1, 0:HIDDEN] = p["fcb1"]; bias[1, HIDDEN:2 * HIDDEN] = p["fdb1"]
    bias[2, 0:HIDDEN] = p["fcb2"]; bias[2, HIDDEN:2 * HIDDEN] = p["fdb2"]
    bias[3, 0:CLASSES] = p["fcb3"]; bias[3, CLASSES:CLASSES + DOMAINS] = p["fdb3"]

    bf = jnp.bfloat16
    return {
        "t_e1": jnp.asarray(t_e1, bf), "t_e2": jnp.asarray(t_e2, bf),
        "t_hd": jnp.asarray(t_hd, bf), "t_d1": jnp.asarray(t_d1, bf),
        "t_d2": jnp.asarray(t_d2, bf), "t_d3": jnp.asarray(t_d3, bf),
        "fcw": jnp.asarray(fcw, bf), "bias": jnp.asarray(bias, jnp.float32),
    }


# ----------------------------- the fused kernel ------------------------------
def _fused_kernel(xin_ref,
                  t_e1_ref, t_e2_ref, t_hd_ref, t_d1_ref,
                  t_d2_hbm, t_d3_hbm,
                  fcw_ref, bias_ref,
                  mu_ref, lv_ref, z_ref, dec_ref, cd_ref,
                  d2_vmem, d3_vmem, dma_sem,
                  *, n, rc1, rc2):
    f32, bf16 = jnp.float32, jnp.bfloat16

    def mmb(a, b):
        # bf16 MXU-native matmul with f32 accumulation (weights already bf16).
        return jnp.dot(a.astype(bf16), b.astype(bf16), preferred_element_type=f32)

    def mmf(a, b):
        # f32 path for the tiny BatchNorm statistic / broadcast matmuls.
        return jnp.dot(a, b, preferred_element_type=f32)

    def lrelu(v):
        return jnp.where(v >= 0, v, LRELU_SLOPE * v)

    # ---- kick off decoder-weight DMAs so they hide under encoder compute ----
    cp_d2 = pltpu.make_async_copy(t_d2_hbm, d2_vmem, dma_sem.at[0])
    cp_d3 = pltpu.make_async_copy(t_d3_hbm, d3_vmem, dma_sem.at[1])
    cp_d2.start()
    cp_d3.start()

    # ---- BN indicator / group maps generated in-kernel (no HBM traffic) -----
    def channel_maps(f, c):            # c is a power of two
        r = lax.broadcasted_iota(jnp.int32, (f, c), 0)
        k = lax.broadcasted_iota(jnp.int32, (f, c), 1)
        cmap = jnp.where(jnp.bitwise_and(r, c - 1) == k, 1.0, 0.0).astype(f32)
        rt = lax.broadcasted_iota(jnp.int32, (c, f), 0)
        kt = lax.broadcasted_iota(jnp.int32, (c, f), 1)
        cmapt = jnp.where(jnp.bitwise_and(kt, c - 1) == rt, 1.0, 0.0).astype(f32)
        return cmap, cmapt

    def group_maps(m, g):              # groups = contiguous blocks of n rows
        r = lax.broadcasted_iota(jnp.int32, (m, g), 0)
        q = lax.broadcasted_iota(jnp.int32, (m, g), 1)
        gmap = jnp.where((r >= q * n) & (r < (q + 1) * n), 1.0, 0.0).astype(f32)
        qt = lax.broadcasted_iota(jnp.int32, (g, m), 0)
        rt = lax.broadcasted_iota(jnp.int32, (g, m), 1)
        gmapt = jnp.where((rt >= qt * n) & (rt < (qt + 1) * n), 1.0, 0.0).astype(f32)
        return gmap, gmapt

    cm16, cm16t = channel_maps(F_E2, 2 * DENSITY)          # [256,16] / [16,256]
    cm8, cm8t = channel_maps(F_D2, DENSITY)                 # [512, 8] / [ 8,512]
    ge, get_ = group_maps(STREAMS * n, STREAMS)             # encoder: per-stream groups
    gd, gdt = group_maps((STREAMS + 2) * n, STREAMS + 2)    # decoder: per-invocation

    def bn_lrelu(h, gmap, gmapt, cmap, cmapt):
        # Training-mode BatchNorm2d (gamma=1, beta=0, biased var) + LeakyReLU,
        # statistics per (row-group, channel) == per original encoder/decoder
        # call.  E[x^2]-E[x]^2 so both reductions share one row-reduce matmul;
        # the channel reductions and the two broadcast-back chains overlap.
        f = h.shape[1]
        c = cmap.shape[1]
        count = float(n * (f // c))
        hh = jnp.concatenate([h, h * h], axis=1)            # [M, 2F] (lane-aligned)
        s = mmf(gmapt, hh)                                  # [G, 2F]
        mean_gc = mmf(s[:, :f], cmap) * (1.0 / count)       # [G, C]
        ex2_gc = mmf(s[:, f:], cmap) * (1.0 / count)        # [G, C] (independent)
        var_gc = jnp.maximum(ex2_gc - mean_gc * mean_gc, 0.0)
        inv_gc = lax.rsqrt(var_gc + BN_EPS)
        scale = mmf(mmf(gmap, inv_gc), cmapt)               # broadcast back [M, F]
        shift = mmf(mmf(gmap, mean_gc * inv_gc), cmapt)     # (independent chain)
        return lrelu(h * scale - shift)

    # ---- encoder: all 4 streams batched along rows ---------------------------
    x = xin_ref[:, 0:F_IMG]                                        # [4N, 768]
    eps = xin_ref[:, F_IMG:F_IMG + Z]                              # [4N, Z]
    h1 = lrelu(mmb(x, t_e1_ref[...]))                              # conv e1       [4N, 512]
    h2 = bn_lrelu(mmb(h1, t_e2_ref[...]), ge, get_, cm16, cm16t)   # conv e2 + BN  [4N, 256]
    heads = mmb(h2, t_hd_ref[...]) + bias_ref[0:1, :]              # mean|logvar   [4N, 256]
    mu = heads[:, 0:Z]                                             # lane offset 0
    logvar = heads[:, LOGVAR_COL:LOGVAR_COL + Z]                   # lane offset 128

    # ---- reparameterization ---------------------------------------------------
    z = eps * jnp.exp(0.5 * logvar) + mu                           # [4N, Z]

    # ---- latent recombination (pure VPU selects, no scratch round trip) ------
    lane = lax.broadcasted_iota(jnp.int32, (n, Z), 1)
    m1 = (lane >= rc1 * GROUP) & (lane < (rc1 + 1) * GROUP)        # rc may be CLUSTERS
    m2 = (lane >= rc2 * GROUP) & (lane < (rc2 + 1) * GROUP)        # -> all-False mask
    rec1 = jnp.where(m1, z[0:n, :], z[2 * n:3 * n, :])             # stream0 vs stream2
    rec2 = jnp.where(m2, z[n:2 * n, :], z[3 * n:4 * n, :])         # stream1 vs stream3
    dec_in = jnp.concatenate([z, rec1, rec2], axis=0)              # [6N, Z]

    # ---- decoder: 6 invocations batched along rows ----------------------------
    g1 = bn_lrelu(mmb(dec_in, t_d1_ref[...]), gd, gdt, cm16, cm16t)   # [6N, 256]
    cp_d2.wait()
    g2 = bn_lrelu(mmb(g1, d2_vmem[...]), gd, gdt, cm8, cm8t)          # [6N, 512]
    cp_d3.wait()
    dec_ref[...] = jnp.tanh(mmb(g2, d3_vmem[...]))                    # [6N, 768] lane-dense

    # ---- RelationPrediction on streams 0 & 1 (class|domain fused, no concat) --
    w1a = fcw_ref[128:128 + Z, :]
    w1b = fcw_ref[160:160 + Z, :]
    w2 = fcw_ref[0:2 * HIDDEN, :]
    w3 = fcw_ref[2 * HIDDEN:4 * HIDDEN, 0:CLASSES + DOMAINS]
    fc = mmb(z[0:n, :], w1a) + mmb(z[n:2 * n, :], w1b) + bias_ref[1:2, 0:2 * HIDDEN]
    fc = mmb(fc, w2) + bias_ref[2:3, 0:2 * HIDDEN]
    cd_ref[...] = mmb(fc, w3) + bias_ref[3:4, 0:CLASSES + DOMAINS]    # [N, 21]

    # ---- latent outputs: three lane-offset-0 stores (no lane concat/rotate) ---
    mu_ref[...] = mu
    lv_ref[...] = logvar
    z_ref[...] = z


def fused_forward(xin, ops, n, rc1, rc2):
    m_enc = STREAMS * n
    m_dec = (STREAMS + 2) * n
    inputs = [xin, ops["t_e1"], ops["t_e2"], ops["t_hd"], ops["t_d1"],
              ops["t_d2"], ops["t_d3"], ops["fcw"], ops["bias"]]
    in_specs = [
        pl.BlockSpec(xin.shape, lambda i: (0, 0)),
        pl.BlockSpec(ops["t_e1"].shape, lambda i: (0, 0)),
        pl.BlockSpec(ops["t_e2"].shape, lambda i: (0, 0)),
        pl.BlockSpec(ops["t_hd"].shape, lambda i: (0, 0)),
        pl.BlockSpec(ops["t_d1"].shape, lambda i: (0, 0)),
        pl.BlockSpec(memory_space=pl.ANY),      # t_d2: manual DMA (overlapped)
        pl.BlockSpec(memory_space=pl.ANY),      # t_d3: manual DMA (overlapped)
        pl.BlockSpec(ops["fcw"].shape, lambda i: (0, 0)),
        pl.BlockSpec(ops["bias"].shape, lambda i: (0, 0)),
    ]
    out_shape = (jax.ShapeDtypeStruct((m_enc, Z), jnp.float32),        # mu
                 jax.ShapeDtypeStruct((m_enc, Z), jnp.float32),        # logvar
                 jax.ShapeDtypeStruct((m_enc, Z), jnp.float32),        # z
                 jax.ShapeDtypeStruct((m_dec, F_IMG), jnp.float32),    # decoder images
                 jax.ShapeDtypeStruct((n, CLASSES + DOMAINS), jnp.float32))
    out_specs = tuple(pl.BlockSpec(s.shape, lambda i: (0, 0)) for s in out_shape)
    kernel = partial(_fused_kernel, n=n, rc1=rc1, rc2=rc2)
    return pl.pallas_call(
        kernel,
        out_shape=out_shape,
        grid=(1,),
        in_specs=in_specs,
        out_specs=out_specs,
        scratch_shapes=[pltpu.VMEM((F_E2, F_D2), jnp.bfloat16),    # t_d2 buffer
                        pltpu.VMEM((F_D2, F_IMG), jnp.bfloat16),   # t_d3 buffer
                        pltpu.SemaphoreType.DMA((2,))],
    )(*inputs)


# ----------------------------- full forward ---------------------------------
@partial(jax.jit, static_argnums=(3, 4))
def _forward_impl(datums, ops, key, rc1, rc2):
    n = datums[0].shape[0]
    x_enc = jnp.concatenate([d.reshape(n, F_IMG) for d in datums], axis=0)  # [4N, 768]
    # TODO(synk): torch.cuda.FloatTensor(std.size()).normal_() replaced with a
    # deterministic stacked jax.random normal fed into the fused kernel.
    eps = jax.random.normal(key, (STREAMS * n, Z), jnp.float32)
    xin = jnp.concatenate([x_enc, eps], axis=1)                             # [4N, 792]
    mu, logvar, z, dec, clsdom = fused_forward(xin, ops, n, rc1, rc2)

    imgs = dec.reshape((STREAMS + 2) * n, IMG, IMG, CHANNELS)
    stream_outputs, mu_lists, std_lists, z_lists = [], [], [], []
    for s in range(STREAMS):
        r0, r1 = s * n, (s + 1) * n
        stream_outputs.append(imgs[r0:r1])
        mu_lists.append([mu[r0:r1, c * GROUP:(c + 1) * GROUP].reshape(n, GROUP, 1, 1)
                         for c in range(CLUSTERS)])
        std_lists.append([logvar[r0:r1, c * GROUP:(c + 1) * GROUP].reshape(n, GROUP, 1, 1)
                          for c in range(CLUSTERS)])
        z_lists.append([z[r0:r1, c * GROUP:(c + 1) * GROUP].reshape(n, GROUP, 1, 1)
                        for c in range(CLUSTERS)])
    rec = [imgs[STREAMS * n:(STREAMS + 1) * n],
           imgs[(STREAMS + 1) * n:(STREAMS + 2) * n]]
    class_prediction = clsdom[:, :CLASSES]
    domain_prediction = clsdom[:, CLASSES:]
    return (stream_outputs, list(datums), rec, mu_lists, std_lists, z_lists,
            class_prediction, domain_prediction)


def face_vae_mixture_forward(datums, ops, key):
    # Faithful to the original: random.randint(0, clusters) (inclusive upper
    # bound, so it may select no cluster), drawn at Python/trace level, once
    # per recombination.
    rc1 = random.randint(0, CLUSTERS)
    rc2 = random.randint(0, CLUSTERS)
    return _forward_impl(tuple(datums), ops, key, rc1, rc2)


# ----------------------------- parameters -----------------------------------
def init_params(key):
    ks = jax.random.split(key, 16)
    nrm = lambda k, s: jax.random.normal(k, s, jnp.float32) * 0.05
    p = {}
    # encoder (conv weights: [KH, KW, Cin, Cout])
    p["w_e1"] = nrm(ks[0], (4, 4, CHANNELS, DENSITY))
    p["w_e2"] = nrm(ks[1], (4, 4, DENSITY, 2 * DENSITY))
    p["w_mean"] = nrm(ks[2], (4, 4, 2 * DENSITY, Z))
    p["b_mean"] = jnp.zeros((Z,), jnp.float32)
    p["w_logvar"] = nrm(ks[3], (4, 4, 2 * DENSITY, Z))
    p["b_logvar"] = jnp.zeros((Z,), jnp.float32)
    # decoder
    p["w_d1"] = nrm(ks[4], (4, 4, Z, 2 * DENSITY))
    p["w_d2"] = nrm(ks[5], (4, 4, 2 * DENSITY, DENSITY))
    p["w_d3"] = nrm(ks[6], (4, 4, DENSITY, CHANNELS))
    # RelationPrediction (streams // 2 = 2 latent streams concatenated)
    p["fc1"], p["fcb1"] = nrm(ks[7], (2 * Z, HIDDEN)), jnp.zeros((HIDDEN,), jnp.float32)
    p["fc2"], p["fcb2"] = nrm(ks[8], (HIDDEN, HIDDEN)), jnp.zeros((HIDDEN,), jnp.float32)
    p["fc3"], p["fcb3"] = nrm(ks[9], (HIDDEN, CLASSES)), jnp.zeros((CLASSES,), jnp.float32)
    p["fd1"], p["fdb1"] = nrm(ks[10], (2 * Z, HIDDEN)), jnp.zeros((HIDDEN,), jnp.float32)
    p["fd2"], p["fdb2"] = nrm(ks[11], (HIDDEN, HIDDEN)), jnp.zeros((HIDDEN,), jnp.float32)
    p["fd3"], p["fdb3"] = nrm(ks[12], (HIDDEN, DOMAINS)), jnp.zeros((DOMAINS,), jnp.float32)
    return p


# ----------------------------- driver ---------------------------------------
if __name__ == "__main__":
    random.seed(0)
    key = jax.random.PRNGKey(0)
    pkey, dkey, skey = jax.random.split(key, 3)

    params = init_params(pkey)
    ops = build_dense_operators(params)        # weight-only, built ONCE (cached)

    dkeys = jax.random.split(dkey, STREAMS)
    datums = [jax.random.normal(dkeys[s], (N, IMG, IMG, CHANNELS), jnp.float32)
              for s in range(STREAMS)]

    outputs = face_vae_mixture_forward(datums, ops, skey)
    for leaf in jax.tree_util.tree_leaves(outputs):
        jax.block_until_ready(leaf)

    (stream_outputs, stream_inputs, rec, mu_lists, std_lists, z_lists,
     cls, dom) = outputs
    assert len(stream_outputs) == STREAMS
    assert stream_outputs[0].shape == (N, IMG, IMG, CHANNELS)
    assert len(rec) == 2 and rec[0].shape == (N, IMG, IMG, CHANNELS)
    assert mu_lists[0][0].shape == (N, GROUP, 1, 1)
    assert z_lists[0][0].shape == (N, GROUP, 1, 1)
    assert cls.shape == (N, CLASSES) and dom.shape == (N, DOMAINS)
    assert bool(jnp.all(jnp.isfinite(stream_outputs[0])))
    assert bool(jnp.all(jnp.isfinite(rec[0])))
    assert bool(jnp.all(jnp.isfinite(cls)))

    print("KERNEL_OK")
</pallas_src>

<mosaic_0001>
module attributes {stable_mosaic.version = 11 : i64} {
  func.func @_fused_kernel(%arg0: i32, %arg1: memref<8x792xf32, #tpu.memory_space<vmem>>, %arg2: memref<768x512xbf16, #tpu.memory_space<vmem>>, %arg3: memref<512x256xbf16, #tpu.memory_space<vmem>>, %arg4: memref<256x256xbf16, #tpu.memory_space<vmem>>, %arg5: memref<24x256xbf16, #tpu.memory_space<vmem>>, %arg6: memref<256x512xbf16, #tpu.memory_space<any>>, %arg7: memref<512x768xbf16, #tpu.memory_space<any>>, %arg8: memref<192x64xbf16, #tpu.memory_space<vmem>>, %arg9: memref<4x256xf32, #tpu.memory_space<vmem>>, %arg10: memref<8x24xf32, #tpu.memory_space<vmem>>, %arg11: memref<8x24xf32, #tpu.memory_space<vmem>>, %arg12: memref<8x24xf32, #tpu.memory_space<vmem>>, %arg13: memref<12x768xf32, #tpu.memory_space<vmem>>, %arg14: memref<2x21xf32, #tpu.memory_space<vmem>>, %arg15: memref<256x512xbf16, #tpu.memory_space<vmem>>, %arg16: memref<512x768xbf16, #tpu.memory_space<vmem>>, %arg17: memref<2x!tpu.dma_semaphore, #tpu.memory_space<semaphore_mem>>) attributes {dimension_semantics = [#tpu.dimension_semantics<arbitrary>], iteration_bounds = array<i64: 1>, scalar_prefetch = 0 : i64, scratch_operands = 3 : i64, tpu.core_type = #tpu.core_type<tc>, window_params = [{pipeline_mode = #tpu.pipeline_mode<synchronous>, transform_indices = @transform_0, window_bounds = array<i64: 8, 792>}, {pipeline_mode = #tpu.pipeline_mode<synchronous>, transform_indices = @transform_1, window_bounds = array<i64: 768, 512>}, {pipeline_mode = #tpu.pipeline_mode<synchronous>, transform_indices = @transform_2, window_bounds = array<i64: 512, 256>}, {pipeline_mode = #tpu.pipeline_mode<synchronous>, transform_indices = @transform_3, window_bounds = array<i64: 256, 256>}, {pipeline_mode = #tpu.pipeline_mode<synchronous>, transform_indices = @transform_4, window_bounds = array<i64: 24, 256>}, {}, {}, {pipeline_mode = #tpu.pipeline_mode<synchronous>, transform_indices = @transform_7, window_bounds = array<i64: 192, 64>}, {pipeline_mode = #tpu.pipeline_mode<synchronous>, transform_indices = @transform_8, window_bounds = array<i64: 4, 256>}, {pipeline_mode = #tpu.pipeline_mode<synchronous>, transform_indices = @transform_9, window_bounds = array<i64: 8, 24>}, {pipeline_mode = #tpu.pipeline_mode<synchronous>, transform_indices = @transform_10, window_bounds = array<i64: 8, 24>}, {pipeline_mode = #tpu.pipeline_mode<synchronous>, transform_indices = @transform_11, window_bounds = array<i64: 8, 24>}, {pipeline_mode = #tpu.pipeline_mode<synchronous>, transform_indices = @transform_12, window_bounds = array<i64: 12, 768>}, {pipeline_mode = #tpu.pipeline_mode<synchronous>, transform_indices = @transform_13, window_bounds = array<i64: 2, 21>}]} {
    %c0_i32 = arith.constant 0 : i32
    %0 = tpu.memref_slice %arg17[%c0_i32] : memref<2x!tpu.dma_semaphore, #tpu.memory_space<semaphore_mem>> -> memref<1x!tpu.dma_semaphore, #tpu.memory_space<semaphore_mem>>
    %1 = tpu.memref_squeeze %0 : memref<1x!tpu.dma_semaphore, #tpu.memory_space<semaphore_mem>> -> memref<!tpu.dma_semaphore, #tpu.memory_space<semaphore_mem>>
    tpu.enqueue_dma source(%arg6 : memref<256x512xbf16, #tpu.memory_space<any>>) target(%arg15 : memref<256x512xbf16, #tpu.memory_space<vmem>>) target_semaphore(%1 : memref<!tpu.dma_semaphore, #tpu.memory_space<semaphore_mem>>)
    %c1_i32 = arith.constant 1 : i32
    %2 = tpu.memref_slice %arg17[%c1_i32] : memref<2x!tpu.dma_semaphore, #tpu.memory_space<semaphore_mem>> -> memref<1x!tpu.dma_semaphore, #tpu.memory_space<semaphore_mem>>
    %3 = tpu.memref_squeeze %2 : memref<1x!tpu.dma_semaphore, #tpu.memory_space<semaphore_mem>> -> memref<!tpu.dma_semaphore, #tpu.memory_space<semaphore_mem>>
    tpu.enqueue_dma source(%arg7 : memref<512x768xbf16, #tpu.memory_space<any>>) target(%arg16 : memref<512x768xbf16, #tpu.memory_space<vmem>>) target_semaphore(%3 : memref<!tpu.dma_semaphore, #tpu.memory_space<semaphore_mem>>)
    %4 = tpu.iota {dimensions = array<i32: 0>} : vector<256x16xi32>
    %5 = tpu.iota {dimensions = array<i32: 1>} : vector<256x16xi32>
    %c15_i32 = arith.constant 15 : i32
    %6 = vector.broadcast %c15_i32 : i32 to vector<256x16xi32>
    %7 = arith.andi %4, %6 : vector<256x16xi32>
    %8 = arith.cmpi eq, %7, %5 : vector<256x16xi32>
    %cst = arith.constant 1.000000e+00 : f32
    %cst_0 = arith.constant 0.000000e+00 : f32
    %9 = vector.broadcast %cst : f32 to vector<256x16xf32>
    %10 = vector.broadcast %cst_0 : f32 to vector<256x16xf32>
    %11 = arith.select %8, %9, %10 : vector<256x16xi1>, vector<256x16xf32>
    %12 = tpu.iota {dimensions = array<i32: 0>} : vector<16x256xi32>
    %13 = tpu.iota {dimensions = array<i32: 1>} : vector<16x256xi32>
    %c15_i32_1 = arith.constant 15 : i32
    %14 = vector.broadcast %c15_i32_1 : i32 to vector<16x256xi32>
    %15 = arith.andi %13, %14 : vector<16x256xi32>
    %16 = arith.cmpi eq, %15, %12 : vector<16x256xi32>
    %cst_2 = arith.constant 1.000000e+00 : f32
    %cst_3 = arith.constant 0.000000e+00 : f32
    %17 = vector.broadcast %cst_2 : f32 to vector<16x256xf32>
    %18 = vector.broadcast %cst_3 : f32 to vector<16x256xf32>
    %19 = arith.select %16, %17, %18 : vector<16x256xi1>, vector<16x256xf32>
    %20 = tpu.iota {dimensions = array<i32: 0>} : vector<512x8xi32>
    %21 = tpu.iota {dimensions = array<i32: 1>} : vector<512x8xi32>
    %c7_i32 = arith.constant 7 : i32
    %22 = vector.broadcast %c7_i32 : i32 to vector<512x8xi32>
    %23 = arith.andi %20, %22 : vector<512x8xi32>
    %24 = arith.cmpi eq, %23, %21 : vector<512x8xi32>
    %cst_4 = arith.constant 1.000000e+00 : f32
    %cst_5 = arith.constant 0.000000e+00 : f32
    %25 = vector.broadcast %cst_4 : f32 to vector<512x8xf32>
    %26 = vector.broadcast %cst_5 : f32 to vector<512x8xf32>
    %27 = arith.select %24, %25, %26 : vector<512x8xi1>, vector<512x8xf32>
    %28 = tpu.iota {dimensions = array<i32: 0>} : vector<8x512xi32>
    %29 = tpu.iota {dimensions = array<i32: 1>} : vector<8x512xi32>
    %c7_i32_6 = arith.constant 7 : i32
    %30 = vector.broadcast %c7_i32_6 : i32 to vector<8x512xi32>
    %31 = arith.andi %29, %30 : vector<8x512xi32>
    %32 = arith.cmpi eq, %31, %28 : vector<8x512xi32>
    %cst_7 = arith.constant 1.000000e+00 : f32
    %cst_8 = arith.constant 0.000000e+00 : f32
    %33 = vector.broadcast %cst_7 : f32 to vector<8x512xf32>
    %34 = vector.broadcast %cst_8 : f32 to vector<8x512xf32>
    %35 = arith.select %32, %33, %34 : vector<8x512xi1>, vector<8x512xf32>
    %36 = tpu.iota {dimensions = array<i32: 0>} : vector<8x4xi32>
    %37 = tpu.iota {dimensions = array<i32: 1>} : vector<8x4xi32>
    %c2_i32 = arith.constant 2 : i32
    %38 = vector.broadcast %c2_i32 : i32 to vector<8x4xi32>
    %39 = arith.muli %37, %38 : vector<8x4xi32>
    %40 = arith.cmpi sge, %36, %39 : vector<8x4xi32>
    %c1_i32_9 = arith.constant 1 : i32
    %41 = vector.broadcast %c1_i32_9 : i32 to vector<8x4xi32>
    %42 = arith.addi %37, %41 : vector<8x4xi32>
    %c2_i32_10 = arith.constant 2 : i32
    %43 = vector.broadcast %c2_i32_10 : i32 to vector<8x4xi32>
    %44 = arith.muli %42, %43 : vector<8x4xi32>
    %45 = arith.cmpi slt, %36, %44 : vector<8x4xi32>
    %46 = arith.andi %40, %45 : vector<8x4xi1>
    %cst_11 = arith.constant 1.000000e+00 : f32
    %cst_12 = arith.constant 0.000000e+00 : f32
    %47 = vector.broadcast %cst_11 : f32 to vector<8x4xf32>
    %48 = vector.broadcast %cst_12 : f32 to vector<8x4xf32>
    %49 = arith.select %46, %47, %48 : vector<8x4xi1>, vector<8x4xf32>
    %50 = tpu.iota {dimensions = array<i32: 0>} : vector<4x8xi32>
    %51 = tpu.iota {dimensions = array<i32: 1>} : vector<4x8xi32>
    %c2_i32_13 = arith.constant 2 : i32
    %52 = vector.broadcast %c2_i32_13 : i32 to vector<4x8xi32>
    %53 = arith.muli %50, %52 : vector<4x8xi32>
    %54 = arith.cmpi sge, %51, %53 : vector<4x8xi32>
    %c1_i32_14 = arith.constant 1 : i32
    %55 = vector.broadcast %c1_i32_14 : i32 to vector<4x8xi32>
    %56 = arith.addi %50, %55 : vector<4x8xi32>
    %c2_i32_15 = arith.constant 2 : i32
    %57 = vector.broadcast %c2_i32_15 : i32 to vector<4x8xi32>
    %58 = arith.muli %56, %57 : vector<4x8xi32>
    %59 = arith.cmpi slt, %51, %58 : vector<4x8xi32>
    %60 = arith.andi %54, %59 : vector<4x8xi1>
    %cst_16 = arith.constant 1.000000e+00 : f32
    %cst_17 = arith.constant 0.000000e+00 : f32
    %61 = vector.broadcast %cst_16 : f32 to vector<4x8xf32>
    %62 = vector.broadcast %cst_17 : f32 to vector<4x8xf32>
    %63 = arith.select %60, %61, %62 : vector<4x8xi1>, vector<4x8xf32>
    %64 = tpu.iota {dimensions = array<i32: 0>} : vector<12x6xi32>
    %65 = tpu.iota {dimensions = array<i32: 1>} : vector<12x6xi32>
    %c2_i32_18 = arith.constant 2 : i32
    %66 = vector.broadcast %c2_i32_18 : i32 to vector<12x6xi32>
    %67 = arith.muli %65, %66 : vector<12x6xi32>
    %68 = arith.cmpi sge, %64, %67 : vector<12x6xi32>
    %c1_i32_19 = arith.constant 1 : i32
    %69 = vector.broadcast %c1_i32_19 : i32 to vector<12x6xi32>
    %70 = arith.addi %65, %69 : vector<12x6xi32>
    %c2_i32_20 = arith.constant 2 : i32
    %71 = vector.broadcast %c2_i32_20 : i32 to vector<12x6xi32>
    %72 = arith.muli %70, %71 : vector<12x6xi32>
    %73 = arith.cmpi slt, %64, %72 : vector<12x6xi32>
    %74 = arith.andi %68, %73 : vector<12x6xi1>
    %cst_21 = arith.constant 1.000000e+00 : f32
    %cst_22 = arith.constant 0.000000e+00 : f32
    %75 = vector.broadcast %cst_21 : f32 to vector<12x6xf32>
    %76 = vector.broadcast %cst_22 : f32 to vector<12x6xf32>
    %77 = arith.select %74, %75, %76 : vector<12x6xi1>, vector<12x6xf32>
    %78 = tpu.iota {dimensions = array<i32: 0>} : vector<6x12xi32>
    %79 = tpu.iota {dimensions = array<i32: 1>} : vector<6x12xi32>
    %c2_i32_23 = arith.constant 2 : i32
    %80 = vector.broadcast %c2_i32_23 : i32 to vector<6x12xi32>
    %81 = arith.muli %78, %80 : vector<6x12xi32>
    %82 = arith.cmpi sge, %79, %81 : vector<6x12xi32>
    %c1_i32_24 = arith.constant 1 : i32
    %83 = vector.broadcast %c1_i32_24 : i32 to vector<6x12xi32>
    %84 = arith.addi %78, %83 : vector<6x12xi32>
    %c2_i32_25 = arith.constant 2 : i32
    %85 = vector.broadcast %c2_i32_25 : i32 to vector<6x12xi32>
    %86 = arith.muli %84, %85 : vector<6x12xi32>
    %87 = arith.cmpi slt, %79, %86 : vector<6x12xi32>
    %88 = arith.andi %82, %87 : vector<6x12xi1>
    %cst_26 = arith.constant 1.000000e+00 : f32
    %cst_27 = arith.constant 0.000000e+00 : f32
    %89 = vector.broadcast %cst_26 : f32 to vector<6x12xf32>
    %90 = vector.broadcast %cst_27 : f32 to vector<6x12xf32>
    %91 = arith.select %88, %89, %90 : vector<6x12xi1>, vector<6x12xf32>
    %c0 = arith.constant 0 : index
    %c0_28 = arith.constant 0 : index
    %92 = vector.load %arg1[%c0, %c0_28] : memref<8x792xf32, #tpu.memory_space<vmem>>, vector<8x768xf32>
    %c0_29 = arith.constant 0 : index
    %c768 = arith.constant 768 : index
    %93 = vector.load %arg1[%c0_29, %c768] : memref<8x792xf32, #tpu.memory_space<vmem>>, vector<8x24xf32>
    %c0_30 = arith.constant 0 : index
    %c0_31 = arith.constant 0 : index
    %94 = vector.load %arg2[%c0_30, %c0_31] : memref<768x512xbf16, #tpu.memory_space<vmem>>, vector<768x512xbf16>
    %95 = arith.truncf %92 : vector<8x768xf32> to vector<8x768xbf16>
    %cst_32 = arith.constant dense<0.000000e+00> : vector<8x512xf32>
    %96 = tpu.matmul %95, %94, %cst_32 {dimension_numbers = #tpu.dot_dimension_numbers<[1], [0], [0], [1], [0, 0, 1, 1], [], []>} : vector<8x768xbf16>, vector<768x512xbf16>, vector<8x512xf32> -> vector<8x512xf32>
    %cst_33 = arith.constant 0.000000e+00 : f32
    %97 = vector.broadcast %cst_33 : f32 to vector<8x512xf32>
    %98 = arith.cmpf oge, %96, %97 : vector<8x512xf32>
    %cst_34 = arith.constant 2.000000e-01 : f32
    %99 = vector.broadcast %cst_34 : f32 to vector<8x512xf32>
    %100 = arith.mulf %99, %96 : vector<8x512xf32>
    %101 = arith.select %98, %96, %100 : vector<8x512xi1>, vector<8x512xf32>
    %c0_35 = arith.constant 0 : index
    %c0_36 = arith.constant 0 : index
    %102 = vector.load %arg3[%c0_35, %c0_36] : memref<512x256xbf16, #tpu.memory_space<vmem>>, vector<512x256xbf16>
    %103 = arith.truncf %101 : vector<8x512xf32> to vector<8x512xbf16>
    %cst_37 = arith.constant dense<0.000000e+00> : vector<8x256xf32>
    %104 = tpu.matmul %103, %102, %cst_37 {dimension_numbers = #tpu.dot_dimension_numbers<[1], [0], [0], [1], [0, 0, 1, 1], [], []>} : vector<8x512xbf16>, vector<512x256xbf16>, vector<8x256xf32> -> vector<8x256xf32>
    %105 = arith.mulf %104, %104 : vector<8x256xf32>
    %106 = tpu.concatenate %104, %105 in 1 : vector<8x256xf32>, vector<8x256xf32> -> vector<8x512xf32>
    %cst_38 = arith.constant dense<0.000000e+00> : vector<4x512xf32>
    %107 = tpu.matmul %63, %106, %cst_38 {dimension_numbers = #tpu.dot_dimension_numbers<[1], [0], [0], [1], [0, 0, 1, 1], [], []>} : vector<4x8xf32>, vector<8x512xf32>, vector<4x512xf32> -> vector<4x512xf32>
    %108 = vector.extract_strided_slice %107 {offsets = [0, 0], sizes = [4, 256], strides = [1, 1]} : vector<4x512xf32> to vector<4x256xf32>
    %cst_39 = arith.constant dense<0.000000e+00> : vector<4x16xf32>
    %109 = tpu.matmul %108, %11, %cst_39 {dimension_numbers = #tpu.dot_dimension_numbers<[1], [0], [0], [1], [0, 0, 1, 1], [], []>} : vector<4x256xf32>, vector<256x16xf32>, vector<4x16xf32> -> vector<4x16xf32>
    %cst_40 = arith.constant 3.125000e-02 : f32
    %110 = vector.broadcast %cst_40 : f32 to vector<4x16xf32>
    %111 = arith.mulf %109, %110 : vector<4x16xf32>
    %112 = vector.extract_strided_slice %107 {offsets = [0, 256], sizes = [4, 256], strides = [1, 1]} : vector<4x512xf32> to vector<4x256xf32>
    %cst_41 = arith.constant dense<0.000000e+00> : vector<4x16xf32>
    %113 = tpu.matmul %112, %11, %cst_41 {dimension_numbers = #tpu.dot_dimension_numbers<[1], [0], [0], [1], [0, 0, 1, 1], [], []>} : vector<4x256xf32>, vector<256x16xf32>, vector<4x16xf32> -> vector<4x16xf32>
    %cst_42 = arith.constant 3.125000e-02 : f32
    %114 = vector.broadcast %cst_42 : f32 to vector<4x16xf32>
    %115 = arith.mulf %113, %114 : vector<4x16xf32>
    %116 = arith.mulf %111, %111 : vector<4x16xf32>
    %117 = arith.subf %115, %116 : vector<4x16xf32>
    %cst_43 = arith.constant 0.000000e+00 : f32
    %118 = vector.broadcast %cst_43 : f32 to vector<4x16xf32>
    %119 = arith.maximumf %117, %118 : vector<4x16xf32>
    %cst_44 = arith.constant 9.99999974E-6 : f32
    %120 = vector.broadcast %cst_44 : f32 to vector<4x16xf32>
    %121 = arith.addf %119, %120 : vector<4x16xf32>
    %122 = math.rsqrt %121 : vector<4x16xf32>
    %cst_45 = arith.constant dense<0.000000e+00> : vector<8x16xf32>
    %123 = tpu.matmul %49, %122, %cst_45 {dimension_numbers = #tpu.dot_dimension_numbers<[1], [0], [0], [1], [0, 0, 1, 1], [], []>} : vector<8x4xf32>, vector<4x16xf32>, vector<8x16xf32> -> vector<8x16xf32>
    %cst_46 = arith.constant dense<0.000000e+00> : vector<8x256xf32>
    %124 = tpu.matmul %123, %19, %cst_46 {dimension_numbers = #tpu.dot_dimension_numbers<[1], [0], [0], [1], [0, 0, 1, 1], [], []>} : vector<8x16xf32>, vector<16x256xf32>, vector<8x256xf32> -> vector<8x256xf32>
    %125 = arith.mulf %111, %122 : vector<4x16xf32>
    %cst_47 = arith.constant dense<0.000000e+00> : vector<8x16xf32>
    %126 = tpu.matmul %49, %125, %cst_47 {dimension_numbers = #tpu.dot_dimension_numbers<[1], [0], [0], [1], [0, 0, 1, 1], [], []>} : vector<8x4xf32>, vector<4x16xf32>, vector<8x16xf32> -> vector<8x16xf32>
    %cst_48 = arith.constant dense<0.000000e+00> : vector<8x256xf32>
    %127 = tpu.matmul %126, %19, %cst_48 {dimension_numbers = #tpu.dot_dimension_numbers<[1], [0], [0], [1], [0, 0, 1, 1], [], []>} : vector<8x16xf32>, vector<16x256xf32>, vector<8x256xf32> -> vector<8x256xf32>
    %128 = arith.mulf %104, %124 : vector<8x256xf32>
    %129 = arith.subf %128, %127 : vector<8x256xf32>
    %cst_49 = arith.constant 0.000000e+00 : f32
    %130 = vector.broadcast %cst_49 : f32 to vector<8x256xf32>
    %131 = arith.cmpf oge, %129, %130 : vector<8x256xf32>
    %cst_50 = arith.constant 2.000000e-01 : f32
    %132 = vector.broadcast %cst_50 : f32 to vector<8x256xf32>
    %133 = arith.mulf %132, %129 : vector<8x256xf32>
    %134 = arith.select %131, %129, %133 : vector<8x256xi1>, vector<8x256xf32>
    %c0_51 = arith.constant 0 : index
    %c0_52 = arith.constant 0 : index
    %135 = vector.load %arg4[%c0_51, %c0_52] : memref<256x256xbf16, #tpu.memory_space<vmem>>, vector<256x256xbf16>
    %136 = arith.truncf %134 : vector<8x256xf32> to vector<8x256xbf16>
    %cst_53 = arith.constant dense<0.000000e+00> : vector<8x256xf32>
    %137 = tpu.matmul %136, %135, %cst_53 {dimension_numbers = #tpu.dot_dimension_numbers<[1], [0], [0], [1], [0, 0, 1, 1], [], []>} : vector<8x256xbf16>, vector<256x256xbf16>, vector<8x256xf32> -> vector<8x256xf32>
    %c0_54 = arith.constant 0 : index
    %c0_55 = arith.constant 0 : index
    %138 = vector.load %arg9[%c0_54, %c0_55] : memref<4x256xf32, #tpu.memory_space<vmem>>, vector<1x256xf32>
    %139 = vector.broadcast %138 : vector<1x256xf32> to vector<8x256xf32>
    %140 = arith.addf %137, %139 : vector<8x256xf32>
    %141 = vector.extract_strided_slice %140 {offsets = [0, 0], sizes = [8, 24], strides = [1, 1]} : vector<8x256xf32> to vector<8x24xf32>
    %142 = vector.extract_strided_slice %140 {offsets = [0, 128], sizes = [8, 24], strides = [1, 1]} : vector<8x256xf32> to vector<8x24xf32>
    %cst_56 = arith.constant 5.000000e-01 : f32
    %143 = vector.broadcast %cst_56 : f32 to vector<8x24xf32>
    %144 = arith.mulf %143, %142 : vector<8x24xf32>
    %145 = math.exp %144 : vector<8x24xf32>
    %146 = arith.mulf %93, %145 : vector<8x24xf32>
    %147 = arith.addf %146, %141 : vector<8x24xf32>
    %148 = tpu.iota {dimensions = array<i32: 1>} : vector<2x24xi32>
    %c24_i32 = arith.constant 24 : i32
    %149 = vector.broadcast %c24_i32 : i32 to vector<2x24xi32>
    %150 = arith.cmpi sge, %148, %149 : vector<2x24xi32>
    %c32_i32 = arith.constant 32 : i32
    %151 = vector.broadcast %c32_i32 : i32 to vector<2x24xi32>
    %152 = arith.cmpi slt, %148, %151 : vector<2x24xi32>
    %153 = arith.andi %150, %152 : vector<2x24xi1>
    %c24_i32_57 = arith.constant 24 : i32
    %154 = vector.broadcast %c24_i32_57 : i32 to vector<2x24xi32>
    %155 = arith.cmpi sge, %148, %154 : vector<2x24xi32>
    %c32_i32_58 = arith.constant 32 : i32
    %156 = vector.broadcast %c32_i32_58 : i32 to vector<2x24xi32>
    %157 = arith.cmpi slt, %148, %156 : vector<2x24xi32>
    %158 = arith.andi %155, %157 : vector<2x24xi1>
    %159 = vector.extract_strided_slice %147 {offsets = [0, 0], sizes = [2, 24], strides = [1, 1]} : vector<8x24xf32> to vector<2x24xf32>
    %160 = vector.extract_strided_slice %147 {offsets = [4, 0], sizes = [2, 24], strides = [1, 1]} : vector<8x24xf32> to vector<2x24xf32>
    %161 = arith.select %153, %159, %160 : vector<2x24xi1>, vector<2x24xf32>
    %162 = vector.extract_strided_slice %147 {offsets = [2, 0], sizes = [2, 24], strides = [1, 1]} : vector<8x24xf32> to vector<2x24xf32>
    %163 = vector.extract_strided_slice %147 {offsets = [6, 0], sizes = [2, 24], strides = [1, 1]} : vector<8x24xf32> to vector<2x24xf32>
    %164 = arith.select %158, %162, %163 : vector<2x24xi1>, vector<2x24xf32>
    %165 = tpu.concatenate %147, %161, %164 in 0 : vector<8x24xf32>, vector<2x24xf32>, vector<2x24xf32> -> vector<12x24xf32>
    %c0_59 = arith.constant 0 : index
    %c0_60 = arith.constant 0 : index
    %166 = vector.load %arg5[%c0_59, %c0_60] : memref<24x256xbf16, #tpu.memory_space<vmem>>, vector<24x256xbf16>
    %167 = arith.truncf %165 : vector<12x24xf32> to vector<12x24xbf16>
    %cst_61 = arith.constant dense<0.000000e+00> : vector<12x256xf32>
    %168 = tpu.matmul %167, %166, %cst_61 {dimension_numbers = #tpu.dot_dimension_numbers<[1], [0], [0], [1], [0, 0, 1, 1], [], []>} : vector<12x24xbf16>, vector<24x256xbf16>, vector<12x256xf32> -> vector<12x256xf32>
    %169 = arith.mulf %168, %168 : vector<12x256xf32>
    %170 = tpu.concatenate %168, %169 in 1 : vector<12x256xf32>, vector<12x256xf32> -> vector<12x512xf32>
    %cst_62 = arith.constant dense<0.000000e+00> : vector<6x512xf32>
    %171 = tpu.matmul %91, %170, %cst_62 {dimension_numbers = #tpu.dot_dimension_numbers<[1], [0], [0], [1], [0, 0, 1, 1], [], []>} : vector<6x12xf32>, vector<12x512xf32>, vector<6x512xf32> -> vector<6x512xf32>
    %172 = vector.extract_strided_slice %171 {offsets = [0, 0], sizes = [6, 256], strides = [1, 1]} : vector<6x512xf32> to vector<6x256xf32>
    %cst_63 = arith.constant dense<0.000000e+00> : vector<6x16xf32>
    %173 = tpu.matmul %172, %11, %cst_63 {dimension_numbers = #tpu.dot_dimension_numbers<[1], [0], [0], [1], [0, 0, 1, 1], [], []>} : vector<6x256xf32>, vector<256x16xf32>, vector<6x16xf32> -> vector<6x16xf32>
    %cst_64 = arith.constant 3.125000e-02 : f32
    %174 = vector.broadcast %cst_64 : f32 to vector<6x16xf32>
    %175 = arith.mulf %173, %174 : vector<6x16xf32>
    %176 = vector.extract_strided_slice %171 {offsets = [0, 256], sizes = [6, 256], strides = [1, 1]} : vector<6x512xf32> to vector<6x256xf32>
    %cst_65 = arith.constant dense<0.000000e+00> : vector<6x16xf32>
    %177 = tpu.matmul %176, %11, %cst_65 {dimension_numbers = #tpu.dot_dimension_numbers<[1], [0], [0], [1], [0, 0, 1, 1], [], []>} : vector<6x256xf32>, vector<256x16xf32>, vector<6x16xf32> -> vector<6x16xf32>
    %cst_66 = arith.constant 3.125000e-02 : f32
    %178 = vector.broadcast %cst_66 : f32 to vector<6x16xf32>
    %179 = arith.mulf %177, %178 : vector<6x16xf32>
    %180 = arith.mulf %175, %175 : vector<6x16xf32>
    %181 = arith.subf %179, %180 : vector<6x16xf32>
    %cst_67 = arith.constant 0.000000e+00 : f32
    %182 = vector.broadcast %cst_67 : f32 to vector<6x16xf32>
    %183 = arith.maximumf %181, %182 : vector<6x16xf32>
    %cst_68 = arith.constant 9.99999974E-6 : f32
    %184 = vector.broadcast %cst_68 : f32 to vector<6x16xf32>
    %185 = arith.addf %183, %184 : vector<6x16xf32>
    %186 = math.rsqrt %185 : vector<6x16xf32>
    %cst_69 = arith.constant dense<0.000000e+00> : vector<12x16xf32>
    %187 = tpu.matmul %77, %186, %cst_69 {dimension_numbers = #tpu.dot_dimension_numbers<[1], [0], [0], [1], [0, 0, 1, 1], [], []>} : vector<12x6xf32>, vector<6x16xf32>, vector<12x16xf32> -> vector<12x16xf32>
    %cst_70 = arith.constant dense<0.000000e+00> : vector<12x256xf32>
    %188 = tpu.matmul %187, %19, %cst_70 {dimension_numbers = #tpu.dot_dimension_numbers<[1], [0], [0], [1], [0, 0, 1, 1], [], []>} : vector<12x16xf32>, vector<16x256xf32>, vector<12x256xf32> -> vector<12x256xf32>
    %189 = arith.mulf %175, %186 : vector<6x16xf32>
    %cst_71 = arith.constant dense<0.000000e+00> : vector<12x16xf32>
    %190 = tpu.matmul %77, %189, %cst_71 {dimension_numbers = #tpu.dot_dimension_numbers<[1], [0], [0], [1], [0, 0, 1, 1], [], []>} : vector<12x6xf32>, vector<6x16xf32>, vector<12x16xf32> -> vector<12x16xf32>
    %cst_72 = arith.constant dense<0.000000e+00> : vector<12x256xf32>
    %191 = tpu.matmul %190, %19, %cst_72 {dimension_numbers = #tpu.dot_dimension_numbers<[1], [0], [0], [1], [0, 0, 1, 1], [], []>} : vector<12x16xf32>, vector<16x256xf32>, vector<12x256xf32> -> vector<12x256xf32>
    %192 = arith.mulf %168, %188 : vector<12x256xf32>
    %193 = arith.subf %192, %191 : vector<12x256xf32>
    %cst_73 = arith.constant 0.000000e+00 : f32
    %194 = vector.broadcast %cst_73 : f32 to vector<12x256xf32>
    %195 = arith.cmpf oge, %193, %194 : vector<12x256xf32>
    %cst_74 = arith.constant 2.000000e-01 : f32
    %196 = vector.broadcast %cst_74 : f32 to vector<12x256xf32>
    %197 = arith.mulf %196, %193 : vector<12x256xf32>
    %198 = arith.select %195, %193, %197 : vector<12x256xi1>, vector<12x256xf32>
    %c0_i32_75 = arith.constant 0 : i32
    %199 = tpu.memref_slice %arg17[%c0_i32_75] : memref<2x!tpu.dma_semaphore, #tpu.memory_space<semaphore_mem>> -> memref<1x!tpu.dma_semaphore, #tpu.memory_space<semaphore_mem>>
    %200 = tpu.memref_squeeze %199 : memref<1x!tpu.dma_semaphore, #tpu.memory_space<semaphore_mem>> -> memref<!tpu.dma_semaphore, #tpu.memory_space<semaphore_mem>>
    tpu.wait_dma2 semaphore(%200 : memref<!tpu.dma_semaphore, #tpu.memory_space<semaphore_mem>>) src(%arg6 : memref<256x512xbf16, #tpu.memory_space<any>>) dst(%arg15 : memref<256x512xbf16, #tpu.memory_space<vmem>>)
    %c0_76 = arith.constant 0 : index
    %c0_77 = arith.constant 0 : index
    %201 = vector.load %arg15[%c0_76, %c0_77] : memref<256x512xbf16, #tpu.memory_space<vmem>>, vector<256x512xbf16>
    %202 = arith.truncf %198 : vector<12x256xf32> to vector<12x256xbf16>
    %cst_78 = arith.constant dense<0.000000e+00> : vector<12x512xf32>
    %203 = tpu.matmul %202, %201, %cst_78 {dimension_numbers = #tpu.dot_dimension_numbers<[1], [0], [0], [1], [0, 0, 1, 1], [], []>} : vector<12x256xbf16>, vector<256x512xbf16>, vector<12x512xf32> -> vector<12x512xf32>
    %204 = arith.mulf %203, %203 : vector<12x512xf32>
    %205 = tpu.concatenate %203, %204 in 1 : vector<12x512xf32>, vector<12x512xf32> -> vector<12x1024xf32>
    %cst_79 = arith.constant dense<0.000000e+00> : vector<6x1024xf32>
    %206 = tpu.matmul %91, %205, %cst_79 {dimension_numbers = #tpu.dot_dimension_numbers<[1], [0], [0], [1], [0, 0, 1, 1], [], []>} : vector<6x12xf32>, vector<12x1024xf32>, vector<6x1024xf32> -> vector<6x1024xf32>
    %207 = vector.extract_strided_slice %206 {offsets = [0, 0], sizes = [6, 512], strides = [1, 1]} : vector<6x1024xf32> to vector<6x512xf32>
    %cst_80 = arith.constant dense<0.000000e+00> : vector<6x8xf32>
    %208 = tpu.matmul %207, %27, %cst_80 {dimension_numbers = #tpu.dot_dimension_numbers<[1], [0], [0], [1], [0, 0, 1, 1], [], []>} : vector<6x512xf32>, vector<512x8xf32>, vector<6x8xf32> -> vector<6x8xf32>
    %cst_81 = arith.constant 7.812500e-03 : f32
    %209 = vector.broadcast %cst_81 : f32 to vector<6x8xf32>
    %210 = arith.mulf %208, %209 : vector<6x8xf32>
    %211 = vector.extract_strided_slice %206 {offsets = [0, 512], sizes = [6, 512], strides = [1, 1]} : vector<6x1024xf32> to vector<6x512xf32>
    %cst_82 = arith.constant dense<0.000000e+00> : vector<6x8xf32>
    %212 = tpu.matmul %211, %27, %cst_82 {dimension_numbers = #tpu.dot_dimension_numbers<[1], [0], [0], [1], [0, 0, 1, 1], [], []>} : vector<6x512xf32>, vector<512x8xf32>, vector<6x8xf32> -> vector<6x8xf32>
    %cst_83 = arith.constant 7.812500e-03 : f32
    %213 = vector.broadcast %cst_83 : f32 to vector<6x8xf32>
    %214 = arith.mulf %212, %213 : vector<6x8xf32>
    %215 = arith.mulf %210, %210 : vector<6x8xf32>
    %216 = arith.subf %214, %215 : vector<6x8xf32>
    %cst_84 = arith.constant 0.000000e+00 : f32
    %217 = vector.broadcast %cst_84 : f32 to vector<6x8xf32>
    %218 = arith.maximumf %216, %217 : vector<6x8xf32>
    %cst_85 = arith.constant 9.99999974E-6 : f32
    %219 = vector.broadcast %cst_85 : f32 to vector<6x8xf32>
    %220 = arith.addf %218, %219 : vector<6x8xf32>
    %221 = math.rsqrt %220 : vector<6x8xf32>
    %cst_86 = arith.constant dense<0.000000e+00> : vector<12x8xf32>
    %222 = tpu.matmul %77, %221, %cst_86 {dimension_numbers = #tpu.dot_dimension_numbers<[1], [0], [0], [1], [0, 0, 1, 1], [], []>} : vector<12x6xf32>, vector<6x8xf32>, vector<12x8xf32> -> vector<12x8xf32>
    %cst_87 = arith.constant dense<0.000000e+00> : vector<12x512xf32>
    %223 = tpu.matmul %222, %35, %cst_87 {dimension_numbers = #tpu.dot_dimension_numbers<[1], [0], [0], [1], [0, 0, 1, 1], [], []>} : vector<12x8xf32>, vector<8x512xf32>, vector<12x512xf32> -> vector<12x512xf32>
    %224 = arith.mulf %210, %221 : vector<6x8xf32>
    %cst_88 = arith.constant dense<0.000000e+00> : vector<12x8xf32>
    %225 = tpu.matmul %77, %224, %cst_88 {dimension_numbers = #tpu.dot_dimension_numbers<[1], [0], [0], [1], [0, 0, 1, 1], [], []>} : vector<12x6xf32>, vector<6x8xf32>, vector<12x8xf32> -> vector<12x8xf32>
    %cst_89 = arith.constant dense<0.000000e+00> : vector<12x512xf32>
    %226 = tpu.matmul %225, %35, %cst_89 {dimension_numbers = #tpu.dot_dimension_numbers<[1], [0], [0], [1], [0, 0, 1, 1], [], []>} : vector<12x8xf32>, vector<8x512xf32>, vector<12x512xf32> -> vector<12x512xf32>
    %227 = arith.mulf %203, %223 : vector<12x512xf32>
    %228 = arith.subf %227, %226 : vector<12x512xf32>
    %cst_90 = arith.constant 0.000000e+00 : f32
    %229 = vector.broadcast %cst_90 : f32 to vector<12x512xf32>
    %230 = arith.cmpf oge, %228, %229 : vector<12x512xf32>
    %cst_91 = arith.constant 2.000000e-01 : f32
    %231 = vector.broadcast %cst_91 : f32 to vector<12x512xf32>
    %232 = arith.mulf %231, %228 : vector<12x512xf32>
    %233 = arith.select %230, %228, %232 : vector<12x512xi1>, vector<12x512xf32>
    %c1_i32_92 = arith.constant 1 : i32
    %234 = tpu.memref_slice %arg17[%c1_i32_92] : memref<2x!tpu.dma_semaphore, #tpu.memory_space<semaphore_mem>> -> memref<1x!tpu.dma_semaphore, #tpu.memory_space<semaphore_mem>>
    %235 = tpu.memref_squeeze %234 : memref<1x!tpu.dma_semaphore, #tpu.memory_space<semaphore_mem>> -> memref<!tpu.dma_semaphore, #tpu.memory_space<semaphore_mem>>
    tpu.wait_dma2 semaphore(%235 : memref<!tpu.dma_semaphore, #tpu.memory_space<semaphore_mem>>) src(%arg7 : memref<512x768xbf16, #tpu.memory_space<any>>) dst(%arg16 : memref<512x768xbf16, #tpu.memory_space<vmem>>)
    %c0_93 = arith.constant 0 : index
    %c0_94 = arith.constant 0 : index
    %236 = vector.load %arg16[%c0_93, %c0_94] : memref<512x768xbf16, #tpu.memory_space<vmem>>, vector<512x768xbf16>
    %237 = arith.truncf %233 : vector<12x512xf32> to vector<12x512xbf16>
    %cst_95 = arith.constant dense<0.000000e+00> : vector<12x768xf32>
    %238 = tpu.matmul %237, %236, %cst_95 {dimension_numbers = #tpu.dot_dimension_numbers<[1], [0], [0], [1], [0, 0, 1, 1], [], []>} : vector<12x512xbf16>, vector<512x768xbf16>, vector<12x768xf32> -> vector<12x768xf32>
    %239 = math.tanh %238 : vector<12x768xf32>
    %c0_96 = arith.constant 0 : index
    %c0_97 = arith.constant 0 : index
    %240 = vector.load %arg13[%c0_96, %c0_97] : memref<12x768xf32, #tpu.memory_space<vmem>>, vector<12x768xf32>
    tpu.vector_store %arg13[%c0_96, %c0_97], %239 {strides = array<i32>} : memref<12x768xf32, #tpu.memory_space<vmem>>, vector<12x768xf32>,
    %c128 = arith.constant 128 : index
    %c0_98 = arith.constant 0 : index
    %241 = vector.load %arg8[%c128, %c0_98] : memref<192x64xbf16, #tpu.memory_space<vmem>>, vector<24x64xbf16>
    %c160 = arith.constant 160 : index
    %c0_99 = arith.constant 0 : index
    %242 = vector.load %arg8[%c160, %c0_99] : memref<192x64xbf16, #tpu.memory_space<vmem>>, vector<24x64xbf16>
    %c0_100 = arith.constant 0 : index
    %c0_101 = arith.constant 0 : index
    %243 = vector.load %arg8[%c0_100, %c0_101] : memref<192x64xbf16, #tpu.memory_space<vmem>>, vector<64x64xbf16>
    %c64 = arith.constant 64 : index
    %c0_102 = arith.constant 0 : index
    %244 = vector.load %arg8[%c64, %c0_102] : memref<192x64xbf16, #tpu.memory_space<vmem>>, vector<64x21xbf16>
    %245 = vector.extract_strided_slice %147 {offsets = [0, 0], sizes = [2, 24], strides = [1, 1]} : vector<8x24xf32> to vector<2x24xf32>
    %246 = arith.truncf %245 : vector<2x24xf32> to vector<2x24xbf16>
    %cst_103 = arith.constant dense<0.000000e+00> : vector<2x64xf32>
    %247 = tpu.matmul %246, %241, %cst_103 {dimension_numbers = #tpu.dot_dimension_numbers<[1], [0], [0], [1], [0, 0, 1, 1], [], []>} : vector<2x24xbf16>, vector<24x64xbf16>, vector<2x64xf32> -> vector<2x64xf32>
    %248 = vector.extract_strided_slice %147 {offsets = [2, 0], sizes = [2, 24], strides = [1, 1]} : vector<8x24xf32> to vector<2x24xf32>
    %249 = arith.truncf %248 : vector<2x24xf32> to vector<2x24xbf16>
    %cst_104 = arith.constant dense<0.000000e+00> : vector<2x64xf32>
    %250 = tpu.matmul %249, %242, %cst_104 {dimension_numbers = #tpu.dot_dimension_numbers<[1], [0], [0], [1], [0, 0, 1, 1], [], []>} : vector<2x24xbf16>, vector<24x64xbf16>, vector<2x64xf32> -> vector<2x64xf32>
    %251 = arith.addf %247, %250 : vector<2x64xf32>
    %c1 = arith.constant 1 : index
    %c0_105 = arith.constant 0 : index
    %252 = vector.load %arg9[%c1, %c0_105] : memref<4x256xf32, #tpu.memory_space<vmem>>, vector<1x64xf32>
    %253 = vector.broadcast %252 : vector<1x64xf32> to vector<2x64xf32>
    %254 = arith.addf %251, %253 : vector<2x64xf32>
    %255 = arith.truncf %254 : vector<2x64xf32> to vector<2x64xbf16>
    %cst_106 = arith.constant dense<0.000000e+00> : vector<2x64xf32>
    %256 = tpu.matmul %255, %243, %cst_106 {dimension_numbers = #tpu.dot_dimension_numbers<[1], [0], [0], [1], [0, 0, 1, 1], [], []>} : vector<2x64xbf16>, vector<64x64xbf16>, vector<2x64xf32> -> vector<2x64xf32>
    %c2 = arith.constant 2 : index
    %c0_107 = arith.constant 0 : index
    %257 = vector.load %arg9[%c2, %c0_107] : memref<4x256xf32, #tpu.memory_space<vmem>>, vector<1x64xf32>
    %258 = vector.broadcast %257 : vector<1x64xf32> to vector<2x64xf32>
    %259 = arith.addf %256, %258 : vector<2x64xf32>
    %260 = arith.truncf %259 : vector<2x64xf32> to vector<2x64xbf16>
    %cst_108 = arith.constant dense<0.000000e+00> : vector<2x21xf32>
    %261 = tpu.matmul %260, %244, %cst_108 {dimension_numbers = #tpu.dot_dimension_numbers<[1], [0], [0], [1], [0, 0, 1, 1], [], []>} : vector<2x64xbf16>, vector<64x21xbf16>, vector<2x21xf32> -> vector<2x21xf32>
    %c3 = arith.constant 3 : index
    %c0_109 = arith.constant 0 : index
    %262 = vector.load %arg9[%c3, %c0_109] : memref<4x256xf32, #tpu.memory_space<vmem>>, vector<1x21xf32>
    %263 = vector.broadcast %262 : vector<1x21xf32> to vector<2x21xf32>
    %264 = arith.addf %261, %263 : vector<2x21xf32>
    %c0_110 = arith.constant 0 : index
    %c0_111 = arith.constant 0 : index
    %265 = vector.load %arg14[%c0_110, %c0_111] : memref<2x21xf32, #tpu.memory_space<vmem>>, vector<2x21xf32>
    tpu.vector_store %arg14[%c0_110, %c0_111], %264 {strides = array<i32>} : memref<2x21xf32, #tpu.memory_space<vmem>>, vector<2x21xf32>,
    %c0_112 = arith.constant 0 : index
    %c0_113 = arith.constant 0 : index
    %266 = vector.load %arg10[%c0_112, %c0_113] : memref<8x24xf32, #tpu.memory_space<vmem>>, vector<8x24xf32>
    tpu.vector_store %arg10[%c0_112, %c0_113], %141 {strides = array<i32>} : memref<8x24xf32, #tpu.memory_space<vmem>>, vector<8x24xf32>,
    %c0_114 = arith.constant 0 : index
    %c0_115 = arith.constant 0 : index
    %267 = vector.load %arg11[%c0_114, %c0_115] : memref<8x24xf32, #tpu.memory_space<vmem>>, vector<8x24xf32>
    tpu.vector_store %arg11[%c0_114, %c0_115], %142 {strides = array<i32>} : memref<8x24xf32, #tpu.memory_space<vmem>>, vector<8x24xf32>,
    %c0_116 = arith.constant 0 : index
    %c0_117 = arith.constant 0 : index
    %268 = vector.load %arg12[%c0_116, %c0_117] : memref<8x24xf32, #tpu.memory_space<vmem>>, vector<8x24xf32>
    tpu.vector_store %arg12[%c0_116, %c0_117], %147 {strides = array<i32>} : memref<8x24xf32, #tpu.memory_space<vmem>>, vector<8x24xf32>,
    return
  }
  func.func @transform_0(%arg0: i32) -> (i32, i32) {
    %c0_i32 = arith.constant 0 : i32
    %c0_i32_0 = arith.constant 0 : i32
    %c0_i32_1 = arith.constant 0 : i32
    return %c0_i32, %c0_i32_0 : i32, i32
  }
  func.func @transform_1(%arg0: i32) -> (i32, i32) {
    %c0_i32 = arith.constant 0 : i32
    %c0_i32_0 = arith.constant 0 : i32
    %c0_i32_1 = arith.constant 0 : i32
    return %c0_i32, %c0_i32_0 : i32, i32
  }
  func.func @transform_2(%arg0: i32) -> (i32, i32) {
    %c0_i32 = arith.constant 0 : i32
    %c0_i32_0 = arith.constant 0 : i32
    %c0_i32_1 = arith.constant 0 : i32
    return %c0_i32, %c0_i32_0 : i32, i32
  }
  func.func @transform_3(%arg0: i32) -> (i32, i32) {
    %c0_i32 = arith.constant 0 : i32
    %c0_i32_0 = arith.constant 0 : i32
    %c0_i32_1 = arith.constant 0 : i32
    return %c0_i32, %c0_i32_0 : i32, i32
  }
  func.func @transform_4(%arg0: i32) -> (i32, i32) {
    %c0_i32 = arith.constant 0 : i32
    %c0_i32_0 = arith.constant 0 : i32
    %c0_i32_1 = arith.constant 0 : i32
    return %c0_i32, %c0_i32_0 : i32, i32
  }
  func.func @transform_7(%arg0: i32) -> (i32, i32) {
    %c0_i32 = arith.constant 0 : i32
    %c0_i32_0 = arith.constant 0 : i32
    %c0_i32_1 = arith.constant 0 : i32
    return %c0_i32, %c0_i32_0 : i32, i32
  }
  func.func @transform_8(%arg0: i32) -> (i32, i32) {
    %c0_i32 = arith.constant 0 : i32
    %c0_i32_0 = arith.constant 0 : i32
    %c0_i32_1 = arith.constant 0 : i32
    return %c0_i32, %c0_i32_0 : i32, i32
  }
  func.func @transform_9(%arg0: i32) -> (i32, i32) {
    %c0_i32 = arith.constant 0 : i32
    %c0_i32_0 = arith.constant 0 : i32
    %c0_i32_1 = arith.constant 0 : i32
    return %c0_i32, %c0_i32_0 : i32, i32
  }
  func.func @transform_10(%arg0: i32) -> (i32, i32) {
    %c0_i32 = arith.constant 0 : i32
    %c0_i32_0 = arith.constant 0 : i32
    %c0_i32_1 = arith.constant 0 : i32
    return %c0_i32, %c0_i32_0 : i32, i32
  }
  func.func @transform_11(%arg0: i32) -> (i32, i32) {
    %c0_i32 = arith.constant 0 : i32
    %c0_i32_0 = arith.constant 0 : i32
    %c0_i32_1 = arith.constant 0 : i32
    return %c0_i32, %c0_i32_0 : i32, i32
  }
  func.func @transform_12(%arg0: i32) -> (i32, i32) {
    %c0_i32 = arith.constant 0 : i32
    %c0_i32_0 = arith.constant 0 : i32
    %c0_i32_1 = arith.constant 0 : i32
    return %c0_i32, %c0_i32_0 : i32, i32
  }
  func.func @transform_13(%arg0: i32) -> (i32, i32) {
    %c0_i32 = arith.constant 0 : i32
    %c0_i32_0 = arith.constant 0 : i32
    %c0_i32_1 = arith.constant 0 : i32
    return %c0_i32, %c0_i32_0 : i32, i32
  }
}

</mosaic_0001>

<bundles_post_ra>
// kernel: _forward_impl.1
= control target key start
LH: loop header
LB: loop body
LE: loop exit
PB: predicated region body
PF: predicated region fallthrough
CT: control target
= control target key end

     0   :  { %s14495_s0 = inlined_call_operand.vmem [shape: f32[8,792], index: 0, kind: input, shape index: {}]   ;;  %s14496_s1 = inlined_call_operand.vmem [shape: bf16[768,512], index: 1, kind: input, shape index: {}]   ;;  %s14497_s2 = inlined_call_operand.vmem [shape: bf16[512,256], index: 2, kind: input, shape index: {}]   ;;  %s14498_s3 = inlined_call_operand.vmem [shape: bf16[256,256], index: 3, kind: input, shape index: {}]   ;;  %s14499_s4 = inlined_call_operand.vmem [shape: bf16[24,256], index: 4, kind: input, shape index: {}]   ;;  %s14500_s5 = inlined_call_operand.vmem [shape: bf16[256,512], index: 5, kind: input, shape index: {}]   ;;  %s14501_s6 = inlined_call_operand.vmem [shape: bf16[512,768], index: 6, kind: input, shape index: {}]   ;;  %s14502_s7 = inlined_call_operand.vmem [shape: bf16[192,64], index: 7, kind: input, shape index: {}]   ;;  %s14503_s8 = inlined_call_operand.vmem [shape: f32[4,256], index: 8, kind: input, shape index: {}]   ;;  %s14504_s9 = inlined_call_operand.vmem [shape: f32[8,24], index: 9, kind: output, shape index: {0}]   ;;  %s14505_s10 = inlined_call_operand.vmem [shape: f32[8,24], index: 10, kind: output, shape index: {1}]   ;;  %s14506_s11 = inlined_call_operand.vmem [shape: f32[8,24], index: 11, kind: output, shape index: {2}]   ;;  %s14507_s12 = inlined_call_operand.vmem [shape: f32[12,768], index: 12, kind: output, shape index: {3}]   ;;  %s14508_s13 = inlined_call_operand.vmem [shape: f32[2,21], index: 13, kind: output, shape index: {4}]  }
   0x1   :  { %v9744_v0 = vld [vmem:[%s14500_s5] sm:$0xff]  ;;  %v9749_v1 = vld [vmem:[%s14500_s5 + $0x8] sm:$0xff]  ;;  %v9754_v2 = vld [vmem:[%s14500_s5 + $0x10] sm:$0xff] }
   0x2   :  { %15057 = vst [vmem:[#allocation9_spill] sm:$0xff] %v9744_v0  ;;  %15058 = vst [vmem:[#allocation10_spill] sm:$0xff] %v9749_v1  ;;  %v9759_v3 = vld [vmem:[%s14500_s5 + $0x18] sm:$0xff]  ;;  %v9764_v4 = vld [vmem:[%s14500_s5 + $0x20] sm:$0xff] }
   0x3   :  { %15059 = vst [vmem:[#allocation11_spill] sm:$0xff] %v9754_v2  ;;  %15060 = vst [vmem:[#allocation12_spill] sm:$0xff] %v9759_v3  ;;  %v9769_v5 = vld [vmem:[%s14500_s5 + $0x28] sm:$0xff]  ;;  %v9774_v6 = vld [vmem:[%s14500_s5 + $0x30] sm:$0xff] }
   0x4   :  { %15061 = vst [vmem:[#allocation13_spill] sm:$0xff] %v9764_v4  ;;  %15062 = vst [vmem:[#allocation14_spill] sm:$0xff] %v9769_v5  ;;  %v9779_v7 = vld [vmem:[%s14500_s5 + $0x38] sm:$0xff]  ;;  %v9784_v8 = vld [vmem:[%s14500_s5 + $0x40] sm:$0xff] }
   0x5   :  { %15063 = vst [vmem:[#allocation15_spill] sm:$0xff] %v9774_v6  ;;  %15064 = vst [vmem:[#allocation16_spill] sm:$0xff] %v9779_v7  ;;  %v9789_v9 = vld [vmem:[%s14500_s5 + $0x48] sm:$0xff]  ;;  %v9794_v10 = vld [vmem:[%s14500_s5 + $0x50] sm:$0xff] }
   0x6   :  { %15065 = vst [vmem:[#allocation17_spill] sm:$0xff] %v9784_v8  ;;  %15066 = vst [vmem:[#allocation18_spill] sm:$0xff] %v9789_v9  ;;  %v9799_v11 = vld [vmem:[%s14500_s5 + $0x58] sm:$0xff]  ;;  %v9804_v12 = vld [vmem:[%s14500_s5 + $0x60] sm:$0xff] }
   0x7   :  { %15067 = vst [vmem:[#allocation19_spill] sm:$0xff] %v9794_v10  ;;  %15068 = vst [vmem:[#allocation20_spill] sm:$0xff] %v9799_v11  ;;  %v9809_v13 = vld [vmem:[%s14500_s5 + $0x68] sm:$0xff]  ;;  %v9814_v14 = vld [vmem:[%s14500_s5 + $0x70] sm:$0xff] }
   0x8   :  { %15069 = vst [vmem:[#allocation21_spill] sm:$0xff] %v9804_v12  ;;  %15070 = vst [vmem:[#allocation22_spill] sm:$0xff] %v9809_v13  ;;  %v9819_v15 = vld [vmem:[%s14500_s5 + $0x78] sm:$0xff]  ;;  %v9824_v16 = vld [vmem:[%s14500_s5 + $0x80] sm:$0xff] }
   0x9   :  { %15071 = vst [vmem:[#allocation23_spill] sm:$0xff] %v9814_v14  ;;  %15072 = vst [vmem:[#allocation24_spill] sm:$0xff] %v9819_v15  ;;  %v9829_v17 = vld [vmem:[%s14500_s5 + $0x88] sm:$0xff]  ;;  %v9834_v18 = vld [vmem:[%s14500_s5 + $0x90] sm:$0xff] }
   0xa   :  { %15073 = vst [vmem:[#allocation25_spill] sm:$0xff] %v9824_v16  ;;  %15074 = vst [vmem:[#allocation26_spill] sm:$0xff] %v9829_v17  ;;  %v9839_v19 = vld [vmem:[%s14500_s5 + $0x98] sm:$0xff]  ;;  %v9844_v20 = vld [vmem:[%s14500_s5 + $0xa0] sm:$0xff] }
   0xb   :  { %15075 = vst [vmem:[#allocation27_spill] sm:$0xff] %v9834_v18  ;;  %15076 = vst [vmem:[#allocation28_spill] sm:$0xff] %v9839_v19  ;;  %v9849_v21 = vld [vmem:[%s14500_s5 + $0xa8] sm:$0xff]  ;;  %v9854_v22 = vld [vmem:[%s14500_s5 + $0xb0] sm:$0xff] }
   0xc   :  { %15077 = vst [vmem:[#allocation29_spill] sm:$0xff] %v9844_v20  ;;  %15078 = vst [vmem:[#allocation30_spill] sm:$0xff] %v9849_v21  ;;  %v9859_v23 = vld [vmem:[%s14500_s5 + $0xb8] sm:$0xff]  ;;  %v9864_v24 = vld [vmem:[%s14500_s5 + $0xc0] sm:$0xff] }
   0xd   :  { %15079 = vst [vmem:[#allocation31_spill] sm:$0xff] %v9854_v22  ;;  %15080 = vst [vmem:[#allocation32_spill] sm:$0xff] %v9859_v23  ;;  %v9869_v25 = vld [vmem:[%s14500_s5 + $0xc8] sm:$0xff]  ;;  %v9874_v26 = vld [vmem:[%s14500_s5 + $0xd0] sm:$0xff] }
   0xe   :  { %15081 = vst [vmem:[#allocation33_spill] sm:$0xff] %v9864_v24  ;;  %15082 = vst [vmem:[#allocation34_spill] sm:$0xff] %v9869_v25  ;;  %v9879_v27 = vld [vmem:[%s14500_s5 + $0xd8] sm:$0xff]  ;;  %v9884_v28 = vld [vmem:[%s14500_s5 + $0xe0] sm:$0xff] }
   0xf   :  { %15083 = vst [vmem:[#allocation35_spill] sm:$0xff] %v9874_v26  ;;  %15084 = vst [vmem:[#allocation36_spill] sm:$0xff] %v9879_v27  ;;  %v9889_v29 = vld [vmem:[%s14500_s5 + $0xe8] sm:$0xff]  ;;  %v9894_v30 = vld [vmem:[%s14500_s5 + $0xf0] sm:$0xff] }
  0x10   :  { %15085 = vst [vmem:[#allocation37_spill] sm:$0xff] %v9889_v29  ;;  %v9899_v31 = vld [vmem:[%s14500_s5 + $0xf8] sm:$0xff]  ;;  %v9904_v32 = vld [vmem:[%s14500_s5 + $0x100] sm:$0xff]  ;;  %v9909_v33 = vld [vmem:[%s14500_s5 + $0x108] sm:$0xff] }
  0x11   :  { %15086 = vst [vmem:[#allocation38_spill] sm:$0xff] %v9899_v31  ;;  %15087 = vst [vmem:[#allocation39_spill] sm:$0xff] %v9904_v32  ;;  %v9914_v34 = vld [vmem:[%s14500_s5 + $0x110] sm:$0xff]  ;;  %v9919_v35 = vld [vmem:[%s14500_s5 + $0x118] sm:$0xff] }
  0x12   :  { %15088 = vst [vmem:[#allocation40_spill] sm:$0xff] %v9909_v33  ;;  %15089 = vst [vmem:[#allocation41_spill] sm:$0xff] %v9914_v34  ;;  %v9924_v36 = vld [vmem:[%s14500_s5 + $0x120] sm:$0xff]  ;;  %v9929_v37 = vld [vmem:[%s14500_s5 + $0x128] sm:$0xff] }
  0x13   :  { %15090 = vst [vmem:[#allocation42_spill] sm:$0xff] %v9919_v35  ;;  %15091 = vst [vmem:[#allocation43_spill] sm:$0xff] %v9924_v36  ;;  %v9934_v38 = vld [vmem:[%s14500_s5 + $0x130] sm:$0xff]  ;;  %v9939_v39 = vld [vmem:[%s14500_s5 + $0x138] sm:$0xff] }
  0x14   :  { %15092 = vst [vmem:[#allocation44_spill] sm:$0xff] %v9929_v37  ;;  %15093 = vst [vmem:[#allocation45_spill] sm:$0xff] %v9934_v38  ;;  %v9944_v40 = vld [vmem:[%s14500_s5 + $0x140] sm:$0xff]  ;;  %v9949_v41 = vld [vmem:[%s14500_s5 + $0x148] sm:$0xff] }
  0x15   :  { %15094 = vst [vmem:[#allocation46_spill] sm:$0xff] %v9939_v39  ;;  %15095 = vst [vmem:[#allocation47_spill] sm:$0xff] %v9944_v40  ;;  %v9954_v42 = vld [vmem:[%s14500_s5 + $0x150] sm:$0xff]  ;;  %v9959_v43 = vld [vmem:[%s14500_s5 + $0x158] sm:$0xff] }
  0x16   :  { %15096 = vst [vmem:[#allocation48_spill] sm:$0xff] %v9949_v41  ;;  %15097 = vst [vmem:[#allocation49_spill] sm:$0xff] %v9954_v42  ;;  %v9964_v44 = vld [vmem:[%s14500_s5 + $0x160] sm:$0xff]  ;;  %v9969_v45 = vld [vmem:[%s14500_s5 + $0x168] sm:$0xff] }
  0x17   :  { %15098 = vst [vmem:[#allocation50_spill] sm:$0xff] %v9959_v43  ;;  %15099 = vst [vmem:[#allocation51_spill] sm:$0xff] %v9964_v44  ;;  %v9974_v46 = vld [vmem:[%s14500_s5 + $0x170] sm:$0xff]  ;;  %v9979_v47 = vld [vmem:[%s14500_s5 + $0x178] sm:$0xff] }
  0x18   :  { %15100 = vst [vmem:[#allocation52_spill] sm:$0xff] %v9969_v45  ;;  %15101 = vst [vmem:[#allocation53_spill] sm:$0xff] %v9974_v46  ;;  %v9984_v48 = vld [vmem:[%s14500_s5 + $0x180] sm:$0xff]  ;;  %v9989_v49 = vld [vmem:[%s14500_s5 + $0x188] sm:$0xff] }
  0x19   :  { %15102 = vst [vmem:[#allocation54_spill] sm:$0xff] %v9979_v47  ;;  %15103 = vst [vmem:[#allocation55_spill] sm:$0xff] %v9984_v48  ;;  %v9994_v50 = vld [vmem:[%s14500_s5 + $0x190] sm:$0xff]  ;;  %v9999_v51 = vld [vmem:[%s14500_s5 + $0x198] sm:$0xff] }
  0x1a   :  { %15104 = vst [vmem:[#allocation56_spill] sm:$0xff] %v9989_v49  ;;  %15105 = vst [vmem:[#allocation57_spill] sm:$0xff] %v9994_v50  ;;  %v10004_v52 = vld [vmem:[%s14500_s5 + $0x1a0] sm:$0xff]  ;;  %v10009_v53 = vld [vmem:[%s14500_s5 + $0x1a8] sm:$0xff] }
  0x1b   :  { %15106 = vst [vmem:[#allocation58_spill] sm:$0xff] %v9999_v51  ;;  %15107 = vst [vmem:[#allocation59_spill] sm:$0xff] %v10004_v52  ;;  %v10014_v54 = vld [vmem:[%s14500_s5 + $0x1b0] sm:$0xff]  ;;  %v10019_v55 = vld [vmem:[%s14500_s5 + $0x1b8] sm:$0xff] }
  0x1c   :  { %15108 = vst [vmem:[#allocation60_spill] sm:$0xff] %v10009_v53  ;;  %15109 = vst [vmem:[#allocation61_spill] sm:$0xff] %v10014_v54  ;;  %v10024_v56 = vld [vmem:[%s14500_s5 + $0x1c0] sm:$0xff]  ;;  %v10029_v57 = vld [vmem:[%s14500_s5 + $0x1c8] sm:$0xff] }
  0x1d   :  { %15110 = vst [vmem:[#allocation62_spill] sm:$0xff] %v10019_v55  ;;  %15111 = vst [vmem:[#allocation63_spill] sm:$0xff] %v10024_v56  ;;  %v10034_v58 = vld [vmem:[%s14500_s5 + $0x1d0] sm:$0xff]  ;;  %v10039_v59 = vld [vmem:[%s14500_s5 + $0x1d8] sm:$0xff] }
  0x1e   :  { %15112 = vst [vmem:[#allocation64_spill] sm:$0xff] %v10029_v57  ;;  %15113 = vst [vmem:[#allocation65_spill] sm:$0xff] %v10034_v58  ;;  %v10044_v60 = vld [vmem:[%s14500_s5 + $0x1e0] sm:$0xff]  ;;  %v10049_v61 = vld [vmem:[%s14500_s5 + $0x1e8] sm:$0xff] }
  0x1f   :  { %15114 = vst [vmem:[#allocation66_spill] sm:$0xff] %v10039_v59  ;;  %15115 = vst [vmem:[#allocation67_spill] sm:$0xff] %v10044_v60  ;;  %v10054_v62 = vld [vmem:[%s14500_s5 + $0x1f0] sm:$0xff]  ;;  %v10059_v63 = vld [vmem:[%s14500_s5 + $0x1f8] sm:$0xff] }
  0x20   :  { %15116 = vst [vmem:[#allocation68_spill] sm:$0xff] %v10049_v61  ;;  %15117 = vst [vmem:[#allocation69_spill] sm:$0xff] %v10054_v62 }
  0x21   :  { %15118 = vst [vmem:[#allocation70_spill] sm:$0xff] %v10059_v63 }
  0x22   :  { %202 = vsyncadd [#allocation4], 8192  ;;  %v10064_v33 = vld [vmem:[%s14501_s6] sm:$0xff]  ;;  %v10069_v35 = vld [vmem:[%s14501_s6 + $0x8] sm:$0xff] }
  0x23   :  { %15119 = vst [vmem:[#allocation71_spill] sm:$0xff] %v10064_v33  ;;  %15120 = vst [vmem:[#allocation72_spill] sm:$0xff] %v10069_v35  ;;  %v10074_v32 = vld [vmem:[%s14501_s6 + $0x10] sm:$0xff]  ;;  %v10079_v34 = vld [vmem:[%s14501_s6 + $0x18] sm:$0xff] }
  0x24   :  { %15121 = vst [vmem:[#allocation73_spill] sm:$0xff] %v10074_v32  ;;  %15122 = vst [vmem:[#allocation74_spill] sm:$0xff] %v10079_v34  ;;  %v10084_v37 = vld [vmem:[%s14501_s6 + $0x20] sm:$0xff]  ;;  %v10089_v33 = vld [vmem:[%s14501_s6 + $0x28] sm:$0xff] }
  0x25   :  { %15123 = vst [vmem:[#allocation75_spill] sm:$0xff] %v10084_v37  ;;  %15124 = vst [vmem:[#allocation76_spill] sm:$0xff] %v10089_v33  ;;  %v10094_v35 = vld [vmem:[%s14501_s6 + $0x30] sm:$0xff]  ;;  %v10099_v32 = vld [vmem:[%s14501_s6 + $0x38] sm:$0xff] }
  0x26   :  { %15125 = vst [vmem:[#allocation77_spill] sm:$0xff] %v10094_v35  ;;  %15126 = vst [vmem:[#allocation78_spill] sm:$0xff] %v10099_v32  ;;  %v10104_v34 = vld [vmem:[%s14501_s6 + $0x40] sm:$0xff]  ;;  %v10109_v37 = vld [vmem:[%s14501_s6 + $0x48] sm:$0xff] }
  0x27   :  { %15127 = vst [vmem:[#allocation79_spill] sm:$0xff] %v10104_v34  ;;  %15128 = vst [vmem:[#allocation80_spill] sm:$0xff] %v10109_v37  ;;  %v10114_v33 = vld [vmem:[%s14501_s6 + $0x50] sm:$0xff]  ;;  %v10119_v35 = vld [vmem:[%s14501_s6 + $0x58] sm:$0xff] }
  0x28   :  { %15129 = vst [vmem:[#allocation81_spill] sm:$0xff] %v10114_v33  ;;  %15130 = vst [vmem:[#allocation82_spill] sm:$0xff] %v10119_v35  ;;  %v10124_v32 = vld [vmem:[%s14501_s6 + $0x60] sm:$0xff]  ;;  %v10129_v34 = vld [vmem:[%s14501_s6 + $0x68] sm:$0xff] }
  0x29   :  { %15131 = vst [vmem:[#allocation83_spill] sm:$0xff] %v10124_v32  ;;  %15132 = vst [vmem:[#allocation84_spill] sm:$0xff] %v10129_v34  ;;  %v10134_v37 = vld [vmem:[%s14501_s6 + $0x70] sm:$0xff]  ;;  %v10139_v33 = vld [vmem:[%s14501_s6 + $0x78] sm:$0xff] }
  0x2a   :  { %15133 = vst [vmem:[#allocation85_spill] sm:$0xff] %v10134_v37  ;;  %15134 = vst [vmem:[#allocation86_spill] sm:$0xff] %v10139_v33  ;;  %v10144_v35 = vld [vmem:[%s14501_s6 + $0x80] sm:$0xff]  ;;  %v10149_v32 = vld [vmem:[%s14501_s6 + $0x88] sm:$0xff] }
  0x2b   :  { %15135 = vst [vmem:[#allocation87_spill] sm:$0xff] %v10144_v35  ;;  %15136 = vst [vmem:[#allocation88_spill] sm:$0xff] %v10149_v32  ;;  %v10154_v34 = vld [vmem:[%s14501_s6 + $0x90] sm:$0xff]  ;;  %v10159_v37 = vld [vmem:[%s14501_s6 + $0x98] sm:$0xff] }
  0x2c   :  { %15137 = vst [vmem:[#allocation89_spill] sm:$0xff] %v10154_v34  ;;  %15138 = vst [vmem:[#allocation90_spill] sm:$0xff] %v10159_v37  ;;  %v10164_v33 = vld [vmem:[%s14501_s6 + $0xa0] sm:$0xff]  ;;  %v10169_v35 = vld [vmem:[%s14501_s6 + $0xa8] sm:$0xff] }
  0x2d   :  { %15139 = vst [vmem:[#allocation91_spill] sm:$0xff] %v10164_v33  ;;  %15140 = vst [vmem:[#allocation92_spill] sm:$0xff] %v10169_v35  ;;  %v10174_v32 = vld [vmem:[%s14501_s6 + $0xb0] sm:$0xff]  ;;  %v10179_v34 = vld [vmem:[%s14501_s6 + $0xb8] sm:$0xff] }
  0x2e   :  { %15141 = vst [vmem:[#allocation93_spill] sm:$0xff] %v10174_v32  ;;  %15142 = vst [vmem:[#allocation94_spill] sm:$0xff] %v10179_v34  ;;  %v10184_v37 = vld [vmem:[%s14501_s6 + $0xc0] sm:$0xff]  ;;  %v10189_v33 = vld [vmem:[%s14501_s6 + $0xc8] sm:$0xff] }
  0x2f   :  { %15143 = vst [vmem:[#allocation95_spill] sm:$0xff] %v10184_v37  ;;  %15144 = vst [vmem:[#allocation96_spill] sm:$0xff] %v10189_v33  ;;  %v10194_v35 = vld [vmem:[%s14501_s6 + $0xd0] sm:$0xff]  ;;  %v10199_v32 = vld [vmem:[%s14501_s6 + $0xd8] sm:$0xff] }
  0x30   :  { %15145 = vst [vmem:[#allocation97_spill] sm:$0xff] %v10194_v35  ;;  %15146 = vst [vmem:[#allocation98_spill] sm:$0xff] %v10199_v32  ;;  %v10204_v34 = vld [vmem:[%s14501_s6 + $0xe0] sm:$0xff]  ;;  %v10209_v37 = vld [vmem:[%s14501_s6 + $0xe8] sm:$0xff] }
  0x31   :  { %15147 = vst [vmem:[#allocation99_spill] sm:$0xff] %v10204_v34  ;;  %15148 = vst [vmem:[#allocation100_spill] sm:$0xff] %v10209_v37  ;;  %v10214_v33 = vld [vmem:[%s14501_s6 + $0xf0] sm:$0xff]  ;;  %v10219_v35 = vld [vmem:[%s14501_s6 + $0xf8] sm:$0xff] }
  0x32   :  { %15149 = vst [vmem:[#allocation101_spill] sm:$0xff] %v10214_v33  ;;  %15150 = vst [vmem:[#allocation102_spill] sm:$0xff] %v10219_v35  ;;  %v10224_v32 = vld [vmem:[%s14501_s6 + $0x100] sm:$0xff]  ;;  %v10229_v34 = vld [vmem:[%s14501_s6 + $0x108] sm:$0xff] }
  0x33   :  { %15151 = vst [vmem:[#allocation103_spill] sm:$0xff] %v10224_v32  ;;  %15152 = vst [vmem:[#allocation104_spill] sm:$0xff] %v10229_v34  ;;  %v10234_v37 = vld [vmem:[%s14501_s6 + $0x110] sm:$0xff]  ;;  %v10239_v33 = vld [vmem:[%s14501_s6 + $0x118] sm:$0xff] }
  0x34   :  { %15153 = vst [vmem:[#allocation105_spill] sm:$0xff] %v10234_v37  ;;  %15154 = vst [vmem:[#allocation106_spill] sm:$0xff] %v10239_v33  ;;  %v10244_v35 = vld [vmem:[%s14501_s6 + $0x120] sm:$0xff]  ;;  %v10249_v32 = vld [vmem:[%s14501_s6 + $0x128] sm:$0xff] }
  0x35   :  { %15155 = vst [vmem:[#allocation107_spill] sm:$0xff] %v10244_v35  ;;  %15156 = vst [vmem:[#allocation108_spill] sm:$0xff] %v10249_v32  ;;  %v10254_v34 = vld [vmem:[%s14501_s6 + $0x130] sm:$0xff]  ;;  %v10259_v37 = vld [vmem:[%s14501_s6 + $0x138] sm:$0xff] }
  0x36   :  { %15157 = vst [vmem:[#allocation109_spill] sm:$0xff] %v10254_v34  ;;  %15158 = vst [vmem:[#allocation110_spill] sm:$0xff] %v10259_v37  ;;  %v10264_v33 = vld [vmem:[%s14501_s6 + $0x140] sm:$0xff]  ;;  %v10269_v35 = vld [vmem:[%s14501_s6 + $0x148] sm:$0xff] }
  0x37   :  { %15159 = vst [vmem:[#allocation111_spill] sm:$0xff] %v10264_v33  ;;  %15160 = vst [vmem:[#allocation112_spill] sm:$0xff] %v10269_v35  ;;  %v10274_v32 = vld [vmem:[%s14501_s6 + $0x150] sm:$0xff]  ;;  %v10279_v34 = vld [vmem:[%s14501_s6 + $0x158] sm:$0xff] }
  0x38   :  { %15161 = vst [vmem:[#allocation113_spill] sm:$0xff] %v10274_v32  ;;  %15162 = vst [vmem:[#allocation114_spill] sm:$0xff] %v10279_v34  ;;  %v10284_v37 = vld [vmem:[%s14501_s6 + $0x160] sm:$0xff]  ;;  %v10289_v33 = vld [vmem:[%s14501_s6 + $0x168] sm:$0xff] }
  0x39   :  { %15163 = vst [vmem:[#allocation115_spill] sm:$0xff] %v10284_v37  ;;  %15164 = vst [vmem:[#allocation116_spill] sm:$0xff] %v10289_v33  ;;  %v10294_v35 = vld [vmem:[%s14501_s6 + $0x170] sm:$0xff]  ;;  %v10299_v32 = vld [vmem:[%s14501_s6 + $0x178] sm:$0xff] }
  0x3a   :  { %15165 = vst [vmem:[#allocation117_spill] sm:$0xff] %v10294_v35  ;;  %15166 = vst [vmem:[#allocation118_spill] sm:$0xff] %v10299_v32  ;;  %v10304_v34 = vld [vmem:[%s14501_s6 + $0x180] sm:$0xff]  ;;  %v10309_v37 = vld [vmem:[%s14501_s6 + $0x188] sm:$0xff] }
  0x3b   :  { %15167 = vst [vmem:[#allocation119_spill] sm:$0xff] %v10304_v34  ;;  %15168 = vst [vmem:[#allocation120_spill] sm:$0xff] %v10309_v37  ;;  %v10314_v33 = vld [vmem:[%s14501_s6 + $0x190] sm:$0xff]  ;;  %v10319_v35 = vld [vmem:[%s14501_s6 + $0x198] sm:$0xff] }
  0x3c   :  { %15169 = vst [vmem:[#allocation121_spill] sm:$0xff] %v10314_v33  ;;  %15170 = vst [vmem:[#allocation122_spill] sm:$0xff] %v10319_v35  ;;  %v10324_v32 = vld [vmem:[%s14501_s6 + $0x1a0] sm:$0xff]  ;;  %v10329_v34 = vld [vmem:[%s14501_s6 + $0x1a8] sm:$0xff] }
  0x3d   :  { %15171 = vst [vmem:[#allocation123_spill] sm:$0xff] %v10324_v32  ;;  %15172 = vst [vmem:[#allocation124_spill] sm:$0xff] %v10329_v34  ;;  %v10334_v37 = vld [vmem:[%s14501_s6 + $0x1b0] sm:$0xff]  ;;  %v10339_v33 = vld [vmem:[%s14501_s6 + $0x1b8] sm:$0xff] }
  0x3e   :  { %15173 = vst [vmem:[#allocation125_spill] sm:$0xff] %v10334_v37  ;;  %15174 = vst [vmem:[#allocation126_spill] sm:$0xff] %v10339_v33  ;;  %v10344_v35 = vld [vmem:[%s14501_s6 + $0x1c0] sm:$0xff]  ;;  %v10349_v32 = vld [vmem:[%s14501_s6 + $0x1c8] sm:$0xff] }
  0x3f   :  { %15175 = vst [vmem:[#allocation127_spill] sm:$0xff] %v10344_v35  ;;  %15176 = vst [vmem:[#allocation128_spill] sm:$0xff] %v10349_v32  ;;  %v10354_v34 = vld [vmem:[%s14501_s6 + $0x1d0] sm:$0xff]  ;;  %v10359_v37 = vld [vmem:[%s14501_s6 + $0x1d8] sm:$0xff] }
  0x40   :  { %15177 = vst [vmem:[#allocation129_spill] sm:$0xff] %v10354_v34  ;;  %15178 = vst [vmem:[#allocation130_spill] sm:$0xff] %v10359_v37  ;;  %v10364_v33 = vld [vmem:[%s14501_s6 + $0x1e0] sm:$0xff]  ;;  %v10369_v35 = vld [vmem:[%s14501_s6 + $0x1e8] sm:$0xff] }
  0x41   :  { %15179 = vst [vmem:[#allocation131_spill] sm:$0xff] %v10364_v33  ;;  %15180 = vst [vmem:[#allocation132_spill] sm:$0xff] %v10369_v35  ;;  %v10374_v32 = vld [vmem:[%s14501_s6 + $0x1f0] sm:$0xff]  ;;  %v10379_v34 = vld [vmem:[%s14501_s6 + $0x1f8] sm:$0xff] }
  0x42   :  { %15181 = vst [vmem:[#allocation133_spill] sm:$0xff] %v10374_v32  ;;  %15182 = vst [vmem:[#allocation134_spill] sm:$0xff] %v10379_v34  ;;  %v10384_v37 = vld [vmem:[%s14501_s6 + $0x200] sm:$0xff]  ;;  %v10389_v33 = vld [vmem:[%s14501_s6 + $0x208] sm:$0xff] }
  0x43   :  { %15183 = vst [vmem:[#allocation135_spill] sm:$0xff] %v10384_v37  ;;  %15184 = vst [vmem:[#allocation136_spill] sm:$0xff] %v10389_v33  ;;  %v10394_v35 = vld [vmem:[%s14501_s6 + $0x210] sm:$0xff]  ;;  %v10399_v32 = vld [vmem:[%s14501_s6 + $0x218] sm:$0xff] }
  0x44   :  { %15185 = vst [vmem:[#allocation137_spill] sm:$0xff] %v10394_v35  ;;  %15186 = vst [vmem:[#allocation138_spill] sm:$0xff] %v10399_v32  ;;  %v10404_v34 = vld [vmem:[%s14501_s6 + $0x220] sm:$0xff]  ;;  %v10409_v37 = vld [vmem:[%s14501_s6 + $0x228] sm:$0xff] }
  0x45   :  { %15187 = vst [vmem:[#allocation139_spill] sm:$0xff] %v10404_v34  ;;  %15188 = vst [vmem:[#allocation140_spill] sm:$0xff] %v10409_v37  ;;  %v10414_v33 = vld [vmem:[%s14501_s6 + $0x230] sm:$0xff]  ;;  %v10419_v35 = vld [vmem:[%s14501_s6 + $0x238] sm:$0xff] }
  0x46   :  { %15189 = vst [vmem:[#allocation141_spill] sm:$0xff] %v10414_v33  ;;  %15190 = vst [vmem:[#allocation142_spill] sm:$0xff] %v10419_v35  ;;  %v10424_v32 = vld [vmem:[%s14501_s6 + $0x240] sm:$0xff]  ;;  %v10429_v34 = vld [vmem:[%s14501_s6 + $0x248] sm:$0xff] }
  0x47   :  { %15191 = vst [vmem:[#allocation143_spill] sm:$0xff] %v10424_v32  ;;  %15192 = vst [vmem:[#allocation144_spill] sm:$0xff] %v10429_v34  ;;  %v10434_v37 = vld [vmem:[%s14501_s6 + $0x250] sm:$0xff]  ;;  %v10439_v33 = vld [vmem:[%s14501_s6 + $0x258] sm:$0xff] }
  0x48   :  { %15193 = vst [vmem:[#allocation145_spill] sm:$0xff] %v10434_v37  ;;  %15194 = vst [vmem:[#allocation146_spill] sm:$0xff] %v10439_v33  ;;  %v10444_v35 = vld [vmem:[%s14501_s6 + $0x260] sm:$0xff]  ;;  %v10449_v32 = vld [vmem:[%s14501_s6 + $0x268] sm:$0xff] }
  0x49   :  { %15195 = vst [vmem:[#allocation147_spill] sm:$0xff] %v10444_v35  ;;  %15196 = vst [vmem:[#allocation148_spill] sm:$0xff] %v10449_v32  ;;  %v10454_v34 = vld [vmem:[%s14501_s6 + $0x270] sm:$0xff]  ;;  %v10459_v37 = vld [vmem:[%s14501_s6 + $0x278] sm:$0xff] }
  0x4a   :  { %15197 = vst [vmem:[#allocation149_spill] sm:$0xff] %v10454_v34  ;;  %15198 = vst [vmem:[#allocation150_spill] sm:$0xff] %v10459_v37  ;;  %v10464_v33 = vld [vmem:[%s14501_s6 + $0x280] sm:$0xff]  ;;  %v10469_v35 = vld [vmem:[%s14501_s6 + $0x288] sm:$0xff] }
  0x4b   :  { %15199 = vst [vmem:[#allocation151_spill] sm:$0xff] %v10464_v33  ;;  %15200 = vst [vmem:[#allocation152_spill] sm:$0xff] %v10469_v35  ;;  %v10474_v32 = vld [vmem:[%s14501_s6 + $0x290] sm:$0xff]  ;;  %v10479_v34 = vld [vmem:[%s14501_s6 + $0x298] sm:$0xff] }
  0x4c   :  { %15201 = vst [vmem:[#allocation153_spill] sm:$0xff] %v10474_v32  ;;  %15202 = vst [vmem:[#allocation154_spill] sm:$0xff] %v10479_v34  ;;  %v10484_v37 = vld [vmem:[%s14501_s6 + $0x2a0] sm:$0xff]  ;;  %v10489_v33 = vld [vmem:[%s14501_s6 + $0x2a8] sm:$0xff] }
  0x4d   :  { %15203 = vst [vmem:[#allocation155_spill] sm:$0xff] %v10484_v37  ;;  %15204 = vst [vmem:[#allocation156_spill] sm:$0xff] %v10489_v33  ;;  %v10494_v35 = vld [vmem:[%s14501_s6 + $0x2b0] sm:$0xff]  ;;  %v10499_v32 = vld [vmem:[%s14501_s6 + $0x2b8] sm:$0xff] }
  0x4e   :  { %15205 = vst [vmem:[#allocation157_spill] sm:$0xff] %v10494_v35  ;;  %15206 = vst [vmem:[#allocation158_spill] sm:$0xff] %v10499_v32  ;;  %v10504_v34 = vld [vmem:[%s14501_s6 + $0x2c0] sm:$0xff]  ;;  %v10509_v37 = vld [vmem:[%s14501_s6 + $0x2c8] sm:$0xff] }
  0x4f   :  { %15207 = vst [vmem:[#allocation159_spill] sm:$0xff] %v10504_v34  ;;  %15208 = vst [vmem:[#allocation160_spill] sm:$0xff] %v10509_v37  ;;  %v10514_v33 = vld [vmem:[%s14501_s6 + $0x2d0] sm:$0xff]  ;;  %v10519_v35 = vld [vmem:[%s14501_s6 + $0x2d8] sm:$0xff] }
  0x50   :  { %15209 = vst [vmem:[#allocation161_spill] sm:$0xff] %v10514_v33  ;;  %15210 = vst [vmem:[#allocation162_spill] sm:$0xff] %v10519_v35  ;;  %v10524_v32 = vld [vmem:[%s14501_s6 + $0x2e0] sm:$0xff]  ;;  %v10529_v34 = vld [vmem:[%s14501_s6 + $0x2e8] sm:$0xff] }
  0x51   :  { %15211 = vst [vmem:[#allocation163_spill] sm:$0xff] %v10524_v32  ;;  %15212 = vst [vmem:[#allocation164_spill] sm:$0xff] %v10529_v34  ;;  %v10534_v37 = vld [vmem:[%s14501_s6 + $0x2f0] sm:$0xff]  ;;  %v10539_v33 = vld [vmem:[%s14501_s6 + $0x2f8] sm:$0xff] }
  0x52   :  { %15213 = vst [vmem:[#allocation165_spill] sm:$0xff] %v10534_v37  ;;  %15214 = vst [vmem:[#allocation166_spill] sm:$0xff] %v10539_v33  ;;  %v10544_v35 = vld [vmem:[%s14501_s6 + $0x300] sm:$0xff]  ;;  %v10549_v32 = vld [vmem:[%s14501_s6 + $0x308] sm:$0xff] }
  0x53   :  { %15215 = vst [vmem:[#allocation167_spill] sm:$0xff] %v10544_v35  ;;  %15216 = vst [vmem:[#allocation168_spill] sm:$0xff] %v10549_v32  ;;  %v10554_v34 = vld [vmem:[%s14501_s6 + $0x310] sm:$0xff]  ;;  %v10559_v37 = vld [vmem:[%s14501_s6 + $0x318] sm:$0xff] }
  0x54   :  { %15217 = vst [vmem:[#allocation169_spill] sm:$0xff] %v10554_v34  ;;  %15218 = vst [vmem:[#allocation170_spill] sm:$0xff] %v10559_v37  ;;  %v10564_v33 = vld [vmem:[%s14501_s6 + $0x320] sm:$0xff]  ;;  %v10569_v35 = vld [vmem:[%s14501_s6 + $0x328] sm:$0xff] }
  0x55   :  { %15219 = vst [vmem:[#allocation171_spill] sm:$0xff] %v10564_v33  ;;  %15220 = vst [vmem:[#allocation172_spill] sm:$0xff] %v10569_v35  ;;  %v10574_v32 = vld [vmem:[%s14501_s6 + $0x330] sm:$0xff]  ;;  %v10579_v34 = vld [vmem:[%s14501_s6 + $0x338] sm:$0xff] }
  0x56   :  { %15221 = vst [vmem:[#allocation173_spill] sm:$0xff] %v10574_v32  ;;  %15222 = vst [vmem:[#allocation174_spill] sm:$0xff] %v10579_v34  ;;  %v10584_v37 = vld [vmem:[%s14501_s6 + $0x340] sm:$0xff]  ;;  %v10589_v33 = vld [vmem:[%s14501_s6 + $0x348] sm:$0xff] }
  0x57   :  { %15223 = vst [vmem:[#allocation175_spill] sm:$0xff] %v10584_v37  ;;  %15224 = vst [vmem:[#allocation176_spill] sm:$0xff] %v10589_v33  ;;  %v10594_v35 = vld [vmem:[%s14501_s6 + $0x350] sm:$0xff]  ;;  %v10599_v32 = vld [vmem:[%s14501_s6 + $0x358] sm:$0xff] }
  0x58   :  { %15225 = vst [vmem:[#allocation177_spill] sm:$0xff] %v10594_v35  ;;  %15226 = vst [vmem:[#allocation178_spill] sm:$0xff] %v10599_v32  ;;  %v10604_v34 = vld [vmem:[%s14501_s6 + $0x360] sm:$0xff]  ;;  %v10609_v37 = vld [vmem:[%s14501_s6 + $0x368] sm:$0xff] }
  0x59   :  { %15227 = vst [vmem:[#allocation179_spill] sm:$0xff] %v10604_v34  ;;  %15228 = vst [vmem:[#allocation180_spill] sm:$0xff] %v10609_v37  ;;  %v10614_v33 = vld [vmem:[%s14501_s6 + $0x370] sm:$0xff]  ;;  %v10619_v35 = vld [vmem:[%s14501_s6 + $0x378] sm:$0xff] }
  0x5a   :  { %15229 = vst [vmem:[#allocation181_spill] sm:$0xff] %v10614_v33  ;;  %15230 = vst [vmem:[#allocation182_spill] sm:$0xff] %v10619_v35  ;;  %v10624_v32 = vld [vmem:[%s14501_s6 + $0x380] sm:$0xff]  ;;  %v10629_v34 = vld [vmem:[%s14501_s6 + $0x388] sm:$0xff] }
  0x5b   :  { %15231 = vst [vmem:[#allocation183_spill] sm:$0xff] %v10624_v32  ;;  %15232 = vst [vmem:[#allocation184_spill] sm:$0xff] %v10629_v34  ;;  %v10634_v37 = vld [vmem:[%s14501_s6 + $0x390] sm:$0xff]  ;;  %v10639_v33 = vld [vmem:[%s14501_s6 + $0x398] sm:$0xff] }
  0x5c   :  { %15233 = vst [vmem:[#allocation185_spill] sm:$0xff] %v10634_v37  ;;  %15234 = vst [vmem:[#allocation186_spill] sm:$0xff] %v10639_v33  ;;  %v10644_v35 = vld [vmem:[%s14501_s6 + $0x3a0] sm:$0xff]  ;;  %v10649_v32 = vld [vmem:[%s14501_s6 + $0x3a8] sm:$0xff] }
  0x5d   :  { %15235 = vst [vmem:[#allocation187_spill] sm:$0xff] %v10644_v35  ;;  %15236 = vst [vmem:[#allocation188_spill] sm:$0xff] %v10649_v32  ;;  %v10654_v34 = vld [vmem:[%s14501_s6 + $0x3b0] sm:$0xff]  ;;  %v10659_v37 = vld [vmem:[%s14501_s6 + $0x3b8] sm:$0xff] }
  0x5e   :  { %15237 = vst [vmem:[#allocation189_spill] sm:$0xff] %v10654_v34  ;;  %15238 = vst [vmem:[#allocation190_spill] sm:$0xff] %v10659_v37  ;;  %v10664_v33 = vld [vmem:[%s14501_s6 + $0x3c0] sm:$0xff]  ;;  %v10669_v35 = vld [vmem:[%s14501_s6 + $0x3c8] sm:$0xff] }
  0x5f   :  { %15239 = vst [vmem:[#allocation191_spill] sm:$0xff] %v10664_v33  ;;  %15240 = vst [vmem:[#allocation192_spill] sm:$0xff] %v10669_v35  ;;  %v10674_v32 = vld [vmem:[%s14501_s6 + $0x3d0] sm:$0xff]  ;;  %v10679_v34 = vld [vmem:[%s14501_s6 + $0x3d8] sm:$0xff] }
  0x60   :  { %15241 = vst [vmem:[#allocation193_spill] sm:$0xff] %v10674_v32  ;;  %15242 = vst [vmem:[#allocation194_spill] sm:$0xff] %v10679_v34  ;;  %v10684_v37 = vld [vmem:[%s14501_s6 + $0x3e0] sm:$0xff]  ;;  %v10689_v33 = vld [vmem:[%s14501_s6 + $0x3e8] sm:$0xff] }
  0x61   :  { %15243 = vst [vmem:[#allocation195_spill] sm:$0xff] %v10684_v37  ;;  %15244 = vst [vmem:[#allocation196_spill] sm:$0xff] %v10689_v33  ;;  %v10694_v35 = vld [vmem:[%s14501_s6 + $0x3f0] sm:$0xff]  ;;  %v10699_v32 = vld [vmem:[%s14501_s6 + $0x3f8] sm:$0xff] }
  0x62   :  { %15245 = vst [vmem:[#allocation197_spill] sm:$0xff] %v10694_v35  ;;  %15246 = vst [vmem:[#allocation198_spill] sm:$0xff] %v10699_v32  ;;  %v10704_v34 = vld [vmem:[%s14501_s6 + $0x400] sm:$0xff]  ;;  %v10709_v37 = vld [vmem:[%s14501_s6 + $0x408] sm:$0xff] }
  0x63   :  { %15247 = vst [vmem:[#allocation199_spill] sm:$0xff] %v10704_v34  ;;  %15248 = vst [vmem:[#allocation200_spill] sm:$0xff] %v10709_v37  ;;  %v10714_v33 = vld [vmem:[%s14501_s6 + $0x410] sm:$0xff]  ;;  %v10719_v35 = vld [vmem:[%s14501_s6 + $0x418] sm:$0xff] }
  0x64   :  { %15249 = vst [vmem:[#allocation201_spill] sm:$0xff] %v10714_v33  ;;  %15250 = vst [vmem:[#allocation202_spill] sm:$0xff] %v10719_v35  ;;  %v10724_v32 = vld [vmem:[%s14501_s6 + $0x420] sm:$0xff]  ;;  %v10729_v34 = vld [vmem:[%s14501_s6 + $0x428] sm:$0xff] }
  0x65   :  { %15251 = vst [vmem:[#allocation203_spill] sm:$0xff] %v10724_v32  ;;  %15252 = vst [vmem:[#allocation204_spill] sm:$0xff] %v10729_v34  ;;  %v10734_v37 = vld [vmem:[%s14501_s6 + $0x430] sm:$0xff]  ;;  %v10739_v33 = vld [vmem:[%s14501_s6 + $0x438] sm:$0xff] }
  0x66   :  { %15253 = vst [vmem:[#allocation205_spill] sm:$0xff] %v10734_v37  ;;  %15254 = vst [vmem:[#allocation206_spill] sm:$0xff] %v10739_v33  ;;  %v10744_v35 = vld [vmem:[%s14501_s6 + $0x440] sm:$0xff]  ;;  %v10749_v32 = vld [vmem:[%s14501_s6 + $0x448] sm:$0xff] }
  0x67   :  { %15255 = vst [vmem:[#allocation207_spill] sm:$0xff] %v10744_v35  ;;  %15256 = vst [vmem:[#allocation208_spill] sm:$0xff] %v10749_v32  ;;  %v10754_v34 = vld [vmem:[%s14501_s6 + $0x450] sm:$0xff]  ;;  %v10759_v37 = vld [vmem:[%s14501_s6 + $0x458] sm:$0xff] }
  0x68   :  { %15257 = vst [vmem:[#allocation209_spill] sm:$0xff] %v10754_v34  ;;  %15258 = vst [vmem:[#allocation210_spill] sm:$0xff] %v10759_v37  ;;  %v10764_v33 = vld [vmem:[%s14501_s6 + $0x460] sm:$0xff]  ;;  %v10769_v35 = vld [vmem:[%s14501_s6 + $0x468] sm:$0xff] }
  0x69   :  { %15259 = vst [vmem:[#allocation211_spill] sm:$0xff] %v10764_v33  ;;  %15260 = vst [vmem:[#allocation212_spill] sm:$0xff] %v10769_v35  ;;  %v10774_v32 = vld [vmem:[%s14501_s6 + $0x470] sm:$0xff]  ;;  %v10779_v34 = vld [vmem:[%s14501_s6 + $0x478] sm:$0xff] }
  0x6a   :  { %15261 = vst [vmem:[#allocation213_spill] sm:$0xff] %v10774_v32  ;;  %15262 = vst [vmem:[#allocation214_spill] sm:$0xff] %v10779_v34  ;;  %v10784_v37 = vld [vmem:[%s14501_s6 + $0x480] sm:$0xff]  ;;  %v10789_v33 = vld [vmem:[%s14501_s6 + $0x488] sm:$0xff] }
  0x6b   :  { %15263 = vst [vmem:[#allocation215_spill] sm:$0xff] %v10784_v37  ;;  %15264 = vst [vmem:[#allocation216_spill] sm:$0xff] %v10789_v33  ;;  %v10794_v35 = vld [vmem:[%s14501_s6 + $0x490] sm:$0xff]  ;;  %v10799_v32 = vld [vmem:[%s14501_s6 + $0x498] sm:$0xff] }
  0x6c   :  { %15265 = vst [vmem:[#allocation217_spill] sm:$0xff] %v10794_v35  ;;  %15266 = vst [vmem:[#allocation218_spill] sm:$0xff] %v10799_v32  ;;  %v10804_v34 = vld [vmem:[%s14501_s6 + $0x4a0] sm:$0xff]  ;;  %v10809_v37 = vld [vmem:[%s14501_s6 + $0x4a8] sm:$0xff] }
  0x6d   :  { %15267 = vst [vmem:[#allocation219_spill] sm:$0xff] %v10804_v34  ;;  %15268 = vst [vmem:[#allocation220_spill] sm:$0xff] %v10809_v37  ;;  %v10814_v33 = vld [vmem:[%s14501_s6 + $0x4b0] sm:$0xff]  ;;  %v10819_v35 = vld [vmem:[%s14501_s6 + $0x4b8] sm:$0xff] }
  0x6e   :  { %15269 = vst [vmem:[#allocation221_spill] sm:$0xff] %v10814_v33  ;;  %15270 = vst [vmem:[#allocation222_spill] sm:$0xff] %v10819_v35  ;;  %v10824_v32 = vld [vmem:[%s14501_s6 + $0x4c0] sm:$0xff]  ;;  %v10829_v34 = vld [vmem:[%s14501_s6 + $0x4c8] sm:$0xff] }
  0x6f   :  { %15271 = vst [vmem:[#allocation223_spill] sm:$0xff] %v10824_v32  ;;  %15272 = vst [vmem:[#allocation224_spill] sm:$0xff] %v10829_v34  ;;  %v10834_v37 = vld [vmem:[%s14501_s6 + $0x4d0] sm:$0xff]  ;;  %v10839_v33 = vld [vmem:[%s14501_s6 + $0x4d8] sm:$0xff] }
  0x70   :  { %15273 = vst [vmem:[#allocation225_spill] sm:$0xff] %v10834_v37  ;;  %15274 = vst [vmem:[#allocation226_spill] sm:$0xff] %v10839_v33  ;;  %v10844_v35 = vld [vmem:[%s14501_s6 + $0x4e0] sm:$0xff]  ;;  %v10849_v32 = vld [vmem:[%s14501_s6 + $0x4e8] sm:$0xff] }
  0x71   :  { %15275 = vst [vmem:[#allocation227_spill] sm:$0xff] %v10844_v35  ;;  %15276 = vst [vmem:[#allocation228_spill] sm:$0xff] %v10849_v32  ;;  %v10854_v34 = vld [vmem:[%s14501_s6 + $0x4f0] sm:$0xff]  ;;  %v10859_v37 = vld [vmem:[%s14501_s6 + $0x4f8] sm:$0xff] }
  0x72   :  { %15277 = vst [vmem:[#allocation229_spill] sm:$0xff] %v10854_v34  ;;  %15278 = vst [vmem:[#allocation230_spill] sm:$0xff] %v10859_v37  ;;  %v10864_v33 = vld [vmem:[%s14501_s6 + $0x500] sm:$0xff]  ;;  %v10869_v35 = vld [vmem:[%s14501_s6 + $0x508] sm:$0xff] }
  0x73   :  { %15279 = vst [vmem:[#allocation231_spill] sm:$0xff] %v10864_v33  ;;  %15280 = vst [vmem:[#allocation232_spill] sm:$0xff] %v10869_v35  ;;  %v10874_v32 = vld [vmem:[%s14501_s6 + $0x510] sm:$0xff]  ;;  %v10879_v34 = vld [vmem:[%s14501_s6 + $0x518] sm:$0xff] }
  0x74   :  { %15281 = vst [vmem:[#allocation233_spill] sm:$0xff] %v10874_v32  ;;  %15282 = vst [vmem:[#allocation234_spill] sm:$0xff] %v10879_v34  ;;  %v10884_v37 = vld [vmem:[%s14501_s6 + $0x520] sm:$0xff]  ;;  %v10889_v33 = vld [vmem:[%s14501_s6 + $0x528] sm:$0xff] }
  0x75   :  { %15283 = vst [vmem:[#allocation235_spill] sm:$0xff] %v10884_v37  ;;  %15284 = vst [vmem:[#allocation236_spill] sm:$0xff] %v10889_v33  ;;  %v10894_v35 = vld [vmem:[%s14501_s6 + $0x530] sm:$0xff]  ;;  %v10899_v32 = vld [vmem:[%s14501_s6 + $0x538] sm:$0xff] }
  0x76   :  { %15285 = vst [vmem:[#allocation237_spill] sm:$0xff] %v10894_v35  ;;  %15286 = vst [vmem:[#allocation238_spill] sm:$0xff] %v10899_v32  ;;  %v10904_v34 = vld [vmem:[%s14501_s6 + $0x540] sm:$0xff]  ;;  %v10909_v37 = vld [vmem:[%s14501_s6 + $0x548] sm:$0xff] }
  0x77   :  { %15287 = vst [vmem:[#allocation239_spill] sm:$0xff] %v10904_v34  ;;  %15288 = vst [vmem:[#allocation240_spill] sm:$0xff] %v10909_v37  ;;  %v10914_v33 = vld [vmem:[%s14501_s6 + $0x550] sm:$0xff]  ;;  %v10919_v35 = vld [vmem:[%s14501_s6 + $0x558] sm:$0xff] }
  0x78   :  { %15289 = vst [vmem:[#allocation241_spill] sm:$0xff] %v10914_v33  ;;  %15290 = vst [vmem:[#allocation242_spill] sm:$0xff] %v10919_v35  ;;  %v10924_v32 = vld [vmem:[%s14501_s6 + $0x560] sm:$0xff]  ;;  %v10929_v34 = vld [vmem:[%s14501_s6 + $0x568] sm:$0xff] }
  0x79   :  { %15291 = vst [vmem:[#allocation243_spill] sm:$0xff] %v10924_v32  ;;  %15292 = vst [vmem:[#allocation244_spill] sm:$0xff] %v10929_v34  ;;  %v10934_v37 = vld [vmem:[%s14501_s6 + $0x570] sm:$0xff]  ;;  %v10939_v33 = vld [vmem:[%s14501_s6 + $0x578] sm:$0xff] }
  0x7a   :  { %15293 = vst [vmem:[#allocation245_spill] sm:$0xff] %v10934_v37  ;;  %15294 = vst [vmem:[#allocation246_spill] sm:$0xff] %v10939_v33  ;;  %v10944_v35 = vld [vmem:[%s14501_s6 + $0x580] sm:$0xff]  ;;  %v10949_v32 = vld [vmem:[%s14501_s6 + $0x588] sm:$0xff] }
  0x7b   :  { %15295 = vst [vmem:[#allocation247_spill] sm:$0xff] %v10944_v35  ;;  %15296 = vst [vmem:[#allocation248_spill] sm:$0xff] %v10949_v32  ;;  %v10954_v34 = vld [vmem:[%s14501_s6 + $0x590] sm:$0xff]  ;;  %v10959_v37 = vld [vmem:[%s14501_s6 + $0x598] sm:$0xff] }
  0x7c   :  { %15297 = vst [vmem:[#allocation249_spill] sm:$0xff] %v10954_v34  ;;  %15298 = vst [vmem:[#allocation250_spill] sm:$0xff] %v10959_v37  ;;  %v10964_v33 = vld [vmem:[%s14501_s6 + $0x5a0] sm:$0xff]  ;;  %v10969_v35 = vld [vmem:[%s14501_s6 + $0x5a8] sm:$0xff] }
  0x7d   :  { %15299 = vst [vmem:[#allocation251_spill] sm:$0xff] %v10964_v33  ;;  %15300 = vst [vmem:[#allocation252_spill] sm:$0xff] %v10969_v35  ;;  %v10974_v32 = vld [vmem:[%s14501_s6 + $0x5b0] sm:$0xff]  ;;  %v10979_v34 = vld [vmem:[%s14501_s6 + $0x5b8] sm:$0xff] }
  0x7e   :  { %15301 = vst [vmem:[#allocation253_spill] sm:$0xff] %v10974_v32  ;;  %15302 = vst [vmem:[#allocation254_spill] sm:$0xff] %v10979_v34  ;;  %v10984_v37 = vld [vmem:[%s14501_s6 + $0x5c0] sm:$0xff]  ;;  %v10989_v33 = vld [vmem:[%s14501_s6 + $0x5c8] sm:$0xff] }
  0x7f   :  { %15303 = vst [vmem:[#allocation255_spill] sm:$0xff] %v10984_v37  ;;  %15304 = vst [vmem:[#allocation256_spill] sm:$0xff] %v10989_v33  ;;  %v10994_v35 = vld [vmem:[%s14501_s6 + $0x5d0] sm:$0xff]  ;;  %v10999_v32 = vld [vmem:[%s14501_s6 + $0x5d8] sm:$0xff] }
  0x80   :  { %15305 = vst [vmem:[#allocation257_spill] sm:$0xff] %v10994_v35  ;;  %15306 = vst [vmem:[#allocation258_spill] sm:$0xff] %v10999_v32  ;;  %v11004_v34 = vld [vmem:[%s14501_s6 + $0x5e0] sm:$0xff]  ;;  %v11009_v37 = vld [vmem:[%s14501_s6 + $0x5e8] sm:$0xff] }
  0x81   :  { %15307 = vst [vmem:[#allocation259_spill] sm:$0xff] %v11004_v34  ;;  %15308 = vst [vmem:[#allocation260_spill] sm:$0xff] %v11009_v37  ;;  %v11014_v33 = vld [vmem:[%s14501_s6 + $0x5f0] sm:$0xff]  ;;  %v11019_v35 = vld [vmem:[%s14501_s6 + $0x5f8] sm:$0xff] }
  0x82   :  { %15309 = vst [vmem:[#allocation261_spill] sm:$0xff] %v11014_v33  ;;  %15310 = vst [vmem:[#allocation262_spill] sm:$0xff] %v11019_v35 }
  0x83   :  { %628 = vsyncadd [#allocation4 + $0x1], 24576  ;;  %v9182_v34 = vld [vmem:[%s14496_s1 + $0xe4] ss:$16 sps:$4 sm:$0xff]   ;;  %v9186_v37 = vld [vmem:[%s14496_s1 + $0xe0] ss:$16 sps:$4 sm:$0xff]  }
  0x84   :  { %v9184_v32 = vld [vmem:[%s14496_s1 + $0x2e4] ss:$16 sps:$4 sm:$0xff]   ;;  %v9187_v33 = vld [vmem:[%s14496_s1 + $0x2e0] ss:$16 sps:$4 sm:$0xff]   ;;  %2192 = vmatprep.subr.bf16.mxu0 %v9182_v34  ;;  %v1028_v41 = vld [vmem:[%s14495_s0 + $0x8] sm:$0xff]  ;;  %v15567_v15 = vmov 0 }
  0x85   :  { %v9188_v35 = vld [vmem:[%s14496_s1 + $0xc4] ss:$16 sps:$4 sm:$0xff]   ;;  %2233 = vmatprep.subr.bf16.mxu1 %v9184_v32  ;;  %2193 = vmatpush1.bf16.msra.mxu0 %v9186_v37  ;;  %v9192_v36 = vld [vmem:[%s14496_s1 + $0xc0] ss:$16 sps:$4 sm:$0xff]   ;;  %v9283_v42 = vld [vmem:[%s14496_s1 + $0xec] ss:$16 sps:$4 sm:$0xff]  }
  0x86   :  { %v9190_v39 = vld [vmem:[%s14496_s1 + $0x2c4] ss:$16 sps:$4 sm:$0xff]   ;;  %2234 = vmatpush1.bf16.msra.mxu1 %v9187_v33  ;;  %2194 = vmatprep.subr.bf16.mxu0 %v9188_v35  ;;  %v9193_v34 = vld [vmem:[%s14496_s1 + $0x2c0] ss:$16 sps:$4 sm:$0xff]   ;;  %v9374_v47 = vld [vmem:[%s14496_s1 + $0x2e8] ss:$16 sps:$4 sm:$0xff]  }
  0x87   :  { %2235 = vmatprep.subr.bf16.mxu1 %v9190_v39  ;;  %v9194_v32 = vld [vmem:[%s14496_s1 + $0xa4] ss:$16 sps:$4 sm:$0xff]   ;;  %v9198_v33 = vld [vmem:[%s14496_s1 + $0xa0] ss:$16 sps:$4 sm:$0xff]   ;;  %v9389_v44 = vld [vmem:[%s14496_s1 + $0x4a8] ss:$16 sps:$4 sm:$0xff]  }
  0x88   :  { %v9196_v37 = vld [vmem:[%s14496_s1 + $0x2a4] ss:$16 sps:$4 sm:$0xff]   ;;  %v9199_v35 = vld [vmem:[%s14496_s1 + $0x2a0] ss:$16 sps:$4 sm:$0xff]   ;;  %v15577_v14 = vmov 0 }
  0x89   :  { %2195 = vmatpush1.bf16.msra.mxu0 %v9192_v36  ;;  %v9200_v39 = vld [vmem:[%s14496_s1 + $0x84] ss:$16 sps:$4 sm:$0xff]   ;;  %v9204_v36 = vld [vmem:[%s14496_s1 + $0x80] ss:$16 sps:$4 sm:$0xff]  }
  0x8a   :  { %2236 = vmatpush1.bf16.msra.mxu1 %v9193_v34  ;;  %2196 = vmatprep.subr.bf16.mxu0 %v9194_v32  ;;  %v9202_v38 = vld [vmem:[%s14496_s1 + $0x284] ss:$16 sps:$4 sm:$0xff]   ;;  %v9205_v34 = vld [vmem:[%s14496_s1 + $0x280] ss:$16 sps:$4 sm:$0xff]  }
  0x8b   :  { %2237 = vmatprep.subr.bf16.mxu1 %v9196_v37  ;;  %v9206_v32 = vld [vmem:[%s14496_s1 + $0x64] ss:$16 sps:$4 sm:$0xff]   ;;  %v9253_v43 = vld [vmem:[%s14496_s1 + $0x380] ss:$16 sps:$4 sm:$0xff]  }
  0x8c   :  { %v9208_v37 = vld [vmem:[%s14496_s1 + $0x264] ss:$16 sps:$4 sm:$0xff]  }
  0x8d   :  { %2197 = vmatpush1.bf16.msra.mxu0 %v9198_v33  ;;  %v9210_v33 = vld [vmem:[%s14496_s1 + $0x60] ss:$16 sps:$4 sm:$0xff]   ;;  %v9254_v40 = vld [vmem:[%s14496_s1 + $0x164] ss:$16 sps:$4 sm:$0xff]  }
  0x8e   :  { %2238 = vmatpush1.bf16.msra.mxu1 %v9199_v35  ;;  %2198 = vmatprep.subr.bf16.mxu0 %v9200_v39  ;;  %v9211_v35 = vld [vmem:[%s14496_s1 + $0x260] ss:$16 sps:$4 sm:$0xff]   ;;  %v9212_v39 = vld [vmem:[%s14496_s1 + $0x44] ss:$16 sps:$4 sm:$0xff]  }
  0x8f   :  { %2239 = vmatprep.subr.bf16.mxu1 %v9202_v38  ;;  %v9214_v38 = vld [vmem:[%s14496_s1 + $0x244] ss:$16 sps:$4 sm:$0xff]  }
  0x91   :  { %2199 = vmatpush1.bf16.msra.mxu0 %v9204_v36  ;;  %v9216_v36 = vld [vmem:[%s14496_s1 + $0x40] ss:$16 sps:$4 sm:$0xff]  }
  0x92   :  { %2240 = vmatpush1.bf16.msra.mxu1 %v9205_v34  ;;  %2200 = vmatprep.subr.bf16.mxu0 %v9206_v32  ;;  %v9217_v34 = vld [vmem:[%s14496_s1 + $0x240] ss:$16 sps:$4 sm:$0xff]   ;;  %v9218_v32 = vld [vmem:[%s14496_s1 + $0x24] ss:$16 sps:$4 sm:$0xff]  }
  0x93   :  { %2241 = vmatprep.subr.bf16.mxu1 %v9208_v37  ;;  %v9220_v37 = vld [vmem:[%s14496_s1 + $0x224] ss:$16 sps:$4 sm:$0xff]  }
  0x95   :  { %2201 = vmatpush1.bf16.msra.mxu0 %v9210_v33  ;;  %v9222_v33 = vld [vmem:[%s14496_s1 + $0x20] ss:$16 sps:$4 sm:$0xff]  }
  0x96   :  { %2242 = vmatpush1.bf16.msra.mxu1 %v9211_v35  ;;  %2202 = vmatprep.subr.bf16.mxu0 %v9212_v39  ;;  %v9223_v35 = vld [vmem:[%s14496_s1 + $0x220] ss:$16 sps:$4 sm:$0xff]   ;;  %v9224_v39 = vld [vmem:[%s14496_s1 + $0x4] ss:$16 sps:$4 sm:$0xff]  }
  0x97   :  { %2243 = vmatprep.subr.bf16.mxu1 %v9214_v38  ;;  %v9226_v38 = vld [vmem:[%s14496_s1 + $0x204] ss:$16 sps:$4 sm:$0xff]  }
  0x99   :  { %2203 = vmatpush1.bf16.msra.mxu0 %v9216_v36  ;;  %v9228_v36 = vld [vmem:[%s14496_s1] ss:$16 sps:$4 sm:$0xff]  }
  0x9a   :  { %2244 = vmatpush1.bf16.msra.mxu1 %v9217_v34  ;;  %2204 = vmatprep.subr.bf16.mxu0 %v9218_v32  ;;  %v9229_v34 = vld [vmem:[%s14496_s1 + $0x200] ss:$16 sps:$4 sm:$0xff]   ;;  %v9230_v32 = vld [vmem:[%s14496_s1 + $0x1e4] ss:$16 sps:$4 sm:$0xff]  }
  0x9b   :  { %2245 = vmatprep.subr.bf16.mxu1 %v9220_v37  ;;  %v9232_v37 = vld [vmem:[%s14496_s1 + $0x3e4] ss:$16 sps:$4 sm:$0xff]  }
  0x9d   :  { %2205 = vmatpush1.bf16.msra.mxu0 %v9222_v33  ;;  %v9234_v33 = vld [vmem:[%s14496_s1 + $0x1e0] ss:$16 sps:$4 sm:$0xff]  }
  0x9e   :  { %2246 = vmatpush1.bf16.msra.mxu1 %v9223_v35  ;;  %2206 = vmatprep.subr.bf16.mxu0 %v9224_v39  ;;  %v9235_v35 = vld [vmem:[%s14496_s1 + $0x3e0] ss:$16 sps:$4 sm:$0xff]   ;;  %v9236_v39 = vld [vmem:[%s14496_s1 + $0x1c4] ss:$16 sps:$4 sm:$0xff]  }
  0x9f   :  { %2247 = vmatprep.subr.bf16.mxu1 %v9226_v38  ;;  %v9238_v38 = vld [vmem:[%s14496_s1 + $0x3c4] ss:$16 sps:$4 sm:$0xff]  }
  0xa1   :  { %2207 = vmatpush1.bf16.msra.mxu0 %v9228_v36  ;;  %v9240_v36 = vld [vmem:[%s14496_s1 + $0x1c0] ss:$16 sps:$4 sm:$0xff]  }
  0xa2   :  { %2248 = vmatpush1.bf16.msra.mxu1 %v9229_v34  ;;  %2208 = vmatprep.subr.bf16.mxu0 %v9230_v32  ;;  %v9241_v34 = vld [vmem:[%s14496_s1 + $0x3c0] ss:$16 sps:$4 sm:$0xff]   ;;  %v9242_v32 = vld [vmem:[%s14496_s1 + $0x1a4] ss:$16 sps:$4 sm:$0xff]  }
  0xa3   :  { %2249 = vmatprep.subr.bf16.mxu1 %v9232_v37  ;;  %v9244_v37 = vld [vmem:[%s14496_s1 + $0x3a4] ss:$16 sps:$4 sm:$0xff]  }
  0xa5   :  { %2209 = vmatpush2.bf16.msra.mxu0 %v9234_v33  ;;  %v9246_v33 = vld [vmem:[%s14496_s1 + $0x1a0] ss:$16 sps:$4 sm:$0xff]  }
  0xa6   :  { %2250 = vmatpush2.bf16.msra.mxu1 %v9235_v35  ;;  %2210 = vmatprep.subr.bf16.mxu0 %v9236_v39  ;;  %v9247_v35 = vld [vmem:[%s14496_s1 + $0x3a0] ss:$16 sps:$4 sm:$0xff]   ;;  %v9248_v39 = vld [vmem:[%s14496_s1 + $0x184] ss:$16 sps:$4 sm:$0xff]  }
  0xa7   :  { %2251 = vmatprep.subr.bf16.mxu1 %v9238_v38  ;;  %v9250_v38 = vld [vmem:[%s14496_s1 + $0x384] ss:$16 sps:$4 sm:$0xff]  }
  0xa9   :  { %2211 = vmatpush2.bf16.msra.mxu0 %v9240_v36  ;;  %v1030_v36 = vld [vmem:[%s14495_s0 + $0x18] sm:$0xff] }
  0xaa   :  { %2252 = vmatpush2.bf16.msra.mxu1 %v9241_v34  ;;  %2212 = vmatprep.subr.bf16.mxu0 %v9242_v32  ;;  %v9252_v34 = vld [vmem:[%s14496_s1 + $0x180] ss:$16 sps:$4 sm:$0xff]   ;;  %v11168_v32 = vpack.c.bf16 %v1028_v41, %v1028_v41 }
  0xab   :  { %2253 = vmatprep.subr.bf16.mxu1 %v9244_v37  ;;  %v11170_v37 = vpack.c.bf16 %v1030_v36, %v1030_v36  ;;  %v9258_v41 = vld [vmem:[%s14496_s1 + $0x160] ss:$16 sps:$4 sm:$0xff]  }
  0xac   :  { %2224 = vmatprep.mubr.bf16.mxu0 %v11168_v32  ;;  %v9264_v36 = vld [vmem:[%s14496_s1 + $0x140] ss:$16 sps:$4 sm:$0xff]  }
  0xad   :  { %2213 = vmatpush2.bf16.msra.mxu0 %v9246_v33  ;;  %v9256_v33 = vld [vmem:[%s14496_s1 + $0x364] ss:$16 sps:$4 sm:$0xff]   ;;  %2265 = vmatprep.mubr.bf16.mxu1 %v11170_v37 }
  0xae   :  { %2254 = vmatpush2.bf16.msra.mxu1 %v9247_v35  ;;  %2214 = vmatprep.subr.bf16.mxu0 %v9248_v39  ;;  %v9259_v35 = vld [vmem:[%s14496_s1 + $0x360] ss:$16 sps:$4 sm:$0xff]   ;;  %v9260_v39 = vld [vmem:[%s14496_s1 + $0x144] ss:$16 sps:$4 sm:$0xff]  }
  0xaf   :  { %2255 = vmatprep.subr.bf16.mxu1 %v9250_v38  ;;  %v9262_v38 = vld [vmem:[%s14496_s1 + $0x344] ss:$16 sps:$4 sm:$0xff]  }
  0xb1   :  { %2215 = vmatpush2.bf16.msra.mxu0 %v9252_v34  ;;  %v9268_v34 = vld [vmem:[%s14496_s1 + $0x324] ss:$16 sps:$4 sm:$0xff]  }
  0xb2   :  { %2256 = vmatpush2.bf16.msra.mxu1 %v9253_v43  ;;  %2216 = vmatprep.subr.bf16.mxu0 %v9254_v40  ;;  %v9265_v40 = vld [vmem:[%s14496_s1 + $0x340] ss:$16 sps:$4 sm:$0xff]   ;;  %v9266_v43 = vld [vmem:[%s14496_s1 + $0x124] ss:$16 sps:$4 sm:$0xff]  }
  0xb3   :  { %2257 = vmatprep.subr.bf16.mxu1 %v9256_v33  ;;  %v9270_v33 = vld [vmem:[%s14496_s1 + $0x120] ss:$16 sps:$4 sm:$0xff]  }
  0xb5   :  { %2217 = vmatpush2.bf16.msra.mxu0 %v9258_v41  ;;  %v9271_v41 = vld [vmem:[%s14496_s1 + $0x320] ss:$16 sps:$4 sm:$0xff]  }
  0xb6   :  { %2258 = vmatpush2.bf16.msra.mxu1 %v9259_v35  ;;  %2218 = vmatprep.subr.bf16.mxu0 %v9260_v39  ;;  %v9272_v35 = vld [vmem:[%s14496_s1 + $0x104] ss:$16 sps:$4 sm:$0xff]  }
  0xb7   :  { %2259 = vmatprep.subr.bf16.mxu1 %v9262_v38  ;;  %v9274_v39 = vld [vmem:[%s14496_s1 + $0x304] ss:$16 sps:$4 sm:$0xff]   ;;  %v9276_v38 = vld [vmem:[%s14496_s1 + $0x100] ss:$16 sps:$4 sm:$0xff]  }
  0xb9   :  { %2219 = vmatpush2.bf16.msra.mxu0 %v9264_v36  ;;  %v9277_v36 = vld [vmem:[%s14496_s1 + $0x300] ss:$16 sps:$4 sm:$0xff]  }
  0xba   :  { %2260 = vmatpush2.bf16.msra.mxu1 %v9265_v40  ;;  %2220 = vmatprep.subr.bf16.mxu0 %v9266_v43  ;;  %v1027_v40 = vld [vmem:[%s14495_s0] sm:$0xff]  ;;  %v1029_v43 = vld [vmem:[%s14495_s0 + $0x10] sm:$0xff] }
  0xbb   :  { %2261 = vmatprep.subr.bf16.mxu1 %v9268_v34  ;;  %v9280_v34 = vld [vmem:[%s14496_s1 + $0x4e4] ss:$16 sps:$4 sm:$0xff]   ;;  %v11239_v45 = vpack.c.bf16 %v1029_v43, %v1029_v43  ;;  %v9295_v43 = vld [vmem:[%s14496_s1 + $0xac] ss:$16 sps:$4 sm:$0xff]  }
  0xbd   :  { %2221 = vmatpush2.bf16.msra.mxu0 %v9270_v33  ;;  %v11237_v33 = vpack.c.bf16 %v1027_v40, %v1027_v40  ;;  %v9287_v40 = vld [vmem:[%s14496_s1 + $0xc8] ss:$16 sps:$4 sm:$0xff]  }
  0xbe   :  { %2262 = vmatpush2.bf16.msra.mxu1 %v9271_v41  ;;  %2222 = vmatprep.subr.bf16.mxu0 %v9272_v35  ;;  %v9278_v41 = vld [vmem:[%s14496_s1 + $0x4e0] ss:$16 sps:$4 sm:$0xff]   ;;  %v9281_v35 = vld [vmem:[%s14496_s1 + $0xe8] ss:$16 sps:$4 sm:$0xff]  }
  0xbf   :  { %2263 = vmatprep.subr.bf16.mxu1 %v9274_v39  ;;  %v9286_v39 = vld [vmem:[%s14496_s1 + $0x4c4] ss:$16 sps:$4 sm:$0xff]  }
  0xc1   :  { %2223 = vmatpush2.bf16.msra.mxu0 %v9276_v38  ;;  %v9289_v38 = vld [vmem:[%s14496_s1 + $0xcc] ss:$16 sps:$4 sm:$0xff]  }
  0xc2   :  { %2264 = vmatpush2.bf16.msra.mxu1 %v9277_v36  ;;  %2274 = vmatprep.subr.bf16.mxu0 %v9280_v34  ;;  %v9284_v36 = vld [vmem:[%s14496_s1 + $0x4c0] ss:$16 sps:$4 sm:$0xff]  }
  0xc3   :  { %2315 = vmatprep.subr.bf16.mxu1 %v9283_v42  ;;  %v9292_v42 = vld [vmem:[%s14496_s1 + $0x4a4] ss:$16 sps:$4 sm:$0xff]   ;;  %v9290_v34 = vld [vmem:[%s14496_s1 + $0x4a0] ss:$16 sps:$4 sm:$0xff]  }
  0xc4   :  { %2225 = vmatmul.mubr.bf16.vlgmr.msra.gmra.mxu0 %v11237_v33 }
  0xc5   :  { %2266 = vmatmul.mubr.bf16.vlgmr.msra.gmra.mxu1 %v11239_v45  ;;  %2275 = vmatpush1.bf16.msra.mxu0 %v9278_v41  ;;  %v9293_v41 = vld [vmem:[%s14496_s1 + $0xa8] ss:$16 sps:$4 sm:$0xff]  }
  0xc6   :  { %2316 = vmatpush1.bf16.msra.mxu1 %v9281_v35  ;;  %2276 = vmatprep.subr.bf16.mxu0 %v9286_v39  ;;  %v9298_v35 = vld [vmem:[%s14496_s1 + $0x484] ss:$16 sps:$4 sm:$0xff]   ;;  %v9296_v39 = vld [vmem:[%s14496_s1 + $0x480] ss:$16 sps:$4 sm:$0xff]  }
  0xc7   :  { %2317 = vmatprep.subr.bf16.mxu1 %v9289_v38  ;;  %2347 = vmatprep.mubr.bf16.mxu1 %v11168_v32  ;;  %v9301_v32 = vld [vmem:[%s14496_s1 + $0x8c] ss:$16 sps:$4 sm:$0xff]   ;;  %v9299_v38 = vld [vmem:[%s14496_s1 + $0x88] ss:$16 sps:$4 sm:$0xff]  }
  0xc9   :  { %2277 = vmatpush1.bf16.msra.mxu0 %v9284_v36  ;;  %v9304_v36 = vld [vmem:[%s14496_s1 + $0x464] ss:$16 sps:$4 sm:$0xff]  }
  0xca   :  { %2318 = vmatpush1.bf16.msra.mxu1 %v9287_v40  ;;  %2278 = vmatprep.subr.bf16.mxu0 %v9292_v42  ;;  %v9307_v40 = vld [vmem:[%s14496_s1 + $0x6c] ss:$16 sps:$4 sm:$0xff]   ;;  %v9302_v42 = vld [vmem:[%s14496_s1 + $0x460] ss:$16 sps:$4 sm:$0xff]  }
  0xcb   :  { %2319 = vmatprep.subr.bf16.mxu1 %v9295_v43  ;;  %v9305_v43 = vld [vmem:[%s14496_s1 + $0x68] ss:$16 sps:$4 sm:$0xff]  }
  0xcd   :  { %2279 = vmatpush1.bf16.msra.mxu0 %v9290_v34  ;;  %v9310_v34 = vld [vmem:[%s14496_s1 + $0x444] ss:$16 sps:$4 sm:$0xff]  }
  0xce   :  { %2320 = vmatpush1.bf16.msra.mxu1 %v9293_v41  ;;  %2280 = vmatprep.subr.bf16.mxu0 %v9298_v35  ;;  %v9313_v41 = vld [vmem:[%s14496_s1 + $0x4c] ss:$16 sps:$4 sm:$0xff]   ;;  %v9308_v35 = vld [vmem:[%s14496_s1 + $0x440] ss:$16 sps:$4 sm:$0xff]  }
  0xcf   :  { %2321 = vmatprep.subr.bf16.mxu1 %v9301_v32  ;;  %v9311_v32 = vld [vmem:[%s14496_s1 + $0x48] ss:$16 sps:$4 sm:$0xff]  }
  0xd1   :  { %2281 = vmatpush1.bf16.msra.mxu0 %v9296_v39  ;;  %v9316_v39 = vld [vmem:[%s14496_s1 + $0x424] ss:$16 sps:$4 sm:$0xff]  }
  0xd2   :  { %2322 = vmatpush1.bf16.msra.mxu1 %v9299_v38  ;;  %2282 = vmatprep.subr.bf16.mxu0 %v9304_v36  ;;  %v9319_v38 = vld [vmem:[%s14496_s1 + $0x2c] ss:$16 sps:$4 sm:$0xff]  }
  0xd3   :  { %2323 = vmatprep.subr.bf16.mxu1 %v9307_v40  ;;  %v1032_v36 = vld [vmem:[%s14495_s0 + $0x28] sm:$0xff]  ;;  %v9314_v40 = vld [vmem:[%s14496_s1 + $0x420] ss:$16 sps:$4 sm:$0xff]  }
  0xd5   :  { %2283 = vmatpush1.bf16.msra.mxu0 %v9302_v42  ;;  %v9317_v42 = vld [vmem:[%s14496_s1 + $0x28] ss:$16 sps:$4 sm:$0xff]  }
  0xd6   :  { %2324 = vmatpush1.bf16.msra.mxu1 %v9305_v43  ;;  %2284 = vmatprep.subr.bf16.mxu0 %v9310_v34  ;;  %v11325_v43 = vpack.c.bf16 %v1032_v36, %v1032_v36  ;;  %v9322_v34 = vld [vmem:[%s14496_s1 + $0x404] ss:$16 sps:$4 sm:$0xff]   ;;  %v9326_v36 = vld [vmem:[%s14496_s1 + $0x5e0] ss:$16 sps:$4 sm:$0xff]  }
  0xd7   :  { %2325 = vmatprep.subr.bf16.mxu1 %v9313_v41  ;;  %v9325_v41 = vld [vmem:[%s14496_s1 + $0xc] ss:$16 sps:$4 sm:$0xff]  }
  0xd8   :  { %2306 = vmatprep.mubr.bf16.mxu0 %v11325_v43 }
  0xd9   :  { %2285 = vmatpush1.bf16.msra.mxu0 %v9308_v35  ;;  %v9320_v35 = vld [vmem:[%s14496_s1 + $0x400] ss:$16 sps:$4 sm:$0xff]  }
  0xda   :  { %2326 = vmatpush1.bf16.msra.mxu1 %v9311_v32  ;;  %2286 = vmatprep.subr.bf16.mxu0 %v9316_v39  ;;  %v9323_v32 = vld [vmem:[%s14496_s1 + $0x8] ss:$16 sps:$4 sm:$0xff]   ;;  %v9328_v39 = vld [vmem:[%s14496_s1 + $0x5e4] ss:$16 sps:$4 sm:$0xff]  }
  0xdb   :  { %2327 = vmatprep.subr.bf16.mxu1 %v9319_v38  ;;  %v9331_v38 = vld [vmem:[%s14496_s1 + $0x1ec] ss:$16 sps:$4 sm:$0xff]  }
  0xdd   :  { %2287 = vmatpush1.bf16.msra.mxu0 %v9314_v40  ;;  %v9329_v40 = vld [vmem:[%s14496_s1 + $0x1e8] ss:$16 sps:$4 sm:$0xff]  }
  0xde   :  { %2328 = vmatpush1.bf16.msra.mxu1 %v9317_v42  ;;  %2288 = vmatprep.subr.bf16.mxu0 %v9322_v34  ;;  %v9334_v42 = vld [vmem:[%s14496_s1 + $0x5c4] ss:$16 sps:$4 sm:$0xff]   ;;  %v9337_v34 = vld [vmem:[%s14496_s1 + $0x1cc] ss:$16 sps:$4 sm:$0xff]  }
  0xdf   :  { %2329 = vmatprep.subr.bf16.mxu1 %v9325_v41  ;;  %v9332_v41 = vld [vmem:[%s14496_s1 + $0x5c0] ss:$16 sps:$4 sm:$0xff]  }
  0xe1   :  { %2289 = vmatpush1.bf16.msra.mxu0 %v9320_v35  ;;  %v9335_v35 = vld [vmem:[%s14496_s1 + $0x1c8] ss:$16 sps:$4 sm:$0xff]  }
  0xe2   :  { %2330 = vmatpush1.bf16.msra.mxu1 %v9323_v32  ;;  %2290 = vmatprep.subr.bf16.mxu0 %v9328_v39  ;;  %v9340_v32 = vld [vmem:[%s14496_s1 + $0x5a4] ss:$16 sps:$4 sm:$0xff]   ;;  %v9343_v39 = vld [vmem:[%s14496_s1 + $0x1ac] ss:$16 sps:$4 sm:$0xff]  }
  0xe3   :  { %2331 = vmatprep.subr.bf16.mxu1 %v9331_v38  ;;  %v9338_v38 = vld [vmem:[%s14496_s1 + $0x5a0] ss:$16 sps:$4 sm:$0xff]  }
  0xe5   :  { %2291 = vmatpush2.bf16.msra.mxu0 %v9326_v36  ;;  %v9341_v36 = vld [vmem:[%s14496_s1 + $0x1a8] ss:$16 sps:$4 sm:$0xff]  }
  0xe6   :  { %2332 = vmatpush2.bf16.msra.mxu1 %v9329_v40  ;;  %2292 = vmatprep.subr.bf16.mxu0 %v9334_v42  ;;  %v9346_v40 = vld [vmem:[%s14496_s1 + $0x584] ss:$16 sps:$4 sm:$0xff]   ;;  %v9349_v42 = vld [vmem:[%s14496_s1 + $0x18c] ss:$16 sps:$4 sm:$0xff]  }
  0xe7   :  { %2333 = vmatprep.subr.bf16.mxu1 %v9337_v34  ;;  %v9344_v34 = vld [vmem:[%s14496_s1 + $0x580] ss:$16 sps:$4 sm:$0xff]  }
  0xe9   :  { %2293 = vmatpush2.bf16.msra.mxu0 %v9332_v41  ;;  %v9347_v41 = vld [vmem:[%s14496_s1 + $0x188] ss:$16 sps:$4 sm:$0xff]  }
  0xea   :  { %2334 = vmatpush2.bf16.msra.mxu1 %v9335_v35  ;;  %2294 = vmatprep.subr.bf16.mxu0 %v9340_v32  ;;  %v9352_v35 = vld [vmem:[%s14496_s1 + $0x564] ss:$16 sps:$4 sm:$0xff]   ;;  %v9355_v32 = vld [vmem:[%s14496_s1 + $0x16c] ss:$16 sps:$4 sm:$0xff]  }
  0xeb   :  { %2335 = vmatprep.subr.bf16.mxu1 %v9343_v39  ;;  %v9350_v39 = vld [vmem:[%s14496_s1 + $0x560] ss:$16 sps:$4 sm:$0xff]  }
  0xed   :  { %2295 = vmatpush2.bf16.msra.mxu0 %v9338_v38  ;;  %v9353_v38 = vld [vmem:[%s14496_s1 + $0x168] ss:$16 sps:$4 sm:$0xff]  }
  0xee   :  { %2336 = vmatpush2.bf16.msra.mxu1 %v9341_v36  ;;  %2296 = vmatprep.subr.bf16.mxu0 %v9346_v40  ;;  %v9358_v36 = vld [vmem:[%s14496_s1 + $0x544] ss:$16 sps:$4 sm:$0xff]   ;;  %v9361_v40 = vld [vmem:[%s14496_s1 + $0x14c] ss:$16 sps:$4 sm:$0xff]  }
  0xef   :  { %2337 = vmatprep.subr.bf16.mxu1 %v9349_v42  ;;  %v9356_v42 = vld [vmem:[%s14496_s1 + $0x540] ss:$16 sps:$4 sm:$0xff]  }
  0xf1   :  { %2297 = vmatpush2.bf16.msra.mxu0 %v9344_v34  ;;  %v9359_v34 = vld [vmem:[%s14496_s1 + $0x148] ss:$16 sps:$4 sm:$0xff]  }
  0xf2   :  { %2338 = vmatpush2.bf16.msra.mxu1 %v9347_v41  ;;  %2298 = vmatprep.subr.bf16.mxu0 %v9352_v35  ;;  %v9364_v41 = vld [vmem:[%s14496_s1 + $0x524] ss:$16 sps:$4 sm:$0xff]   ;;  %v9367_v35 = vld [vmem:[%s14496_s1 + $0x12c] ss:$16 sps:$4 sm:$0xff]  }
  0xf3   :  { %2339 = vmatprep.subr.bf16.mxu1 %v9355_v32  ;;  %v9362_v32 = vld [vmem:[%s14496_s1 + $0x520] ss:$16 sps:$4 sm:$0xff]  }
  0xf5   :  { %2299 = vmatpush2.bf16.msra.mxu0 %v9350_v39  ;;  %v9365_v39 = vld [vmem:[%s14496_s1 + $0x128] ss:$16 sps:$4 sm:$0xff]  }
  0xf6   :  { %2340 = vmatpush2.bf16.msra.mxu1 %v9353_v38  ;;  %2300 = vmatprep.subr.bf16.mxu0 %v9358_v36  ;;  %v9370_v38 = vld [vmem:[%s14496_s1 + $0x504] ss:$16 sps:$4 sm:$0xff]   ;;  %v9373_v36 = vld [vmem:[%s14496_s1 + $0x10c] ss:$16 sps:$4 sm:$0xff]  }
  0xf7   :  { %2341 = vmatprep.subr.bf16.mxu1 %v9361_v40  ;;  %v9368_v40 = vld [vmem:[%s14496_s1 + $0x500] ss:$16 sps:$4 sm:$0xff]  }
  0xf9   :  { %2301 = vmatpush2.bf16.msra.mxu0 %v9356_v42  ;;  %v9371_v42 = vld [vmem:[%s14496_s1 + $0x108] ss:$16 sps:$4 sm:$0xff]  }
  0xfa   :  { %2342 = vmatpush2.bf16.msra.mxu1 %v9359_v34  ;;  %2302 = vmatprep.subr.bf16.mxu0 %v9364_v41  ;;  %v1031_v34 = vld [vmem:[%s14495_s0 + $0x20] sm:$0xff]  ;;  %v9376_v41 = vld [vmem:[%s14496_s1 + $0x2ec] ss:$16 sps:$4 sm:$0xff]  }
  0xfb   :  { %2343 = vmatprep.subr.bf16.mxu1 %v9367_v35  ;;  %v9379_v35 = vld [vmem:[%s14496_s1 + $0x4ec] ss:$16 sps:$4 sm:$0xff]  }
  0xfd   :  { %2303 = vmatpush2.bf16.msra.mxu0 %v9362_v32  ;;  %v11445_v32 = vpack.c.bf16 %v1031_v34, %v1031_v34  ;;  %v9388_v34 = vld [vmem:[%s14496_s1 + $0x2ac] ss:$16 sps:$4 sm:$0xff]  }
  0xfe   :  { %2344 = vmatpush2.bf16.msra.mxu1 %v9365_v39  ;;  %2304 = vmatprep.subr.bf16.mxu0 %v9370_v38  ;;  %v9377_v39 = vld [vmem:[%s14496_s1 + $0x4e8] ss:$16 sps:$4 sm:$0xff]   ;;  %v9382_v38 = vld [vmem:[%s14496_s1 + $0x2cc] ss:$16 sps:$4 sm:$0xff]  }
  0xff   :  { %2345 = vmatprep.subr.bf16.mxu1 %v9373_v36  ;;  %v9380_v36 = vld [vmem:[%s14496_s1 + $0x2c8] ss:$16 sps:$4 sm:$0xff]  }
 0x101   :  { %2305 = vmatpush2.bf16.msra.mxu0 %v9368_v40  ;;  %v9385_v40 = vld [vmem:[%s14496_s1 + $0x4cc] ss:$16 sps:$4 sm:$0xff]  }
 0x102   :  { %2346 = vmatpush2.bf16.msra.mxu1 %v9371_v42  ;;  %2356 = vmatprep.subr.bf16.mxu0 %v9376_v41  ;;  %v9383_v42 = vld [vmem:[%s14496_s1 + $0x4c8] ss:$16 sps:$4 sm:$0xff]   ;;  %v9391_v41 = vld [vmem:[%s14496_s1 + $0x4ac] ss:$16 sps:$4 sm:$0xff]  }
 0x103   :  { %2397 = vmatprep.subr.bf16.mxu1 %v9379_v35  ;;  %v9386_v35 = vld [vmem:[%s14496_s1 + $0x2a8] ss:$16 sps:$4 sm:$0xff]  }
 0x104   :  { %2307 = vmatmul.mubr.bf16.vlgmr.msra.gmra.mxu0 %v11445_v32 }
 0x105   :  { %2348 = vmatmul.mubr.bf16.vlgmr.msra.gmra.mxu1 %v11237_v33  ;;  %2357 = vmatpush1.bf16.msra.mxu0 %v9374_v47  ;;  %v9394_v47 = vld [vmem:[%s14496_s1 + $0x28c] ss:$16 sps:$4 sm:$0xff]  }
 0x106   :  { %2398 = vmatpush1.bf16.msra.mxu1 %v9377_v39  ;;  %2358 = vmatprep.subr.bf16.mxu0 %v9382_v38  ;;  %v9397_v33 = vld [vmem:[%s14496_s1 + $0x48c] ss:$16 sps:$4 sm:$0xff]   ;;  %v9395_v39 = vld [vmem:[%s14496_s1 + $0x488] ss:$16 sps:$4 sm:$0xff]  }
 0x107   :  { %2399 = vmatprep.subr.bf16.mxu1 %v9385_v40  ;;  %2388 = vmatprep.mubr.bf16.mxu0 %v11170_v37  ;;  %v9392_v37 = vld [vmem:[%s14496_s1 + $0x288] ss:$16 sps:$4 sm:$0xff]   ;;  %v9403_v38 = vld [vmem:[%s14496_s1 + $0x46c] ss:$16 sps:$4 sm:$0xff]  }
 0x108   :  { %2429 = vmatprep.mubr.bf16.mxu1 %v11325_v43  ;;  %v9400_v43 = vld [vmem:[%s14496_s1 + $0x26c] ss:$16 sps:$4 sm:$0xff]  }
 0x109   :  { %2359 = vmatpush1.bf16.msra.mxu0 %v9380_v36  ;;  %v9398_v36 = vld [vmem:[%s14496_s1 + $0x268] ss:$16 sps:$4 sm:$0xff]   ;;  %v9406_v40 = vld [vmem:[%s14496_s1 + $0x24c] ss:$16 sps:$4 sm:$0xff]  }
 0x10a   :  { %2400 = vmatpush1.bf16.msra.mxu1 %v9383_v42  ;;  %2360 = vmatprep.subr.bf16.mxu0 %v9388_v34  ;;  %v9409_v42 = vld [vmem:[%s14496_s1 + $0x44c] ss:$16 sps:$4 sm:$0xff]   ;;  %v9404_v34 = vld [vmem:[%s14496_s1 + $0x248] ss:$16 sps:$4 sm:$0xff]  }
 0x10b   :  { %2401 = vmatprep.subr.bf16.mxu1 %v9391_v41  ;;  %v9407_v41 = vld [vmem:[%s14496_s1 + $0x448] ss:$16 sps:$4 sm:$0xff]  }
 0x10d   :  { %2361 = vmatpush1.bf16.msra.mxu0 %v9386_v35  ;;  %v9412_v35 = vld [vmem:[%s14496_s1 + $0x22c] ss:$16 sps:$4 sm:$0xff]  }
 0x10e   :  { %2402 = vmatpush1.bf16.msra.mxu1 %v9389_v44  ;;  %2362 = vmatprep.subr.bf16.mxu0 %v9394_v47  ;;  %v9401_v44 = vld [vmem:[%s14496_s1 + $0x468] ss:$16 sps:$4 sm:$0xff]   ;;  %v9415_v47 = vld [vmem:[%s14496_s1 + $0x42c] ss:$16 sps:$4 sm:$0xff]  }
 0x10f   :  { %2403 = vmatprep.subr.bf16.mxu1 %v9397_v33  ;;  %v9410_v33 = vld [vmem:[%s14496_s1 + $0x228] ss:$16 sps:$4 sm:$0xff]  }
 0x111   :  { %2363 = vmatpush1.bf16.msra.mxu0 %v9392_v37  ;;  %v9413_v37 = vld [vmem:[%s14496_s1 + $0x428] ss:$16 sps:$4 sm:$0xff]  }
 0x112   :  { %2404 = vmatpush1.bf16.msra.mxu1 %v9395_v39  ;;  %2364 = vmatprep.subr.bf16.mxu0 %v9400_v43  ;;  %v9418_v39 = vld [vmem:[%s14496_s1 + $0x20c] ss:$16 sps:$4 sm:$0xff]  }
 0x113   :  { %2405 = vmatprep.subr.bf16.mxu1 %v9403_v38  ;;  %v9421_v43 = vld [vmem:[%s14496_s1 + $0x40c] ss:$16 sps:$4 sm:$0xff]   ;;  %v9416_v38 = vld [vmem:[%s14496_s1 + $0x208] ss:$16 sps:$4 sm:$0xff]  }
 0x115   :  { %2365 = vmatpush1.bf16.msra.mxu0 %v9398_v36  ;;  %v9419_v36 = vld [vmem:[%s14496_s1 + $0x408] ss:$16 sps:$4 sm:$0xff]  }
 0x116   :  { %2406 = vmatpush1.bf16.msra.mxu1 %v9401_v44  ;;  %2366 = vmatprep.subr.bf16.mxu0 %v9406_v40  ;;  %v9424_v44 = vld [vmem:[%s14496_s1 + $0x3ec] ss:$16 sps:$4 sm:$0xff]  }
 0x117   :  { %2407 = vmatprep.subr.bf16.mxu1 %v9409_v42  ;;  %v9427_v40 = vld [vmem:[%s14496_s1 + $0x5ec] ss:$16 sps:$4 sm:$0xff]   ;;  %v9422_v42 = vld [vmem:[%s14496_s1 + $0x3e8] ss:$16 sps:$4 sm:$0xff]  }
 0x119   :  { %2367 = vmatpush1.bf16.msra.mxu0 %v9404_v34  ;;  %v9425_v34 = vld [vmem:[%s14496_s1 + $0x5e8] ss:$16 sps:$4 sm:$0xff]  }
 0x11a   :  { %2408 = vmatpush1.bf16.msra.mxu1 %v9407_v41  ;;  %2368 = vmatprep.subr.bf16.mxu0 %v9412_v35  ;;  %v9430_v41 = vld [vmem:[%s14496_s1 + $0x3cc] ss:$16 sps:$4 sm:$0xff]  }
 0x11b   :  { %2409 = vmatprep.subr.bf16.mxu1 %v9415_v47  ;;  %v9433_v35 = vld [vmem:[%s14496_s1 + $0x5cc] ss:$16 sps:$4 sm:$0xff]   ;;  %v9428_v47 = vld [vmem:[%s14496_s1 + $0x3c8] ss:$16 sps:$4 sm:$0xff]  }
 0x11d   :  { %2369 = vmatpush1.bf16.msra.mxu0 %v9410_v33  ;;  %v9431_v33 = vld [vmem:[%s14496_s1 + $0x5c8] ss:$16 sps:$4 sm:$0xff]  }
 0x11e   :  { %2410 = vmatpush1.bf16.msra.mxu1 %v9413_v37  ;;  %2370 = vmatprep.subr.bf16.mxu0 %v9418_v39  ;;  %v9436_v37 = vld [vmem:[%s14496_s1 + $0x3ac] ss:$16 sps:$4 sm:$0xff]  }
 0x11f   :  { %2411 = vmatprep.subr.bf16.mxu1 %v9421_v43  ;;  %v9439_v39 = vld [vmem:[%s14496_s1 + $0x5ac] ss:$16 sps:$4 sm:$0xff]   ;;  %v9434_v43 = vld [vmem:[%s14496_s1 + $0x3a8] ss:$16 sps:$4 sm:$0xff]  }
 0x121   :  { %2371 = vmatpush1.bf16.msra.mxu0 %v9416_v38  ;;  %v9437_v38 = vld [vmem:[%s14496_s1 + $0x5a8] ss:$16 sps:$4 sm:$0xff]  }
 0x122   :  { %2412 = vmatpush1.bf16.msra.mxu1 %v9419_v36  ;;  %2372 = vmatprep.subr.bf16.mxu0 %v9424_v44  ;;  %v9442_v36 = vld [vmem:[%s14496_s1 + $0x38c] ss:$16 sps:$4 sm:$0xff]  }
 0x123   :  { %2413 = vmatprep.subr.bf16.mxu1 %v9427_v40  ;;  %v9445_v44 = vld [vmem:[%s14496_s1 + $0x58c] ss:$16 sps:$4 sm:$0xff]   ;;  %v9440_v40 = vld [vmem:[%s14496_s1 + $0x388] ss:$16 sps:$4 sm:$0xff]  }
 0x125   :  { %2373 = vmatpush2.bf16.msra.mxu0 %v9422_v42  ;;  %v9443_v42 = vld [vmem:[%s14496_s1 + $0x588] ss:$16 sps:$4 sm:$0xff]  }
 0x126   :  { %2414 = vmatpush2.bf16.msra.mxu1 %v9425_v34  ;;  %2374 = vmatprep.subr.bf16.mxu0 %v9430_v41  ;;  %v9448_v34 = vld [vmem:[%s14496_s1 + $0x36c] ss:$16 sps:$4 sm:$0xff]  }
 0x127   :  { %2415 = vmatprep.subr.bf16.mxu1 %v9433_v35  ;;  %v9451_v41 = vld [vmem:[%s14496_s1 + $0x56c] ss:$16 sps:$4 sm:$0xff]   ;;  %v9446_v35 = vld [vmem:[%s14496_s1 + $0x368] ss:$16 sps:$4 sm:$0xff]  }
 0x129   :  { %2375 = vmatpush2.bf16.msra.mxu0 %v9428_v47  ;;  %v9449_v47 = vld [vmem:[%s14496_s1 + $0x568] ss:$16 sps:$4 sm:$0xff]  }
 0x12a   :  { %2416 = vmatpush2.bf16.msra.mxu1 %v9431_v33  ;;  %2376 = vmatprep.subr.bf16.mxu0 %v9436_v37  ;;  %v9454_v33 = vld [vmem:[%s14496_s1 + $0x34c] ss:$16 sps:$4 sm:$0xff]  }
 0x12b   :  { %2417 = vmatprep.subr.bf16.mxu1 %v9439_v39  ;;  %v9457_v37 = vld [vmem:[%s14496_s1 + $0x54c] ss:$16 sps:$4 sm:$0xff]   ;;  %v9452_v39 = vld [vmem:[%s14496_s1 + $0x348] ss:$16 sps:$4 sm:$0xff]  }
 0x12d   :  { %2377 = vmatpush2.bf16.msra.mxu0 %v9434_v43  ;;  %v9455_v43 = vld [vmem:[%s14496_s1 + $0x548] ss:$16 sps:$4 sm:$0xff]  }
 0x12e   :  { %2418 = vmatpush2.bf16.msra.mxu1 %v9437_v38  ;;  %2378 = vmatprep.subr.bf16.mxu0 %v9442_v36  ;;  %v9460_v38 = vld [vmem:[%s14496_s1 + $0x32c] ss:$16 sps:$4 sm:$0xff]  }
 0x12f   :  { %2419 = vmatprep.subr.bf16.mxu1 %v9445_v44  ;;  %v9463_v36 = vld [vmem:[%s14496_s1 + $0x52c] ss:$16 sps:$4 sm:$0xff]   ;;  %v9458_v44 = vld [vmem:[%s14496_s1 + $0x328] ss:$16 sps:$4 sm:$0xff]  }
 0x131   :  { %2379 = vmatpush2.bf16.msra.mxu0 %v9440_v40  ;;  %v9461_v40 = vld [vmem:[%s14496_s1 + $0x528] ss:$16 sps:$4 sm:$0xff]  }
 0x132   :  { %2420 = vmatpush2.bf16.msra.mxu1 %v9443_v42  ;;  %2380 = vmatprep.subr.bf16.mxu0 %v9448_v34  ;;  %v9466_v42 = vld [vmem:[%s14496_s1 + $0x30c] ss:$16 sps:$4 sm:$0xff]  }
 0x133   :  { %2421 = vmatprep.subr.bf16.mxu1 %v9451_v41  ;;  %v9469_v34 = vld [vmem:[%s14496_s1 + $0x50c] ss:$16 sps:$4 sm:$0xff]   ;;  %v9464_v41 = vld [vmem:[%s14496_s1 + $0x308] ss:$16 sps:$4 sm:$0xff]  }
 0x135   :  { %2381 = vmatpush2.bf16.msra.mxu0 %v9446_v35  ;;  %v9467_v35 = vld [vmem:[%s14496_s1 + $0x508] ss:$16 sps:$4 sm:$0xff]  }
 0x136   :  { %2422 = vmatpush2.bf16.msra.mxu1 %v9449_v47  ;;  %2382 = vmatprep.subr.bf16.mxu0 %v9454_v33  ;;  %v9472_v47 = vld [vmem:[%s14497_s2 + $0x74] ss:$8 sps:$4 sm:$0xff]   ;;  %v9470_v33 = vld [vmem:[%s14497_s2 + $0x70] ss:$8 sps:$4 sm:$0xff]  }
 0x137   :  { %2423 = vmatprep.subr.bf16.mxu1 %v9457_v37  ;;  %v9475_v37 = vld [vmem:[%s14497_s2 + $0x64] ss:$8 sps:$4 sm:$0xff]  }
 0x139   :  { %2383 = vmatpush2.bf16.msra.mxu0 %v9452_v39  ;;  %v9473_v39 = vld [vmem:[%s14497_s2 + $0x60] ss:$8 sps:$4 sm:$0xff]  }
 0x13a   :  { %2424 = vmatpush2.bf16.msra.mxu1 %v9455_v43  ;;  %2384 = vmatprep.subr.bf16.mxu0 %v9460_v38  ;;  %v9478_v43 = vld [vmem:[%s14497_s2 + $0x54] ss:$8 sps:$4 sm:$0xff]   ;;  %v9476_v38 = vld [vmem:[%s14497_s2 + $0x50] ss:$8 sps:$4 sm:$0xff]  }
 0x13b   :  { %2425 = vmatprep.subr.bf16.mxu1 %v9463_v36  ;;  %v9484_v36 = vld [vmem:[%s14497_s2 + $0x34] ss:$8 sps:$4 sm:$0xff]  }
 0x13d   :  { %2385 = vmatpush2.bf16.msra.mxu0 %v9458_v44  ;;  %v9518_v44 = vld [vmem:[%s14497_s2 + $0x170] ss:$8 sps:$4 sm:$0xff]  }
 0x13e   :  { %2426 = vmatpush2.bf16.msra.mxu1 %v9461_v40  ;;  %2386 = vmatprep.subr.bf16.mxu0 %v9466_v42  ;;  %v9520_v40 = vld [vmem:[%s14497_s2 + $0x174] ss:$8 sps:$4 sm:$0xff]   ;;  %v9523_v42 = vld [vmem:[%s14497_s2 + $0x164] ss:$8 sps:$4 sm:$0xff]  }
 0x13f   :  { %2427 = vmatprep.subr.bf16.mxu1 %v9469_v34  ;;  %v9482_v34 = vld [vmem:[%s14497_s2 + $0x30] ss:$8 sps:$4 sm:$0xff]  }
 0x141   :  { %2387 = vmatpush2.bf16.msra.mxu0 %v9464_v41  ;;  %v9487_v41 = vld [vmem:[%s14497_s2 + $0x24] ss:$8 sps:$4 sm:$0xff]  }
 0x142   :  { %2428 = vmatpush2.bf16.msra.mxu1 %v9467_v35  ;;  %2838 = vmatprep.subr.bf16.mxu0 %v9472_v47  ;;  %v9521_v35 = vld [vmem:[%s14497_s2 + $0x160] ss:$8 sps:$4 sm:$0xff]   ;;  %v9526_v47 = vld [vmem:[%s14497_s2 + $0x154] ss:$8 sps:$4 sm:$0xff]  }
 0x143   :  { %2879 = vmatprep.subr.bf16.mxu1 %v9520_v40  ;;  %v9496_v40 = vld [vmem:[%s14497_s2 + $0xf4] ss:$8 sps:$4 sm:$0xff]  }
 0x144   :  { %2389 = vmatmul.mubr.bf16.vlgmr.msra.gmra.mxu0 %v11239_v45  ;;  %v9481_v45 = vld [vmem:[%s14497_s2 + $0x44] ss:$8 sps:$4 sm:$0xff]  }
 0x145   :  { %2430 = vmatmul.mubr.bf16.vlgmr.msra.gmra.mxu1 %v11445_v32  ;;  %2839 = vmatpush1.bf16.msra.mxu0 %v9470_v33  ;;  %v9479_v32 = vld [vmem:[%s14497_s2 + $0x40] ss:$8 sps:$4 sm:$0xff]  }
 0x146   :  { %2840 = vmatprep.subr.bf16.mxu0 %v9475_v37  ;;  %2880 = vmatpush1.bf16.msra.mxu1 %v9518_v44  ;;  %v9485_v33 = vld [vmem:[%s14497_s2 + $0x20] ss:$8 sps:$4 sm:$0xff]   ;;  %v9490_v37 = vld [vmem:[%s14497_s2 + $0x14] ss:$8 sps:$4 sm:$0xff]  }
 0x147   :  { %2881 = vmatprep.subr.bf16.mxu1 %v9523_v42  ;;  %v9491_v44 = vld [vmem:[%s14497_s2] ss:$8 sps:$4 sm:$0xff]   ;;  %v9530_v42 = vld [vmem:[%s14497_s2 + $0x130] ss:$8 sps:$4 sm:$0xff]  }
 0x149   :  { %2841 = vmatpush1.bf16.msra.mxu0 %v9473_v39  ;;  %v9524_v39 = vld [vmem:[%s14497_s2 + $0x150] ss:$8 sps:$4 sm:$0xff]  }
 0x14a   :  { %2842 = vmatprep.subr.bf16.mxu0 %v9478_v43  ;;  %2882 = vmatpush1.bf16.msra.mxu1 %v9521_v35  ;;  %v9529_v43 = vld [vmem:[%s14497_s2 + $0x144] ss:$8 sps:$4 sm:$0xff]  }
 0x14b   :  { %2883 = vmatprep.subr.bf16.mxu1 %v9526_v47  ;;  %v9499_v35 = vld [vmem:[%s14497_s2 + $0xe4] ss:$8 sps:$4 sm:$0xff]   ;;  %v9533_v47 = vld [vmem:[%s14497_s2 + $0x120] ss:$8 sps:$4 sm:$0xff]  }
 0x14d   :  { %2843 = vmatpush1.bf16.msra.mxu0 %v9476_v38  ;;  %v9488_v38 = vld [vmem:[%s14497_s2 + $0x10] ss:$8 sps:$4 sm:$0xff]  }
 0x14e   :  { %2844 = vmatprep.subr.bf16.mxu0 %v9481_v45  ;;  %v9493_v45 = vld [vmem:[%s14497_s2 + $0x4] ss:$8 sps:$4 sm:$0xff]   ;;  %2884 = vmatpush1.bf16.msra.mxu1 %v9524_v39  ;;  %v9502_v39 = vld [vmem:[%s14497_s2 + $0xd4] ss:$8 sps:$4 sm:$0xff]  }
 0x14f   :  { %2885 = vmatprep.subr.bf16.mxu1 %v9529_v43  ;;  %v9536_v43 = vld [vmem:[%s14497_s2 + $0x110] ss:$8 sps:$4 sm:$0xff]  }
 0x151   :  { %2845 = vmatpush1.bf16.msra.mxu0 %v9479_v32  ;;  %v9527_v32 = vld [vmem:[%s14497_s2 + $0x140] ss:$8 sps:$4 sm:$0xff]  }
 0x152   :  { %2846 = vmatprep.subr.bf16.mxu0 %v9484_v36  ;;  %v9532_v36 = vld [vmem:[%s14497_s2 + $0x134] ss:$8 sps:$4 sm:$0xff]   ;;  %2886 = vmatpush1.bf16.msra.mxu1 %v9527_v32  ;;  %v9505_v32 = vld [vmem:[%s14497_s2 + $0xc4] ss:$8 sps:$4 sm:$0xff]  }
 0x153   :  { %2887 = vmatprep.subr.bf16.mxu1 %v9532_v36  ;;  %v9539_v36 = vld [vmem:[%s14497_s2 + $0x100] ss:$8 sps:$4 sm:$0xff]  }
 0x155   :  { %2847 = vmatpush1.bf16.msra.mxu0 %v9482_v34  ;;  %v9535_v34 = vld [vmem:[%s14497_s2 + $0x124] ss:$8 sps:$4 sm:$0xff]  }
 0x156   :  { %2848 = vmatprep.subr.bf16.mxu0 %v9487_v41  ;;  %v9494_v41 = vld [vmem:[%s14497_s2 + $0xf0] ss:$8 sps:$4 sm:$0xff]   ;;  %2888 = vmatpush1.bf16.msra.mxu1 %v9530_v42  ;;  %v9508_v42 = vld [vmem:[%s14497_s2 + $0xb4] ss:$8 sps:$4 sm:$0xff]  }
 0x157   :  { %2889 = vmatprep.subr.bf16.mxu1 %v9535_v34  ;;  %v9542_v34 = vld [vmem:[%s14497_s2 + $0x1f0] ss:$8 sps:$4 sm:$0xff]  }
 0x159   :  { %2849 = vmatpush1.bf16.msra.mxu0 %v9485_v33  ;;  %v9538_v33 = vld [vmem:[%s14497_s2 + $0x114] ss:$8 sps:$4 sm:$0xff]  }
 0x15a   :  { %2850 = vmatprep.subr.bf16.mxu0 %v9490_v37  ;;  %v9497_v37 = vld [vmem:[%s14497_s2 + $0xe0] ss:$8 sps:$4 sm:$0xff]   ;;  %2890 = vmatpush1.bf16.msra.mxu1 %v9533_v47  ;;  %v9511_v47 = vld [vmem:[%s14497_s2 + $0xa4] ss:$8 sps:$4 sm:$0xff]  }
 0x15b   :  { %2891 = vmatprep.subr.bf16.mxu1 %v9538_v33  ;;  %v9545_v33 = vld [vmem:[%s14497_s2 + $0x1e0] ss:$8 sps:$4 sm:$0xff]  }
 0x15d   :  { %2851 = vmatpush1.bf16.msra.mxu0 %v9488_v38  ;;  %v9541_v38 = vld [vmem:[%s14497_s2 + $0x104] ss:$8 sps:$4 sm:$0xff]  }
 0x15e   :  { %2852 = vmatprep.subr.bf16.mxu0 %v9493_v45  ;;  %v9500_v45 = vld [vmem:[%s14497_s2 + $0xd0] ss:$8 sps:$4 sm:$0xff]   ;;  %2892 = vmatpush1.bf16.msra.mxu1 %v9536_v43  ;;  %v9514_v43 = vld [vmem:[%s14497_s2 + $0x94] ss:$8 sps:$4 sm:$0xff]  }
 0x15f   :  { %2893 = vmatprep.subr.bf16.mxu1 %v9541_v38  ;;  %v9548_v38 = vld [vmem:[%s14497_s2 + $0x1d0] ss:$8 sps:$4 sm:$0xff]  }
 0x161   :  { %2853 = vmatpush1.bf16.msra.mxu0 %v9491_v44  ;;  %v9544_v44 = vld [vmem:[%s14497_s2 + $0x1f4] ss:$8 sps:$4 sm:$0xff]  }
 0x162   :  { %2854 = vmatprep.subr.bf16.mxu0 %v9496_v40  ;;  %v9503_v40 = vld [vmem:[%s14497_s2 + $0xc0] ss:$8 sps:$4 sm:$0xff]   ;;  %2894 = vmatpush1.bf16.msra.mxu1 %v9539_v36  ;;  %v9517_v36 = vld [vmem:[%s14497_s2 + $0x84] ss:$8 sps:$4 sm:$0xff]  }
 0x163   :  { %2895 = vmatprep.subr.bf16.mxu1 %v9544_v44  ;;  %v9551_v44 = vld [vmem:[%s14497_s2 + $0x1c0] ss:$8 sps:$4 sm:$0xff]  }
 0x165   :  { %2855 = vmatpush2.bf16.msra.mxu0 %v9494_v41  ;;  %v9547_v41 = vld [vmem:[%s14497_s2 + $0x1e4] ss:$8 sps:$4 sm:$0xff]  }
 0x166   :  { %2856 = vmatprep.subr.bf16.mxu0 %v9499_v35  ;;  %v9506_v35 = vld [vmem:[%s14497_s2 + $0xb0] ss:$8 sps:$4 sm:$0xff]   ;;  %2896 = vmatpush2.bf16.msra.mxu1 %v9542_v34 }
 0x167   :  { %2897 = vmatprep.subr.bf16.mxu1 %v9547_v41  ;;  %v9554_v34 = vld [vmem:[%s14497_s2 + $0x1b0] ss:$8 sps:$4 sm:$0xff]  }
 0x169   :  { %2857 = vmatpush2.bf16.msra.mxu0 %v9497_v37  ;;  %v9550_v37 = vld [vmem:[%s14497_s2 + $0x1d4] ss:$8 sps:$4 sm:$0xff]  }
 0x16a   :  { %2858 = vmatprep.subr.bf16.mxu0 %v9502_v39  ;;  %v9509_v39 = vld [vmem:[%s14497_s2 + $0xa0] ss:$8 sps:$4 sm:$0xff]   ;;  %2898 = vmatpush2.bf16.msra.mxu1 %v9545_v33 }
 0x16b   :  { %2899 = vmatprep.subr.bf16.mxu1 %v9550_v37  ;;  %v9557_v33 = vld [vmem:[%s14497_s2 + $0x1a0] ss:$8 sps:$4 sm:$0xff]  }
 0x16d   :  { %2859 = vmatpush2.bf16.msra.mxu0 %v9500_v45  ;;  %v9553_v45 = vld [vmem:[%s14497_s2 + $0x1c4] ss:$8 sps:$4 sm:$0xff]  }
 0x16e   :  { %2860 = vmatprep.subr.bf16.mxu0 %v9505_v32  ;;  %v9512_v32 = vld [vmem:[%s14497_s2 + $0x90] ss:$8 sps:$4 sm:$0xff]   ;;  %2900 = vmatpush2.bf16.msra.mxu1 %v9548_v38 }
 0x16f   :  { %2901 = vmatprep.subr.bf16.mxu1 %v9553_v45  ;;  %v9562_v45 = vld [vmem:[%s14497_s2 + $0x194] ss:$8 sps:$4 sm:$0xff]  }
 0x171   :  { %2861 = vmatpush2.bf16.msra.mxu0 %v9503_v40  ;;  %v9556_v40 = vld [vmem:[%s14497_s2 + $0x1b4] ss:$8 sps:$4 sm:$0xff]  }
 0x172   :  { %2862 = vmatprep.subr.bf16.mxu0 %v9508_v42  ;;  %v9515_v42 = vld [vmem:[%s14497_s2 + $0x80] ss:$8 sps:$4 sm:$0xff]   ;;  %2902 = vmatpush2.bf16.msra.mxu1 %v9551_v44 }
 0x173   :  { %2903 = vmatprep.subr.bf16.mxu1 %v9556_v40 }
 0x175   :  { %2863 = vmatpush2.bf16.msra.mxu0 %v9506_v35  ;;  %v9559_v35 = vld [vmem:[%s14497_s2 + $0x1a4] ss:$8 sps:$4 sm:$0xff]  }
 0x176   :  { %2864 = vmatprep.subr.bf16.mxu0 %v9511_v47  ;;  %2904 = vmatpush2.bf16.msra.mxu1 %v9554_v34  ;;  %v9565_v34 = vld [vmem:[%s14497_s2 + $0x184] ss:$8 sps:$4 sm:$0xff]  }
 0x177   :  { %2905 = vmatprep.subr.bf16.mxu1 %v9559_v35 }
 0x179   :  { %2865 = vmatpush2.bf16.msra.mxu0 %v9509_v39 }
 0x17a   :  { %2866 = vmatprep.subr.bf16.mxu0 %v9514_v43  ;;  %2906 = vmatpush2.bf16.msra.mxu1 %v9557_v33 }
 0x17b   :  { %2907 = vmatprep.subr.bf16.mxu1 %v9562_v45 }
 0x17d   :  { %2867 = vmatpush2.bf16.msra.mxu0 %v9512_v32 }
 0x17e   :  { %2868 = vmatprep.subr.bf16.mxu0 %v9517_v36  ;;  %v9560_v36 = vld [vmem:[%s14497_s2 + $0x190] ss:$8 sps:$4 sm:$0xff]  }
 0x17f   :  { %2908 = vmatpush2.bf16.msra.mxu1 %v9560_v36 }
 0x180   :  { %2909 = vmatprep.subr.bf16.mxu1 %v9565_v34 }
 0x181   :  { %2869 = vmatpush2.bf16.msra.mxu0 %v9515_v42  ;;  %v9563_v42 = vld [vmem:[%s14497_s2 + $0x180] ss:$8 sps:$4 sm:$0xff]  }
 0x183   :  { %2910 = vmatpush2.bf16.msra.mxu1 %v9563_v42 }
 0x184   :  { %v2226_v41 = vpop.f32.mrf.mxu0 }
 0x185   :  { %v2267_v47 = vpop.f32.mrf.mxu1 }
 0x186   :  { %v2268_v37 = vadd.f32 %v2267_v47, %v2226_v41  ;;  %v2228_v39 = vpop.f32.mrf.mxu0 }
 0x187   :  { %v2269_v43 = vpop.f32.mrf.mxu1 }
 0x188   :  { %v2230_v38 = vpop.f32.mrf.mxu0  ;;  %v2270_v35 = vadd.f32 %v2269_v43, %v2228_v39 }
 0x189   :  { %v2271_v32 = vpop.f32.mrf.mxu1 }
 0x18a   :  { %v2231_v44 = vpop.f32.mrf.mxu0 }
 0x18b   :  { %v2272_v40 = vpop.f32.mrf.mxu1 }
 0x1c4   :  { %v2308_v41 = vpop.f32.mrf.mxu0 }
 0x1c5   :  { %v2309_v47 = vadd.f32 %v2308_v41, %v2268_v37  ;;  %v2349_v33 = vpop.f32.mrf.mxu1 }
 0x1c6   :  { %v2310_v38 = vpop.f32.mrf.mxu0 }
 0x1c7   :  { %vm2438_vm0 = vcmp.ge.f32.partialorder %v2309_v47, 0.0  ;;  %v2442_v32 = vmul.f32 0.2, %v2309_v47  ;;  %v2311_v45 = vadd.f32 %v2310_v38, %v2270_v35  ;;  %v2351_v44 = vpop.f32.mrf.mxu1 }
 0x1c8   :  { %v2312_v36 = vpop.f32.mrf.mxu0 }
 0x1c9   :  { %vm2439_vm1 = vcmp.ge.f32.partialorder %v2311_v45, 0.0  ;;  %v2443_v40 = vmul.f32 0.2, %v2311_v45  ;;  %v2353_v46 = vpop.f32.mrf.mxu1  ;;  %v2446_v49 = vsel %vm2438_vm0, %v2309_v47, %v2442_v32 }
 0x1ca   :  { %v2313_v51 = vpop.f32.mrf.mxu0  ;;  %v2514_v34 = vpack.c.bf16 %v2446_v49, %v2446_v49 }
 0x1cb   :  { %v2354_v48 = vpop.f32.mrf.mxu1  ;;  %v2447_v50 = vsel %vm2439_vm1, %v2311_v45, %v2443_v40 }
 0x1cc   :  { %v2515_v53 = vpack.c.bf16 %v2447_v50, %v2447_v50 }
 0x1ce   :  { %2870 = vmatprep.mubr.bf16.mxu0 %v2515_v53 }
 0x1cf   :  { %2871 = vmatmul.mubr.bf16.vlgmr.msra.gmra.mxu0 %v2514_v34 }
 0x204   :  { %v2390_v39 = vpop.f32.mrf.mxu0 }
 0x205   :  { %v2391_v37 = vadd.f32 %v2390_v39, %v2349_v33  ;;  %v2431_v43 = vpop.f32.mrf.mxu1  ;;  %v629_v33 = vlaneseq  ;;  %v14724_v39 = vmov 0.0  }
 0x206   :  { %v2392_v42 = vpop.f32.mrf.mxu0  ;;  %2990 = vmatprep.mubr.f32.mxu0 %v14724_v39 }
 0x207   :  { %v2432_v41 = vadd.f32 %v2431_v43, %v2391_v37  ;;  %v2393_v55 = vadd.f32 %v2392_v42, %v2351_v44  ;;  %v2433_v35 = vpop.f32.mrf.mxu1  ;;  %v11831_v45 = vshrl.u32 %v629_v33, 7  ;;  %v11833_v44 = vand.u32 127, %v629_v33 }
 0x208   :  { %v2394_v38 = vpop.f32.mrf.mxu0 }
 0x209   :  { %vm2440_vm2 = vcmp.ge.f32.partialorder %v2432_v41, 0.0  ;;  %v2444_v36 = vmul.f32 0.2, %v2432_v41  ;;  %v2434_v52 = vadd.f32 %v2433_v35, %v2393_v55  ;;  %v2435_v46 = vpop.f32.mrf.mxu1  ;;  %v11836_v40 = vadd.s32 256, %v11831_v45 }
 0x20a   :  { %v2395_v47 = vpop.f32.mrf.mxu0  ;;  %v11839_v55 = vadd.s32 264, %v11831_v45  ;;  %v11842_v34 = vadd.s32 272, %v11831_v45  ;;  %v11849_v37 = vadd.s32 288, %v11831_v45  ;;  %v11852_v43 = vadd.s32 296, %v11831_v45 }
 0x20b   :  { %vm2441_vm3 = vcmp.ge.f32.partialorder %v2434_v52, 0.0  ;;  %v2445_v48 = vmul.f32 0.2, %v2434_v52  ;;  %v2436_v51 = vpop.f32.mrf.mxu1  ;;  %v2448_v50 = vsel %vm2440_vm2, %v2432_v41, %v2444_v36  ;;  %v11855_v42 = vadd.s32 304, %v11831_v45 }
 0x20c   :  { %v2516_v32 = vpack.c.bf16 %v2448_v50, %v2448_v50  ;;  %v11859_v41 = vadd.s32 312, %v11831_v45  ;;  %v11862_v35 = vadd.s32 320, %v11831_v45  ;;  %v11865_v38 = vadd.s32 328, %v11831_v45 }
 0x20d   :  { %v2449_v49 = vsel %vm2441_vm3, %v2434_v52, %v2445_v48  ;;  %v11846_v52 = vadd.s32 280, %v11831_v45  ;;  %v11868_v36 = vadd.s32 336, %v11831_v45  ;;  %v11871_v46 = vadd.s32 344, %v11831_v45 }
 0x20e   :  { %v2517_v53 = vpack.c.bf16 %v2449_v49, %v2449_v49  ;;  %v11874_v47 = vadd.s32 352, %v11831_v45  ;;  %v11877_v48 = vadd.s32 360, %v11831_v45  ;;  %v11880_v51 = vadd.s32 368, %v11831_v45 }
 0x20f   :  { %v11883_v50 = vadd.s32 376, %v11831_v45  ;;  %v11886_v49 = vadd.s32 384, %v11831_v45  ;;  %v11895_v33 = vadd.s32 408, %v11831_v45  ;;  %v11901_v54 = vadd.s32 424, %v11831_v45 }
 0x210   :  { %2911 = vmatprep.mubr.bf16.mxu1 %v2517_v53  ;;  %v11889_v53 = vadd.s32 392, %v11831_v45  ;;  %v11904_v57 = vadd.s32 432, %v11831_v45  ;;  %v11907_v59 = vadd.s32 440, %v11831_v45  ;;  %v11910_v56 = vadd.s32 448, %v11831_v45 }
 0x211   :  { %2912 = vmatmul.mubr.bf16.vlgmr.msra.gmra.mxu1 %v2516_v32  ;;  %v11892_v32 = vadd.s32 400, %v11831_v45  ;;  %v11913_v58 = vadd.s32 456, %v11831_v45  ;;  %v11916_v61 = vadd.s32 464, %v11831_v45  ;;  %v11919_v63 = vadd.s32 472, %v11831_v45 }
 0x212   :  { %3061 = vmatprep.mubr.f32.mxu1 %v14724_v39  ;;  %v11898_v39 = vadd.s32 416, %v11831_v45  ;;  %v11922_v60 = vadd.s32 480, %v11831_v45  ;;  %v11925_v62 = vadd.s32 488, %v11831_v45  ;;  %v11928_v1 = vadd.s32 496, %v11831_v45 }
 0x213   :  { %v11931_v3 = vadd.s32 504, %v11831_v45  ;;  %v803_v0 = vand.u32 7, %v11831_v45  ;;  %v835_v2 = vand.u32 7, %v11836_v40  ;;  %v836_v5 = vand.u32 7, %v11839_v55 }
 0x214   :  { %v837_v7 = vand.u32 7, %v11842_v34  ;;  %v838_v4 = vand.u32 7, %v11846_v52  ;;  %v839_v6 = vand.u32 7, %v11849_v37  ;;  %v840_v9 = vand.u32 7, %v11852_v43 }
 0x215   :  { %v841_v11 = vand.u32 7, %v11855_v42  ;;  %v842_v8 = vand.u32 7, %v11859_v41  ;;  %v843_v10 = vand.u32 7, %v11862_v35  ;;  %v844_v13 = vand.u32 7, %v11865_v38 }
 0x216   :  { %v845_v40 = vand.u32 7, %v11868_v36  ;;  %v846_v55 = vand.u32 7, %v11871_v46  ;;  %v847_v34 = vand.u32 7, %v11874_v47  ;;  %v848_v52 = vand.u32 7, %v11877_v48 }
 0x217   :  { %v849_v37 = vand.u32 7, %v11880_v51  ;;  %v850_v43 = vand.u32 7, %v11883_v50  ;;  %v851_v42 = vand.u32 7, %v11886_v49  ;;  %v852_v41 = vand.u32 7, %v11889_v53 }
 0x218   :  { %v853_v35 = vand.u32 7, %v11892_v32  ;;  %v854_v38 = vand.u32 7, %v11895_v33  ;;  %v855_v36 = vand.u32 7, %v11898_v39  ;;  %v856_v46 = vand.u32 7, %v11901_v54 }
 0x219   :  { %v857_v47 = vand.u32 7, %v11904_v57  ;;  %v858_v48 = vand.u32 7, %v11907_v59  ;;  %v859_v51 = vand.u32 7, %v11910_v56  ;;  %v860_v50 = vand.u32 7, %v11913_v58 }
 0x21a   :  { %v861_v49 = vand.u32 7, %v11916_v61  ;;  %v862_v53 = vand.u32 7, %v11919_v63  ;;  %v863_v32 = vand.u32 7, %v11922_v60  ;;  %v864_v33 = vand.u32 7, %v11925_v62 }
 0x21b   :  { %v865_v39 = vand.u32 7, %v11928_v1  ;;  %v866_v54 = vand.u32 7, %v11931_v3  ;;  %vm11967_vm4 = vcmp.eq.s32.totalorder %v803_v0, %v11833_v44  ;;  %v15311_v57 = vmov 0 }
 0x21c   :  { %v15312_v57 = vsel %vm11967_vm4, 4294967295, %v15311_v57  ;;  %vm11972_vm5 = vcmp.eq.s32.totalorder %v835_v2, %v11833_v44  ;;  %v15314_v56 = vmov 0  ;;  %vm11977_vm6 = vcmp.eq.s32.totalorder %v836_v5, %v11833_v44 }
 0x21d   :  { %15313 = vst [vmem:[#allocation263_spill] sm:$0xff] %v15312_v57  ;;  %v15315_v56 = vsel %vm11972_vm5, 4294967295, %v15314_v56  ;;  %v15317_v58 = vmov 0  ;;  %vm11982_vm7 = vcmp.eq.s32.totalorder %v837_v7, %v11833_v44  ;;  %v15320_v1 = vmov 0 }
 0x21e   :  { %15316 = vst [vmem:[#allocation264_spill] sm:$0xff] %v15315_v56  ;;  %v15318_v58 = vsel %vm11977_vm6, 4294967295, %v15317_v58  ;;  %v15321_v1 = vsel %vm11982_vm7, 4294967295, %v15320_v1  ;;  %vm11987_vm8 = vcmp.eq.s32.totalorder %v838_v4, %v11833_v44  ;;  %v15323_v0 = vmov 0 }
 0x21f   :  { %15319 = vst [vmem:[#allocation265_spill] sm:$0xff] %v15318_v58  ;;  %15322 = vst [vmem:[#allocation266_spill] sm:$0xff] %v15321_v1  ;;  %v15324_v0 = vsel %vm11987_vm8, 4294967295, %v15323_v0  ;;  %vm11992_vm9 = vcmp.eq.s32.totalorder %v839_v6, %v11833_v44  ;;  %v15326_v2 = vmov 0  ;;  %vm11997_vm10 = vcmp.eq.s32.totalorder %v840_v9, %v11833_v44 }
 0x220   :  { %15325 = vst [vmem:[#allocation267_spill] sm:$0xff] %v15324_v0  ;;  %v15327_v2 = vsel %vm11992_vm9, 4294967295, %v15326_v2  ;;  %v15329_v3 = vmov 0  ;;  %vm12002_vm11 = vcmp.eq.s32.totalorder %v841_v11, %v11833_v44  ;;  %v15332_v5 = vmov 0 }
 0x221   :  { %15328 = vst [vmem:[#allocation268_spill] sm:$0xff] %v15327_v2  ;;  %v15330_v3 = vsel %vm11997_vm10, 4294967295, %v15329_v3  ;;  %v15333_v5 = vsel %vm12002_vm11, 4294967295, %v15332_v5  ;;  %vm12007_vm12 = vcmp.eq.s32.totalorder %v842_v8, %v11833_v44  ;;  %v15335_v4 = vmov 0 }
 0x222   :  { %15331 = vst [vmem:[#allocation269_spill] sm:$0xff] %v15330_v3  ;;  %15334 = vst [vmem:[#allocation270_spill] sm:$0xff] %v15333_v5  ;;  %v15336_v4 = vsel %vm12007_vm12, 4294967295, %v15335_v4  ;;  %vm12012_vm13 = vcmp.eq.s32.totalorder %v843_v10, %v11833_v44  ;;  %v15338_v6 = vmov 0  ;;  %vm12017_vm14 = vcmp.eq.s32.totalorder %v844_v13, %v11833_v44 }
 0x223   :  { %15337 = vst [vmem:[#allocation271_spill] sm:$0xff] %v15336_v4  ;;  %v15339_v6 = vsel %vm12012_vm13, 4294967295, %v15338_v6  ;;  %v15341_v7 = vmov 0  ;;  %vm12022_vm15 = vcmp.eq.s32.totalorder %v845_v40, %v11833_v44  ;;  %v15344_v9 = vmov 0 }
 0x224   :  { %15340 = vst [vmem:[#allocation272_spill] sm:$0xff] %v15339_v6  ;;  %v15342_v7 = vsel %vm12017_vm14, 4294967295, %v15341_v7  ;;  %v15345_v9 = vsel %vm12022_vm15, 4294967295, %v15344_v9  ;;  %vm12027_vm0 = vcmp.eq.s32.totalorder %v846_v55, %v11833_v44  ;;  %v15347_v8 = vmov 0 }
 0x225   :  { %15343 = vst [vmem:[#allocation273_spill] sm:$0xff] %v15342_v7  ;;  %15346 = vst [vmem:[#allocation274_spill] sm:$0xff] %v15345_v9  ;;  %v15348_v8 = vsel %vm12027_vm0, 4294967295, %v15347_v8  ;;  %vm12032_vm1 = vcmp.eq.s32.totalorder %v847_v34, %v11833_v44  ;;  %v15350_v10 = vmov 0  ;;  %vm12037_vm2 = vcmp.eq.s32.totalorder %v848_v52, %v11833_v44 }
 0x226   :  { %15349 = vst [vmem:[#allocation275_spill] sm:$0xff] %v15348_v8  ;;  %v15351_v10 = vsel %vm12032_vm1, 4294967295, %v15350_v10  ;;  %v15353_v11 = vmov 0  ;;  %vm12042_vm3 = vcmp.eq.s32.totalorder %v849_v37, %v11833_v44  ;;  %v15356_v13 = vmov 0 }
 0x227   :  { %15352 = vst [vmem:[#allocation276_spill] sm:$0xff] %v15351_v10  ;;  %v15354_v11 = vsel %vm12037_vm2, 4294967295, %v15353_v11  ;;  %v15357_v13 = vsel %vm12042_vm3, 4294967295, %v15356_v13  ;;  %vm12047_vm5 = vcmp.eq.s32.totalorder %v850_v43, %v11833_v44  ;;  %v15359_v59 = vmov 0 }
 0x228   :  { %15355 = vst [vmem:[#allocation277_spill] sm:$0xff] %v15354_v11  ;;  %15358 = vst [vmem:[#allocation278_spill] sm:$0xff] %v15357_v13  ;;  %v15360_v59 = vsel %vm12047_vm5, 4294967295, %v15359_v59  ;;  %vm12052_vm4 = vcmp.eq.s32.totalorder %v851_v42, %v11833_v44  ;;  %v15362_v60 = vmov 0  ;;  %vm12057_vm6 = vcmp.eq.s32.totalorder %v852_v41, %v11833_v44 }
 0x229   :  { %15361 = vst [vmem:[#allocation279_spill] sm:$0xff] %v15360_v59  ;;  %v15363_v60 = vsel %vm12052_vm4, 4294967295, %v15362_v60  ;;  %v15365_v61 = vmov 0  ;;  %vm12062_vm7 = vcmp.eq.s32.totalorder %v853_v35, %v11833_v44  ;;  %v15368_v62 = vmov 0 }
 0x22a   :  { %15364 = vst [vmem:[#allocation280_spill] sm:$0xff] %v15363_v60  ;;  %v15366_v61 = vsel %vm12057_vm6, 4294967295, %v15365_v61  ;;  %v15369_v62 = vsel %vm12062_vm7, 4294967295, %v15368_v62  ;;  %vm12067_vm8 = vcmp.eq.s32.totalorder %v854_v38, %v11833_v44  ;;  %v15371_v63 = vmov 0 }
 0x22b   :  { %15367 = vst [vmem:[#allocation281_spill] sm:$0xff] %v15366_v61  ;;  %15370 = vst [vmem:[#allocation282_spill] sm:$0xff] %v15369_v62  ;;  %v15372_v63 = vsel %vm12067_vm8, 4294967295, %v15371_v63  ;;  %vm12072_vm9 = vcmp.eq.s32.totalorder %v855_v36, %v11833_v44  ;;  %v15374_v40 = vmov 0  ;;  %vm12077_vm4 = vcmp.eq.s32.totalorder %v856_v46, %v11833_v44 }
 0x22c   :  { %15373 = vst [vmem:[#allocation283_spill] sm:$0xff] %v15372_v63  ;;  %v15375_v40 = vsel %vm12072_vm9, 4294967295, %v15374_v40  ;;  %v15377_v55 = vmov 0  ;;  %vm12082_vm6 = vcmp.eq.s32.totalorder %v857_v47, %v11833_v44  ;;  %v15380_v34 = vmov 0 }
 0x22d   :  { %15376 = vst [vmem:[#allocation284_spill] sm:$0xff] %v15375_v40  ;;  %v15378_v55 = vsel %vm12077_vm4, 4294967295, %v15377_v55  ;;  %v15381_v34 = vsel %vm12082_vm6, 4294967295, %v15380_v34  ;;  %vm12087_vm7 = vcmp.eq.s32.totalorder %v858_v48, %v11833_v44  ;;  %v15383_v52 = vmov 0 }
 0x22e   :  { %15379 = vst [vmem:[#allocation285_spill] sm:$0xff] %v15378_v55  ;;  %15382 = vst [vmem:[#allocation286_spill] sm:$0xff] %v15381_v34  ;;  %v15384_v52 = vsel %vm12087_vm7, 4294967295, %v15383_v52  ;;  %vm12092_vm8 = vcmp.eq.s32.totalorder %v859_v51, %v11833_v44  ;;  %v15386_v37 = vmov 0  ;;  %vm12097_vm9 = vcmp.eq.s32.totalorder %v860_v50, %v11833_v44 }
 0x22f   :  { %15385 = vst [vmem:[#allocation287_spill] sm:$0xff] %v15384_v52  ;;  %v15387_v37 = vsel %vm12092_vm8, 4294967295, %v15386_v37  ;;  %v15389_v43 = vmov 0  ;;  %vm12102_vm10 = vcmp.eq.s32.totalorder %v861_v49, %v11833_v44  ;;  %v15392_v42 = vmov 0 }
 0x230   :  { %15388 = vst [vmem:[#allocation288_spill] sm:$0xff] %v15387_v37  ;;  %v15390_v43 = vsel %vm12097_vm9, 4294967295, %v15389_v43  ;;  %v15393_v42 = vsel %vm12102_vm10, 4294967295, %v15392_v42  ;;  %vm12107_vm4 = vcmp.eq.s32.totalorder %v862_v53, %v11833_v44  ;;  %v15395_v41 = vmov 0 }
 0x231   :  { %15391 = vst [vmem:[#allocation289_spill] sm:$0xff] %v15390_v43  ;;  %15394 = vst [vmem:[#allocation290_spill] sm:$0xff] %v15393_v42  ;;  %v15396_v41 = vsel %vm12107_vm4, 4294967295, %v15395_v41  ;;  %vm12112_vm11 = vcmp.eq.s32.totalorder %v863_v32, %v11833_v44  ;;  %v15398_v35 = vmov 0  ;;  %vm12117_vm6 = vcmp.eq.s32.totalorder %v864_v33, %v11833_v44 }
 0x232   :  { %15397 = vst [vmem:[#allocation291_spill] sm:$0xff] %v15396_v41  ;;  %v15399_v35 = vsel %vm12112_vm11, 4294967295, %v15398_v35  ;;  %v15401_v38 = vmov 0  ;;  %vm12122_vm12 = vcmp.eq.s32.totalorder %v865_v39, %v11833_v44  ;;  %v15404_v36 = vmov 0 }
 0x233   :  { %15400 = vst [vmem:[#allocation292_spill] sm:$0xff] %v15399_v35  ;;  %v15402_v38 = vsel %vm12117_vm6, 4294967295, %v15401_v38  ;;  %v15405_v36 = vsel %vm12122_vm12, 4294967295, %v15404_v36  ;;  %vm12127_vm7 = vcmp.eq.s32.totalorder %v866_v54, %v11833_v44  ;;  %v15407_v46 = vmov 0 }
 0x234   :  { %15403 = vst [vmem:[#allocation293_spill] sm:$0xff] %v15402_v38  ;;  %15406 = vst [vmem:[#allocation294_spill] sm:$0xff] %v15405_v36  ;;  %v15408_v46 = vsel %vm12127_vm7, 4294967295, %v15407_v46  ;;  %v995_v47 = vadd.s32 256, %v11833_v44  ;;  %v996_v48 = vadd.s32 384, %v11833_v44  ;;  %v997_v51 = vand.u32 7, %v11833_v44 }
 0x235   :  { %15409 = vst [vmem:[#allocation295_spill] sm:$0xff] %v15408_v46  ;;  %v12135_v49 = vadd.s32 248, %v11831_v45  ;;  %v15410_v32 = vmov 0  ;;  %v12143_v33 = vadd.s32 120, %v11831_v45  ;;  %v12146_v39 = vadd.s32 240, %v11831_v45 }
 0x236   :  { %v999_v50 = vand.u32 7, %v995_v47  ;;  %v1000_v53 = vand.u32 7, %v996_v48  ;;  %vm12138_vm13 = vcmp.eq.s32.totalorder %v997_v51, %v11831_v45  ;;  %v15413_v54 = vmov 0 }
 0x237   :  { %v15411_v32 = vsel %vm12138_vm13, 4294967295, %v15410_v32  ;;  %v834_v47 = vand.u32 7, %v12135_v49  ;;  %v15416_v48 = vmov 0  ;;  %v818_v51 = vand.u32 7, %v12143_v33 }
 0x238   :  { %15412 = vst [vmem:[#allocation296_spill] sm:$0xff] %v15411_v32  ;;  %vm12149_vm8 = vcmp.eq.s32.totalorder %v999_v50, %v11831_v45  ;;  %vm12155_vm14 = vcmp.eq.s32.totalorder %v1000_v53, %v11831_v45  ;;  %v833_v32 = vand.u32 7, %v12146_v39  ;;  %v12162_v56 = vadd.s32 112, %v11831_v45 }
 0x239   :  { %v15414_v54 = vsel %vm12149_vm8, 4294967295, %v15413_v54  ;;  %v15417_v48 = vsel %vm12155_vm14, 4294967295, %v15416_v48  ;;  %vm12165_vm13 = vcmp.eq.s32.totalorder %v834_v47, %v11833_v44  ;;  %v15419_v50 = vmov 0 }
 0x23a   :  { %15415 = vst [vmem:[#allocation297_spill] sm:$0xff] %v15414_v54  ;;  %15418 = vst [vmem:[#allocation298_spill] sm:$0xff] %v15417_v48  ;;  %v15420_v50 = vsel %vm12165_vm13, 4294967295, %v15419_v50  ;;  %vm12170_vm8 = vcmp.eq.s32.totalorder %v818_v51, %v11833_v44  ;;  %v15422_v54 = vmov 0  ;;  %vm12175_vm9 = vcmp.eq.s32.totalorder %v833_v32, %v11833_v44 }
 0x23b   :  { %15421 = vst [vmem:[#allocation299_spill] sm:$0xff] %v15420_v50  ;;  %v15423_v54 = vsel %vm12170_vm8, 4294967295, %v15422_v54  ;;  %v15425_v53 = vmov 0  ;;  %v817_v48 = vand.u32 7, %v12162_v56  ;;  %v12181_v57 = vadd.s32 232, %v11831_v45 }
 0x23c   :  { %15424 = vst [vmem:[#allocation300_spill] sm:$0xff] %v15423_v54  ;;  %v15426_v53 = vsel %vm12175_vm9, 4294967295, %v15425_v53  ;;  %v12184_v47 = vadd.s32 104, %v11831_v45  ;;  %v15428_v60 = vmov 0  ;;  %v12192_v51 = vadd.s32 224, %v11831_v45 }
 0x23d   :  { %15427 = vst [vmem:[#allocation301_spill] sm:$0xff] %v15426_v53  ;;  %vm12187_vm14 = vcmp.eq.s32.totalorder %v817_v48, %v11833_v44  ;;  %v12195_v32 = vadd.s32 96, %v11831_v45  ;;  %v832_v58 = vand.u32 7, %v12181_v57  ;;  %v15431_v48 = vmov 0 }
 0x23e   :  { %v15429_v60 = vsel %vm12187_vm14, 4294967295, %v15428_v60  ;;  %v816_v61 = vand.u32 7, %v12184_v47  ;;  %v831_v1 = vand.u32 7, %v12192_v51  ;;  %v15434_v0 = vmov 0 }
 0x23f   :  { %15430 = vst [vmem:[#allocation302_spill] sm:$0xff] %v15429_v60  ;;  %v815_v62 = vand.u32 7, %v12195_v32  ;;  %vm12202_vm15 = vcmp.eq.s32.totalorder %v832_v58, %v11833_v44  ;;  %v12212_v63 = vadd.s32 216, %v11831_v45  ;;  %v12215_v2 = vadd.s32 88, %v11831_v45 }
 0x240   :  { %v15432_v48 = vsel %vm12202_vm15, 4294967295, %v15431_v48  ;;  %vm12207_vm10 = vcmp.eq.s32.totalorder %v816_v61, %v11833_v44  ;;  %vm12218_vm0 = vcmp.eq.s32.totalorder %v831_v1, %v11833_v44  ;;  %v15437_v40 = vmov 0 }
 0x241   :  { %15433 = vst [vmem:[#allocation303_spill] sm:$0xff] %v15432_v48  ;;  %v15435_v0 = vsel %vm12207_vm10, 4294967295, %v15434_v0  ;;  %v15438_v40 = vsel %vm12218_vm0, 4294967295, %v15437_v40  ;;  %vm12223_vm4 = vcmp.eq.s32.totalorder %v815_v62, %v11833_v44  ;;  %v15440_v58 = vmov 0 }
 0x242   :  { %15436 = vst [vmem:[#allocation304_spill] sm:$0xff] %v15435_v0  ;;  %15439 = vst [vmem:[#allocation305_spill] sm:$0xff] %v15438_v40  ;;  %v15441_v58 = vsel %vm12223_vm4, 4294967295, %v15440_v58  ;;  %v830_v61 = vand.u32 7, %v12212_v63  ;;  %v814_v3 = vand.u32 7, %v12215_v2  ;;  %v12230_v55 = vadd.s32 208, %v11831_v45 }
 0x243   :  { %15442 = vst [vmem:[#allocation306_spill] sm:$0xff] %v15441_v58  ;;  %v12233_v5 = vadd.s32 80, %v11831_v45  ;;  %v15443_v1 = vmov 0  ;;  %v15446_v62 = vmov 0  ;;  %v12246_v34 = vadd.s32 200, %v11831_v45 }
 0x244   :  { %vm12236_vm1 = vcmp.eq.s32.totalorder %v830_v61, %v11833_v44  ;;  %vm12241_vm11 = vcmp.eq.s32.totalorder %v814_v3, %v11833_v44  ;;  %v12249_v4 = vadd.s32 72, %v11831_v45  ;;  %v829_v52 = vand.u32 7, %v12230_v55 }
 0x245   :  { %v15444_v1 = vsel %vm12236_vm1, 4294967295, %v15443_v1  ;;  %v15447_v62 = vsel %vm12241_vm11, 4294967295, %v15446_v62  ;;  %v813_v6 = vand.u32 7, %v12233_v5  ;;  %v828_v61 = vand.u32 7, %v12246_v34 }
 0x246   :  { %15445 = vst [vmem:[#allocation307_spill] sm:$0xff] %v15444_v1  ;;  %15448 = vst [vmem:[#allocation308_spill] sm:$0xff] %v15447_v62  ;;  %v812_v37 = vand.u32 7, %v12249_v4  ;;  %vm12256_vm1 = vcmp.eq.s32.totalorder %v829_v52, %v11833_v44  ;;  %v15449_v3 = vmov 0  ;;  %v15452_v7 = vmov 0 }
 0x247   :  { %v15450_v3 = vsel %vm12256_vm1, 4294967295, %v15449_v3  ;;  %vm12261_vm11 = vcmp.eq.s32.totalorder %v813_v6, %v11833_v44  ;;  %vm12266_vm4 = vcmp.eq.s32.totalorder %v828_v61, %v11833_v44  ;;  %v15455_v43 = vmov 0 }
 0x248   :  { %15451 = vst [vmem:[#allocation309_spill] sm:$0xff] %v15450_v3  ;;  %v15453_v7 = vsel %vm12261_vm11, 4294967295, %v15452_v7  ;;  %v15456_v43 = vsel %vm12266_vm4, 4294967295, %v15455_v43  ;;  %vm12271_vm0 = vcmp.eq.s32.totalorder %v812_v37, %v11833_v44  ;;  %v15458_v9 = vmov 0 }
 0x249   :  { %15454 = vst [vmem:[#allocation310_spill] sm:$0xff] %v15453_v7  ;;  %15457 = vst [vmem:[#allocation311_spill] sm:$0xff] %v15456_v43  ;;  %v15459_v9 = vsel %vm12271_vm0, 4294967295, %v15458_v9  ;;  %v12276_v52 = vadd.s32 192, %v11831_v45  ;;  %v12279_v42 = vadd.s32 64, %v11831_v45  ;;  %v12282_v6 = vadd.s32 184, %v11831_v45 }
 0x24a   :  { %15460 = vst [vmem:[#allocation312_spill] sm:$0xff] %v15459_v9  ;;  %v12285_v7 = vadd.s32 56, %v11831_v45  ;;  %v15461_v3 = vmov 0  ;;  %v15464_v8 = vmov 0  ;;  %v12302_v62 = vadd.s32 176, %v11831_v45 }
 0x24b   :  { %v827_v61 = vand.u32 7, %v12276_v52  ;;  %v811_v43 = vand.u32 7, %v12279_v42  ;;  %v826_v37 = vand.u32 7, %v12282_v6  ;;  %v12305_v41 = vadd.s32 48, %v11831_v45 }
 0x24c   :  { %v810_v9 = vand.u32 7, %v12285_v7  ;;  %v15467_v1 = vmov 0  ;;  %v15482_v35 = vmov 0  ;;  %v12354_v40 = vadd.s32 152, %v11831_v45 }
 0x24d   :  { %vm12292_vm0 = vcmp.eq.s32.totalorder %v827_v61, %v11833_v44  ;;  %vm12297_vm4 = vcmp.eq.s32.totalorder %v811_v43, %v11833_v44  ;;  %vm12308_vm11 = vcmp.eq.s32.totalorder %v826_v37, %v11833_v44  ;;  %v15470_v61 = vmov 0 }
 0x24e   :  { %v15462_v3 = vsel %vm12292_vm0, 4294967295, %v15461_v3  ;;  %v15465_v8 = vsel %vm12297_vm4, 4294967295, %v15464_v8  ;;  %v15468_v1 = vsel %vm12308_vm11, 4294967295, %v15467_v1  ;;  %vm12313_vm1 = vcmp.eq.s32.totalorder %v810_v9, %v11833_v44 }
 0x24f   :  { %15463 = vst [vmem:[#allocation313_spill] sm:$0xff] %v15462_v3  ;;  %15466 = vst [vmem:[#allocation314_spill] sm:$0xff] %v15465_v8  ;;  %v15471_v61 = vsel %vm12313_vm1, 4294967295, %v15470_v61  ;;  %v12318_v43 = vadd.s32 168, %v11831_v45  ;;  %v12321_v8 = vadd.s32 40, %v11831_v45  ;;  %v825_v3 = vand.u32 7, %v12302_v62 }
 0x250   :  { %15469 = vst [vmem:[#allocation315_spill] sm:$0xff] %v15468_v1  ;;  %15472 = vst [vmem:[#allocation316_spill] sm:$0xff] %v15471_v61  ;;  %v809_v10 = vand.u32 7, %v12305_v41  ;;  %v15473_v9 = vmov 0  ;;  %v15476_v61 = vmov 0  ;;  %v15479_v1 = vmov 0 }
 0x251   :  { %v824_v37 = vand.u32 7, %v12318_v43  ;;  %v808_v58 = vand.u32 7, %v12321_v8  ;;  %vm12328_vm11 = vcmp.eq.s32.totalorder %v825_v3, %v11833_v44  ;;  %v12348_v3 = vadd.s32 160, %v11831_v45 }
 0x252   :  { %v15474_v9 = vsel %vm12328_vm11, 4294967295, %v15473_v9  ;;  %vm12333_vm1 = vcmp.eq.s32.totalorder %v809_v10, %v11833_v44  ;;  %v15485_v0 = vmov 0  ;;  %v15488_v38 = vmov 0 }
 0x253   :  { %15475 = vst [vmem:[#allocation317_spill] sm:$0xff] %v15474_v9  ;;  %v15477_v61 = vsel %vm12333_vm1, 4294967295, %v15476_v61  ;;  %vm12338_vm4 = vcmp.eq.s32.totalorder %v824_v37, %v11833_v44  ;;  %vm12343_vm0 = vcmp.eq.s32.totalorder %v808_v58, %v11833_v44  ;;  %v12351_v9 = vadd.s32 32, %v11831_v45 }
 0x254   :  { %15478 = vst [vmem:[#allocation318_spill] sm:$0xff] %v15477_v61  ;;  %v15480_v1 = vsel %vm12338_vm4, 4294967295, %v15479_v1  ;;  %v15483_v35 = vsel %vm12343_vm0, 4294967295, %v15482_v35  ;;  %v12357_v37 = vadd.s32 24, %v11831_v45  ;;  %v12374_v48 = vadd.s32 144, %v11831_v45 }
 0x255   :  { %15481 = vst [vmem:[#allocation319_spill] sm:$0xff] %v15480_v1  ;;  %15484 = vst [vmem:[#allocation320_spill] sm:$0xff] %v15483_v35  ;;  %v823_v1 = vand.u32 7, %v12348_v3  ;;  %v807_v58 = vand.u32 7, %v12351_v9  ;;  %v822_v35 = vand.u32 7, %v12354_v40  ;;  %v12377_v13 = vadd.s32 16, %v11831_v45 }
 0x256   :  { %v806_v11 = vand.u32 7, %v12357_v37  ;;  %v15491_v36 = vmov 0  ;;  %v15497_v53 = vmov 0  ;;  %v15503_v46 = vmov 0.0  }
 0x257   :  { %vm12364_vm0 = vcmp.eq.s32.totalorder %v823_v1, %v11833_v44  ;;  %vm12369_vm4 = vcmp.eq.s32.totalorder %v807_v58, %v11833_v44  ;;  %vm12380_vm1 = vcmp.eq.s32.totalorder %v822_v35, %v11833_v44  ;;  %v15494_v1 = vmov 0 }
 0x258   :  { %v15486_v0 = vsel %vm12364_vm0, 4294967295, %v15485_v0  ;;  %v15489_v38 = vsel %vm12369_vm4, 4294967295, %v15488_v38  ;;  %v15492_v36 = vsel %vm12380_vm1, 4294967295, %v15491_v36  ;;  %vm12385_vm11 = vcmp.eq.s32.totalorder %v806_v11, %v11833_v44 }
 0x259   :  { %15487 = vst [vmem:[#allocation321_spill] sm:$0xff] %v15486_v0  ;;  %15490 = vst [vmem:[#allocation322_spill] sm:$0xff] %v15489_v38  ;;  %v15495_v1 = vsel %vm12385_vm11, 4294967295, %v15494_v1  ;;  %v821_v58 = vand.u32 7, %v12374_v48  ;;  %v805_v38 = vand.u32 7, %v12377_v13  ;;  %v1018_v11 = vadd.s32 1, %v11831_v45 }
 0x25a   :  { %15493 = vst [vmem:[#allocation323_spill] sm:$0xff] %v15492_v36  ;;  %15496 = vst [vmem:[#allocation324_spill] sm:$0xff] %v15495_v1  ;;  %v1016_v35 = vmul.u32 2, %v11831_v45  ;;  %v15562_v50 = vmov 0  ;;  %v12861_v25 = vadd.s32 1, %v11833_v44  ;;  %v15022_v27 = vmul.u32 2, %v11833_v44 }
 0x25b   :  { %vm12392_vm4 = vcmp.eq.s32.totalorder %v821_v58, %v11833_v44  ;;  %vm12397_vm0 = vcmp.eq.s32.totalorder %v805_v38, %v11833_v44  ;;  %v1019_v1 = vmul.u32 2, %v1018_v11  ;;  %v695_v58 = vand.u32 15, %v12135_v49 }
 0x25c   :  { %v15498_v53 = vsel %vm12392_vm4, 4294967295, %v15497_v53  ;;  %vm1017_vm11 = vcmp.ge.s32.totalorder %v11833_v44, %v1016_v35  ;;  %v679_v38 = vand.u32 15, %v12143_v33  ;;  %v693_v33 = vand.u32 15, %v12181_v57 }
 0x25d   :  { %15499 = vst [vmem:[#allocation325_spill] sm:$0xff] %v15498_v53  ;;  %vm1020_vm1 = vcmp.lt.s32.totalorder %v11833_v44, %v1019_v1  ;;  %v678_v1 = vand.u32 15, %v12162_v56  ;;  %v14982_v35 = vmov 1.0   ;;  %v15021_v24 = vmul.u32 2, %v12861_v25 }
 0x25e   :  { %vm1021_vm2 = vmand %vm1017_vm11, %vm1020_vm1  ;;  %vm12420_vm11 = vcmp.eq.s32.totalorder %v695_v58, %v11833_v44  ;;  %vm12429_vm1 = vcmp.eq.s32.totalorder %v679_v38, %v11833_v44  ;;  %vm12457_vm10 = vcmp.eq.s32.totalorder %v693_v33, %v11833_v44  ;;  %v675_v58 = vand.u32 15, %v12215_v2 }
 0x25f   :  { %v12413_v11 = vsel %vm1021_vm2, 1.0, %v15503_v46  ;;  %vm12446_vm4 = vcmp.eq.s32.totalorder %v678_v1, %v11833_v44  ;;  %v690_v38 = vand.u32 15, %v12230_v55  ;;  %v15518_v2 = vmov 0 }
 0x260   :  { %v674_v1 = vand.u32 15, %v12233_v5  ;;  %v15520_v55 = vmov 0  ;;  %vm12517_vm14 = vcmp.eq.s32.totalorder %v675_v58, %v11833_v44  ;;  %v15522_v5 = vmov 0 }
 0x261   :  { %v15523_v5 = vsel %vm12517_vm14, 4294967295, %v15522_v5  ;;  %v673_v33 = vand.u32 15, %v12249_v4  ;;  %vm12529_vm12 = vcmp.eq.s32.totalorder %v690_v38, %v11833_v44  ;;  %v15526_v4 = vmov 0 }
 0x262   :  { %vm12541_vm9 = vcmp.eq.s32.totalorder %v674_v1, %v11833_v44  ;;  %v685_v58 = vand.u32 15, %v12318_v43  ;;  %v669_v38 = vand.u32 15, %v12321_v8  ;;  %v15540_v43 = vmov 0 }
 0x263   :  { %v15527_v4 = vsel %vm12541_vm9, 4294967295, %v15526_v4  ;;  %vm12565_vm8 = vcmp.eq.s32.totalorder %v673_v33, %v11833_v44  ;;  %v684_v1 = vand.u32 15, %v12348_v3  ;;  %v15542_v8 = vmov 0 }
 0x264   :  { %v15544_v3 = vmov 0  ;;  %v683_v33 = vand.u32 15, %v12354_v40  ;;  %v15548_v40 = vmov 0 }
 0x28f   :  { %v2872_v10 = vpop.f32.mrf.mxu0 }
 0x291   :  { %v2874_v61 = vpop.f32.mrf.mxu0 }
 0x293   :  { %v2876_v60 = vpop.f32.mrf.mxu0 }
 0x294   :  { %v15500_v60 = vmov 0 }
 0x295   :  { %v2877_v0 = vpop.f32.mrf.mxu0  ;;  %v15501_v60 = vsel %vm12397_vm0, 4294967295, %v15500_v60  ;;  %vm14928_vm0 = vcmask 64512  }
 0x296   :  { %15502 = vst [vmem:[#allocation326_spill] sm:$0xff] %v15501_v60  ;;  %v694_v60 = vand.u32 15, %v12146_v39 }
 0x298   :  { %vm12437_vm2 = vcmp.eq.s32.totalorder %v694_v60, %v11833_v44  ;;  %v691_v60 = vand.u32 15, %v12212_v63 }
 0x29a   :  { %vm12505_vm3 = vcmp.eq.s32.totalorder %v691_v60, %v11833_v44  ;;  %v670_v60 = vand.u32 15, %v12305_v41  ;;  %v15538_v41 = vmov 0 }
 0x29b   :  { %v15521_v55 = vsel %vm12505_vm3, 4294967295, %v15520_v55 }
 0x2d1   :  { %v2913_v0 = vpop.f32.mrf.mxu1 }
 0x2d2   :  { %v12406_v36 = vadd.f32 %v2913_v0, %v2872_v10  ;;  %v676_v0 = vand.u32 15, %v12195_v32 }
 0x2d3   :  { %v2915_v53 = vpop.f32.mrf.mxu1 }
 0x2d4   :  { %v12409_v59 = vadd.f32 %v2915_v53, %v2874_v61  ;;  %v2920_v39 = vmul.f32 %v12406_v36, %v12406_v36  ;;  %v677_v53 = vand.u32 15, %v12184_v47  ;;  %v692_v61 = vand.u32 15, %v12192_v51 }
 0x2d5   :  { %v2917_v54 = vpop.f32.mrf.mxu1  ;;  %vm12493_vm15 = vcmp.eq.s32.totalorder %v676_v0, %v11833_v44  ;;  %v686_v0 = vand.u32 15, %v12302_v62  ;;  %v15536_v62 = vmov 0 }
 0x2d6   :  { %2956 = vmatprep.subr.mxu0 %v12409_v59  ;;  %v2921_v49 = vmul.f32 %v12409_v59, %v12409_v59  ;;  %vm12481_vm6 = vcmp.eq.s32.totalorder %v692_v61, %v11833_v44  ;;  %v15519_v2 = vsel %vm12493_vm15, 4294967295, %v15518_v2  ;;  %v671_v61 = vand.u32 15, %v12285_v7 }
 0x2d7   :  { %v2918_v54 = vpop.f32.mrf.mxu1  ;;  %2957 = vmatpush1.msra.mxu0 %v12406_v36  ;;  %v15534_v7 = vmov 0 }
 0x2d8   :  { %8151 = vmatmul.mubr.msk.f32.vlgmr.msra.gmra.mxu0 %vm14928_vm0, %v12413_v11  ;;  %3027 = vmatprep.subr.mxu1 %v2921_v49  ;;  %v689_v49 = vand.u32 15, %v12246_v34  ;;  %v15524_v34 = vmov 0  ;;  %v672_v54 = vand.u32 15, %v12279_v42  ;;  %v15530_v42 = vmov 0 }
 0x2d9   :  { %3028 = vmatpush1.msra.mxu1 %v2920_v39  ;;  %8796 = vmatprep.subr.msk.mxu0 %vm12420_vm11, %v14982_v35  ;;  %v15525_v34 = vsel %vm12529_vm12, 4294967295, %v15524_v34  ;;  %v688_v39 = vand.u32 15, %v12276_v52  ;;  %v15528_v52 = vmov 0  ;;  %v15531_v42 = vsel %vm12565_vm8, 4294967295, %v15530_v42 }
 0x2da   :  { %8152 = vmatmul.mubr.msk.f32.vlgmr.msra.gmra.mxu1 %vm14928_vm0, %v12413_v11  ;;  %8797 = vmatpush3.msk.msra.mxu0 %vm12429_vm1, %v14982_v35  ;;  %vm12469_vm0 = vcmp.eq.s32.totalorder %v677_v53, %v11833_v44  ;;  %vm12553_vm5 = vcmp.eq.s32.totalorder %v689_v49, %v11833_v44  ;;  %v687_v53 = vand.u32 15, %v12282_v6  ;;  %v15532_v6 = vmov 0 }
 0x2db   :  { %8798 = vmatprep.subr.msk.mxu0 %vm12437_vm2, %v14982_v35  ;;  %8831 = vmatprep.subr.msk.mxu1 %vm12420_vm11, %v14982_v35  ;;  %v15529_v52 = vsel %vm12553_vm5, 4294967295, %v15528_v52  ;;  %vm12577_vm7 = vcmp.eq.s32.totalorder %v688_v39, %v11833_v44  ;;  %vm12589_vm13 = vcmp.eq.s32.totalorder %v672_v54, %v11833_v44  ;;  %v668_v49 = vand.u32 15, %v12351_v9 }
 0x2dc   :  { %8799 = vmatpush3.msk.msra.mxu0 %vm12446_vm4, %v14982_v35  ;;  %8832 = vmatpush3.msk.msra.mxu1 %vm12429_vm1, %v14982_v35  ;;  %v15533_v6 = vsel %vm12577_vm7, 4294967295, %v15532_v6  ;;  %v15535_v7 = vsel %vm12589_vm13, 4294967295, %v15534_v7  ;;  %v15546_v9 = vmov 0  ;;  %v667_v39 = vand.u32 15, %v12357_v37 }
 0x2dd   :  { %8800 = vmatprep.subr.msk.mxu0 %vm12457_vm10, %v14982_v35  ;;  %8833 = vmatprep.subr.msk.mxu1 %vm12437_vm2, %v14982_v35  ;;  %v682_v54 = vand.u32 15, %v12374_v48  ;;  %v15550_v37 = vmov 0  ;;  %v15552_v48 = vmov 0 }
 0x2de   :  { %8801 = vmatpush3.msk.msra.mxu0 %vm12469_vm0, %v14982_v35  ;;  %8834 = vmatpush3.msk.msra.mxu1 %vm12446_vm4, %v14982_v35 }
 0x2df   :  { %8802 = vmatprep.subr.msk.mxu0 %vm12481_vm6, %v14982_v35  ;;  %8835 = vmatprep.subr.msk.mxu1 %vm12457_vm10, %v14982_v35 }
 0x2e0   :  { %8803 = vmatpush3.msk.msra.mxu0 %vm12493_vm15, %v14982_v35  ;;  %8836 = vmatpush3.msk.msra.mxu1 %vm12469_vm0, %v14982_v35 }
 0x2e1   :  { %8804 = vmatprep.subr.msk.mxu0 %vm12505_vm3, %v14982_v35  ;;  %8837 = vmatprep.subr.msk.mxu1 %vm12481_vm6, %v14982_v35 }
 0x2e2   :  { %8805 = vmatpush3.msk.msra.mxu0 %vm12517_vm14, %v14982_v35  ;;  %8838 = vmatpush3.msk.msra.mxu1 %vm12493_vm15, %v14982_v35  ;;  %vm15588_vm15 = vmmov 0  }
 0x2e3   :  { %8806 = vmatprep.subr.msk.mxu0 %vm12529_vm12, %v14982_v35  ;;  %8839 = vmatprep.subr.msk.mxu1 %vm12505_vm3, %v14982_v35  ;;  %vm3215_vm3 = vcmask 31744  }
 0x2e4   :  { %8807 = vmatpush3.msk.msra.mxu0 %vm12541_vm9, %v14982_v35  ;;  %8840 = vmatpush3.msk.msra.mxu1 %vm12517_vm14, %v14982_v35  ;;  %vm12601_vm14 = vcmp.eq.s32.totalorder %v687_v53, %v11833_v44  ;;  %v666_v53 = vand.u32 15, %v12377_v13  ;;  %v15554_v13 = vmov 0 }
 0x2e5   :  { %8808 = vmatprep.subr.msk.mxu0 %vm12553_vm5, %v14982_v35  ;;  %8841 = vmatprep.subr.msk.mxu1 %vm12529_vm12, %v14982_v35  ;;  %v15537_v62 = vsel %vm12601_vm14, 4294967295, %v15536_v62  ;;  %vm12613_vm12 = vcmp.eq.s32.totalorder %v671_v61, %v11833_v44  ;;  %v15556_v61 = vmov 0 }
 0x2e6   :  { %8809 = vmatpush3.msk.msra.mxu0 %vm12565_vm8, %v14982_v35  ;;  %8842 = vmatpush3.msk.msra.mxu1 %vm12541_vm9, %v14982_v35  ;;  %v15539_v41 = vsel %vm12613_vm12, 4294967295, %v15538_v41  ;;  %vm12625_vm9 = vcmp.eq.s32.totalorder %v686_v0, %v11833_v44  ;;  %v15558_v0 = vmov 0 }
 0x2e7   :  { %8810 = vmatprep.subr.msk.mxu0 %vm12577_vm7, %v14982_v35  ;;  %8843 = vmatprep.subr.msk.mxu1 %vm12553_vm5, %v14982_v35  ;;  %v15541_v43 = vsel %vm12625_vm9, 4294967295, %v15540_v43  ;;  %vm12637_vm5 = vcmp.eq.s32.totalorder %v670_v60, %v11833_v44  ;;  %v647_v60 = vadd.s32 136, %v11831_v45 }
 0x2e8   :  { %8811 = vmatpush3.msk.msra.mxu0 %vm12589_vm13, %v14982_v35  ;;  %8844 = vmatpush3.msk.msra.mxu1 %vm12565_vm8, %v14982_v35  ;;  %v15543_v8 = vsel %vm12637_vm5, 4294967295, %v15542_v8  ;;  %vm12649_vm8 = vcmp.eq.s32.totalorder %v685_v58, %v11833_v44  ;;  %v12760_v58 = vadd.s32 8, %v11831_v45 }
 0x2e9   :  { %8812 = vmatprep.subr.msk.mxu0 %vm12601_vm14, %v14982_v35  ;;  %8845 = vmatprep.subr.msk.mxu1 %vm12577_vm7, %v14982_v35  ;;  %v15545_v3 = vsel %vm12649_vm8, 4294967295, %v15544_v3  ;;  %vm12661_vm7 = vcmp.eq.s32.totalorder %v669_v38, %v11833_v44  ;;  %v681_v38 = vand.u32 15, %v647_v60 }
 0x2ea   :  { %8813 = vmatpush3.msk.msra.mxu0 %vm12613_vm12, %v14982_v35  ;;  %8846 = vmatpush3.msk.msra.mxu1 %vm12589_vm13, %v14982_v35  ;;  %v15547_v9 = vsel %vm12661_vm7, 4294967295, %v15546_v9  ;;  %vm12673_vm13 = vcmp.eq.s32.totalorder %v684_v1, %v11833_v44  ;;  %v646_v1 = vadd.s32 128, %v11831_v45 }
 0x2eb   :  { %8814 = vmatprep.subr.msk.mxu0 %vm12625_vm9, %v14982_v35  ;;  %8847 = vmatprep.subr.msk.mxu1 %vm12601_vm14, %v14982_v35  ;;  %v15549_v40 = vsel %vm12673_vm13, 4294967295, %v15548_v40  ;;  %vm12685_vm14 = vcmp.eq.s32.totalorder %v668_v49, %v11833_v44  ;;  %v665_v49 = vand.u32 15, %v12760_v58 }
 0x2ec   :  { %8815 = vmatpush3.msk.msra.mxu0 %vm12637_vm5, %v14982_v35  ;;  %8848 = vmatpush3.msk.msra.mxu1 %vm12613_vm12, %v14982_v35  ;;  %v15551_v37 = vsel %vm12685_vm14, 4294967295, %v15550_v37  ;;  %vm12697_vm12 = vcmp.eq.s32.totalorder %v683_v33, %v11833_v44  ;;  %v15560_v33 = vmov 0  ;;  %v819_v12 = vand.u32 7, %v646_v1 }
 0x2ed   :  { %8816 = vmatprep.subr.msk.mxu0 %vm12649_vm8, %v14982_v35  ;;  %8849 = vmatprep.subr.msk.mxu1 %vm12625_vm9, %v14982_v35  ;;  %v15553_v48 = vsel %vm12697_vm12, 4294967295, %v15552_v48  ;;  %vm12708_vm9 = vcmp.eq.s32.totalorder %v667_v39, %v11833_v44  ;;  %v820_v39 = vand.u32 7, %v647_v60  ;;  %v15564_v60 = vmov 0 }
 0x2ee   :  { %8817 = vmatpush3.msk.msra.mxu0 %vm12661_vm7, %v14982_v35  ;;  %8850 = vmatpush3.msk.msra.mxu1 %vm12637_vm5, %v14982_v35  ;;  %v15555_v13 = vsel %vm12708_vm9, 4294967295, %v15554_v13  ;;  %vm12719_vm5 = vcmp.eq.s32.totalorder %v682_v54, %v11833_v44  ;;  %v804_v54 = vand.u32 7, %v12760_v58 }
 0x2ef   :  { %8818 = vmatprep.subr.msk.mxu0 %vm12673_vm13, %v14982_v35  ;;  %8851 = vmatprep.subr.msk.mxu1 %vm12649_vm8, %v14982_v35  ;;  %v15557_v61 = vsel %vm12719_vm5, 4294967295, %v15556_v61  ;;  %vm12730_vm8 = vcmp.eq.s32.totalorder %v666_v53, %v11833_v44  ;;  %v680_v53 = vand.u32 15, %v646_v1  ;;  %v15574_v1 = vmov 0 }
 0x2f0   :  { %8819 = vmatpush3.msk.msra.mxu0 %vm12685_vm14, %v14982_v35  ;;  %8852 = vmatpush3.msk.msra.mxu1 %vm12661_vm7, %v14982_v35  ;;  %v15559_v0 = vsel %vm12730_vm8, 4294967295, %v15558_v0  ;;  %vm15027_vm7 = vcmask 1043456  }
 0x2f1   :  { %8820 = vmatprep.subr.msk.mxu0 %vm12697_vm12, %v14982_v35  ;;  %8853 = vmatprep.subr.msk.mxu1 %vm12673_vm13, %v14982_v35 }
 0x2f2   :  { %8821 = vmatpush3.msk.msra.mxu0 %vm12708_vm9, %v14982_v35  ;;  %8854 = vmatpush3.msk.msra.mxu1 %vm12685_vm14, %v14982_v35  ;;  %vm12796_vm14 = vcmp.eq.s32.totalorder %v680_v53, %v11833_v44 }
 0x2f3   :  { %8822 = vmatprep.subr.msk.mxu0 %vm12719_vm5, %v14982_v35  ;;  %8855 = vmatprep.subr.msk.mxu1 %vm12697_vm12, %v14982_v35  ;;  %vm12788_vm12 = vcmp.eq.s32.totalorder %v804_v54, %v11833_v44 }
 0x2f4   :  { %8823 = vmatpush3.msk.msra.mxu0 %vm12730_vm8, %v14982_v35  ;;  %8856 = vmatpush3.msk.msra.mxu1 %vm12708_vm9, %v14982_v35  ;;  %vm12765_vm9 = vcmp.eq.s32.totalorder %v681_v38, %v11833_v44  ;;  %v664_v38 = vand.u32 15, %v11831_v45  ;;  %v15568_v15 = vsel %vm12788_vm12, 4294967295, %v15567_v15 }
 0x2f5   :  { %8857 = vmatprep.subr.msk.mxu1 %vm12719_vm5, %v14982_v35  ;;  %v15561_v33 = vsel %vm12765_vm9, 4294967295, %v15560_v33  ;;  %8824 = vmatprep.subr.msk.mxu0 %vm12765_vm9, %v14982_v35  ;;  %vm12783_vm5 = vcmp.eq.s32.totalorder %v820_v39, %v11833_v44  ;;  %15569 = vst [vmem:[#allocation328_spill] sm:$0xff] %v15568_v15  ;;  %v15572_v39 = vmov 0 }
 0x2f6   :  { %8858 = vmatpush3.msk.msra.mxu1 %vm12730_vm8, %v14982_v35  ;;  %vm12774_vm8 = vcmp.eq.s32.totalorder %v665_v49, %v11833_v44  ;;  %v15565_v60 = vsel %vm12783_vm5, 4294967295, %v15564_v60  ;;  %v15570_v49 = vmov 0  ;;  %vm12807_vm12 = vcmp.eq.s32.totalorder %v664_v38, %v11833_v44 }
 0x2f7   :  { %v15563_v50 = vsel %vm12774_vm8, 4294967295, %v15562_v50  ;;  %8859 = vmatprep.subr.msk.mxu1 %vm12765_vm9, %v14982_v35  ;;  %15566 = vst [vmem:[#allocation327_spill] sm:$0xff] %v15565_v60  ;;  %8825 = vmatpush3.msk.msra.mxu0 %vm12774_vm8, %v14982_v35  ;;  %v15571_v49 = vsel %vm12796_vm14, 4294967295, %v15570_v49  ;;  %v15573_v39 = vsel %vm12807_vm12, 4294967295, %v15572_v39  ;;  %vm12815_vm5 = vcmp.eq.s32.totalorder %v819_v12, %v11833_v44 }
 0x2f8   :  { %8860 = vmatpush3.msk.msra.mxu1 %vm12774_vm8, %v14982_v35  ;;  %8826 = vmatprep.subr.msk.mxu0 %vm12796_vm14, %v14982_v35  ;;  %v15575_v1 = vsel %vm12815_vm5, 4294967295, %v15574_v1  ;;  %vm14995_vm5 = vmmov 0   ;;  %v760_v12 = vadd.s32 128, %v11833_v44  ;;  %vm1013_vm9 = vcmp.lt.s32.totalorder %v11831_v45, %v15021_v24 }
 0x2f9   :  { %8861 = vmatprep.subr.msk.mxu1 %vm12796_vm14, %v14982_v35  ;;  %15576 = vst [vmem:[#allocation329_spill] sm:$0xff] %v15575_v1  ;;  %8827 = vmatpush3.msk.msra.mxu0 %vm12807_vm12, %v14982_v35 }
 0x2fa   :  { %8862 = vmatpush3.msk.msra.mxu1 %vm12807_vm12, %v14982_v35  ;;  %9108 = vmatprep.subr.mxu0 %v15503_v46  ;;  %v761_v35 = vand.u32 15, %v11833_v44  ;;  %v762_v1 = vand.u32 15, %v760_v12  ;;  %v998_v60 = vand.u32 7, %v760_v12 }
 0x2fc   :  { %vm12832_vm12 = vcmp.eq.s32.totalorder %v761_v35, %v12760_v58  ;;  %vm12837_vm14 = vcmp.eq.s32.totalorder %v762_v1, %v12760_v58  ;;  %vm12842_vm8 = vcmp.eq.s32.totalorder %v998_v60, %v11831_v45 }
 0x2fd   :  { %v15578_v14 = vsel %vm12832_vm12, 4294967295, %v15577_v14 }
 0x398   :  { %v2992_v54 = vpop.f32.mrf.mxu0 }
 0x39a   :  { %v2994_v53 = vpop.f32.mrf.mxu0  ;;  %v3063_v38 = vpop.f32.mrf.mxu1 }
 0x39b   :  { %3132 = vmatprep.mubr.f32.mxu0 %v2994_v53  ;;  %v15584_v53 = vmov 0 }
 0x39c   :  { %v3065_v15 = vpop.f32.mrf.mxu1  ;;  %3133 = vmatmul.mubr.f32.vlgmr.msra.gmra.mxu0 %v2992_v54  ;;  %v15581_v54 = vmov 0 }
 0x39d   :  { %3203 = vmatprep.mubr.f32.mxu1 %v3065_v15  ;;  %9110 = vmatprep.mubr.msk.f32.mxu0 %vm14995_vm5, %v15503_v46  ;;  %v15579_v15 = vmov 0  ;;  %v15582_v54 = vsel %vm12842_vm8, 4294967295, %v15581_v54  ;;  %vm12847_vm5 = vcmp.eq.s32.totalorder %v762_v1, %v11831_v45  ;;  %vm1010_vm8 = vcmp.ge.s32.totalorder %v11831_v45, %v15022_v27 }
 0x39e   :  { %3204 = vmatmul.mubr.f32.vlgmr.msra.gmra.mxu1 %v3063_v38  ;;  %v15580_v15 = vsel %vm12837_vm14, 4294967295, %v15579_v15  ;;  %15583 = vst [vmem:[#allocation330_spill] sm:$0xff] %v15582_v54  ;;  %v15585_v53 = vsel %vm12847_vm5, 4294967295, %v15584_v53  ;;  %v15586_v38 = vmov 1.0   ;;  %vm1014_vm13 = vmand %vm1010_vm8, %vm1013_vm9  ;;  %vm12882_vm8 = vcmp.eq.s32.totalorder %v761_v35, %v11831_v45  ;;  %v9574_v35 = vld [vmem:[%s14498_s3 + $0x54] ss:$8 sps:$4 sm:$0xff]  }
 0x39f   :  { %3361 = vmatprep.mubr.f32.mxu1 %v15503_v46  ;;  %8219 = vmatprep.subr.msk.mxu1 %vm12837_vm14, %v15586_v38  ;;  %vm15026_vm9 = vcmask 130048  }
 0x3a0   :  { %8220 = vmatpush1.msk.msra.mxu1 %vm12832_vm12, %v15586_v38 }
 0x3a1   :  { %8221 = vmatprep.subr.msk.mxu1 %vm12847_vm5, %v15586_v38 }
 0x3a2   :  { %8222 = vmatpush1.msk.msra.mxu1 %vm12882_vm8, %v15586_v38 }
 0x3a3   :  { %8226 = vmatprep.subr.msk.mxu1 %vm12837_vm14, %v15586_v38  ;;  %vm15605_vm14 = vnez %v15535_v7 }
 0x45c   :  { %v8828_v60 = vpop.f32.mrf.mxu0 }
 0x45e   :  { %v8829_v12 = vpop.f32.mrf.mxu0  ;;  %v8863_v54 = vpop.f32.mrf.mxu1 }
 0x45f   :  { %v8830_v17 = vadd.f32 %v8829_v12, %v8828_v60  ;;  %v9577_v60 = vld [vmem:[%s14498_s3 + $0x44] ss:$8 sps:$4 sm:$0xff]   ;;  %v9575_v12 = vld [vmem:[%s14498_s3 + $0x40] ss:$8 sps:$4 sm:$0xff]  }
 0x460   :  { %v8864_v1 = vpop.f32.mrf.mxu1 }
 0x461   :  { %v3138_v19 = vmul.f32 0.03125, %v8830_v17  ;;  %v8865_v16 = vadd.f32 %v8864_v1, %v8863_v54  ;;  %v9572_v54 = vld [vmem:[%s14498_s3 + $0x50] ss:$8 sps:$4 sm:$0xff]   ;;  %v9580_v1 = vld [vmem:[%s14498_s3 + $0x34] ss:$8 sps:$4 sm:$0xff]  }
 0x463   :  { %v3210_v18 = vmul.f32 %v3138_v19, %v3138_v19  ;;  %v3209_v21 = vmul.f32 0.03125, %v8865_v16  ;;  %v12872_v16 = vsel %vm1014_vm13, 1.0, %v15503_v46 }
 0x464   :  { %15587 = vst [vmem:[#allocation331_spill] sm:$0xff] %v12872_v16 }
 0x465   :  { %v3211_v23 = vsub.f32 %v3209_v21, %v3210_v18  ;;  %v9568_v21 = vld [vmem:[%s14498_s3 + $0x74] ss:$8 sps:$4 sm:$0xff]  }
 0x467   :  { %v3212_v20 = vmax.f32 %v3211_v23, 0.0  ;;  %v9569_v23 = vld [vmem:[%s14498_s3 + $0x60] ss:$8 sps:$4 sm:$0xff]  }
 0x469   :  { %v3213_v22 = vadd.f32 1e-05, %v3212_v20  ;;  %v15589_v20 = vmov 0 }
 0x46a   :  { %v15590_v20 = vsel %vm12882_vm8, 4294967295, %v15589_v20 }
 0x46b   :  { %9619 = vrsqrt.f32 %v3213_v22  ;;  %v9571_v22 = vld [vmem:[%s14498_s3 + $0x64] ss:$8 sps:$4 sm:$0xff]  }
 0x478   :  { %v9620_v17 = vpop.eup %9619 }
 0x479   :  { %9109 = vmatpush3.msk.msra.mxu0 %vm15027_vm7, %v9620_v17  ;;  %v3368_v18 = vmul.f32 %v9620_v17, %v3138_v19  ;;  %v9566_v19 = vld [vmem:[%s14498_s3 + $0x70] ss:$8 sps:$4 sm:$0xff]  }
 0x47a   :  { %9111 = vmatmul.mubr.msk.f32.vlgmr.msra.gmra.mxu0 %vm3215_vm3, %v12872_v16  ;;  %9113 = vmatprep.subr.mxu0 %v15503_v46  ;;  %v9578_v17 = vld [vmem:[%s14498_s3 + $0x30] ss:$8 sps:$4 sm:$0xff]  }
 0x47b   :  { %9114 = vmatpush3.msk.msra.mxu0 %vm15027_vm7, %v3368_v18  ;;  %9115 = vmatprep.mubr.msk.f32.mxu0 %vm15588_vm15, %v15503_v46  ;;  %v9583_v18 = vld [vmem:[%s14498_s3 + $0x24] ss:$8 sps:$4 sm:$0xff]   ;;  %vm15601_vm15 = vnez %v15527_v4 }
 0x47c   :  { %3732 = vmatprep.subr.bf16.mxu0 %v9568_v21  ;;  %v9586_v21 = vld [vmem:[%s14498_s3 + $0x14] ss:$8 sps:$4 sm:$0xff]  }
 0x47e   :  { %9116 = vmatmul.mubr.msk.f32.vlgmr.msra.gmra.mxu0 %vm3215_vm3, %v12872_v16 }
 0x47f   :  { %3733 = vmatpush1.bf16.msra.mxu0 %v9566_v19  ;;  %v9581_v19 = vld [vmem:[%s14498_s3 + $0x20] ss:$8 sps:$4 sm:$0xff]  }
 0x480   :  { %3734 = vmatprep.subr.bf16.mxu0 %v9571_v22  ;;  %v9584_v22 = vld [vmem:[%s14498_s3 + $0x10] ss:$8 sps:$4 sm:$0xff]  }
 0x483   :  { %3735 = vmatpush1.bf16.msra.mxu0 %v9569_v23  ;;  %v9589_v23 = vld [vmem:[%s14498_s3 + $0x4] ss:$8 sps:$4 sm:$0xff]  }
 0x484   :  { %3736 = vmatprep.subr.bf16.mxu0 %v9574_v35  ;;  %v9587_v35 = vld [vmem:[%s14498_s3] ss:$8 sps:$4 sm:$0xff]  }
 0x487   :  { %3737 = vmatpush1.bf16.msra.mxu0 %v9572_v54  ;;  %v9592_v54 = vld [vmem:[%s14498_s3 + $0xf4] ss:$8 sps:$4 sm:$0xff]  }
 0x488   :  { %3738 = vmatprep.subr.bf16.mxu0 %v9577_v60  ;;  %v9590_v60 = vld [vmem:[%s14498_s3 + $0xf0] ss:$8 sps:$4 sm:$0xff]  }
 0x48b   :  { %3739 = vmatpush1.bf16.msra.mxu0 %v9575_v12  ;;  %v9595_v12 = vld [vmem:[%s14498_s3 + $0xe4] ss:$8 sps:$4 sm:$0xff]  }
 0x48c   :  { %3740 = vmatprep.subr.bf16.mxu0 %v9580_v1  ;;  %v9593_v1 = vld [vmem:[%s14498_s3 + $0xe0] ss:$8 sps:$4 sm:$0xff]  }
 0x48f   :  { %3741 = vmatpush1.bf16.msra.mxu0 %v9578_v17  ;;  %v9598_v17 = vld [vmem:[%s14498_s3 + $0xd4] ss:$8 sps:$4 sm:$0xff]  }
 0x490   :  { %3742 = vmatprep.subr.bf16.mxu0 %v9583_v18  ;;  %v9596_v18 = vld [vmem:[%s14498_s3 + $0xd0] ss:$8 sps:$4 sm:$0xff]  }
 0x493   :  { %3743 = vmatpush1.bf16.msra.mxu0 %v9581_v19  ;;  %v9601_v19 = vld [vmem:[%s14498_s3 + $0xc4] ss:$8 sps:$4 sm:$0xff]  }
 0x494   :  { %3744 = vmatprep.subr.bf16.mxu0 %v9586_v21  ;;  %v9599_v21 = vld [vmem:[%s14498_s3 + $0xc0] ss:$8 sps:$4 sm:$0xff]  }
 0x497   :  { %3745 = vmatpush1.bf16.msra.mxu0 %v9584_v22  ;;  %v9604_v22 = vld [vmem:[%s14498_s3 + $0xb4] ss:$8 sps:$4 sm:$0xff]  }
 0x498   :  { %3746 = vmatprep.subr.bf16.mxu0 %v9589_v23  ;;  %v9602_v23 = vld [vmem:[%s14498_s3 + $0xb0] ss:$8 sps:$4 sm:$0xff]  }
 0x49b   :  { %3747 = vmatpush1.bf16.msra.mxu0 %v9587_v35 }
 0x49c   :  { %3748 = vmatprep.subr.bf16.mxu0 %v9592_v54 }
 0x49f   :  { %3749 = vmatpush2.bf16.msra.mxu0 %v9590_v60 }
 0x4a0   :  { %3750 = vmatprep.subr.bf16.mxu0 %v9595_v12 }
 0x4a3   :  { %3751 = vmatpush2.bf16.msra.mxu0 %v9593_v1  ;;  %v9607_v1 = vld [vmem:[%s14498_s3 + $0xa4] ss:$8 sps:$4 sm:$0xff]  }
 0x4a4   :  { %3752 = vmatprep.subr.bf16.mxu0 %v9598_v17  ;;  %v9605_v17 = vld [vmem:[%s14498_s3 + $0xa0] ss:$8 sps:$4 sm:$0xff]  }
 0x4a7   :  { %3753 = vmatpush2.bf16.msra.mxu0 %v9596_v18  ;;  %v9610_v18 = vld [vmem:[%s14498_s3 + $0x94] ss:$8 sps:$4 sm:$0xff]  }
 0x4a8   :  { %3754 = vmatprep.subr.bf16.mxu0 %v9601_v19  ;;  %v9608_v19 = vld [vmem:[%s14498_s3 + $0x90] ss:$8 sps:$4 sm:$0xff]  }
 0x4ab   :  { %3755 = vmatpush2.bf16.msra.mxu0 %v9599_v21  ;;  %v9611_v21 = vld [vmem:[%s14498_s3 + $0x80] ss:$8 sps:$4 sm:$0xff]  }
 0x4ac   :  { %3756 = vmatprep.subr.bf16.mxu0 %v9604_v22  ;;  %v9613_v22 = vld [vmem:[%s14498_s3 + $0x84] ss:$8 sps:$4 sm:$0xff]  }
 0x4af   :  { %3757 = vmatpush2.bf16.msra.mxu0 %v9602_v23 }
 0x4b0   :  { %3758 = vmatprep.subr.bf16.mxu0 %v9607_v1 }
 0x4b3   :  { %3759 = vmatpush2.bf16.msra.mxu0 %v9605_v17 }
 0x4b4   :  { %3760 = vmatprep.subr.bf16.mxu0 %v9610_v18 }
 0x4b7   :  { %3761 = vmatpush2.bf16.msra.mxu0 %v9608_v19 }
 0x4b8   :  { %3762 = vmatprep.subr.bf16.mxu0 %v9613_v22 }
 0x4bb   :  { %3763 = vmatpush2.bf16.msra.mxu0 %v9611_v21 }
 0x53a   :  { %v3289_v35 = vpop.f32.mrf.mxu0 }
 0x53b   :  { %8223 = vmatmul.mubr.msk.f32.vlgmr.msra.gmra.mxu1 %vm15026_vm9, %v3289_v35 }
 0x53c   :  { %v9112_v54 = vpop.f32.mrf.mxu0  ;;  %8227 = vmatpush1.msk.msra.mxu1 %vm12832_vm12, %v15586_v38  ;;  %3509 = vmatprep.mubr.f32.mxu1 %v15503_v46  ;;  %vm15604_vm12 = vnez %v15533_v6 }
 0x53d   :  { %8228 = vmatprep.subr.msk.mxu1 %vm12847_vm5, %v15586_v38  ;;  %vm15603_vm5 = vnez %v15531_v42 }
 0x53e   :  { %v3438_v60 = vpop.f32.mrf.mxu0  ;;  %8229 = vmatpush1.msk.msra.mxu1 %vm12882_vm8, %v15586_v38  ;;  %vm15602_vm8 = vnez %v15529_v52 }
 0x53f   :  { %8230 = vmatmul.mubr.msk.f32.vlgmr.msra.gmra.mxu1 %vm15026_vm9, %v3438_v60 }
 0x540   :  { %v9117_v12 = vpop.f32.mrf.mxu0 }
 0x5fb   :  { %v3363_v23 = vpop.f32.mrf.mxu1 }
 0x5fc   :  { %v3516_v54 = vmul.f32 %v3363_v23, %v12406_v36  ;;  %v3787_v36 = vld [vmem:[%s14499_s4 + $0x10] sm:$0xff]  ;;  %v9670_v23 = vmov 0  }
 0x5fd   :  { %v3365_v35 = vpop.f32.mrf.mxu1  ;;  %v8266_v21 = vcombine.high %v3787_v36, %v3787_v36  ;;  %v8265_v22 = vcombine.low %v3787_v36, %v3787_v36  ;;  %3846 = vmatprep.mubr.bf16.mxu1 %v9670_v23 }
 0x5fe   :  { %v3517_v12 = vmul.f32 %v3365_v35, %v12409_v59  ;;  %v9618_v59 = vld [vmem:[%s14499_s4 + $0x4] ss:$8 sps:$4 sm:$0xff]  }
 0x5ff   :  { %v3511_v60 = vpop.f32.mrf.mxu1  ;;  %8267 = vmatprep.subr.msk.bf16.mxu1 %vm15027_vm7, %v8266_v21  ;;  %v1033_v21 = vld [vmem:[%s14495_s0 + $0x30] sm:$0xff] }
 0x600   :  { %v3518_v1 = vsub.f32 %v3516_v54, %v3511_v60 }
 0x601   :  { %v3513_v17 = vpop.f32.mrf.mxu1 }
 0x602   :  { %vm3520_vm13 = vcmp.ge.f32.partialorder %v3518_v1, 0.0  ;;  %v3522_v18 = vmul.f32 0.2, %v3518_v1  ;;  %v3519_v19 = vsub.f32 %v3517_v12, %v3513_v17 }
 0x604   :  { %vm3521_vm3 = vcmp.ge.f32.partialorder %v3519_v19, 0.0  ;;  %v3523_v24 = vmul.f32 0.2, %v3519_v19  ;;  %v3524_v27 = vsel %vm3520_vm13, %v3518_v1, %v3522_v18  ;;  %vm3778_vm13 = vcmp.ge.s32.totalorder %v11833_v44, 24 }
 0x605   :  { %v3558_v31 = vpack.c.bf16 %v3524_v27, %v3524_v27  ;;  %v3568_v27 = vsub.s32 1, %v11831_v45 }
 0x606   :  { %v3525_v26 = vsel %vm3521_vm3, %v3519_v19, %v3523_v24  ;;  %v3809_v24 = vsel %vm15027_vm7, %v8265_v22, 0  ;;  %v3564_v19 = vsub.s32 0, %v11831_v45  ;;  %vm3779_vm3 = vcmp.lt.s32.totalorder %v11833_v44, 32 }
 0x607   :  { %v3559_v29 = vpack.c.bf16 %v3525_v26, %v3525_v26  ;;  %3827 = vmatpush1.bf16.msra.mxu1 %v3809_v24  ;;  %v9616_v26 = vld [vmem:[%s14499_s4] ss:$8 sps:$4 sm:$0xff]   ;;  %vm3780_vm9 = vmand %vm3778_vm13, %vm3779_vm3  ;;  %vm15028_vm7 = vcmask 195584   ;;  %vm15594_vm13 = vcmask 1043456   ;;  %vm15029_vm3 = vcmask 97280  }
 0x608   :  { %3828 = vmatprep.subr.bf16.mxu1 %v9618_v59 }
 0x609   :  { %3764 = vmatprep.mubr.bf16.mxu0 %v3559_v29  ;;  %v3560_v29 = vld [vmem:[%s14503_s8] ss:$4 sm:$0x3] }
 0x60a   :  { %3765 = vmatmul.mubr.bf16.vlgmr.msra.gmra.mxu0 %v3558_v31  ;;  %v3569_v31 = vrot.slane %v3560_v29, %v3568_v27  ;;  %v3565_v36 = vrot.slane %v3560_v29, %v3564_v19 }
 0x60b   :  { %3829 = vmatpush1.bf16.msra.mxu1 %v9616_v26 }
 0x6ca   :  { %v3766_v35 = vpop.f32.mrf.mxu0 }
 0x6cb   :  { %v13024_v59 = vadd.f32 %v3766_v35, %v3565_v36 }
 0x6cc   :  { %v3768_v54 = vpop.f32.mrf.mxu0 }
 0x6cd   :  { %v13017_v60 = vadd.f32 %v3768_v54, %v3569_v31  ;;  %15592 = vst [vmem:[#allocation333_spill] sm:$0xff] %v13024_v59 }
 0x6ce   :  { %v3770_v12 = vpop.f32.mrf.mxu0 }
 0x6cf   :  { %15591 = vst [vmem:[#allocation332_spill] sm:$0xff] %v13017_v60  ;;  %v3773_v1 = vmul.f32 0.5, %v13017_v60 }
 0x6d0   :  { %v3771_v17 = vpop.f32.mrf.mxu0 }
 0x6d1   :  { %v3774_v18 = vmul.f32 1.442695, %v3773_v1 }
 0x6d3   :  { %9621 = vpow2.f32 %v3774_v18 }
 0x6e0   :  { %v9622_v22 = vpop.eup %9621 }
 0x6e1   :  { %v3776_v23 = vmul.f32 %v9622_v22, %v1033_v21 }
 0x6e3   :  { %v13029_v24 = vadd.f32 %v3776_v23, %v13024_v59 }
 0x6e5   :  { %15593 = vst [vmem:[#allocation334_spill] sm:$0xff] %v13029_v24  ;;  %v3782_v26 = vrot.slane %v13029_v24, 4 }
 0x6e7   :  { %v3784_v45 = vsel %vm3780_vm9, %v13029_v24, %v3782_v26  ;;  %vm15595_vm9 = vmmov %vm15594_vm13 }
 0x6e8   :  { %v3788_v27 = vpack.c.bf16 %v3784_v45, %v13029_v24 }
 0x6ea   :  { %8268 = vmatmul.mubr.msk.bf16.vlgmr.msra.gmra.mxu1 %vm15028_vm7, %v3788_v27  ;;  %vm15599_vm7 = vnez %v15523_v5 }
 0x6eb   :  { %3940 = vmatprep.mubr.f32.mxu1 %v15503_v46 }
 0x7aa   :  { %v13036_v29 = vpop.f32.mrf.mxu1 }
 0x7ab   :  { %v3857_v18 = vmul.f32 %v13036_v29, %v13036_v29 }
 0x7ac   :  { %v13038_v31 = vpop.f32.mrf.mxu1 }
 0x7ad   :  { %v3858_v17 = vmul.f32 %v13038_v31, %v13038_v31 }
 0x7ae   :  { %v13040_v35 = vpop.f32.mrf.mxu1 }
 0x7af   :  { %v3859_v1 = vmul.f32 %v13040_v35, %v13040_v35 }
 0x7b0   :  { %v13042_v54 = vpop.f32.mrf.mxu1 }
 0x7b1   :  { %8269 = vmatprep.subr.msk.mxu1 %vm15594_vm13, %v13042_v54  ;;  %v3860_v12 = vmul.f32 %v13042_v54, %v13042_v54  ;;  %vm15596_vm13 = vmmov %vm15595_vm9 }
 0x7b2   :  { %8270 = vmatpush1.msk.msra.mxu1 %vm15595_vm9, %v13040_v35 }
 0x7b3   :  { %3906 = vmatprep.subr.mxu1 %v13038_v31 }
 0x7b4   :  { %3907 = vmatpush1.msra.mxu1 %v13036_v29 }
 0x7b5   :  { %8271 = vmatmul.mubr.msk.f32.vlgmr.msra.gmra.mxu1 %vm15029_vm3, %v12413_v11  ;;  %8272 = vmatprep.subr.msk.mxu1 %vm15596_vm13, %v3860_v12  ;;  %vm15597_vm13 = vnez %v15519_v2  ;;  %v15650_v12 = vld [vmem:[#allocation37_spill] sm:$0xff] }
 0x7b6   :  { %8273 = vmatpush1.msk.msra.mxu1 %vm15595_vm9, %v3859_v1  ;;  %4011 = vmatprep.mubr.f32.mxu1 %v15503_v46  ;;  %vm15598_vm9 = vnez %v15521_v55 }
 0x7b7   :  { %3977 = vmatprep.subr.mxu1 %v3858_v17  ;;  %v8385_v17 = vcombine.low %v9884_v28, %v9894_v30 }
 0x7b8   :  { %3978 = vmatpush1.msra.mxu1 %v3857_v18 }
 0x7b9   :  { %8274 = vmatmul.mubr.msk.f32.vlgmr.msra.gmra.mxu1 %vm15029_vm3, %v12413_v11  ;;  %8870 = vmatprep.subr.msk.mxu1 %vm12420_vm11, %v15586_v38  ;;  %vm15600_vm3 = vnez %v15525_v34 }
 0x7ba   :  { %8871 = vmatpush3.msk.msra.mxu1 %vm12429_vm1, %v15586_v38 }
 0x7bb   :  { %8872 = vmatprep.subr.msk.mxu1 %vm12437_vm2, %v15586_v38 }
 0x7bc   :  { %8873 = vmatpush3.msk.msra.mxu1 %vm12446_vm4, %v15586_v38 }
 0x7bd   :  { %8874 = vmatprep.subr.msk.mxu1 %vm12457_vm10, %v15586_v38 }
 0x7be   :  { %8875 = vmatpush3.msk.msra.mxu1 %vm12469_vm0, %v15586_v38 }
 0x7bf   :  { %8876 = vmatprep.subr.msk.mxu1 %vm12481_vm6, %v15586_v38 }
 0x7c0   :  { %8877 = vmatpush3.msk.msra.mxu1 %vm15597_vm13, %v15586_v38 }
 0x7c1   :  { %8878 = vmatprep.subr.msk.mxu1 %vm15598_vm9, %v15586_v38 }
 0x7c2   :  { %8879 = vmatpush3.msk.msra.mxu1 %vm15599_vm7, %v15586_v38 }
 0x7c3   :  { %8880 = vmatprep.subr.msk.mxu1 %vm15600_vm3, %v15586_v38  ;;  %vm15606_vm3 = vnez %v15537_v62 }
 0x7c4   :  { %8881 = vmatpush3.msk.msra.mxu1 %vm15601_vm15, %v15586_v38  ;;  %vm15607_vm15 = vnez %v15539_v41 }
 0x7c5   :  { %8882 = vmatprep.subr.msk.mxu1 %vm15602_vm8, %v15586_v38  ;;  %vm15608_vm8 = vnez %v15541_v43 }
 0x7c6   :  { %8883 = vmatpush3.msk.msra.mxu1 %vm15603_vm5, %v15586_v38  ;;  %vm15609_vm5 = vnez %v15543_v8 }
 0x7c7   :  { %8884 = vmatprep.subr.msk.mxu1 %vm15604_vm12, %v15586_v38  ;;  %vm15610_vm12 = vnez %v15545_v3 }
 0x7c8   :  { %8885 = vmatpush3.msk.msra.mxu1 %vm15605_vm14, %v15586_v38  ;;  %vm15611_vm14 = vnez %v15547_v9 }
 0x7c9   :  { %8886 = vmatprep.subr.msk.mxu1 %vm15606_vm3, %v15586_v38  ;;  %vm15612_vm3 = vnez %v15549_v40 }
 0x7ca   :  { %8887 = vmatpush3.msk.msra.mxu1 %vm15607_vm15, %v15586_v38  ;;  %vm15613_vm15 = vnez %v15551_v37 }
 0x7cb   :  { %8888 = vmatprep.subr.msk.mxu1 %vm15608_vm8, %v15586_v38  ;;  %vm15614_vm8 = vnez %v15553_v48 }
 0x7cc   :  { %8889 = vmatpush3.msk.msra.mxu1 %vm15609_vm5, %v15586_v38  ;;  %vm15615_vm5 = vnez %v15555_v13 }
 0x7cd   :  { %8890 = vmatprep.subr.msk.mxu1 %vm15610_vm12, %v15586_v38  ;;  %vm15616_vm12 = vnez %v15557_v61 }
 0x7ce   :  { %8891 = vmatpush3.msk.msra.mxu1 %vm15611_vm14, %v15586_v38  ;;  %vm15617_vm14 = vnez %v15559_v0 }
 0x7cf   :  { %8892 = vmatprep.subr.msk.mxu1 %vm15612_vm3, %v15586_v38  ;;  %vm15618_vm3 = vnez %v15561_v33 }
 0x7d0   :  { %8893 = vmatpush3.msk.msra.mxu1 %vm15613_vm15, %v15586_v38  ;;  %vm15619_vm15 = vnez %v15563_v50 }
 0x7d1   :  { %8894 = vmatprep.subr.msk.mxu1 %vm15614_vm8, %v15586_v38  ;;  %vm15620_vm8 = vnez %v15571_v49 }
 0x7d2   :  { %8895 = vmatpush3.msk.msra.mxu1 %vm15615_vm5, %v15586_v38  ;;  %vm15621_vm5 = vnez %v15573_v39 }
 0x7d3   :  { %8896 = vmatprep.subr.msk.mxu1 %vm15616_vm12, %v15586_v38 }
 0x7d4   :  { %8897 = vmatpush3.msk.msra.mxu1 %vm15617_vm14, %v15586_v38 }
 0x7d5   :  { %8898 = vmatprep.subr.msk.mxu1 %vm15618_vm3, %v15586_v38 }
 0x7d6   :  { %8899 = vmatpush3.msk.msra.mxu1 %vm15619_vm15, %v15586_v38 }
 0x7d7   :  { %8900 = vmatprep.subr.msk.mxu1 %vm15620_vm8, %v15586_v38 }
 0x7d8   :  { %8901 = vmatpush3.msk.msra.mxu1 %vm15621_vm5, %v15586_v38 }
 0x7d9   :  { %8905 = vmatprep.subr.msk.mxu1 %vm12420_vm11, %v15586_v38  ;;  %vm15626_vm11 = vnez %v15533_v6 }
 0x875   :  { %v3942_v19 = vpop.f32.mrf.mxu1 }
 0x877   :  { %v3944_v36 = vpop.f32.mrf.mxu1 }
 0x878   :  { %4082 = vmatprep.mubr.f32.mxu1 %v3944_v36 }
 0x879   :  { %4083 = vmatmul.mubr.f32.vlgmr.msra.gmra.mxu1 %v3942_v19  ;;  %v4013_v21 = vpop.f32.mrf.mxu1 }
 0x87a   :  { %8906 = vmatpush3.msk.msra.mxu1 %vm12429_vm1, %v15586_v38  ;;  %vm15628_vm1 = vnez %v15537_v62 }
 0x87b   :  { %8907 = vmatprep.subr.msk.mxu1 %vm12437_vm2, %v15586_v38  ;;  %v4015_v22 = vpop.f32.mrf.mxu1  ;;  %vm15629_vm2 = vnez %v15539_v41 }
 0x87c   :  { %8908 = vmatpush3.msk.msra.mxu1 %vm12446_vm4, %v15586_v38  ;;  %4153 = vmatprep.mubr.f32.mxu1 %v4015_v22  ;;  %vm15622_vm4 = vnez %v15525_v34 }
 0x87d   :  { %8909 = vmatprep.subr.msk.mxu1 %vm12457_vm10, %v15586_v38  ;;  %vm15623_vm10 = vnez %v15527_v4  ;;  %v15638_v4 = vmul.u32 2, %v11833_v44 }
 0x87e   :  { %8910 = vmatpush3.msk.msra.mxu1 %vm12469_vm0, %v15586_v38  ;;  %vm15625_vm0 = vnez %v15531_v42 }
 0x87f   :  { %8911 = vmatprep.subr.msk.mxu1 %vm12481_vm6, %v15586_v38  ;;  %vm15624_vm6 = vnez %v15529_v52  ;;  %v15639_v52 = vmul.u32 2, %v12861_v25 }
 0x880   :  { %8912 = vmatpush3.msk.msra.mxu1 %vm15597_vm13, %v15586_v38  ;;  %vm15630_vm13 = vnez %v15541_v43 }
 0x881   :  { %8913 = vmatprep.subr.msk.mxu1 %vm15598_vm9, %v15586_v38  ;;  %vm15631_vm9 = vnez %v15543_v8 }
 0x882   :  { %8914 = vmatpush3.msk.msra.mxu1 %vm15599_vm7, %v15586_v38  ;;  %vm15627_vm7 = vnez %v15535_v7 }
 0x883   :  { %8915 = vmatprep.subr.msk.mxu1 %vm15622_vm4, %v15586_v38  ;;  %vm15632_vm4 = vnez %v15545_v3 }
 0x884   :  { %8916 = vmatpush3.msk.msra.mxu1 %vm15623_vm10, %v15586_v38  ;;  %vm15633_vm10 = vnez %v15547_v9 }
 0x885   :  { %8917 = vmatprep.subr.msk.mxu1 %vm15624_vm6, %v15586_v38  ;;  %vm15634_vm6 = vnez %v15549_v40 }
 0x886   :  { %8918 = vmatpush3.msk.msra.mxu1 %vm15625_vm0, %v15586_v38  ;;  %vm15635_vm0 = vnez %v15551_v37 }
 0x887   :  { %8919 = vmatprep.subr.msk.mxu1 %vm15626_vm11, %v15586_v38  ;;  %vm15636_vm11 = vnez %v15553_v48 }
 0x888   :  { %8920 = vmatpush3.msk.msra.mxu1 %vm15627_vm7, %v15586_v38  ;;  %vm15637_vm7 = vnez %v15555_v13 }
 0x889   :  { %8921 = vmatprep.subr.msk.mxu1 %vm15628_vm1, %v15586_v38  ;;  %vm15642_vm1 = vnez %v15578_v14 }
 0x88a   :  { %8922 = vmatpush3.msk.msra.mxu1 %vm15629_vm2, %v15586_v38  ;;  %vm15643_vm2 = vnez %v15585_v53 }
 0x88b   :  { %8923 = vmatprep.subr.msk.mxu1 %vm15630_vm13, %v15586_v38  ;;  %vm15644_vm13 = vnez %v15590_v20 }
 0x88c   :  { %8924 = vmatpush3.msk.msra.mxu1 %vm15631_vm9, %v15586_v38  ;;  %vm15645_vm9 = vcmask 130048  }
 0x88d   :  { %8925 = vmatprep.subr.msk.mxu1 %vm15632_vm4, %v15586_v38  ;;  %vm15646_vm4 = vmmov %vm15645_vm9 }
 0x88e   :  { %8926 = vmatpush3.msk.msra.mxu1 %vm15633_vm10, %v15586_v38  ;;  %vm15647_vm10 = vmmov %vm15646_vm4 }
 0x88f   :  { %8927 = vmatprep.subr.msk.mxu1 %vm15634_vm6, %v15586_v38  ;;  %vm15648_vm6 = vmmov %vm15646_vm4 }
 0x890   :  { %8928 = vmatpush3.msk.msra.mxu1 %vm15635_vm0, %v15586_v38 }
 0x891   :  { %8929 = vmatprep.subr.msk.mxu1 %vm15636_vm11, %v15586_v38 }
 0x892   :  { %8930 = vmatpush3.msk.msra.mxu1 %vm15637_vm7, %v15586_v38 }
 0x893   :  { %8931 = vmatprep.subr.msk.mxu1 %vm15616_vm12, %v15586_v38  ;;  %vm15039_vm12 = vcmask 48128  }
 0x894   :  { %8932 = vmatpush3.msk.msra.mxu1 %vm15617_vm14, %v15586_v38  ;;  %9120 = vmatprep.mubr.msk.f32.mxu0 %vm15039_vm12, %v12872_v16  ;;  %vm1024_vm14 = vcmp.lt.s32.totalorder %v12760_v58, %v15639_v52 }
 0x895   :  { %8933 = vmatprep.subr.msk.mxu1 %vm15618_vm3, %v15586_v38  ;;  %vm15641_vm3 = vnez %v15580_v15 }
 0x896   :  { %8934 = vmatpush3.msk.msra.mxu1 %vm15619_vm15, %v15586_v38 }
 0x897   :  { %8935 = vmatprep.subr.msk.mxu1 %vm15620_vm8, %v15586_v38  ;;  %vm15038_vm8 = vcmask 1045504  }
 0x898   :  { %8936 = vmatpush3.msk.msra.mxu1 %vm15621_vm5, %v15586_v38  ;;  %vm1023_vm5 = vcmp.ge.s32.totalorder %v12760_v58, %v15638_v4 }
 0x899   :  { %4154 = vmatmul.mubr.f32.vlgmr.msra.gmra.mxu1 %v4013_v21  ;;  %vm1025_vm15 = vmand %vm1023_vm5, %vm1024_vm14 }
 0x89a   :  { %v13266_v6 = vsel %vm1025_vm15, 1.0, %v15503_v46 }
 0x89b   :  { %15640 = vst [vmem:[#allocation335_spill] sm:$0xff] %v13266_v6 }
 0x939   :  { %v8902_v10 = vpop.f32.mrf.mxu1 }
 0x93b   :  { %v8903_v56 = vpop.f32.mrf.mxu1 }
 0x93c   :  { %v8904_v57 = vadd.f32 %v8903_v56, %v8902_v10 }
 0x93e   :  { %v4088_v51 = vmul.f32 0.03125, %v8904_v57 }
 0x940   :  { %v4160_v63 = vmul.f32 %v4088_v51, %v4088_v51 }
 0x959   :  { %v8937_v47 = vpop.f32.mrf.mxu1 }
 0x95b   :  { %v8938_v50 = vpop.f32.mrf.mxu1 }
 0x95c   :  { %v8939_v32 = vadd.f32 %v8938_v50, %v8937_v47 }
 0x95e   :  { %v4159_v2 = vmul.f32 0.03125, %v8939_v32 }
 0x960   :  { %v4161_v55 = vsub.f32 %v4159_v2, %v4160_v63 }
 0x962   :  { %v4162_v5 = vmax.f32 %v4161_v55, 0.0 }
 0x964   :  { %v4163_v34 = vadd.f32 1e-05, %v4162_v5 }
 0x966   :  { %9623 = vrsqrt.f32 %v4163_v34 }
 0x973   :  { %v9624_v42 = vpop.eup %9623 }
 0x974   :  { %9118 = vmatprep.subr.msk.mxu0 %vm15038_vm8, %v9624_v42  ;;  %v4333_v25 = vmul.f32 %v9624_v42, %v4088_v51 }
 0x975   :  { %9119 = vmatpush3.msk.msra.mxu0 %vm15038_vm8, %v9624_v42 }
 0x976   :  { %9121 = vmatmul.mubr.msk.f32.vlgmr.msra.gmra.mxu0 %vm15039_vm12, %v13266_v6  ;;  %8342 = vmatprep.subr.msk.mxu0 %vm15641_vm3, %v15586_v38 }
 0x977   :  { %8343 = vmatpush1.msk.msra.mxu0 %vm15642_vm1, %v15586_v38  ;;  %4320 = vmatprep.mubr.f32.mxu0 %v15503_v46 }
 0x978   :  { %8344 = vmatprep.subr.msk.mxu0 %vm15643_vm2, %v15586_v38 }
 0x979   :  { %8345 = vmatpush1.msk.msra.mxu0 %vm15644_vm13, %v15586_v38 }
 0x97a   :  { %9123 = vmatprep.subr.msk.mxu0 %vm15038_vm8, %v4333_v25 }
 0xa36   :  { %v9122_v44 = vpop.f32.mrf.mxu0 }
 0xa38   :  { %v4241_v7 = vpop.f32.mrf.mxu0 }
 0xa39   :  { %8346 = vmatmul.mubr.msk.f32.vlgmr.msra.gmra.mxu0 %vm15645_vm9, %v4241_v7 }
 0xa3a   :  { %9124 = vmatpush3.msk.msra.mxu0 %vm15038_vm8, %v4333_v25  ;;  %4326 = vmatprep.mubr.f32.mxu0 %v15503_v46 }
 0xa3b   :  { %8351 = vmatprep.subr.msk.mxu0 %vm15641_vm3, %v15586_v38 }
 0xa3d   :  { %8347 = vmatmul.mubr.msk.f32.gmra.mxu0 %vm15646_vm4, %v9122_v44 }
 0xa3e   :  { %9125 = vmatprep.mubr.msk.f32.mxu0 %vm15039_vm12, %v12872_v16 }
 0xa41   :  { %9126 = vmatmul.mubr.msk.f32.vlgmr.msra.gmra.mxu0 %vm15039_vm12, %v13266_v6 }
 0xa42   :  { %8352 = vmatpush1.msk.msra.mxu0 %vm15642_vm1, %v15586_v38  ;;  %4482 = vmatprep.mubr.f32.mxu0 %v15503_v46 }
 0xa43   :  { %8353 = vmatprep.subr.msk.mxu0 %vm15643_vm2, %v15586_v38 }
 0xa44   :  { %8354 = vmatpush1.msk.msra.mxu0 %vm15644_vm13, %v15586_v38 }
 0xaf9   :  { %v4322_v62 = vpop.f32.mrf.mxu0 }
 0xafa   :  { %v4495_v14 = vmul.f32 %v4322_v62, %v13036_v29 }
 0xafb   :  { %v4324_v41 = vpop.f32.mrf.mxu0 }
 0xafc   :  { %v4496_v37 = vmul.f32 %v4324_v41, %v13038_v31 }
 0xafd   :  { %v4328_v43 = vpop.f32.mrf.mxu0 }
 0xafe   :  { %v4497_v61 = vmul.f32 %v4328_v43, %v13040_v35  ;;  %v8386_v35 = vcombine.high %v9884_v28, %v9894_v30 }
 0xaff   :  { %v4330_v8 = vpop.f32.mrf.mxu0 }
 0xb00   :  { %v4498_v33 = vmul.f32 %v4330_v8, %v13042_v54  ;;  %v15649_v54 = vld [vmem:[#allocation38_spill] sm:$0xff] }
 0xb01   :  { %v9127_v3 = vpop.f32.mrf.mxu0  ;;  %v8388_v1 = vcombine.high %v15650_v12, %v15649_v54  ;;  %v8387_v18 = vcombine.low %v15650_v12, %v15649_v54 }
 0xb03   :  { %v4403_v9 = vpop.f32.mrf.mxu0 }
 0xb04   :  { %8355 = vmatmul.mubr.msk.f32.vlgmr.msra.gmra.mxu0 %vm15647_vm10, %v4403_v9 }
 0xb05   :  { %4488 = vmatprep.mubr.f32.mxu0 %v15503_v46 }
 0xb08   :  { %8356 = vmatmul.mubr.msk.f32.gmra.mxu0 %vm15648_vm6, %v9127_v3 }
 0xbc4   :  { %v4484_v40 = vpop.f32.mrf.mxu0 }
 0xbc5   :  { %v4499_v48 = vsub.f32 %v4495_v14, %v4484_v40 }
 0xbc6   :  { %v4486_v13 = vpop.f32.mrf.mxu0 }
 0xbc7   :  { %vm4503_vm0 = vcmp.ge.f32.partialorder %v4499_v48, 0.0  ;;  %v4507_v0 = vmul.f32 0.2, %v4499_v48  ;;  %v4500_v58 = vsub.f32 %v4496_v37, %v4486_v13 }
 0xbc8   :  { %v4490_v49 = vpop.f32.mrf.mxu0 }
 0xbc9   :  { %v13314_v39 = vsel %vm4503_vm0, %v4499_v48, %v4507_v0  ;;  %vm4504_vm11 = vcmp.ge.f32.partialorder %v4500_v58, 0.0  ;;  %v4508_v15 = vmul.f32 0.2, %v4500_v58  ;;  %v4501_v53 = vsub.f32 %v4497_v61, %v4490_v49 }
 0xbca   :  { %v4492_v20 = vpop.f32.mrf.mxu0 }
 0xbcb   :  { %v4512_v23 = vsel %vm4504_vm11, %v4500_v58, %v4508_v15  ;;  %vm4505_vm7 = vcmp.ge.f32.partialorder %v4501_v53, 0.0  ;;  %v4509_v26 = vmul.f32 0.2, %v4501_v53  ;;  %v4502_v45 = vsub.f32 %v4498_v33, %v4492_v20 }
 0xbcd   :  { %v13316_v27 = vsel %vm4505_vm7, %v4501_v53, %v4509_v26  ;;  %vm4506_vm5 = vcmp.ge.f32.partialorder %v4502_v45, 0.0  ;;  %v4510_v29 = vmul.f32 0.2, %v4502_v45 }
 0xbcf   :  { %v4514_v31 = vsel %vm4506_vm5, %v4502_v45, %v4510_v29 }
 0xbd0   :  { %9663 = dma.done.wait [#allocation4], 8192 }
 0xbd1   :  { %9664 = vsyncadd [#allocation4], 4294959104  ;;  %v15651_v19 = vld [vmem:[#allocation35_spill] sm:$0xff]  ;;  %v15652_v36 = vld [vmem:[#allocation33_spill] sm:$0xff]  ;;  %4905 = vmatprep.subr.bf16.mxu1 %v8386_v35  ;;  %4948 = vmatprep.subr.bf16.mxu0 %v8388_v1  ;;  %v4584_v33 = vpack.c.bf16 %v4514_v31, %v4512_v23  ;;  %vm15719_vm14 = vcmask 1043456   ;;  %vm15723_vm2 = vcmask 97280  }
 0xbd2   :  { %v8382_v21 = vcombine.high %v15652_v36, %v15651_v19  ;;  %v15653_v22 = vld [vmem:[#allocation36_spill] sm:$0xff]  ;;  %v15654_v10 = vld [vmem:[#allocation34_spill] sm:$0xff]  ;;  %4906 = vmatpush1.bf16.msra.mxu1 %v8385_v17  ;;  %4949 = vmatpush1.bf16.msra.mxu0 %v8387_v18  ;;  %v8381_v57 = vcombine.low %v15652_v36, %v15651_v19  ;;  %v15655_v30 = vld [vmem:[#allocation31_spill] sm:$0xff] }
 0xbd3   :  { %v8384_v56 = vcombine.high %v15654_v10, %v15653_v22  ;;  %v8383_v28 = vcombine.low %v15654_v10, %v15653_v22  ;;  %v15656_v47 = vld [vmem:[#allocation29_spill] sm:$0xff]  ;;  %v15657_v50 = vld [vmem:[#allocation32_spill] sm:$0xff]  ;;  %v15658_v32 = vld [vmem:[#allocation30_spill] sm:$0xff]  ;;  %4937 = vmatprep.mubr.bf16.mxu1 %v4584_v33  ;;  %4980 = vmatprep.mubr.bf16.mxu0 %v4584_v33 }
 0xbd4   :  { %4907 = vmatprep.subr.bf16.mxu1 %v8382_v21  ;;  %v8378_v51 = vcombine.high %v15656_v47, %v15655_v30  ;;  %v8380_v63 = vcombine.high %v15658_v32, %v15657_v50  ;;  %v8377_v2 = vcombine.low %v15656_v47, %v15655_v30  ;;  %v8379_v55 = vcombine.low %v15658_v32, %v15657_v50  ;;  %v15659_v5 = vld [vmem:[#allocation27_spill] sm:$0xff]  ;;  %v15660_v34 = vld [vmem:[#allocation25_spill] sm:$0xff]  ;;  %v15661_v52 = vld [vmem:[#allocation28_spill] sm:$0xff] }
 0xbd5   :  { %4950 = vmatprep.subr.bf16.mxu0 %v8384_v56  ;;  %v8374_v4 = vcombine.high %v15660_v34, %v15659_v5  ;;  %v15662_v42 = vld [vmem:[#allocation26_spill] sm:$0xff]  ;;  %v8373_v44 = vcombine.low %v15660_v34, %v15659_v5  ;;  %v15663_v62 = vld [vmem:[#allocation23_spill] sm:$0xff]  ;;  %v15664_v41 = vld [vmem:[#allocation21_spill] sm:$0xff] }
 0xbd6   :  { %4908 = vmatpush1.bf16.msra.mxu1 %v8381_v57  ;;  %4951 = vmatpush1.bf16.msra.mxu0 %v8383_v28  ;;  %v8376_v25 = vcombine.high %v15662_v42, %v15661_v52  ;;  %v8375_v7 = vcombine.low %v15662_v42, %v15661_v52  ;;  %v8370_v43 = vcombine.high %v15664_v41, %v15663_v62  ;;  %v15665_v8 = vld [vmem:[#allocation24_spill] sm:$0xff]  ;;  %v15666_v3 = vld [vmem:[#allocation22_spill] sm:$0xff]  ;;  %v15667_v37 = vld [vmem:[#allocation19_spill] sm:$0xff] }
 0xbd7   :  { %4909 = vmatprep.subr.bf16.mxu1 %v8378_v51  ;;  %4952 = vmatprep.subr.bf16.mxu0 %v8380_v63  ;;  %v8372_v9 = vcombine.high %v15666_v3, %v15665_v8  ;;  %v8369_v14 = vcombine.low %v15664_v41, %v15663_v62  ;;  %v8371_v40 = vcombine.low %v15666_v3, %v15665_v8  ;;  %v15668_v48 = vld [vmem:[#allocation17_spill] sm:$0xff]  ;;  %v15669_v61 = vld [vmem:[#allocation20_spill] sm:$0xff]  ;;  %v15670_v0 = vld [vmem:[#allocation18_spill] sm:$0xff] }
 0xbd8   :  { %v8366_v13 = vcombine.high %v15668_v48, %v15667_v37  ;;  %v8368_v58 = vcombine.high %v15670_v0, %v15669_v61  ;;  %v8365_v49 = vcombine.low %v15668_v48, %v15667_v37  ;;  %v8367_v15 = vcombine.low %v15670_v0, %v15669_v61  ;;  %v15671_v53 = vld [vmem:[#allocation15_spill] sm:$0xff]  ;;  %v15672_v20 = vld [vmem:[#allocation13_spill] sm:$0xff]  ;;  %v15673_v45 = vld [vmem:[#allocation16_spill] sm:$0xff] }
 0xbd9   :  { %v8362_v26 = vcombine.high %v15672_v20, %v15671_v53  ;;  %v15674_v29 = vld [vmem:[#allocation14_spill] sm:$0xff]  ;;  %v8361_v23 = vcombine.low %v15672_v20, %v15671_v53  ;;  %v15675_v54 = vld [vmem:[#allocation11_spill] sm:$0xff]  ;;  %v15676_v12 = vld [vmem:[#allocation9_spill] sm:$0xff] }
 0xbda   :  { %4910 = vmatpush1.bf16.msra.mxu1 %v8377_v2  ;;  %4953 = vmatpush1.bf16.msra.mxu0 %v8379_v55  ;;  %v8364_v35 = vcombine.high %v15674_v29, %v15673_v45  ;;  %v8363_v31 = vcombine.low %v15674_v29, %v15673_v45  ;;  %v8358_v1 = vcombine.high %v15676_v12, %v15675_v54  ;;  %v15677_v17 = vld [vmem:[#allocation12_spill] sm:$0xff]  ;;  %v15678_v18 = vld [vmem:[#allocation10_spill] sm:$0xff]  ;;  %v15679_v22 = vld [vmem:[#allocation69_spill] sm:$0xff] }
 0xbdb   :  { %4911 = vmatprep.subr.bf16.mxu1 %v8374_v4  ;;  %4954 = vmatprep.subr.bf16.mxu0 %v8376_v25  ;;  %v8360_v19 = vcombine.high %v15678_v18, %v15677_v17  ;;  %v8357_v36 = vcombine.low %v15676_v12, %v15675_v54  ;;  %v8359_v21 = vcombine.low %v15678_v18, %v15677_v17  ;;  %v15680_v10 = vld [vmem:[#allocation67_spill] sm:$0xff]  ;;  %v15681_v57 = vld [vmem:[#allocation70_spill] sm:$0xff]  ;;  %v15682_v28 = vld [vmem:[#allocation68_spill] sm:$0xff] }
 0xbdc   :  { %v8418_v56 = vcombine.high %v15680_v10, %v15679_v22  ;;  %v8420_v30 = vcombine.high %v15682_v28, %v15681_v57  ;;  %v8417_v47 = vcombine.low %v15680_v10, %v15679_v22  ;;  %v8419_v51 = vcombine.low %v15682_v28, %v15681_v57  ;;  %v15683_v50 = vld [vmem:[#allocation65_spill] sm:$0xff]  ;;  %v15684_v32 = vld [vmem:[#allocation63_spill] sm:$0xff]  ;;  %v15685_v2 = vld [vmem:[#allocation66_spill] sm:$0xff] }
 0xbdd   :  { %v8414_v63 = vcombine.high %v15684_v32, %v15683_v50  ;;  %v15686_v55 = vld [vmem:[#allocation64_spill] sm:$0xff]  ;;  %v8413_v34 = vcombine.low %v15684_v32, %v15683_v50  ;;  %v15687_v52 = vld [vmem:[#allocation61_spill] sm:$0xff]  ;;  %v15688_v42 = vld [vmem:[#allocation59_spill] sm:$0xff] }
 0xbde   :  { %4912 = vmatpush1.bf16.msra.mxu1 %v8373_v44  ;;  %4955 = vmatpush1.bf16.msra.mxu0 %v8375_v7  ;;  %v8416_v5 = vcombine.high %v15686_v55, %v15685_v2  ;;  %v8415_v4 = vcombine.low %v15686_v55, %v15685_v2  ;;  %v8410_v25 = vcombine.high %v15688_v42, %v15687_v52  ;;  %v15689_v44 = vld [vmem:[#allocation62_spill] sm:$0xff]  ;;  %v15690_v7 = vld [vmem:[#allocation60_spill] sm:$0xff]  ;;  %v15691_v8 = vld [vmem:[#allocation57_spill] sm:$0xff] }
 0xbdf   :  { %4913 = vmatprep.subr.bf16.mxu1 %v8370_v43  ;;  %4956 = vmatprep.subr.bf16.mxu0 %v8372_v9  ;;  %v8412_v62 = vcombine.high %v15690_v7, %v15689_v44  ;;  %v8409_v41 = vcombine.low %v15688_v42, %v15687_v52  ;;  %v8411_v43 = vcombine.low %v15690_v7, %v15689_v44  ;;  %v15692_v3 = vld [vmem:[#allocation55_spill] sm:$0xff]  ;;  %v15695_v61 = vld [vmem:[#allocation53_spill] sm:$0xff]  ;;  %v15697_v33 = vld [vmem:[#allocation54_spill] sm:$0xff] }
 0xbe0   :  { %v8406_v9 = vcombine.high %v15692_v3, %v15691_v8  ;;  %v8405_v48 = vcombine.low %v15692_v3, %v15691_v8  ;;  %v15696_v0 = vld [vmem:[#allocation51_spill] sm:$0xff]  ;;  %vm15720_vm15 = vmmov %vm15719_vm14  ;;  %v15831_v60 = vld [vmem:[#allocation324_spill] sm:$0xff] }
 0xbe1   :  { %v8401_v53 = vcombine.low %v15696_v0, %v15695_v61  ;;  %v15700_v45 = vld [vmem:[#allocation47_spill] sm:$0xff]  ;;  %vm15721_vm3 = vmmov %vm15719_vm14  ;;  %v15851_v6 = vld [vmem:[#allocation329_spill] sm:$0xff] }
 0xbe2   :  { %4914 = vmatpush1.bf16.msra.mxu1 %v8369_v14  ;;  %4957 = vmatpush1.bf16.msra.mxu0 %v8371_v40  ;;  %v15693_v14 = vld [vmem:[#allocation58_spill] sm:$0xff]  ;;  %v15694_v40 = vld [vmem:[#allocation56_spill] sm:$0xff]  ;;  %v15704_v17 = vld [vmem:[#allocation43_spill] sm:$0xff] }
 0xbe3   :  { %4915 = vmatprep.subr.bf16.mxu1 %v8366_v13  ;;  %4958 = vmatprep.subr.bf16.mxu0 %v8368_v58  ;;  %v8408_v37 = vcombine.high %v15694_v40, %v15693_v14  ;;  %v8407_v13 = vcombine.low %v15694_v40, %v15693_v14  ;;  %v8402_v58 = vcombine.high %v15696_v0, %v15695_v61  ;;  %v15708_v57 = vld [vmem:[#allocation39_spill] sm:$0xff]  ;;  %vm15722_vm1 = vmmov %vm15721_vm3  ;;  %v15735_v14 = vld [vmem:[#allocation300_spill] sm:$0xff] }
 0xbe4   :  { %vm15724_vm13 = vmmov %vm15723_vm2  ;;  %v15731_v3 = vld [vmem:[#allocation299_spill] sm:$0xff]  ;;  %v15749_v0 = vld [vmem:[#allocation293_spill] sm:$0xff] }
 0xbe5   :  { %vm15725_vm9 = vmmov %vm15722_vm1  ;;  %vm15732_vm7 = vnez %v15731_v3  ;;  %v15737_v40 = vld [vmem:[#allocation279_spill] sm:$0xff] }
 0xbe6   :  { %4916 = vmatpush1.bf16.msra.mxu1 %v8365_v49  ;;  %4959 = vmatpush1.bf16.msra.mxu0 %v8367_v15  ;;  %v15698_v49 = vld [vmem:[#allocation52_spill] sm:$0xff]  ;;  %vm15726_vm4 = vmmov %vm15722_vm1  ;;  %v15747_v61 = vld [vmem:[#allocation303_spill] sm:$0xff] }
 0xbe7   :  { %4917 = vmatprep.subr.bf16.mxu1 %v8362_v26  ;;  %4960 = vmatprep.subr.bf16.mxu0 %v8364_v35  ;;  %v8404_v15 = vcombine.high %v15698_v49, %v15697_v33  ;;  %v8403_v20 = vcombine.low %v15698_v49, %v15697_v33  ;;  %v15699_v26 = vld [vmem:[#allocation49_spill] sm:$0xff]  ;;  %v15701_v35 = vld [vmem:[#allocation50_spill] sm:$0xff]  ;;  %vm15727_vm10 = vmmov %vm15722_vm1 }
 0xbe8   :  { %v8398_v29 = vcombine.high %v15700_v45, %v15699_v26  ;;  %v8397_v54 = vcombine.low %v15700_v45, %v15699_v26  ;;  %vm15728_vm6 = vmmov %vm15722_vm1  ;;  %v15753_v33 = vld [vmem:[#allocation277_spill] sm:$0xff]  ;;  %v15763_v26 = vld [vmem:[#allocation307_spill] sm:$0xff] }
 0xbe9   :  { %vm15729_vm0 = vmmov %vm15723_vm2  ;;  %v15755_v49 = vld [vmem:[#allocation305_spill] sm:$0xff]  ;;  %v15765_v45 = vld [vmem:[#allocation291_spill] sm:$0xff] }
 0xbea   :  { %4918 = vmatpush1.bf16.msra.mxu1 %v8361_v23  ;;  %4961 = vmatpush1.bf16.msra.mxu0 %v8363_v31  ;;  %v15702_v23 = vld [vmem:[#allocation48_spill] sm:$0xff]  ;;  %vm15730_vm11 = vmmov %vm15729_vm0  ;;  %v15829_v24 = vld [vmem:[#allocation283_spill] sm:$0xff] }
 0xbeb   :  { %4919 = vmatprep.subr.bf16.mxu1 %v8358_v1  ;;  %4962 = vmatprep.subr.bf16.mxu0 %v8360_v19  ;;  %v8400_v31 = vcombine.high %v15702_v23, %v15701_v35  ;;  %v8399_v12 = vcombine.low %v15702_v23, %v15701_v35  ;;  %v15703_v1 = vld [vmem:[#allocation45_spill] sm:$0xff]  ;;  %v15705_v19 = vld [vmem:[#allocation46_spill] sm:$0xff]  ;;  %v15769_v35 = vld [vmem:[#allocation275_spill] sm:$0xff] }
 0xbec   :  { %v8394_v18 = vcombine.high %v15704_v17, %v15703_v1  ;;  %v8393_v22 = vcombine.low %v15704_v17, %v15703_v1  ;;  %v15771_v23 = vld [vmem:[#allocation309_spill] sm:$0xff]  ;;  %v15779_v1 = vld [vmem:[#allocation311_spill] sm:$0xff] }
 0xbed   :  { %v15781_v17 = vld [vmem:[#allocation289_spill] sm:$0xff]  ;;  %v15833_v59 = vld [vmem:[#allocation267_spill] sm:$0xff] }
 0xbee   :  { %4920 = vmatpush1.bf16.msra.mxu1 %v8357_v36  ;;  %4963 = vmatpush1.bf16.msra.mxu0 %v8359_v21  ;;  %v15706_v36 = vld [vmem:[#allocation44_spill] sm:$0xff]  ;;  %v15855_v16 = vld [vmem:[#allocation263_spill] sm:$0xff] }
 0xbef   :  { %4921 = vmatprep.subr.bf16.mxu1 %v8418_v56  ;;  %4964 = vmatprep.subr.bf16.mxu0 %v8420_v30  ;;  %v8396_v21 = vcombine.high %v15706_v36, %v15705_v19  ;;  %v8395_v10 = vcombine.low %v15706_v36, %v15705_v19  ;;  %v15707_v56 = vld [vmem:[#allocation41_spill] sm:$0xff]  ;;  %v15709_v30 = vld [vmem:[#allocation42_spill] sm:$0xff] }
 0xbf0   :  { %v8390_v28 = vcombine.high %v15708_v57, %v15707_v56  ;;  %v8389_v50 = vcombine.low %v15708_v57, %v15707_v56  ;;  %v15785_v19 = vld [vmem:[#allocation273_spill] sm:$0xff]  ;;  %v15795_v56 = vld [vmem:[#allocation315_spill] sm:$0xff] }
 0xbf1   :  { %v15787_v36 = vld [vmem:[#allocation313_spill] sm:$0xff]  ;;  %v15797_v57 = vld [vmem:[#allocation287_spill] sm:$0xff] }
 0xbf2   :  { %4922 = vmatpush2.bf16.msra.mxu1 %v8417_v47  ;;  %4965 = vmatpush2.bf16.msra.mxu0 %v8419_v51  ;;  %v15710_v47 = vld [vmem:[#allocation40_spill] sm:$0xff] }
 0xbf3   :  { %4923 = vmatprep.subr.bf16.mxu1 %v8414_v63  ;;  %4966 = vmatprep.subr.bf16.mxu0 %v8416_v5  ;;  %v8392_v51 = vcombine.high %v15710_v47, %v15709_v30  ;;  %v8391_v32 = vcombine.low %v15710_v47, %v15709_v30  ;;  %v4583_v63 = vpack.c.bf16 %v13316_v27, %v13314_v39  ;;  %v15801_v30 = vld [vmem:[#allocation271_spill] sm:$0xff]  ;;  %v15803_v47 = vld [vmem:[#allocation317_spill] sm:$0xff] }
 0xbf6   :  { %4924 = vmatpush2.bf16.msra.mxu1 %v8413_v34  ;;  %4967 = vmatpush2.bf16.msra.mxu0 %v8415_v4 }
 0xbf7   :  { %4925 = vmatprep.subr.bf16.mxu1 %v8410_v25  ;;  %4968 = vmatprep.subr.bf16.mxu0 %v8412_v62 }
 0xbfa   :  { %4926 = vmatpush2.bf16.msra.mxu1 %v8409_v41  ;;  %4969 = vmatpush2.bf16.msra.mxu0 %v8411_v43 }
 0xbfb   :  { %4927 = vmatprep.subr.bf16.mxu1 %v8406_v9  ;;  %4970 = vmatprep.subr.bf16.mxu0 %v8408_v37  ;;  %v15733_v9 = vld [vmem:[#allocation295_spill] sm:$0xff]  ;;  %v15739_v37 = vld [vmem:[#allocation301_spill] sm:$0xff] }
 0xbfc   :  { %vm15734_vm5 = vnez %v15733_v9 }
 0xbfe   :  { %4928 = vmatpush2.bf16.msra.mxu1 %v8405_v48  ;;  %4971 = vmatpush2.bf16.msra.mxu0 %v8407_v13  ;;  %v15743_v48 = vld [vmem:[#allocation302_spill] sm:$0xff] }
 0xbff   :  { %4929 = vmatprep.subr.bf16.mxu1 %v8402_v58  ;;  %4972 = vmatprep.subr.bf16.mxu0 %v8404_v15  ;;  %v15745_v13 = vld [vmem:[#allocation278_spill] sm:$0xff]  ;;  %v15751_v58 = vld [vmem:[#allocation304_spill] sm:$0xff] }
 0xc00   :  { %v15757_v15 = vld [vmem:[#allocation292_spill] sm:$0xff] }
 0xc02   :  { %4930 = vmatpush2.bf16.msra.mxu1 %v8401_v53  ;;  %4973 = vmatpush2.bf16.msra.mxu0 %v8403_v20  ;;  %v15759_v53 = vld [vmem:[#allocation306_spill] sm:$0xff]  ;;  %v15761_v20 = vld [vmem:[#allocation276_spill] sm:$0xff] }
 0xc03   :  { %4931 = vmatprep.subr.bf16.mxu1 %v8398_v29  ;;  %4974 = vmatprep.subr.bf16.mxu0 %v8400_v31  ;;  %vm15760_vm8 = vnez %v15759_v53  ;;  %vm15762_vm12 = vnez %v15761_v20  ;;  %v15767_v29 = vld [vmem:[#allocation308_spill] sm:$0xff]  ;;  %v15773_v31 = vld [vmem:[#allocation290_spill] sm:$0xff] }
 0xc06   :  { %4932 = vmatpush2.bf16.msra.mxu1 %v8397_v54  ;;  %4975 = vmatpush2.bf16.msra.mxu0 %v8399_v12  ;;  %v15775_v54 = vld [vmem:[#allocation310_spill] sm:$0xff] }
 0xc07   :  { %4933 = vmatprep.subr.bf16.mxu1 %v8394_v18  ;;  %4976 = vmatprep.subr.bf16.mxu0 %v8396_v21  ;;  %v15777_v12 = vld [vmem:[#allocation274_spill] sm:$0xff]  ;;  %v15783_v18 = vld [vmem:[#allocation312_spill] sm:$0xff] }
 0xc08   :  { %v15789_v21 = vld [vmem:[#allocation288_spill] sm:$0xff] }
 0xc0a   :  { %4934 = vmatpush2.bf16.msra.mxu1 %v8393_v22  ;;  %4977 = vmatpush2.bf16.msra.mxu0 %v8395_v10  ;;  %v15791_v22 = vld [vmem:[#allocation314_spill] sm:$0xff]  ;;  %v15793_v10 = vld [vmem:[#allocation272_spill] sm:$0xff] }
 0xc0b   :  { %4935 = vmatprep.subr.bf16.mxu1 %v8390_v28  ;;  %4978 = vmatprep.subr.bf16.mxu0 %v8392_v51  ;;  %v15799_v28 = vld [vmem:[#allocation316_spill] sm:$0xff]  ;;  %v15805_v51 = vld [vmem:[#allocation286_spill] sm:$0xff] }
 0xc0e   :  { %4936 = vmatpush2.bf16.msra.mxu1 %v8389_v50  ;;  %4979 = vmatpush2.bf16.msra.mxu0 %v8391_v32  ;;  %v15807_v50 = vld [vmem:[#allocation318_spill] sm:$0xff] }
 0xc0f   :  { %v15809_v32 = vld [vmem:[#allocation270_spill] sm:$0xff] }
 0xc11   :  { %4938 = vmatmul.mubr.bf16.vlgmr.msra.gmra.mxu1 %v4583_v63  ;;  %4981 = vmatmul.mubr.bf16.vlgmr.msra.gmra.mxu0 %v4583_v63  ;;  %v15811_v63 = vld [vmem:[#allocation319_spill] sm:$0xff] }
 0xc12   :  { %5087 = vmatprep.mubr.f32.mxu1 %v15503_v46  ;;  %5158 = vmatprep.mubr.f32.mxu0 %v15503_v46 }
 0xcd1   :  { %v13450_v2 = vpop.f32.mrf.mxu1  ;;  %v13452_v55 = vpop.f32.mrf.mxu0 }
 0xcd2   :  { %15711 = vst [vmem:[#allocation38_spill] sm:$0xff] %v13450_v2  ;;  %15712 = vst [vmem:[#allocation37_spill] sm:$0xff] %v13452_v55  ;;  %v4991_v43 = vmul.f32 %v13450_v2, %v13450_v2  ;;  %v4993_v8 = vmul.f32 %v13452_v55, %v13452_v55 }
 0xcd3   :  { %v13454_v5 = vpop.f32.mrf.mxu1  ;;  %v13456_v34 = vpop.f32.mrf.mxu0 }
 0xcd4   :  { %15713 = vst [vmem:[#allocation35_spill] sm:$0xff] %v13454_v5  ;;  %15714 = vst [vmem:[#allocation33_spill] sm:$0xff] %v13456_v34  ;;  %v4992_v62 = vmul.f32 %v13454_v5, %v13454_v5  ;;  %v4994_v41 = vmul.f32 %v13456_v34, %v13456_v34 }
 0xcd5   :  { %v13458_v4 = vpop.f32.mrf.mxu1  ;;  %v13460_v52 = vpop.f32.mrf.mxu0 }
 0xcd6   :  { %15715 = vst [vmem:[#allocation36_spill] sm:$0xff] %v13458_v4  ;;  %15716 = vst [vmem:[#allocation34_spill] sm:$0xff] %v13460_v52  ;;  %v4995_v44 = vmul.f32 %v13458_v4, %v13458_v4  ;;  %v4997_v7 = vmul.f32 %v13460_v52, %v13460_v52 }
 0xcd7   :  { %v13462_v39 = vpop.f32.mrf.mxu1  ;;  %v13464_v27 = vpop.f32.mrf.mxu0 }
 0xcd8   :  { %15717 = vst [vmem:[#allocation31_spill] sm:$0xff] %v13462_v39  ;;  %15718 = vst [vmem:[#allocation29_spill] sm:$0xff] %v13464_v27  ;;  %8421 = vmatprep.subr.msk.mxu1 %vm15719_vm14, %v13462_v39  ;;  %8424 = vmatprep.subr.msk.mxu0 %vm15720_vm15, %v13464_v27  ;;  %v4996_v42 = vmul.f32 %v13462_v39, %v13462_v39  ;;  %v4998_v25 = vmul.f32 %v13464_v27, %v13464_v27  ;;  %vm15736_vm14 = vnez %v15735_v14  ;;  %v15835_v27 = vld [vmem:[#allocation325_spill] sm:$0xff]  ;;  %v15837_v39 = vld [vmem:[#allocation282_spill] sm:$0xff] }
 0xcd9   :  { %8422 = vmatpush1.msk.msra.mxu1 %vm15721_vm3, %v13458_v4  ;;  %8425 = vmatpush1.msk.msra.mxu0 %vm15722_vm1, %v13460_v52  ;;  %vm15738_vm15 = vnez %v15737_v40  ;;  %vm15740_vm3 = vnez %v15739_v37  ;;  %v15839_v52 = vld [vmem:[#allocation326_spill] sm:$0xff] }
 0xcda   :  { %5053 = vmatprep.subr.mxu1 %v13454_v5  ;;  %5124 = vmatprep.subr.mxu0 %v13456_v34  ;;  %v15841_v4 = vld [vmem:[#allocation266_spill] sm:$0xff]  ;;  %v15843_v34 = vld [vmem:[#allocation327_spill] sm:$0xff]  ;;  %v15845_v5 = vld [vmem:[#allocation281_spill] sm:$0xff] }
 0xcdb   :  { %5054 = vmatpush1.msra.mxu1 %v13450_v2  ;;  %5125 = vmatpush1.msra.mxu0 %v13452_v55  ;;  %v15847_v55 = vld [vmem:[#allocation328_spill] sm:$0xff]  ;;  %v15849_v2 = vld [vmem:[#allocation265_spill] sm:$0xff] }
 0xcdc   :  { %8423 = vmatmul.mubr.msk.f32.vlgmr.msra.gmra.mxu1 %vm15723_vm2, %v12413_v11  ;;  %8426 = vmatmul.mubr.msk.f32.vlgmr.msra.gmra.mxu0 %vm15724_vm13, %v12413_v11  ;;  %vm15744_vm2 = vnez %v15743_v48  ;;  %vm15746_vm13 = vnez %v15745_v13 }
 0xcdd   :  { %8427 = vmatprep.subr.msk.mxu1 %vm15725_vm9, %v4996_v42  ;;  %8430 = vmatprep.subr.msk.mxu0 %vm15726_vm4, %v4998_v25  ;;  %vm15748_vm9 = vnez %v15747_v61  ;;  %vm15750_vm4 = vnez %v15749_v0  ;;  %v15813_v42 = vld [vmem:[#allocation285_spill] sm:$0xff]  ;;  %v15815_v25 = vld [vmem:[#allocation320_spill] sm:$0xff] }
 0xcde   :  { %8428 = vmatpush1.msk.msra.mxu1 %vm15727_vm10, %v4995_v44  ;;  %8431 = vmatpush1.msk.msra.mxu0 %vm15728_vm6, %v4997_v7  ;;  %vm15752_vm10 = vnez %v15751_v58  ;;  %vm15754_vm6 = vnez %v15753_v33  ;;  %v15817_v44 = vld [vmem:[#allocation269_spill] sm:$0xff] }
 0xcdf   :  { %5195 = vmatprep.subr.mxu1 %v4992_v62  ;;  %5266 = vmatprep.subr.mxu0 %v4994_v41  ;;  %v15819_v7 = vld [vmem:[#allocation321_spill] sm:$0xff]  ;;  %v15821_v62 = vld [vmem:[#allocation284_spill] sm:$0xff]  ;;  %v15823_v41 = vld [vmem:[#allocation322_spill] sm:$0xff] }
 0xce0   :  { %5196 = vmatpush1.msra.mxu1 %v4991_v43  ;;  %5267 = vmatpush1.msra.mxu0 %v4993_v8  ;;  %v15825_v43 = vld [vmem:[#allocation268_spill] sm:$0xff]  ;;  %v15827_v8 = vld [vmem:[#allocation323_spill] sm:$0xff] }
 0xce1   :  { %5229 = vmatprep.mubr.f32.mxu1 %v15503_v46  ;;  %5300 = vmatprep.mubr.f32.mxu0 %v15503_v46  ;;  %v15853_v46 = vld [vmem:[#allocation280_spill] sm:$0xff] }
 0xce2   :  { %8429 = vmatmul.mubr.msk.f32.vlgmr.msra.gmra.mxu1 %vm15729_vm0, %v12413_v11  ;;  %8432 = vmatmul.mubr.msk.f32.vlgmr.msra.gmra.mxu0 %vm15730_vm11, %v12413_v11  ;;  %v15741_v11 = vld [vmem:[#allocation294_spill] sm:$0xff]  ;;  %vm15756_vm0 = vnez %v15755_v49  ;;  %vm15758_vm11 = vnez %v15757_v15 }
 0xce3   :  { %8946 = vmatprep.subr.msk.mxu1 %vm15732_vm7, %v15586_v38  ;;  %8981 = vmatprep.subr.msk.mxu0 %vm15734_vm5, %v15586_v38  ;;  %vm15742_vm1 = vnez %v15741_v11 }
 0xce4   :  { %8947 = vmatpush3.msk.msra.mxu1 %vm15736_vm14, %v15586_v38  ;;  %8982 = vmatpush3.msk.msra.mxu0 %vm15738_vm15, %v15586_v38 }
 0xce5   :  { %8948 = vmatprep.subr.msk.mxu1 %vm15740_vm3, %v15586_v38  ;;  %8983 = vmatprep.subr.msk.mxu0 %vm15742_vm1, %v15586_v38 }
 0xce6   :  { %8949 = vmatpush3.msk.msra.mxu1 %vm15744_vm2, %v15586_v38  ;;  %8984 = vmatpush3.msk.msra.mxu0 %vm15746_vm13, %v15586_v38 }
 0xce7   :  { %8950 = vmatprep.subr.msk.mxu1 %vm15748_vm9, %v15586_v38  ;;  %8985 = vmatprep.subr.msk.mxu0 %vm15750_vm4, %v15586_v38 }
 0xce8   :  { %8951 = vmatpush3.msk.msra.mxu1 %vm15752_vm10, %v15586_v38  ;;  %8986 = vmatpush3.msk.msra.mxu0 %vm15754_vm6, %v15586_v38  ;;  %vm15764_vm10 = vnez %v15763_v26  ;;  %vm15766_vm6 = vnez %v15765_v45 }
 0xce9   :  { %8952 = vmatprep.subr.msk.mxu1 %vm15756_vm0, %v15586_v38  ;;  %8987 = vmatprep.subr.msk.mxu0 %vm15758_vm11, %v15586_v38  ;;  %vm15768_vm0 = vnez %v15767_v29  ;;  %vm15770_vm11 = vnez %v15769_v35 }
 0xcea   :  { %8953 = vmatpush3.msk.msra.mxu1 %vm15760_vm8, %v15586_v38  ;;  %8988 = vmatpush3.msk.msra.mxu0 %vm15762_vm12, %v15586_v38  ;;  %vm15772_vm8 = vnez %v15771_v23  ;;  %vm15774_vm12 = vnez %v15773_v31 }
 0xceb   :  { %8954 = vmatprep.subr.msk.mxu1 %vm15764_vm10, %v15586_v38  ;;  %8989 = vmatprep.subr.msk.mxu0 %vm15766_vm6, %v15586_v38  ;;  %vm15776_vm10 = vnez %v15775_v54  ;;  %vm15778_vm6 = vnez %v15777_v12 }
 0xcec   :  { %8955 = vmatpush3.msk.msra.mxu1 %vm15768_vm0, %v15586_v38  ;;  %8990 = vmatpush3.msk.msra.mxu0 %vm15770_vm11, %v15586_v38  ;;  %vm15780_vm0 = vnez %v15779_v1  ;;  %vm15782_vm11 = vnez %v15781_v17 }
 0xced   :  { %8956 = vmatprep.subr.msk.mxu1 %vm15772_vm8, %v15586_v38  ;;  %8991 = vmatprep.subr.msk.mxu0 %vm15774_vm12, %v15586_v38  ;;  %vm15784_vm8 = vnez %v15783_v18  ;;  %vm15786_vm12 = vnez %v15785_v19 }
 0xcee   :  { %8957 = vmatpush3.msk.msra.mxu1 %vm15776_vm10, %v15586_v38  ;;  %8992 = vmatpush3.msk.msra.mxu0 %vm15778_vm6, %v15586_v38  ;;  %vm15788_vm10 = vnez %v15787_v36  ;;  %vm15790_vm6 = vnez %v15789_v21 }
 0xcef   :  { %8958 = vmatprep.subr.msk.mxu1 %vm15780_vm0, %v15586_v38  ;;  %8993 = vmatprep.subr.msk.mxu0 %vm15782_vm11, %v15586_v38  ;;  %vm15792_vm0 = vnez %v15791_v22  ;;  %vm15794_vm11 = vnez %v15793_v10 }
 0xcf0   :  { %8959 = vmatpush3.msk.msra.mxu1 %vm15784_vm8, %v15586_v38  ;;  %8994 = vmatpush3.msk.msra.mxu0 %vm15786_vm12, %v15586_v38  ;;  %vm15796_vm8 = vnez %v15795_v56  ;;  %vm15798_vm12 = vnez %v15797_v57 }
 0xcf1   :  { %8960 = vmatprep.subr.msk.mxu1 %vm15788_vm10, %v15586_v38  ;;  %8995 = vmatprep.subr.msk.mxu0 %vm15790_vm6, %v15586_v38  ;;  %vm15800_vm10 = vnez %v15799_v28  ;;  %vm15802_vm6 = vnez %v15801_v30 }
 0xcf2   :  { %8961 = vmatpush3.msk.msra.mxu1 %vm15792_vm0, %v15586_v38  ;;  %8996 = vmatpush3.msk.msra.mxu0 %vm15794_vm11, %v15586_v38  ;;  %vm15804_vm0 = vnez %v15803_v47  ;;  %vm15806_vm11 = vnez %v15805_v51 }
 0xcf3   :  { %8962 = vmatprep.subr.msk.mxu1 %vm15796_vm8, %v15586_v38  ;;  %8997 = vmatprep.subr.msk.mxu0 %vm15798_vm12, %v15586_v38  ;;  %vm15808_vm8 = vnez %v15807_v50  ;;  %vm15810_vm12 = vnez %v15809_v32 }
 0xcf4   :  { %8963 = vmatpush3.msk.msra.mxu1 %vm15800_vm10, %v15586_v38  ;;  %8998 = vmatpush3.msk.msra.mxu0 %vm15802_vm6, %v15586_v38  ;;  %vm15812_vm10 = vnez %v15811_v63  ;;  %vm15814_vm6 = vnez %v15813_v42 }
 0xcf5   :  { %8964 = vmatprep.subr.msk.mxu1 %vm15804_vm0, %v15586_v38  ;;  %8999 = vmatprep.subr.msk.mxu0 %vm15806_vm11, %v15586_v38  ;;  %vm15816_vm0 = vnez %v15815_v25  ;;  %vm15818_vm11 = vnez %v15817_v44 }
 0xcf6   :  { %8965 = vmatpush3.msk.msra.mxu1 %vm15808_vm8, %v15586_v38  ;;  %9000 = vmatpush3.msk.msra.mxu0 %vm15810_vm12, %v15586_v38  ;;  %vm15820_vm8 = vnez %v15819_v7  ;;  %vm15822_vm12 = vnez %v15821_v62 }
 0xcf7   :  { %8966 = vmatprep.subr.msk.mxu1 %vm15812_vm10, %v15586_v38  ;;  %9001 = vmatprep.subr.msk.mxu0 %vm15814_vm6, %v15586_v38  ;;  %vm15824_vm10 = vnez %v15823_v41  ;;  %vm15826_vm6 = vnez %v15825_v43 }
 0xcf8   :  { %8967 = vmatpush3.msk.msra.mxu1 %vm15816_vm0, %v15586_v38  ;;  %9002 = vmatpush3.msk.msra.mxu0 %vm15818_vm11, %v15586_v38  ;;  %vm15828_vm0 = vnez %v15827_v8  ;;  %vm15830_vm11 = vnez %v15829_v24 }
 0xcf9   :  { %8968 = vmatprep.subr.msk.mxu1 %vm15820_vm8, %v15586_v38  ;;  %9003 = vmatprep.subr.msk.mxu0 %vm15822_vm12, %v15586_v38  ;;  %vm15832_vm8 = vnez %v15831_v60  ;;  %vm15834_vm12 = vnez %v15833_v59 }
 0xcfa   :  { %8969 = vmatpush3.msk.msra.mxu1 %vm15824_vm10, %v15586_v38  ;;  %9004 = vmatpush3.msk.msra.mxu0 %vm15826_vm6, %v15586_v38  ;;  %vm15836_vm10 = vnez %v15835_v27  ;;  %vm15838_vm6 = vnez %v15837_v39 }
 0xcfb   :  { %8970 = vmatprep.subr.msk.mxu1 %vm15828_vm0, %v15586_v38  ;;  %9005 = vmatprep.subr.msk.mxu0 %vm15830_vm11, %v15586_v38  ;;  %vm15840_vm0 = vnez %v15839_v52  ;;  %vm15842_vm11 = vnez %v15841_v4 }
 0xcfc   :  { %8971 = vmatpush3.msk.msra.mxu1 %vm15832_vm8, %v15586_v38  ;;  %9006 = vmatpush3.msk.msra.mxu0 %vm15834_vm12, %v15586_v38  ;;  %vm15844_vm8 = vnez %v15843_v34  ;;  %vm15846_vm12 = vnez %v15845_v5  ;;  %v15857_v5 = vld [vmem:[#allocation264_spill] sm:$0xff] }
 0xcfd   :  { %8972 = vmatprep.subr.msk.mxu1 %vm15836_vm10, %v15586_v38  ;;  %9007 = vmatprep.subr.msk.mxu0 %vm15838_vm6, %v15586_v38  ;;  %vm15848_vm10 = vnez %v15847_v55  ;;  %vm15850_vm6 = vnez %v15849_v2 }
 0xcfe   :  { %8973 = vmatpush3.msk.msra.mxu1 %vm15840_vm0, %v15586_v38  ;;  %9008 = vmatpush3.msk.msra.mxu0 %vm15842_vm11, %v15586_v38  ;;  %vm15852_vm0 = vnez %v15851_v6  ;;  %vm15854_vm11 = vnez %v15853_v46 }
 0xcff   :  { %8974 = vmatprep.subr.msk.mxu1 %vm15844_vm8, %v15586_v38  ;;  %9009 = vmatprep.subr.msk.mxu0 %vm15846_vm12, %v15586_v38  ;;  %vm15856_vm8 = vnez %v15855_v16  ;;  %vm15858_vm12 = vnez %v15857_v5  ;;  %v15918_v16 = vmov 0.0  }
 0xd00   :  { %8975 = vmatpush3.msk.msra.mxu1 %vm15848_vm10, %v15586_v38  ;;  %9010 = vmatpush3.msk.msra.mxu0 %vm15850_vm6, %v15586_v38 }
 0xd01   :  { %8976 = vmatprep.subr.msk.mxu1 %vm15852_vm0, %v15586_v38  ;;  %9011 = vmatprep.subr.msk.mxu0 %vm15854_vm11, %v15586_v38 }
 0xd02   :  { %8977 = vmatpush3.msk.msra.mxu1 %vm15856_vm8, %v15586_v38  ;;  %9012 = vmatpush3.msk.msra.mxu0 %vm15858_vm12, %v15586_v38 }
 0xd03   :  { %9016 = vmatprep.subr.msk.mxu1 %vm15732_vm7, %v15586_v38  ;;  %9051 = vmatprep.subr.msk.mxu0 %vm15734_vm5, %v15586_v38  ;;  %vm15859_vm7 = vnez %v15751_v58  ;;  %vm15860_vm5 = vnez %v15753_v33 }
 0xd9c   :  { %v5089_v6 = vpop.f32.mrf.mxu1  ;;  %v5160_v2 = vpop.f32.mrf.mxu0 }
 0xd9e   :  { %v5091_v46 = vpop.f32.mrf.mxu1  ;;  %v5162_v55 = vpop.f32.mrf.mxu0 }
 0xd9f   :  { %5371 = vmatprep.mubr.f32.mxu1 %v5091_v46  ;;  %5441 = vmatprep.mubr.f32.mxu0 %v5162_v55 }
 0xda0   :  { %5372 = vmatmul.mubr.f32.vlgmr.msra.gmra.mxu1 %v5089_v6  ;;  %5442 = vmatmul.mubr.f32.vlgmr.msra.gmra.mxu0 %v5160_v2 }
 0xda1   :  { %9017 = vmatpush3.msk.msra.mxu1 %vm15736_vm14, %v15586_v38  ;;  %9052 = vmatpush3.msk.msra.mxu0 %vm15738_vm15, %v15586_v38  ;;  %vm15861_vm14 = vnez %v15755_v49  ;;  %vm15862_vm15 = vnez %v15757_v15 }
 0xda2   :  { %9018 = vmatprep.subr.msk.mxu1 %vm15740_vm3, %v15586_v38  ;;  %9053 = vmatprep.subr.msk.mxu0 %vm15742_vm1, %v15586_v38  ;;  %vm15863_vm3 = vnez %v15759_v53  ;;  %vm15864_vm1 = vnez %v15761_v20  ;;  %v5231_v46 = vpop.f32.mrf.mxu1  ;;  %v5302_v6 = vpop.f32.mrf.mxu0 }
 0xda3   :  { %9019 = vmatpush3.msk.msra.mxu1 %vm15744_vm2, %v15586_v38  ;;  %9054 = vmatpush3.msk.msra.mxu0 %vm15746_vm13, %v15586_v38  ;;  %vm15865_vm2 = vnez %v15763_v26  ;;  %vm15866_vm13 = vnez %v15765_v45 }
 0xda4   :  { %9020 = vmatprep.subr.msk.mxu1 %vm15748_vm9, %v15586_v38  ;;  %9055 = vmatprep.subr.msk.mxu0 %vm15750_vm4, %v15586_v38  ;;  %vm15867_vm9 = vnez %v15767_v29  ;;  %vm15868_vm4 = vnez %v15769_v35  ;;  %v5304_v55 = vpop.f32.mrf.mxu0 }
 0xda5   :  { %9021 = vmatpush3.msk.msra.mxu1 %vm15859_vm7, %v15586_v38  ;;  %9056 = vmatpush3.msk.msra.mxu0 %vm15860_vm5, %v15586_v38  ;;  %vm15869_vm7 = vnez %v15771_v23  ;;  %vm15870_vm5 = vnez %v15773_v31  ;;  %v15921_v31 = vld [vmem:[#allocation335_spill] sm:$0xff] }
 0xda6   :  { %9022 = vmatprep.subr.msk.mxu1 %vm15861_vm14, %v15586_v38  ;;  %9057 = vmatprep.subr.msk.mxu0 %vm15862_vm15, %v15586_v38  ;;  %vm15871_vm14 = vnez %v15775_v54  ;;  %vm15872_vm15 = vnez %v15777_v12  ;;  %v15924_v54 = vld [vmem:[#allocation298_spill] sm:$0xff]  ;;  %v15926_v12 = vld [vmem:[#allocation297_spill] sm:$0xff] }
 0xda7   :  { %9023 = vmatpush3.msk.msra.mxu1 %vm15863_vm3, %v15586_v38  ;;  %9058 = vmatpush3.msk.msra.mxu0 %vm15864_vm1, %v15586_v38  ;;  %vm15873_vm3 = vnez %v15779_v1  ;;  %vm15874_vm1 = vnez %v15781_v17 }
 0xda8   :  { %9024 = vmatprep.subr.msk.mxu1 %vm15865_vm2, %v15586_v38  ;;  %9059 = vmatprep.subr.msk.mxu0 %vm15866_vm13, %v15586_v38  ;;  %vm15875_vm2 = vnez %v15783_v18  ;;  %vm15876_vm13 = vnez %v15785_v19 }
 0xda9   :  { %9025 = vmatpush3.msk.msra.mxu1 %vm15867_vm9, %v15586_v38  ;;  %9060 = vmatpush3.msk.msra.mxu0 %vm15868_vm4, %v15586_v38  ;;  %vm15877_vm9 = vnez %v15787_v36  ;;  %vm15878_vm4 = vnez %v15789_v21 }
 0xdaa   :  { %9026 = vmatprep.subr.msk.mxu1 %vm15869_vm7, %v15586_v38  ;;  %9061 = vmatprep.subr.msk.mxu0 %vm15870_vm5, %v15586_v38  ;;  %vm15879_vm7 = vnez %v15791_v22  ;;  %vm15880_vm5 = vnez %v15793_v10 }
 0xdab   :  { %9027 = vmatpush3.msk.msra.mxu1 %vm15871_vm14, %v15586_v38  ;;  %9062 = vmatpush3.msk.msra.mxu0 %vm15872_vm15, %v15586_v38  ;;  %vm15881_vm14 = vnez %v15795_v56  ;;  %vm15882_vm15 = vnez %v15797_v57 }
 0xdac   :  { %9028 = vmatprep.subr.msk.mxu1 %vm15873_vm3, %v15586_v38  ;;  %9063 = vmatprep.subr.msk.mxu0 %vm15874_vm1, %v15586_v38  ;;  %vm15883_vm3 = vnez %v15799_v28  ;;  %vm15884_vm1 = vnez %v15801_v30  ;;  %v15939_v30 = vld [vmem:[#allocation38_spill] sm:$0xff] }
 0xdad   :  { %9029 = vmatpush3.msk.msra.mxu1 %vm15875_vm2, %v15586_v38  ;;  %9064 = vmatpush3.msk.msra.mxu0 %vm15876_vm13, %v15586_v38  ;;  %vm15885_vm2 = vnez %v15803_v47  ;;  %vm15886_vm13 = vnez %v15805_v51  ;;  %v15940_v51 = vld [vmem:[#allocation37_spill] sm:$0xff] }
 0xdae   :  { %9030 = vmatprep.subr.msk.mxu1 %vm15877_vm9, %v15586_v38  ;;  %9065 = vmatprep.subr.msk.mxu0 %vm15878_vm4, %v15586_v38  ;;  %vm15887_vm9 = vnez %v15807_v50  ;;  %vm15888_vm4 = vnez %v15809_v32 }
 0xdaf   :  { %9031 = vmatpush3.msk.msra.mxu1 %vm15879_vm7, %v15586_v38  ;;  %9066 = vmatpush3.msk.msra.mxu0 %vm15880_vm5, %v15586_v38  ;;  %vm15889_vm7 = vnez %v15811_v63  ;;  %vm15890_vm5 = vnez %v15813_v42 }
 0xdb0   :  { %9032 = vmatprep.subr.msk.mxu1 %vm15881_vm14, %v15586_v38  ;;  %9067 = vmatprep.subr.msk.mxu0 %vm15882_vm15, %v15586_v38  ;;  %vm15891_vm14 = vnez %v15815_v25  ;;  %vm15892_vm15 = vnez %v15817_v44  ;;  %v15941_v44 = vld [vmem:[#allocation35_spill] sm:$0xff] }
 0xdb1   :  { %9033 = vmatpush3.msk.msra.mxu1 %vm15883_vm3, %v15586_v38  ;;  %9068 = vmatpush3.msk.msra.mxu0 %vm15884_vm1, %v15586_v38  ;;  %vm15893_vm3 = vnez %v15819_v7  ;;  %vm15894_vm1 = vnez %v15821_v62  ;;  %v15942_v62 = vld [vmem:[#allocation33_spill] sm:$0xff] }
 0xdb2   :  { %9034 = vmatprep.subr.msk.mxu1 %vm15885_vm2, %v15586_v38  ;;  %9069 = vmatprep.subr.msk.mxu0 %vm15886_vm13, %v15586_v38  ;;  %vm15895_vm2 = vnez %v15823_v41  ;;  %vm15896_vm13 = vnez %v15825_v43  ;;  %v15943_v43 = vld [vmem:[#allocation36_spill] sm:$0xff] }
 0xdb3   :  { %9035 = vmatpush3.msk.msra.mxu1 %vm15887_vm9, %v15586_v38  ;;  %9070 = vmatpush3.msk.msra.mxu0 %vm15888_vm4, %v15586_v38  ;;  %vm15897_vm9 = vnez %v15827_v8  ;;  %vm15898_vm4 = vnez %v15829_v24 }
 0xdb4   :  { %9036 = vmatprep.subr.msk.mxu1 %vm15889_vm7, %v15586_v38  ;;  %9071 = vmatprep.subr.msk.mxu0 %vm15890_vm5, %v15586_v38  ;;  %vm15899_vm7 = vnez %v15831_v60  ;;  %vm15900_vm5 = vnez %v15833_v59  ;;  %v15906_v60 = vld [vmem:[#allocation281_spill] sm:$0xff]  ;;  %v5233_v59 = vpop.f32.mrf.mxu1 }
 0xdb5   :  { %9037 = vmatpush3.msk.msra.mxu1 %vm15891_vm14, %v15586_v38  ;;  %9072 = vmatpush3.msk.msra.mxu0 %vm15892_vm15, %v15586_v38  ;;  %vm15901_vm14 = vnez %v15835_v27  ;;  %vm15902_vm15 = vnez %v15837_v39  ;;  %v15914_v39 = vld [vmem:[#allocation331_spill] sm:$0xff]  ;;  %v15916_v27 = vld [vmem:[#allocation296_spill] sm:$0xff] }
 0xdb6   :  { %9038 = vmatprep.subr.msk.mxu1 %vm15893_vm3, %v15586_v38  ;;  %9073 = vmatprep.subr.msk.mxu0 %vm15894_vm1, %v15586_v38  ;;  %vm15903_vm3 = vnez %v15839_v52  ;;  %vm15904_vm1 = vnez %v15841_v4  ;;  %v15912_v52 = vld [vmem:[#allocation330_spill] sm:$0xff] }
 0xdb7   :  { %9039 = vmatpush3.msk.msra.mxu1 %vm15895_vm2, %v15586_v38  ;;  %9074 = vmatpush3.msk.msra.mxu0 %vm15896_vm13, %v15586_v38  ;;  %vm15905_vm2 = vnez %v15843_v34  ;;  %vm15907_vm13 = vnez %v15906_v60  ;;  %v15946_v34 = vld [vmem:[#allocation29_spill] sm:$0xff] }
 0xdb8   :  { %9040 = vmatprep.subr.msk.mxu1 %vm15897_vm9, %v15586_v38  ;;  %9075 = vmatprep.subr.msk.mxu0 %vm15898_vm4, %v15586_v38  ;;  %vm15925_vm4 = vnez %v15924_v54  ;;  %v15948_v54 = vld [vmem:[#allocation113_spill] sm:$0xff] }
 0xdb9   :  { %9041 = vmatpush3.msk.msra.mxu1 %vm15899_vm7, %v15586_v38  ;;  %9076 = vmatpush3.msk.msra.mxu0 %vm15900_vm5, %v15586_v38  ;;  %vm15927_vm7 = vnez %v15926_v12  ;;  %vm15928_vm5 = vcmask 64512  }
 0xdba   :  { %9042 = vmatprep.subr.msk.mxu1 %vm15901_vm14, %v15586_v38  ;;  %9077 = vmatprep.subr.msk.mxu0 %vm15902_vm15, %v15586_v38  ;;  %vm15929_vm14 = vmmov %vm15928_vm5 }
 0xdbb   :  { %9043 = vmatpush3.msk.msra.mxu1 %vm15903_vm3, %v15586_v38  ;;  %9078 = vmatpush3.msk.msra.mxu0 %vm15904_vm1, %v15586_v38  ;;  %vm15931_vm3 = vmmov %vm15928_vm5 }
 0xdbc   :  { %9044 = vmatprep.subr.msk.mxu1 %vm15905_vm2, %v15586_v38  ;;  %9079 = vmatprep.subr.msk.mxu0 %vm15907_vm13, %v15586_v38  ;;  %vm15932_vm1 = vmmov %vm15931_vm3 }
 0xdbd   :  { %9045 = vmatpush3.msk.msra.mxu1 %vm15848_vm10, %v15586_v38  ;;  %9080 = vmatpush3.msk.msra.mxu0 %vm15850_vm6, %v15586_v38  ;;  %vm15913_vm10 = vnez %v15912_v52  ;;  %vm15915_vm6 = vcmask 48128  }
 0xdbe   :  { %9046 = vmatprep.subr.msk.mxu1 %vm15852_vm0, %v15586_v38  ;;  %9081 = vmatprep.subr.msk.mxu0 %vm15854_vm11, %v15586_v38  ;;  %vm15917_vm0 = vnez %v15916_v27  ;;  %vm15922_vm11 = vmmov %vm15915_vm6 }
 0xdbf   :  { %9047 = vmatpush3.msk.msra.mxu1 %vm15856_vm8, %v15586_v38  ;;  %5512 = vmatprep.mubr.f32.mxu1 %v5233_v59  ;;  %vm15933_vm2 = vmmov %vm15915_vm6 }
 0xdc0   :  { %9082 = vmatpush3.msk.msra.mxu0 %vm15858_vm12, %v15586_v38  ;;  %5582 = vmatprep.mubr.f32.mxu0 %v5304_v55  ;;  %vm15919_vm12 = vcmask 1045504   ;;  %vm15934_vm13 = vmmov %vm15933_vm2  ;;  %v15945_v55 = vld [vmem:[#allocation31_spill] sm:$0xff] }
 0xdc1   :  { %5513 = vmatmul.mubr.f32.vlgmr.msra.gmra.mxu1 %v5231_v46  ;;  %5583 = vmatmul.mubr.f32.vlgmr.msra.gmra.mxu0 %v5302_v6  ;;  %vm15920_vm8 = vmmov %vm15919_vm12  ;;  %v15944_v46 = vld [vmem:[#allocation34_spill] sm:$0xff] }
 0xdc2   :  { %8564 = vmatprep.subr.msk.mxu0 %vm15913_vm10, %v15586_v38  ;;  %9130 = vmatprep.mubr.msk.f32.mxu1 %vm15915_vm6, %v15914_v39  ;;  %vm15923_vm9 = vmmov %vm15920_vm8 }
 0xdc3   :  { %8565 = vmatpush1.msk.msra.mxu0 %vm15917_vm0, %v15586_v38  ;;  %5742 = vmatprep.mubr.f32.mxu0 %v15918_v16  ;;  %vm15930_vm15 = vmmov %vm15920_vm8 }
 0xdc4   :  { %vm15936_vm6 = vmmov %vm15932_vm1 }
 0xe60   :  { %v8978_v3 = vpop.f32.mrf.mxu1  ;;  %v9013_v9 = vpop.f32.mrf.mxu0 }
 0xe62   :  { %v8979_v5 = vpop.f32.mrf.mxu1  ;;  %v9014_v14 = vpop.f32.mrf.mxu0 }
 0xe63   :  { %v8980_v40 = vadd.f32 %v8979_v5, %v8978_v3  ;;  %v9015_v37 = vadd.f32 %v9014_v14, %v9013_v9 }
 0xe65   :  { %v5444_v11 = vadd.f32 %v9015_v37, %v8980_v40 }
 0xe67   :  { %v5447_v58 = vmul.f32 0.0078125, %v5444_v11 }
 0xe69   :  { %v5589_v53 = vmul.f32 %v5447_v58, %v5447_v58 }
 0xe81   :  { %v9048_v48 = vpop.f32.mrf.mxu1  ;;  %v9083_v13 = vpop.f32.mrf.mxu0 }
 0xe83   :  { %v9049_v61 = vpop.f32.mrf.mxu1  ;;  %v9084_v0 = vpop.f32.mrf.mxu0 }
 0xe84   :  { %v9050_v33 = vadd.f32 %v9049_v61, %v9048_v48  ;;  %v9085_v49 = vadd.f32 %v9084_v0, %v9083_v13 }
 0xe86   :  { %v5585_v15 = vadd.f32 %v9085_v49, %v9050_v33 }
 0xe88   :  { %v5588_v20 = vmul.f32 0.0078125, %v5585_v15 }
 0xe8a   :  { %v5590_v26 = vsub.f32 %v5588_v20, %v5589_v53 }
 0xe8c   :  { %v5591_v45 = vmax.f32 %v5590_v26, 0.0 }
 0xe8e   :  { %v5592_v29 = vadd.f32 1e-05, %v5591_v45 }
 0xe90   :  { %9625 = vrsqrt.f32 %v5592_v29 }
 0xe9d   :  { %v9626_v35 = vpop.eup %9625 }
 0xe9e   :  { %9128 = vmatprep.subr.msk.mxu1 %vm15919_vm12, %v9626_v35  ;;  %v5832_v23 = vmul.f32 %v9626_v35, %v5447_v58 }
 0xe9f   :  { %9129 = vmatpush3.msk.msra.mxu1 %vm15920_vm8, %v9626_v35 }
 0xea0   :  { %9131 = vmatmul.mubr.msk.f32.vlgmr.msra.gmra.mxu1 %vm15922_vm11, %v15921_v31  ;;  %9133 = vmatprep.subr.msk.mxu0 %vm15923_vm9, %v5832_v23 }
 0xea1   :  { %8568 = vmatprep.subr.msk.mxu1 %vm15925_vm4, %v15586_v38  ;;  %5819 = vmatprep.mubr.f32.mxu1 %v15918_v16 }
 0xea2   :  { %8569 = vmatpush1.msk.msra.mxu1 %vm15927_vm7, %v15586_v38 }
 0xea3   :  { %8575 = vmatprep.subr.msk.mxu1 %vm15913_vm10, %v15586_v38  ;;  %vm15935_vm10 = vmmov %vm15932_vm1 }
 0xf60   :  { %v9132_v1 = vpop.f32.mrf.mxu1 }
 0xf62   :  { %v5663_v17 = vpop.f32.mrf.mxu1 }
 0xf63   :  { %8566 = vmatmul.mubr.msk.f32.vlgmr.msra.gmra.mxu0 %vm15928_vm5, %v5663_v17  ;;  %8570 = vmatmul.mubr.msk.f32.vlgmr.msra.gmra.mxu1 %vm15929_vm14, %v5663_v17  ;;  %v15950_v17 = vld [vmem:[#allocation209_spill] sm:$0xff] }
 0xf64   :  { %9134 = vmatpush3.msk.msra.mxu0 %vm15930_vm15, %v5832_v23  ;;  %5748 = vmatprep.mubr.f32.mxu0 %v15918_v16 }
 0xf65   :  { %5825 = vmatprep.mubr.f32.mxu1 %v15918_v16  ;;  %8576 = vmatpush1.msk.msra.mxu1 %vm15917_vm0, %v15586_v38  ;;  %vm15937_vm0 = vmmov %vm15932_vm1 }
 0xf66   :  { %8579 = vmatprep.subr.msk.mxu0 %vm15925_vm4, %v15586_v38  ;;  %vm15938_vm12 = vmmov %vm15937_vm0 }
 0xf67   :  { %8567 = vmatmul.mubr.msk.f32.gmra.mxu0 %vm15931_vm3, %v9132_v1  ;;  %8571 = vmatmul.mubr.msk.f32.gmra.mxu1 %vm15932_vm1, %v9132_v1  ;;  %v15949_v1 = vld [vmem:[#allocation212_spill] sm:$0xff] }
 0xf68   :  { %9135 = vmatprep.mubr.msk.f32.mxu0 %vm15933_vm2, %v15914_v39  ;;  %5981 = vmatprep.mubr.f32.mxu1 %v15918_v16 }
 0xf6b   :  { %9136 = vmatmul.mubr.msk.f32.vlgmr.msra.gmra.mxu0 %vm15934_vm13, %v15921_v31  ;;  %v15947_v31 = vld [vmem:[#allocation116_spill] sm:$0xff] }
 0xf6c   :  { %8580 = vmatpush1.msk.msra.mxu0 %vm15927_vm7, %v15586_v38  ;;  %6058 = vmatprep.mubr.f32.mxu0 %v15918_v16  ;;  %v8626_v12 = vcombine.high %v15948_v54, %v15947_v31 }
0x1023   :  { %v5744_v18 = vpop.f32.mrf.mxu0  ;;  %v5821_v38 = vpop.f32.mrf.mxu1 }
0x1024   :  { %v6071_v47 = vmul.f32 %v5744_v18, %v15939_v30  ;;  %v6073_v50 = vmul.f32 %v5821_v38, %v15940_v51  ;;  %v8722_v18 = vcombine.high %v15950_v17, %v15949_v1 }
0x1025   :  { %v5746_v19 = vpop.f32.mrf.mxu0  ;;  %v5823_v56 = vpop.f32.mrf.mxu1 }
0x1026   :  { %v6072_v7 = vmul.f32 %v5746_v19, %v15941_v44  ;;  %v6074_v41 = vmul.f32 %v5823_v56, %v15942_v62  ;;  %v8625_v19 = vcombine.low %v15948_v54, %v15947_v31 }
0x1027   :  { %v5750_v36 = vpop.f32.mrf.mxu0  ;;  %v5827_v57 = vpop.f32.mrf.mxu1 }
0x1028   :  { %v6075_v8 = vmul.f32 %v5750_v36, %v15943_v43  ;;  %v6077_v6 = vmul.f32 %v5827_v57, %v15944_v46  ;;  %v8721_v36 = vcombine.low %v15950_v17, %v15949_v1 }
0x1029   :  { %v5752_v21 = vpop.f32.mrf.mxu0  ;;  %v5829_v28 = vpop.f32.mrf.mxu1 }
0x102a   :  { %v6076_v4 = vmul.f32 %v5752_v21, %v15945_v55  ;;  %v6078_v52 = vmul.f32 %v5829_v28, %v15946_v34 }
0x102b   :  { %v9137_v22 = vpop.f32.mrf.mxu0 }
0x102d   :  { %v5902_v10 = vpop.f32.mrf.mxu0 }
0x102e   :  { %8577 = vmatmul.mubr.msk.f32.vlgmr.msra.gmra.mxu1 %vm15935_vm10, %v5902_v10  ;;  %8581 = vmatmul.mubr.msk.f32.vlgmr.msra.gmra.mxu0 %vm15936_vm6, %v5902_v10 }
0x102f   :  { %5987 = vmatprep.mubr.f32.mxu1 %v15918_v16  ;;  %6064 = vmatprep.mubr.f32.mxu0 %v15918_v16 }
0x1032   :  { %8578 = vmatmul.mubr.msk.f32.gmra.mxu1 %vm15937_vm0, %v9137_v22  ;;  %8582 = vmatmul.mubr.msk.f32.gmra.mxu0 %vm15938_vm12, %v9137_v22 }
0x10ee   :  { %v5983_v32 = vpop.f32.mrf.mxu1  ;;  %v6060_v63 = vpop.f32.mrf.mxu0 }
0x10ef   :  { %v6079_v42 = vsub.f32 %v6071_v47, %v5983_v32  ;;  %v6081_v25 = vsub.f32 %v6073_v50, %v6060_v63 }
0x10f0   :  { %v5985_v60 = vpop.f32.mrf.mxu1  ;;  %v6062_v59 = vpop.f32.mrf.mxu0 }
0x10f1   :  { %vm6087_vm8 = vcmp.ge.f32.partialorder %v6079_v42, 0.0  ;;  %v6095_v24 = vmul.f32 0.2, %v6079_v42  ;;  %vm6089_vm11 = vcmp.ge.f32.partialorder %v6081_v25, 0.0  ;;  %v6097_v2 = vmul.f32 0.2, %v6081_v25 }
0x10f2   :  { %v6080_v39 = vsub.f32 %v6072_v7, %v5985_v60  ;;  %v6082_v27 = vsub.f32 %v6074_v41, %v6062_v59  ;;  %v5989_v3 = vpop.f32.mrf.mxu1  ;;  %v6066_v9 = vpop.f32.mrf.mxu0 }
0x10f3   :  { %v13952_v5 = vsel %vm6087_vm8, %v6079_v42, %v6095_v24  ;;  %v13954_v14 = vsel %vm6089_vm11, %v6081_v25, %v6097_v2  ;;  %v6083_v40 = vsub.f32 %v6075_v8, %v5989_v3  ;;  %v6085_v37 = vsub.f32 %v6077_v6, %v6066_v9 }
0x10f4   :  { %vm6088_vm9 = vcmp.ge.f32.partialorder %v6080_v39, 0.0  ;;  %v6096_v11 = vmul.f32 0.2, %v6080_v39  ;;  %vm6090_vm4 = vcmp.ge.f32.partialorder %v6082_v27, 0.0  ;;  %v6098_v48 = vmul.f32 0.2, %v6082_v27  ;;  %v5991_v13 = vpop.f32.mrf.mxu1  ;;  %v6068_v61 = vpop.f32.mrf.mxu0 }
0x10f5   :  { %vm6091_vm7 = vcmp.ge.f32.partialorder %v6083_v40, 0.0  ;;  %v6099_v0 = vmul.f32 0.2, %v6083_v40  ;;  %vm6093_vm5 = vcmp.ge.f32.partialorder %v6085_v37, 0.0  ;;  %v6101_v58 = vmul.f32 0.2, %v6085_v37 }
0x10f6   :  { %v6104_v33 = vsel %vm6088_vm9, %v6080_v39, %v6096_v11  ;;  %v6106_v49 = vsel %vm6090_vm4, %v6082_v27, %v6098_v48  ;;  %v6084_v15 = vsub.f32 %v6076_v4, %v5991_v13  ;;  %v6086_v53 = vsub.f32 %v6078_v52, %v6068_v61 }
0x10f7   :  { %v13956_v20 = vsel %vm6091_vm7, %v6083_v40, %v6099_v0  ;;  %v13958_v26 = vsel %vm6093_vm5, %v6085_v37, %v6101_v58 }
0x10f8   :  { %vm6092_vm14 = vcmp.ge.f32.partialorder %v6084_v15, 0.0  ;;  %v6100_v45 = vmul.f32 0.2, %v6084_v15  ;;  %vm6094_vm15 = vcmp.ge.f32.partialorder %v6086_v53, 0.0  ;;  %v6102_v29 = vmul.f32 0.2, %v6086_v53 }
0x10fa   :  { %v6108_v35 = vsel %vm6092_vm14, %v6084_v15, %v6100_v45  ;;  %v6110_v23 = vsel %vm6094_vm15, %v6086_v53, %v6102_v29 }
0x10fb   :  { %9665 = dma.done.wait [#allocation4 + $0x1], 24576 }
0x10fc   :  { %9666 = vsyncadd [#allocation4 + $0x1], 4294942720  ;;  %v15951_v21 = vld [vmem:[#allocation110_spill] sm:$0xff]  ;;  %v15952_v22 = vld [vmem:[#allocation107_spill] sm:$0xff]  ;;  %vm15956_vm3 = vcmask 195584   ;;  %7271 = vmatprep.subr.bf16.mxu1 %v8626_v12  ;;  %7314 = vmatprep.subr.bf16.mxu0 %v8722_v18  ;;  %v14019_v0 = vpack.c.bf16 %v6108_v35, %v6104_v33  ;;  %v14021_v58 = vpack.c.bf16 %v6110_v23, %v6106_v49  ;;  %vm16145_vm13 = vcmask 1043456  }
0x10fd   :  { %v8620_v10 = vcombine.high %v15952_v22, %v15951_v21  ;;  %v15953_v38 = vld [vmem:[#allocation206_spill] sm:$0xff]  ;;  %v15954_v56 = vld [vmem:[#allocation203_spill] sm:$0xff]  ;;  %v15955_v28 = vld [vmem:[#allocation333_spill] sm:$0xff]  ;;  %7272 = vmatpush1.bf16.msra.mxu1 %v8625_v19  ;;  %7315 = vmatpush1.bf16.msra.mxu0 %v8721_v36  ;;  %v8619_v51 = vcombine.low %v15952_v22, %v15951_v21  ;;  %vm16147_vm6 = vmmov 0   ;;  %vm7724_vm8 = vcmask 523264  }
0x10fe   :  { %v8716_v57 = vcombine.high %v15954_v56, %v15953_v38  ;;  %7843 = vst.msk [vmem:[%s14504_s9] sm:$0xff] %vm15956_vm3, %v15955_v28  ;;  %v15957_v30 = vld [vmem:[#allocation332_spill] sm:$0xff]  ;;  %vm15958_vm1 = vmmov %vm15956_vm3  ;;  %v15959_v47 = vld [vmem:[#allocation334_spill] sm:$0xff]  ;;  %v8715_v50 = vcombine.low %v15954_v56, %v15953_v38  ;;  %7303 = vmatprep.mubr.bf16.mxu1 %v14019_v0  ;;  %7346 = vmatprep.mubr.bf16.mxu0 %v14021_v58  ;;  %vm7841_vm11 = vcmask 164864  }
0x10ff   :  { %7844 = vst.msk [vmem:[%s14505_s10] sm:$0xff] %vm15958_vm1, %v15957_v30  ;;  %vm15960_vm2 = vmmov %vm15958_vm1  ;;  %7273 = vmatprep.subr.bf16.mxu1 %v8620_v10  ;;  %v15961_v32 = vld [vmem:[#allocation104_spill] sm:$0xff]  ;;  %v15962_v63 = vld [vmem:[#allocation101_spill] sm:$0xff] }
0x1100   :  { %7845 = vst.msk [vmem:[%s14506_s11] sm:$0xff] %vm15960_vm2, %v15959_v47  ;;  %7316 = vmatprep.subr.bf16.mxu0 %v8716_v57  ;;  %v8614_v42 = vcombine.high %v15962_v63, %v15961_v32  ;;  %v15963_v25 = vld [vmem:[#allocation200_spill] sm:$0xff]  ;;  %v15964_v44 = vld [vmem:[#allocation197_spill] sm:$0xff]  ;;  %v8613_v62 = vcombine.low %v15962_v63, %v15961_v32  ;;  %v15965_v43 = vld [vmem:[#allocation98_spill] sm:$0xff] }
0x1101   :  { %v8710_v7 = vcombine.high %v15964_v44, %v15963_v25  ;;  %7274 = vmatpush1.bf16.msra.mxu1 %v8619_v51  ;;  %7317 = vmatpush1.bf16.msra.mxu0 %v8715_v50  ;;  %v8709_v41 = vcombine.low %v15964_v44, %v15963_v25  ;;  %v15966_v8 = vld [vmem:[#allocation95_spill] sm:$0xff]  ;;  %v15967_v6 = vld [vmem:[#allocation194_spill] sm:$0xff]  ;;  %v15969_v55 = vld [vmem:[#allocation92_spill] sm:$0xff] }
0x1102   :  { %7275 = vmatprep.subr.bf16.mxu1 %v8614_v42  ;;  %v8608_v46 = vcombine.high %v15966_v8, %v15965_v43  ;;  %v15968_v60 = vld [vmem:[#allocation191_spill] sm:$0xff]  ;;  %v8607_v24 = vcombine.low %v15966_v8, %v15965_v43  ;;  %v15970_v4 = vld [vmem:[#allocation89_spill] sm:$0xff]  ;;  %v15971_v52 = vld [vmem:[#allocation188_spill] sm:$0xff] }
0x1103   :  { %7318 = vmatprep.subr.bf16.mxu0 %v8710_v7  ;;  %v8704_v59 = vcombine.high %v15968_v60, %v15967_v6  ;;  %v8703_v2 = vcombine.low %v15968_v60, %v15967_v6  ;;  %v8602_v34 = vcombine.high %v15970_v4, %v15969_v55  ;;  %v15972_v39 = vld [vmem:[#allocation185_spill] sm:$0xff]  ;;  %v8601_v3 = vcombine.low %v15970_v4, %v15969_v55  ;;  %v15973_v40 = vld [vmem:[#allocation86_spill] sm:$0xff]  ;;  %v15974_v37 = vld [vmem:[#allocation83_spill] sm:$0xff] }
0x1104   :  { %v8698_v27 = vcombine.high %v15972_v39, %v15971_v52  ;;  %v8697_v9 = vcombine.low %v15972_v39, %v15971_v52  ;;  %v8596_v11 = vcombine.high %v15974_v37, %v15973_v40  ;;  %v15975_v48 = vld [vmem:[#allocation182_spill] sm:$0xff]  ;;  %v15976_v13 = vld [vmem:[#allocation179_spill] sm:$0xff]  ;;  %v8595_v15 = vcombine.low %v15974_v37, %v15973_v40  ;;  %v15977_v45 = vld [vmem:[#allocation80_spill] sm:$0xff] }
0x1105   :  { %7276 = vmatpush1.bf16.msra.mxu1 %v8613_v62  ;;  %7319 = vmatpush1.bf16.msra.mxu0 %v8709_v41  ;;  %v8692_v61 = vcombine.high %v15976_v13, %v15975_v48  ;;  %v8691_v53 = vcombine.low %v15976_v13, %v15975_v48  ;;  %v15978_v29 = vld [vmem:[#allocation77_spill] sm:$0xff]  ;;  %v15979_v54 = vld [vmem:[#allocation176_spill] sm:$0xff]  ;;  %v15981_v35 = vld [vmem:[#allocation74_spill] sm:$0xff] }
0x1106   :  { %7277 = vmatprep.subr.bf16.mxu1 %v8608_v46  ;;  %7320 = vmatprep.subr.bf16.mxu0 %v8704_v59  ;;  %v8590_v31 = vcombine.high %v15978_v29, %v15977_v45  ;;  %v15980_v12 = vld [vmem:[#allocation173_spill] sm:$0xff]  ;;  %v8589_v33 = vcombine.low %v15978_v29, %v15977_v45  ;;  %v15982_v23 = vld [vmem:[#allocation71_spill] sm:$0xff]  ;;  %v15983_v18 = vld [vmem:[#allocation170_spill] sm:$0xff] }
0x1107   :  { %v8686_v1 = vcombine.high %v15980_v12, %v15979_v54  ;;  %v8685_v49 = vcombine.low %v15980_v12, %v15979_v54  ;;  %v8584_v17 = vcombine.high %v15982_v23, %v15981_v35  ;;  %v15984_v19 = vld [vmem:[#allocation167_spill] sm:$0xff]  ;;  %v8583_v21 = vcombine.low %v15982_v23, %v15981_v35  ;;  %v15985_v10 = vld [vmem:[#allocation164_spill] sm:$0xff]  ;;  %v15986_v38 = vld [vmem:[#allocation161_spill] sm:$0xff] }
0x1108   :  { %v8680_v36 = vcombine.high %v15984_v19, %v15983_v18  ;;  %v8679_v22 = vcombine.low %v15984_v19, %v15983_v18  ;;  %v8674_v56 = vcombine.high %v15986_v38, %v15985_v10  ;;  %v15987_v57 = vld [vmem:[#allocation260_spill] sm:$0xff]  ;;  %v15988_v28 = vld [vmem:[#allocation257_spill] sm:$0xff]  ;;  %v8673_v51 = vcombine.low %v15986_v38, %v15985_v10  ;;  %v15989_v32 = vld [vmem:[#allocation158_spill] sm:$0xff] }
0x1109   :  { %7278 = vmatpush1.bf16.msra.mxu1 %v8607_v24  ;;  %7321 = vmatpush1.bf16.msra.mxu0 %v8703_v2  ;;  %v8770_v30 = vcombine.high %v15988_v28, %v15987_v57  ;;  %v8769_v50 = vcombine.low %v15988_v28, %v15987_v57  ;;  %v15990_v63 = vld [vmem:[#allocation155_spill] sm:$0xff]  ;;  %v15991_v25 = vld [vmem:[#allocation254_spill] sm:$0xff]  ;;  %v15993_v43 = vld [vmem:[#allocation152_spill] sm:$0xff] }
0x110a   :  { %7279 = vmatprep.subr.bf16.mxu1 %v8602_v34  ;;  %7322 = vmatprep.subr.bf16.mxu0 %v8698_v27  ;;  %v8668_v42 = vcombine.high %v15990_v63, %v15989_v32  ;;  %v15992_v44 = vld [vmem:[#allocation251_spill] sm:$0xff]  ;;  %v8667_v62 = vcombine.low %v15990_v63, %v15989_v32  ;;  %v15994_v8 = vld [vmem:[#allocation149_spill] sm:$0xff]  ;;  %v15995_v6 = vld [vmem:[#allocation248_spill] sm:$0xff] }
0x110b   :  { %v8764_v7 = vcombine.high %v15992_v44, %v15991_v25  ;;  %v8763_v41 = vcombine.low %v15992_v44, %v15991_v25  ;;  %v8662_v46 = vcombine.high %v15994_v8, %v15993_v43  ;;  %v15996_v60 = vld [vmem:[#allocation245_spill] sm:$0xff]  ;;  %v8661_v24 = vcombine.low %v15994_v8, %v15993_v43  ;;  %v15997_v55 = vld [vmem:[#allocation146_spill] sm:$0xff]  ;;  %v15998_v4 = vld [vmem:[#allocation143_spill] sm:$0xff] }
0x110c   :  { %v8758_v59 = vcombine.high %v15996_v60, %v15995_v6  ;;  %v8757_v2 = vcombine.low %v15996_v60, %v15995_v6  ;;  %v8656_v34 = vcombine.high %v15998_v4, %v15997_v55  ;;  %v15999_v52 = vld [vmem:[#allocation242_spill] sm:$0xff]  ;;  %v16000_v39 = vld [vmem:[#allocation239_spill] sm:$0xff]  ;;  %v16001_v40 = vld [vmem:[#allocation140_spill] sm:$0xff] }
0x110d   :  { %7280 = vmatpush1.bf16.msra.mxu1 %v8601_v3  ;;  %7323 = vmatpush1.bf16.msra.mxu0 %v8697_v9  ;;  %v8752_v27 = vcombine.high %v16000_v39, %v15999_v52  ;;  %v8655_v3 = vcombine.low %v15998_v4, %v15997_v55  ;;  %v8751_v9 = vcombine.low %v16000_v39, %v15999_v52  ;;  %v16002_v37 = vld [vmem:[#allocation137_spill] sm:$0xff]  ;;  %v16003_v48 = vld [vmem:[#allocation236_spill] sm:$0xff]  ;;  %v16005_v45 = vld [vmem:[#allocation134_spill] sm:$0xff] }
0x110e   :  { %7281 = vmatprep.subr.bf16.mxu1 %v8596_v11  ;;  %7324 = vmatprep.subr.bf16.mxu0 %v8692_v61  ;;  %v8650_v11 = vcombine.high %v16002_v37, %v16001_v40  ;;  %v16004_v13 = vld [vmem:[#allocation233_spill] sm:$0xff]  ;;  %v16006_v29 = vld [vmem:[#allocation131_spill] sm:$0xff]  ;;  %v16007_v54 = vld [vmem:[#allocation230_spill] sm:$0xff] }
0x110f   :  { %v8746_v61 = vcombine.high %v16004_v13, %v16003_v48  ;;  %v16008_v12 = vld [vmem:[#allocation227_spill] sm:$0xff]  ;;  %v16009_v35 = vld [vmem:[#allocation128_spill] sm:$0xff]  ;;  %v16010_v23 = vld [vmem:[#allocation125_spill] sm:$0xff] }
0x1110   :  { %v16011_v18 = vld [vmem:[#allocation224_spill] sm:$0xff]  ;;  %v16012_v19 = vld [vmem:[#allocation221_spill] sm:$0xff]  ;;  %v16013_v10 = vld [vmem:[#allocation122_spill] sm:$0xff] }
0x1111   :  { %7282 = vmatpush1.bf16.msra.mxu1 %v8595_v15  ;;  %7325 = vmatpush1.bf16.msra.mxu0 %v8691_v53  ;;  %v8649_v15 = vcombine.low %v16002_v37, %v16001_v40  ;;  %v8745_v53 = vcombine.low %v16004_v13, %v16003_v48  ;;  %v16014_v38 = vld [vmem:[#allocation119_spill] sm:$0xff]  ;;  %v16015_v57 = vld [vmem:[#allocation218_spill] sm:$0xff]  ;;  %v16017_v32 = vld [vmem:[#allocation117_spill] sm:$0xff] }
0x1112   :  { %7283 = vmatprep.subr.bf16.mxu1 %v8590_v31  ;;  %7326 = vmatprep.subr.bf16.mxu0 %v8686_v1  ;;  %v8644_v31 = vcombine.high %v16006_v29, %v16005_v45  ;;  %v8740_v1 = vcombine.high %v16008_v12, %v16007_v54  ;;  %v16016_v28 = vld [vmem:[#allocation215_spill] sm:$0xff]  ;;  %v16018_v63 = vld [vmem:[#allocation114_spill] sm:$0xff]  ;;  %v16019_v25 = vld [vmem:[#allocation213_spill] sm:$0xff] }
0x1113   :  { %v16020_v44 = vld [vmem:[#allocation210_spill] sm:$0xff]  ;;  %v8627_v43 = vcombine.low %v16018_v63, %v16017_v32  ;;  %v16022_v6 = vld [vmem:[#allocation108_spill] sm:$0xff]  ;;  %v16027_v4 = vld [vmem:[#allocation201_spill] sm:$0xff] }
0x1114   :  { %v8723_v8 = vcombine.low %v16020_v44, %v16019_v25  ;;  %v16031_v37 = vld [vmem:[#allocation195_spill] sm:$0xff]  ;;  %vm16146_vm10 = vmmov %vm16145_vm13 }
0x1115   :  { %7284 = vmatpush1.bf16.msra.mxu1 %v8589_v33  ;;  %7327 = vmatpush1.bf16.msra.mxu0 %v8685_v49  ;;  %v8643_v33 = vcombine.low %v16006_v29, %v16005_v45  ;;  %v8739_v49 = vcombine.low %v16008_v12, %v16007_v54  ;;  %v16035_v29 = vld [vmem:[#allocation189_spill] sm:$0xff]  ;;  %vm16148_vm0 = vmmov %vm15958_vm1 }
0x1116   :  { %7285 = vmatprep.subr.bf16.mxu1 %v8584_v17  ;;  %7328 = vmatprep.subr.bf16.mxu0 %v8680_v36  ;;  %v8638_v17 = vcombine.high %v16010_v23, %v16009_v35  ;;  %v8734_v36 = vcombine.high %v16012_v19, %v16011_v18  ;;  %vm16149_vm12 = vmmov %vm16148_vm0 }
0x1119   :  { %7286 = vmatpush1.bf16.msra.mxu1 %v8583_v21  ;;  %7329 = vmatpush1.bf16.msra.mxu0 %v8679_v22  ;;  %v8637_v21 = vcombine.low %v16010_v23, %v16009_v35  ;;  %v8733_v22 = vcombine.low %v16012_v19, %v16011_v18  ;;  %v16039_v23 = vld [vmem:[#allocation183_spill] sm:$0xff] }
0x111a   :  { %7287 = vmatprep.subr.bf16.mxu1 %v8674_v56  ;;  %7330 = vmatprep.subr.bf16.mxu0 %v8770_v30  ;;  %v8632_v56 = vcombine.high %v16014_v38, %v16013_v10  ;;  %v8728_v30 = vcombine.high %v16016_v28, %v16015_v57 }
0x111d   :  { %7288 = vmatpush2.bf16.msra.mxu1 %v8673_v51  ;;  %7331 = vmatpush2.bf16.msra.mxu0 %v8769_v50  ;;  %v8631_v51 = vcombine.low %v16014_v38, %v16013_v10  ;;  %v8727_v50 = vcombine.low %v16016_v28, %v16015_v57  ;;  %v16043_v38 = vld [vmem:[#allocation177_spill] sm:$0xff] }
0x111e   :  { %7289 = vmatprep.subr.bf16.mxu1 %v8668_v42  ;;  %7332 = vmatprep.subr.bf16.mxu0 %v8764_v7  ;;  %v8628_v42 = vcombine.high %v16018_v63, %v16017_v32  ;;  %v8724_v7 = vcombine.high %v16020_v44, %v16019_v25  ;;  %v16047_v63 = vld [vmem:[#allocation171_spill] sm:$0xff] }
0x1121   :  { %7290 = vmatpush2.bf16.msra.mxu1 %v8667_v62  ;;  %7333 = vmatpush2.bf16.msra.mxu0 %v8763_v41  ;;  %v14115_v62 = vpack.c.bf16 %v13956_v20, %v13952_v5  ;;  %v14119_v41 = vpack.c.bf16 %v13958_v26, %v13954_v14  ;;  %v16024_v5 = vld [vmem:[#allocation204_spill] sm:$0xff] }
0x1122   :  { %7291 = vmatprep.subr.bf16.mxu1 %v8662_v46  ;;  %7334 = vmatprep.subr.bf16.mxu0 %v8758_v59  ;;  %v16021_v46 = vld [vmem:[#allocation111_spill] sm:$0xff] }
0x1123   :  { %v8622_v60 = vcombine.high %v16022_v6, %v16021_v46  ;;  %v16023_v59 = vld [vmem:[#allocation207_spill] sm:$0xff]  ;;  %v8621_v14 = vcombine.low %v16022_v6, %v16021_v46  ;;  %v16051_v6 = vld [vmem:[#allocation261_spill] sm:$0xff] }
0x1124   :  { %v8718_v20 = vcombine.high %v16024_v5, %v16023_v59  ;;  %v8717_v26 = vcombine.low %v16024_v5, %v16023_v59 }
0x1125   :  { %7292 = vmatpush2.bf16.msra.mxu1 %v8661_v24  ;;  %7335 = vmatpush2.bf16.msra.mxu0 %v8757_v2  ;;  %v16025_v24 = vld [vmem:[#allocation105_spill] sm:$0xff]  ;;  %v16026_v2 = vld [vmem:[#allocation102_spill] sm:$0xff] }
0x1126   :  { %7293 = vmatprep.subr.bf16.mxu1 %v8656_v34  ;;  %7336 = vmatprep.subr.bf16.mxu0 %v8752_v27  ;;  %v8616_v55 = vcombine.high %v16026_v2, %v16025_v24  ;;  %v16028_v34 = vld [vmem:[#allocation198_spill] sm:$0xff]  ;;  %v8615_v39 = vcombine.low %v16026_v2, %v16025_v24  ;;  %v16055_v2 = vld [vmem:[#allocation255_spill] sm:$0xff] }
0x1127   :  { %v8712_v52 = vcombine.high %v16028_v34, %v16027_v4  ;;  %v8711_v27 = vcombine.low %v16028_v34, %v16027_v4 }
0x1129   :  { %7294 = vmatpush2.bf16.msra.mxu1 %v8655_v3  ;;  %7337 = vmatpush2.bf16.msra.mxu0 %v8751_v9  ;;  %v16029_v3 = vld [vmem:[#allocation99_spill] sm:$0xff]  ;;  %v16030_v9 = vld [vmem:[#allocation96_spill] sm:$0xff] }
0x112a   :  { %7295 = vmatprep.subr.bf16.mxu1 %v8650_v11  ;;  %7338 = vmatprep.subr.bf16.mxu0 %v8746_v61  ;;  %v8610_v40 = vcombine.high %v16030_v9, %v16029_v3  ;;  %v16032_v11 = vld [vmem:[#allocation192_spill] sm:$0xff]  ;;  %v8609_v13 = vcombine.low %v16030_v9, %v16029_v3  ;;  %v16059_v9 = vld [vmem:[#allocation249_spill] sm:$0xff] }
0x112b   :  { %v8706_v48 = vcombine.high %v16032_v11, %v16031_v37  ;;  %v8705_v61 = vcombine.low %v16032_v11, %v16031_v37 }
0x112d   :  { %7296 = vmatpush2.bf16.msra.mxu1 %v8649_v15  ;;  %7339 = vmatpush2.bf16.msra.mxu0 %v8745_v53  ;;  %v16033_v15 = vld [vmem:[#allocation93_spill] sm:$0xff]  ;;  %v16034_v53 = vld [vmem:[#allocation90_spill] sm:$0xff] }
0x112e   :  { %7297 = vmatprep.subr.bf16.mxu1 %v8644_v31  ;;  %7340 = vmatprep.subr.bf16.mxu0 %v8740_v1  ;;  %v8604_v45 = vcombine.high %v16034_v53, %v16033_v15  ;;  %v16036_v31 = vld [vmem:[#allocation186_spill] sm:$0xff]  ;;  %v8603_v12 = vcombine.low %v16034_v53, %v16033_v15  ;;  %v16063_v53 = vld [vmem:[#allocation243_spill] sm:$0xff] }
0x112f   :  { %v8700_v54 = vcombine.high %v16036_v31, %v16035_v29  ;;  %v8699_v1 = vcombine.low %v16036_v31, %v16035_v29 }
0x1131   :  { %7298 = vmatpush2.bf16.msra.mxu1 %v8643_v33  ;;  %7341 = vmatpush2.bf16.msra.mxu0 %v8739_v49  ;;  %v16037_v33 = vld [vmem:[#allocation87_spill] sm:$0xff]  ;;  %v16038_v49 = vld [vmem:[#allocation84_spill] sm:$0xff] }
0x1132   :  { %7299 = vmatprep.subr.bf16.mxu1 %v8638_v17  ;;  %7342 = vmatprep.subr.bf16.mxu0 %v8734_v36  ;;  %v8598_v35 = vcombine.high %v16038_v49, %v16037_v33  ;;  %v16040_v17 = vld [vmem:[#allocation180_spill] sm:$0xff]  ;;  %v8597_v19 = vcombine.low %v16038_v49, %v16037_v33  ;;  %v16067_v49 = vld [vmem:[#allocation237_spill] sm:$0xff] }
0x1133   :  { %v8694_v18 = vcombine.high %v16040_v17, %v16039_v23  ;;  %v8693_v36 = vcombine.low %v16040_v17, %v16039_v23 }
0x1135   :  { %7300 = vmatpush2.bf16.msra.mxu1 %v8637_v21  ;;  %7343 = vmatpush2.bf16.msra.mxu0 %v8733_v22  ;;  %v16041_v21 = vld [vmem:[#allocation81_spill] sm:$0xff]  ;;  %v16042_v22 = vld [vmem:[#allocation78_spill] sm:$0xff] }
0x1136   :  { %7301 = vmatprep.subr.bf16.mxu1 %v8632_v56  ;;  %7344 = vmatprep.subr.bf16.mxu0 %v8728_v30  ;;  %v8592_v10 = vcombine.high %v16042_v22, %v16041_v21  ;;  %v16044_v56 = vld [vmem:[#allocation174_spill] sm:$0xff]  ;;  %v8591_v28 = vcombine.low %v16042_v22, %v16041_v21  ;;  %v16071_v22 = vld [vmem:[#allocation231_spill] sm:$0xff] }
0x1137   :  { %v8688_v57 = vcombine.high %v16044_v56, %v16043_v38  ;;  %v8687_v30 = vcombine.low %v16044_v56, %v16043_v38 }
0x1139   :  { %7302 = vmatpush2.bf16.msra.mxu1 %v8631_v51  ;;  %7345 = vmatpush2.bf16.msra.mxu0 %v8727_v50  ;;  %v16045_v51 = vld [vmem:[#allocation75_spill] sm:$0xff]  ;;  %v16046_v50 = vld [vmem:[#allocation72_spill] sm:$0xff] }
0x113a   :  { %7357 = vmatprep.subr.bf16.mxu1 %v8628_v42  ;;  %7400 = vmatprep.subr.bf16.mxu0 %v8724_v7  ;;  %v8586_v32 = vcombine.high %v16046_v50, %v16045_v51  ;;  %v16048_v42 = vld [vmem:[#allocation168_spill] sm:$0xff]  ;;  %v8585_v44 = vcombine.low %v16046_v50, %v16045_v51  ;;  %v16075_v50 = vld [vmem:[#allocation225_spill] sm:$0xff] }
0x113b   :  { %v8682_v25 = vcombine.high %v16048_v42, %v16047_v63  ;;  %v8681_v7 = vcombine.low %v16048_v42, %v16047_v63 }
0x113c   :  { %7304 = vmatmul.mubr.bf16.vlgmr.msra.gmra.mxu1 %v14115_v62  ;;  %7347 = vmatmul.mubr.bf16.vlgmr.msra.gmra.mxu0 %v14119_v41 }
0x113d   :  { %7358 = vmatpush1.bf16.msra.mxu1 %v8627_v43  ;;  %7401 = vmatpush1.bf16.msra.mxu0 %v8723_v8  ;;  %v16049_v43 = vld [vmem:[#allocation165_spill] sm:$0xff]  ;;  %v16050_v8 = vld [vmem:[#allocation162_spill] sm:$0xff] }
0x113e   :  { %7359 = vmatprep.subr.bf16.mxu1 %v8622_v60  ;;  %7402 = vmatprep.subr.bf16.mxu0 %v8718_v20  ;;  %v8676_v46 = vcombine.high %v16050_v8, %v16049_v43  ;;  %v16052_v60 = vld [vmem:[#allocation258_spill] sm:$0xff]  ;;  %v8675_v5 = vcombine.low %v16050_v8, %v16049_v43  ;;  %v16079_v8 = vld [vmem:[#allocation219_spill] sm:$0xff] }
0x113f   :  { %7389 = vmatprep.mubr.bf16.mxu1 %v14019_v0  ;;  %7432 = vmatprep.mubr.bf16.mxu0 %v14021_v58  ;;  %v8772_v59 = vcombine.high %v16052_v60, %v16051_v6  ;;  %v8771_v20 = vcombine.low %v16052_v60, %v16051_v6 }
0x1141   :  { %7360 = vmatpush1.bf16.msra.mxu1 %v8621_v14  ;;  %7403 = vmatpush1.bf16.msra.mxu0 %v8717_v26  ;;  %v16053_v14 = vld [vmem:[#allocation159_spill] sm:$0xff]  ;;  %v16054_v26 = vld [vmem:[#allocation156_spill] sm:$0xff] }
0x1142   :  { %7361 = vmatprep.subr.bf16.mxu1 %v8616_v55  ;;  %7404 = vmatprep.subr.bf16.mxu0 %v8712_v52  ;;  %v8670_v24 = vcombine.high %v16054_v26, %v16053_v14  ;;  %v16056_v55 = vld [vmem:[#allocation252_spill] sm:$0xff]  ;;  %v8669_v34 = vcombine.low %v16054_v26, %v16053_v14  ;;  %v16083_v26 = vld [vmem:[#allocation214_spill] sm:$0xff] }
0x1143   :  { %v8766_v4 = vcombine.high %v16056_v55, %v16055_v2  ;;  %v8765_v52 = vcombine.low %v16056_v55, %v16055_v2 }
0x1145   :  { %7362 = vmatpush1.bf16.msra.mxu1 %v8615_v39  ;;  %7405 = vmatpush1.bf16.msra.mxu0 %v8711_v27  ;;  %v16057_v39 = vld [vmem:[#allocation153_spill] sm:$0xff]  ;;  %v16058_v27 = vld [vmem:[#allocation150_spill] sm:$0xff] }
0x1146   :  { %7363 = vmatprep.subr.bf16.mxu1 %v8610_v40  ;;  %7406 = vmatprep.subr.bf16.mxu0 %v8706_v48  ;;  %v8664_v3 = vcombine.high %v16058_v27, %v16057_v39  ;;  %v16060_v40 = vld [vmem:[#allocation246_spill] sm:$0xff]  ;;  %v8663_v11 = vcombine.low %v16058_v27, %v16057_v39  ;;  %v16087_v27 = vld [vmem:[#allocation208_spill] sm:$0xff] }
0x1147   :  { %v8760_v37 = vcombine.high %v16060_v40, %v16059_v9  ;;  %v8759_v48 = vcombine.low %v16060_v40, %v16059_v9 }
0x1149   :  { %7364 = vmatpush1.bf16.msra.mxu1 %v8609_v13  ;;  %7407 = vmatpush1.bf16.msra.mxu0 %v8705_v61  ;;  %v16061_v13 = vld [vmem:[#allocation147_spill] sm:$0xff]  ;;  %v16062_v61 = vld [vmem:[#allocation144_spill] sm:$0xff] }
0x114a   :  { %7365 = vmatprep.subr.bf16.mxu1 %v8604_v45  ;;  %7408 = vmatprep.subr.bf16.mxu0 %v8700_v54  ;;  %v8658_v15 = vcombine.high %v16062_v61, %v16061_v13  ;;  %v16064_v45 = vld [vmem:[#allocation240_spill] sm:$0xff]  ;;  %v8657_v31 = vcombine.low %v16062_v61, %v16061_v13  ;;  %v16091_v61 = vld [vmem:[#allocation202_spill] sm:$0xff] }
0x114b   :  { %v8754_v29 = vcombine.high %v16064_v45, %v16063_v53  ;;  %v8753_v54 = vcombine.low %v16064_v45, %v16063_v53 }
0x114d   :  { %7366 = vmatpush1.bf16.msra.mxu1 %v8603_v12  ;;  %7409 = vmatpush1.bf16.msra.mxu0 %v8699_v1  ;;  %v16065_v12 = vld [vmem:[#allocation141_spill] sm:$0xff]  ;;  %v16066_v1 = vld [vmem:[#allocation138_spill] sm:$0xff] }
0x114e   :  { %7367 = vmatprep.subr.bf16.mxu1 %v8598_v35  ;;  %7410 = vmatprep.subr.bf16.mxu0 %v8694_v18  ;;  %v8652_v33 = vcombine.high %v16066_v1, %v16065_v12  ;;  %v16068_v35 = vld [vmem:[#allocation234_spill] sm:$0xff]  ;;  %v8651_v17 = vcombine.low %v16066_v1, %v16065_v12  ;;  %v16095_v1 = vld [vmem:[#allocation196_spill] sm:$0xff] }
0x114f   :  { %v8748_v23 = vcombine.high %v16068_v35, %v16067_v49  ;;  %v8747_v18 = vcombine.low %v16068_v35, %v16067_v49  ;;  %v16097_v35 = vld [vmem:[#allocation94_spill] sm:$0xff] }
0x1151   :  { %7368 = vmatpush1.bf16.msra.mxu1 %v8597_v19  ;;  %7411 = vmatpush1.bf16.msra.mxu0 %v8693_v36  ;;  %v16069_v19 = vld [vmem:[#allocation135_spill] sm:$0xff]  ;;  %v16070_v36 = vld [vmem:[#allocation132_spill] sm:$0xff] }
0x1152   :  { %7369 = vmatprep.subr.bf16.mxu1 %v8592_v10  ;;  %7412 = vmatprep.subr.bf16.mxu0 %v8688_v57  ;;  %v8646_v21 = vcombine.high %v16070_v36, %v16069_v19  ;;  %v16072_v10 = vld [vmem:[#allocation228_spill] sm:$0xff]  ;;  %v8645_v56 = vcombine.low %v16070_v36, %v16069_v19  ;;  %v16100_v19 = vld [vmem:[#allocation187_spill] sm:$0xff] }
0x1153   :  { %v8742_v38 = vcombine.high %v16072_v10, %v16071_v22  ;;  %v8741_v57 = vcombine.low %v16072_v10, %v16071_v22  ;;  %v16101_v10 = vld [vmem:[#allocation88_spill] sm:$0xff] }
0x1155   :  { %7370 = vmatpush1.bf16.msra.mxu1 %v8591_v28  ;;  %7413 = vmatpush1.bf16.msra.mxu0 %v8687_v30  ;;  %v16073_v28 = vld [vmem:[#allocation129_spill] sm:$0xff]  ;;  %v16074_v30 = vld [vmem:[#allocation126_spill] sm:$0xff] }
0x1156   :  { %7371 = vmatprep.subr.bf16.mxu1 %v8586_v32  ;;  %7414 = vmatprep.subr.bf16.mxu0 %v8682_v25  ;;  %v8640_v51 = vcombine.high %v16074_v30, %v16073_v28  ;;  %v16076_v32 = vld [vmem:[#allocation222_spill] sm:$0xff]  ;;  %v8639_v42 = vcombine.low %v16074_v30, %v16073_v28  ;;  %v16104_v28 = vld [vmem:[#allocation181_spill] sm:$0xff] }
0x1157   :  { %v8736_v63 = vcombine.high %v16076_v32, %v16075_v50  ;;  %v8735_v25 = vcombine.low %v16076_v32, %v16075_v50  ;;  %v16105_v32 = vld [vmem:[#allocation82_spill] sm:$0xff] }
0x1159   :  { %7372 = vmatpush1.bf16.msra.mxu1 %v8585_v44  ;;  %7415 = vmatpush1.bf16.msra.mxu0 %v8681_v7  ;;  %v16077_v44 = vld [vmem:[#allocation123_spill] sm:$0xff]  ;;  %v16078_v7 = vld [vmem:[#allocation120_spill] sm:$0xff] }
0x115a   :  { %7373 = vmatprep.subr.bf16.mxu1 %v8676_v46  ;;  %7416 = vmatprep.subr.bf16.mxu0 %v8772_v59  ;;  %v8634_v43 = vcombine.high %v16078_v7, %v16077_v44  ;;  %v16080_v46 = vld [vmem:[#allocation216_spill] sm:$0xff]  ;;  %v8633_v60 = vcombine.low %v16078_v7, %v16077_v44  ;;  %v16108_v44 = vld [vmem:[#allocation175_spill] sm:$0xff] }
0x115b   :  { %v8730_v6 = vcombine.high %v16080_v46, %v16079_v8  ;;  %v8729_v59 = vcombine.low %v16080_v46, %v16079_v8  ;;  %v16109_v46 = vld [vmem:[#allocation76_spill] sm:$0xff] }
0x115d   :  { %7374 = vmatpush2.bf16.msra.mxu1 %v8675_v5  ;;  %7417 = vmatpush2.bf16.msra.mxu0 %v8771_v20  ;;  %v16081_v5 = vld [vmem:[#allocation118_spill] sm:$0xff]  ;;  %v16082_v20 = vld [vmem:[#allocation115_spill] sm:$0xff] }
0x115e   :  { %7375 = vmatprep.subr.bf16.mxu1 %v8670_v24  ;;  %7418 = vmatprep.subr.bf16.mxu0 %v8766_v4  ;;  %v8630_v14 = vcombine.high %v16082_v20, %v16081_v5  ;;  %v16084_v24 = vld [vmem:[#allocation211_spill] sm:$0xff]  ;;  %v8629_v55 = vcombine.low %v16082_v20, %v16081_v5  ;;  %v16112_v5 = vld [vmem:[#allocation169_spill] sm:$0xff] }
0x115f   :  { %v8726_v2 = vcombine.high %v16084_v24, %v16083_v26  ;;  %v8725_v4 = vcombine.low %v16084_v24, %v16083_v26  ;;  %v16113_v24 = vld [vmem:[#allocation166_spill] sm:$0xff] }
0x1161   :  { %7376 = vmatpush2.bf16.msra.mxu1 %v8669_v34  ;;  %7419 = vmatpush2.bf16.msra.mxu0 %v8765_v52  ;;  %v16085_v34 = vld [vmem:[#allocation112_spill] sm:$0xff]  ;;  %v16086_v52 = vld [vmem:[#allocation109_spill] sm:$0xff] }
0x1162   :  { %7377 = vmatprep.subr.bf16.mxu1 %v8664_v3  ;;  %7420 = vmatprep.subr.bf16.mxu0 %v8760_v37  ;;  %v8624_v39 = vcombine.high %v16086_v52, %v16085_v34  ;;  %v16088_v3 = vld [vmem:[#allocation205_spill] sm:$0xff]  ;;  %v8623_v40 = vcombine.low %v16086_v52, %v16085_v34  ;;  %v16116_v34 = vld [vmem:[#allocation259_spill] sm:$0xff] }
0x1163   :  { %v8720_v9 = vcombine.high %v16088_v3, %v16087_v27  ;;  %v8719_v37 = vcombine.low %v16088_v3, %v16087_v27  ;;  %v16117_v3 = vld [vmem:[#allocation160_spill] sm:$0xff] }
0x1165   :  { %7378 = vmatpush2.bf16.msra.mxu1 %v8663_v11  ;;  %7421 = vmatpush2.bf16.msra.mxu0 %v8759_v48  ;;  %v16089_v11 = vld [vmem:[#allocation106_spill] sm:$0xff]  ;;  %v16090_v48 = vld [vmem:[#allocation103_spill] sm:$0xff] }
0x1166   :  { %7379 = vmatprep.subr.bf16.mxu1 %v8658_v15  ;;  %7422 = vmatprep.subr.bf16.mxu0 %v8754_v29  ;;  %v8618_v13 = vcombine.high %v16090_v48, %v16089_v11  ;;  %v16092_v15 = vld [vmem:[#allocation199_spill] sm:$0xff]  ;;  %v8617_v45 = vcombine.low %v16090_v48, %v16089_v11  ;;  %v16120_v11 = vld [vmem:[#allocation253_spill] sm:$0xff] }
0x1167   :  { %v8714_v53 = vcombine.high %v16092_v15, %v16091_v61  ;;  %v8713_v29 = vcombine.low %v16092_v15, %v16091_v61  ;;  %v16121_v15 = vld [vmem:[#allocation154_spill] sm:$0xff] }
0x1169   :  { %7380 = vmatpush2.bf16.msra.mxu1 %v8657_v31  ;;  %7423 = vmatpush2.bf16.msra.mxu0 %v8753_v54  ;;  %v16093_v31 = vld [vmem:[#allocation100_spill] sm:$0xff]  ;;  %v16094_v54 = vld [vmem:[#allocation97_spill] sm:$0xff] }
0x116a   :  { %7381 = vmatprep.subr.bf16.mxu1 %v8652_v33  ;;  %7424 = vmatprep.subr.bf16.mxu0 %v8748_v23  ;;  %v8612_v12 = vcombine.high %v16094_v54, %v16093_v31  ;;  %v16096_v33 = vld [vmem:[#allocation193_spill] sm:$0xff]  ;;  %v16098_v23 = vld [vmem:[#allocation91_spill] sm:$0xff] }
0x116b   :  { %v8708_v49 = vcombine.high %v16096_v33, %v16095_v1 }
0x116d   :  { %7382 = vmatpush2.bf16.msra.mxu1 %v8651_v17  ;;  %7425 = vmatpush2.bf16.msra.mxu0 %v8747_v18  ;;  %v8606_v17 = vcombine.high %v16098_v23, %v16097_v35  ;;  %v16099_v18 = vld [vmem:[#allocation190_spill] sm:$0xff] }
0x116e   :  { %7383 = vmatprep.subr.bf16.mxu1 %v8646_v21  ;;  %7426 = vmatprep.subr.bf16.mxu0 %v8742_v38  ;;  %v8702_v36 = vcombine.high %v16100_v19, %v16099_v18  ;;  %v8605_v21 = vcombine.low %v16098_v23, %v16097_v35  ;;  %v8701_v22 = vcombine.low %v16100_v19, %v16099_v18  ;;  %v16102_v38 = vld [vmem:[#allocation85_spill] sm:$0xff]  ;;  %v16129_v19 = vld [vmem:[#allocation142_spill] sm:$0xff] }
0x116f   :  { %v16128_v35 = vld [vmem:[#allocation241_spill] sm:$0xff] }
0x1171   :  { %7384 = vmatpush2.bf16.msra.mxu1 %v8645_v56  ;;  %7427 = vmatpush2.bf16.msra.mxu0 %v8741_v57  ;;  %v8600_v56 = vcombine.high %v16102_v38, %v16101_v10  ;;  %v16103_v57 = vld [vmem:[#allocation184_spill] sm:$0xff] }
0x1172   :  { %7385 = vmatprep.subr.bf16.mxu1 %v8640_v51  ;;  %7428 = vmatprep.subr.bf16.mxu0 %v8736_v63  ;;  %v8696_v30 = vcombine.high %v16104_v28, %v16103_v57  ;;  %v8599_v51 = vcombine.low %v16102_v38, %v16101_v10  ;;  %v8695_v50 = vcombine.low %v16104_v28, %v16103_v57  ;;  %v16106_v63 = vld [vmem:[#allocation79_spill] sm:$0xff]  ;;  %v16133_v28 = vld [vmem:[#allocation136_spill] sm:$0xff] }
0x1173   :  { %v16132_v10 = vld [vmem:[#allocation235_spill] sm:$0xff] }
0x1175   :  { %7386 = vmatpush2.bf16.msra.mxu1 %v8639_v42  ;;  %7429 = vmatpush2.bf16.msra.mxu0 %v8735_v25  ;;  %v8594_v42 = vcombine.high %v16106_v63, %v16105_v32  ;;  %v16107_v25 = vld [vmem:[#allocation178_spill] sm:$0xff] }
0x1176   :  { %7387 = vmatprep.subr.bf16.mxu1 %v8634_v43  ;;  %7430 = vmatprep.subr.bf16.mxu0 %v8730_v6  ;;  %v8690_v7 = vcombine.high %v16108_v44, %v16107_v25  ;;  %v8593_v43 = vcombine.low %v16106_v63, %v16105_v32  ;;  %v8689_v8 = vcombine.low %v16108_v44, %v16107_v25  ;;  %v16110_v6 = vld [vmem:[#allocation73_spill] sm:$0xff]  ;;  %v16137_v44 = vld [vmem:[#allocation130_spill] sm:$0xff] }
0x1177   :  { %v16136_v32 = vld [vmem:[#allocation229_spill] sm:$0xff] }
0x1179   :  { %7388 = vmatpush2.bf16.msra.mxu1 %v8633_v60  ;;  %7431 = vmatpush2.bf16.msra.mxu0 %v8729_v59  ;;  %v8588_v60 = vcombine.high %v16110_v6, %v16109_v46  ;;  %v16111_v59 = vld [vmem:[#allocation172_spill] sm:$0xff] }
0x117a   :  { %7443 = vmatprep.subr.bf16.mxu1 %v8630_v14  ;;  %7486 = vmatprep.subr.bf16.mxu0 %v8726_v2  ;;  %v8684_v20 = vcombine.high %v16112_v5, %v16111_v59  ;;  %v8587_v14 = vcombine.low %v16110_v6, %v16109_v46  ;;  %v8683_v26 = vcombine.low %v16112_v5, %v16111_v59  ;;  %v16114_v2 = vld [vmem:[#allocation163_spill] sm:$0xff]  ;;  %v16141_v5 = vld [vmem:[#allocation124_spill] sm:$0xff] }
0x117b   :  { %v16140_v46 = vld [vmem:[#allocation223_spill] sm:$0xff] }
0x117c   :  { %7390 = vmatmul.mubr.bf16.vlgmr.msra.gmra.mxu1 %v14115_v62  ;;  %7433 = vmatmul.mubr.bf16.vlgmr.msra.gmra.mxu0 %v14119_v41 }
0x117d   :  { %7444 = vmatpush1.bf16.msra.mxu1 %v8629_v55  ;;  %7487 = vmatpush1.bf16.msra.mxu0 %v8725_v4  ;;  %v8678_v55 = vcombine.high %v16114_v2, %v16113_v24  ;;  %v16115_v4 = vld [vmem:[#allocation262_spill] sm:$0xff] }
0x117e   :  { %7445 = vmatprep.subr.bf16.mxu1 %v8624_v39  ;;  %7488 = vmatprep.subr.bf16.mxu0 %v8720_v9  ;;  %v8774_v52 = vcombine.high %v16116_v34, %v16115_v4  ;;  %v8677_v39 = vcombine.low %v16114_v2, %v16113_v24  ;;  %v8773_v27 = vcombine.low %v16116_v34, %v16115_v4  ;;  %v16118_v9 = vld [vmem:[#allocation157_spill] sm:$0xff]  ;;  %v9627_v34 = vld [vmem:[%s14502_s7 + $0x58] ss:$0 sps:$4 sm:$0xff]  }
0x117f   :  { %7475 = vmatprep.mubr.bf16.mxu1 %v14019_v0  ;;  %7518 = vmatprep.mubr.bf16.mxu0 %v14021_v58  ;;  %v8611_v0 = vcombine.low %v16094_v54, %v16093_v31  ;;  %v8707_v58 = vcombine.low %v16096_v33, %v16095_v1  ;;  %v16124_v31 = vld [vmem:[#allocation247_spill] sm:$0xff]  ;;  %v16125_v33 = vld [vmem:[#allocation148_spill] sm:$0xff]  ;;  %v16144_v24 = vld [vmem:[#allocation217_spill] sm:$0xff] }
0x1181   :  { %7446 = vmatpush1.bf16.msra.mxu1 %v8623_v40  ;;  %7489 = vmatpush1.bf16.msra.mxu0 %v8719_v37  ;;  %v8672_v40 = vcombine.high %v16118_v9, %v16117_v3  ;;  %v16119_v37 = vld [vmem:[#allocation256_spill] sm:$0xff] }
0x1182   :  { %7447 = vmatprep.subr.bf16.mxu1 %v8618_v13  ;;  %7490 = vmatprep.subr.bf16.mxu0 %v8714_v53  ;;  %v8768_v48 = vcombine.high %v16120_v11, %v16119_v37  ;;  %v8671_v13 = vcombine.low %v16118_v9, %v16117_v3  ;;  %v8767_v61 = vcombine.low %v16120_v11, %v16119_v37  ;;  %v16122_v53 = vld [vmem:[#allocation151_spill] sm:$0xff] }
0x1183   :  { %v7575_v3 = vpack.c.bf16 %v15959_v47, %v15959_v47  ;;  %v9629_v9 = vld [vmem:[%s14502_s7 + $0x50] sm:$0xff]  }
0x1185   :  { %7448 = vmatpush1.bf16.msra.mxu1 %v8617_v45  ;;  %7491 = vmatpush1.bf16.msra.mxu0 %v8713_v29  ;;  %v8666_v45 = vcombine.high %v16122_v53, %v16121_v15  ;;  %v16123_v29 = vld [vmem:[#allocation250_spill] sm:$0xff]  ;;  %v7577_v47 = vrot.slane %v7575_v3, 1 }
0x1186   :  { %7449 = vmatprep.subr.bf16.mxu1 %v8612_v12  ;;  %7492 = vmatprep.subr.bf16.mxu0 %v8708_v49  ;;  %v8762_v54 = vcombine.high %v16124_v31, %v16123_v29  ;;  %v8665_v12 = vcombine.low %v16122_v53, %v16121_v15  ;;  %v8761_v1 = vcombine.low %v16124_v31, %v16123_v29  ;;  %v16126_v49 = vld [vmem:[#allocation145_spill] sm:$0xff] }
0x1189   :  { %7450 = vmatpush1.bf16.msra.mxu1 %v8611_v0  ;;  %7493 = vmatpush1.bf16.msra.mxu0 %v8707_v58  ;;  %v8660_v0 = vcombine.high %v16126_v49, %v16125_v33  ;;  %v16127_v58 = vld [vmem:[#allocation244_spill] sm:$0xff] }
0x118a   :  { %7451 = vmatprep.subr.bf16.mxu1 %v8606_v17  ;;  %7494 = vmatprep.subr.bf16.mxu0 %v8702_v36  ;;  %v8756_v23 = vcombine.high %v16128_v35, %v16127_v58  ;;  %v8659_v17 = vcombine.low %v16126_v49, %v16125_v33  ;;  %v8755_v18 = vcombine.low %v16128_v35, %v16127_v58  ;;  %v16130_v36 = vld [vmem:[#allocation139_spill] sm:$0xff]  ;;  %v9634_v33 = vld [vmem:[%s14502_s7] sm:$0xff]  }
0x118d   :  { %7452 = vmatpush1.bf16.msra.mxu1 %v8605_v21  ;;  %7495 = vmatpush1.bf16.msra.mxu0 %v8701_v22  ;;  %v8654_v21 = vcombine.high %v16130_v36, %v16129_v19  ;;  %v16131_v22 = vld [vmem:[#allocation238_spill] sm:$0xff] }
0x118e   :  { %7453 = vmatprep.subr.bf16.mxu1 %v8600_v56  ;;  %7496 = vmatprep.subr.bf16.mxu0 %v8696_v30  ;;  %v8750_v38 = vcombine.high %v16132_v10, %v16131_v22  ;;  %v8653_v56 = vcombine.low %v16130_v36, %v16129_v19  ;;  %v8749_v57 = vcombine.low %v16132_v10, %v16131_v22  ;;  %v16134_v30 = vld [vmem:[#allocation133_spill] sm:$0xff] }
0x1191   :  { %7454 = vmatpush1.bf16.msra.mxu1 %v8599_v51  ;;  %7497 = vmatpush1.bf16.msra.mxu0 %v8695_v50  ;;  %v8648_v51 = vcombine.high %v16134_v30, %v16133_v28  ;;  %v16135_v50 = vld [vmem:[#allocation232_spill] sm:$0xff] }
0x1192   :  { %7455 = vmatprep.subr.bf16.mxu1 %v8594_v42  ;;  %7498 = vmatprep.subr.bf16.mxu0 %v8690_v7  ;;  %v8744_v63 = vcombine.high %v16136_v32, %v16135_v50  ;;  %v8647_v42 = vcombine.low %v16134_v30, %v16133_v28  ;;  %v8743_v25 = vcombine.low %v16136_v32, %v16135_v50  ;;  %v16138_v7 = vld [vmem:[#allocation127_spill] sm:$0xff] }
0x1195   :  { %7456 = vmatpush1.bf16.msra.mxu1 %v8593_v43  ;;  %7499 = vmatpush1.bf16.msra.mxu0 %v8689_v8  ;;  %v8642_v43 = vcombine.high %v16138_v7, %v16137_v44  ;;  %v16139_v8 = vld [vmem:[#allocation226_spill] sm:$0xff] }
0x1196   :  { %7457 = vmatprep.subr.bf16.mxu1 %v8588_v60  ;;  %7500 = vmatprep.subr.bf16.mxu0 %v8684_v20  ;;  %v8738_v6 = vcombine.high %v16140_v46, %v16139_v8  ;;  %v8641_v60 = vcombine.low %v16138_v7, %v16137_v44  ;;  %v8737_v59 = vcombine.low %v16140_v46, %v16139_v8  ;;  %v16142_v20 = vld [vmem:[#allocation121_spill] sm:$0xff] }
0x1199   :  { %7458 = vmatpush1.bf16.msra.mxu1 %v8587_v14  ;;  %7501 = vmatpush1.bf16.msra.mxu0 %v8683_v26  ;;  %v8636_v14 = vcombine.high %v16142_v20, %v16141_v5  ;;  %v16143_v26 = vld [vmem:[#allocation220_spill] sm:$0xff] }
0x119a   :  { %7459 = vmatprep.subr.bf16.mxu1 %v8678_v55  ;;  %7502 = vmatprep.subr.bf16.mxu0 %v8774_v52  ;;  %v8732_v2 = vcombine.high %v16144_v24, %v16143_v26  ;;  %v8635_v55 = vcombine.low %v16142_v20, %v16141_v5  ;;  %v8731_v4 = vcombine.low %v16144_v24, %v16143_v26  ;;  %v9628_v52 = vld [vmem:[%s14502_s7 + $0x48] ss:$0 sps:$4 sm:$0xff]  }
0x119d   :  { %7460 = vmatpush2.bf16.msra.mxu1 %v8677_v39  ;;  %7503 = vmatpush2.bf16.msra.mxu0 %v8773_v27  ;;  %v7591_v39 = vsel %vm16145_vm13, %v9627_v34, 0  ;;  %v7646_v27 = vsel %vm16146_vm10, %v9628_v52, 0 }
0x119e   :  { %7461 = vmatprep.subr.bf16.mxu1 %v8672_v40  ;;  %7504 = vmatprep.subr.bf16.mxu0 %v8768_v48  ;;  %v9630_v40 = vld [vmem:[%s14502_s7 + $0x40] sm:$0xff]  }
0x11a1   :  { %7462 = vmatpush2.bf16.msra.mxu1 %v8671_v13  ;;  %7505 = vmatpush2.bf16.msra.mxu0 %v8767_v61  ;;  %v9632_v61 = vld [vmem:[%s14502_s7 + $0x10] sm:$0xff]  }
0x11a2   :  { %7463 = vmatprep.subr.bf16.mxu1 %v8666_v45  ;;  %7506 = vmatprep.subr.bf16.mxu0 %v8762_v54 }
0x11a5   :  { %7464 = vmatpush2.bf16.msra.mxu1 %v8665_v12  ;;  %7507 = vmatpush2.bf16.msra.mxu0 %v8761_v1  ;;  %v9633_v12 = vld [vmem:[%s14502_s7 + $0x8] sm:$0xff]  }
0x11a6   :  { %7465 = vmatprep.subr.bf16.mxu1 %v8660_v0  ;;  %7508 = vmatprep.subr.bf16.mxu0 %v8756_v23  ;;  %v9635_v23 = vld [vmem:[%s14502_s7 + $0x38] sm:$0xff]  }
0x11a9   :  { %7466 = vmatpush2.bf16.msra.mxu1 %v8659_v17  ;;  %7509 = vmatpush2.bf16.msra.mxu0 %v8755_v18  ;;  %v9636_v17 = vld [vmem:[%s14502_s7 + $0x30] sm:$0xff]   ;;  %v9637_v18 = vld [vmem:[%s14502_s7 + $0x28] sm:$0xff]  }
0x11aa   :  { %7467 = vmatprep.subr.bf16.mxu1 %v8654_v21  ;;  %7510 = vmatprep.subr.bf16.mxu0 %v8750_v38 }
0x11ad   :  { %7468 = vmatpush2.bf16.msra.mxu1 %v8653_v56  ;;  %7511 = vmatpush2.bf16.msra.mxu0 %v8749_v57 }
0x11ae   :  { %7469 = vmatprep.subr.bf16.mxu1 %v8648_v51  ;;  %7512 = vmatprep.subr.bf16.mxu0 %v8744_v63 }
0x11b1   :  { %7470 = vmatpush2.bf16.msra.mxu1 %v8647_v42  ;;  %7513 = vmatpush2.bf16.msra.mxu0 %v8743_v25 }
0x11b2   :  { %7471 = vmatprep.subr.bf16.mxu1 %v8642_v43  ;;  %7514 = vmatprep.subr.bf16.mxu0 %v8738_v6 }
0x11b5   :  { %7472 = vmatpush2.bf16.msra.mxu1 %v8641_v60  ;;  %7515 = vmatpush2.bf16.msra.mxu0 %v8737_v59 }
0x11b6   :  { %7473 = vmatprep.subr.bf16.mxu1 %v8636_v14  ;;  %7516 = vmatprep.subr.bf16.mxu0 %v8732_v2  ;;  %v8781_v2 = vld [vmem:[%s14503_s8 + $0x1] ss:$0 sm:$0xff] }
0x11b9   :  { %7474 = vmatpush2.bf16.msra.mxu1 %v8635_v55  ;;  %7517 = vmatpush2.bf16.msra.mxu0 %v8731_v4 }
0x11ba   :  { %9138 = vmatprep.subr.bf16.mxu1 %v15918_v16  ;;  %9146 = vmatprep.subr.bf16.mxu0 %v15918_v16 }
0x11bc   :  { %7476 = vmatmul.mubr.bf16.vlgmr.msra.gmra.mxu1 %v14115_v62  ;;  %7519 = vmatmul.mubr.bf16.vlgmr.msra.gmra.mxu0 %v14119_v41  ;;  %v9631_v62 = vld [vmem:[%s14502_s7 + $0x18] sm:$0xff]  }
0x11bd   :  { %9139 = vmatpush3.bf16.msra.mxu1 %v7591_v39  ;;  %9147 = vmatpush3.bf16.msra.mxu0 %v7646_v27 }
0x11be   :  { %9140 = vmatprep.subr.bf16.mxu1 %v15918_v16  ;;  %9148 = vmatprep.subr.bf16.mxu0 %v15918_v16 }
0x11bf   :  { %9142 = vmatprep.mubr.msk.bf16.mxu1 %vm16147_vm6, %v15918_v16  ;;  %9150 = vmatprep.mubr.msk.bf16.mxu0 %vm16147_vm6, %v15918_v16 }
0x11c1   :  { %9141 = vmatpush3.bf16.msra.mxu1 %v9629_v9  ;;  %9149 = vmatpush3.bf16.msra.mxu0 %v9630_v40 }
0x11c2   :  { %9154 = vmatprep.subr.bf16.mxu1 %v15918_v16  ;;  %9166 = vmatprep.subr.bf16.mxu0 %v15918_v16 }
0x11c4   :  { %9143 = vmatmul.mubr.msk.bf16.vlgmr.msra.gmra.mxu1 %vm16148_vm0, %v7577_v47  ;;  %9151 = vmatmul.mubr.msk.bf16.vlgmr.msra.gmra.mxu0 %vm16149_vm12, %v7575_v3 }
0x11c5   :  { %9162 = vmatprep.mubr.msk.bf16.mxu1 %vm16147_vm6, %v15918_v16  ;;  %9174 = vmatprep.mubr.msk.bf16.mxu0 %vm16147_vm6, %v15918_v16 }
0x11c6   :  { %9155 = vmatpush3.bf16.msra.mxu1 %v9631_v62  ;;  %9167 = vmatpush3.bf16.msra.mxu0 %v9635_v23 }
0x11c7   :  { %9156 = vmatprep.subr.bf16.mxu1 %v15918_v16  ;;  %9168 = vmatprep.subr.bf16.mxu0 %v15918_v16 }
0x11ca   :  { %9157 = vmatpush3.bf16.msra.mxu1 %v9632_v61  ;;  %9169 = vmatpush3.bf16.msra.mxu0 %v9636_v17 }
0x11cb   :  { %9158 = vmatprep.subr.bf16.mxu1 %v15918_v16  ;;  %9170 = vmatprep.subr.bf16.mxu0 %v15918_v16 }
0x11ce   :  { %9159 = vmatpush3.bf16.msra.mxu1 %v9633_v12  ;;  %9171 = vmatpush3.bf16.msra.mxu0 %v9637_v18 }
0x11cf   :  { %9160 = vmatprep.subr.bf16.mxu1 %v15918_v16  ;;  %9172 = vmatprep.subr.bf16.mxu0 %v15918_v16 }
0x11d2   :  { %9161 = vmatpush3.bf16.msra.mxu1 %v9634_v33 }
0x11fc   :  { %v7305_v41 = vpop.f32.mrf.mxu1  ;;  %v7348_v37 = vpop.f32.mrf.mxu0 }
0x11fd   :  { %v7349_v11 = vadd.f32 %v7348_v37, %v7305_v41 }
0x11fe   :  { %v7307_v48 = vpop.f32.mrf.mxu1  ;;  %v7350_v13 = vpop.f32.mrf.mxu0 }
0x11ff   :  { %9639 = vtanh.f32 %v7349_v11  ;;  %v7351_v15 = vadd.f32 %v7350_v13, %v7307_v48  ;;  %v9638_v11 = vld [vmem:[%s14502_s7 + $0x20] sm:$0xff]  }
0x1200   :  { %v7309_v53 = vpop.f32.mrf.mxu1  ;;  %v7352_v45 = vpop.f32.mrf.mxu0  ;;  %9173 = vmatpush3.bf16.msra.mxu0 %v9638_v11  ;;  %v8782_v48 = vld [vmem:[%s14503_s8 + $0x2] ss:$0 sm:$0xff] }
0x1201   :  { %9641 = vtanh.f32 %v7351_v15  ;;  %v7353_v29 = vadd.f32 %v7352_v45, %v7309_v53 }
0x1202   :  { %v7311_v31 = vpop.f32.mrf.mxu1  ;;  %v7354_v54 = vpop.f32.mrf.mxu0 }
0x1203   :  { %9643 = vtanh.f32 %v7353_v29  ;;  %v7355_v1 = vadd.f32 %v7354_v54, %v7311_v31  ;;  %v8788_v31 = vld [vmem:[%s14503_s8 + $0x3] ss:$0 sm:$0xff] }
0x1205   :  { %9645 = vtanh.f32 %v7355_v1 }
0x120c   :  { %v9640_v49 = vpop.eup %9639 }
0x120d   :  { %7541 = vst [vmem:[%s14507_s12] sm:$0xff] %v9640_v49 }
0x120e   :  { %v9642_v0 = vpop.eup %9641 }
0x120f   :  { %7542 = vst [vmem:[%s14507_s12 + $0x8] sm:$0xff] %v9642_v0 }
0x1210   :  { %v9644_v58 = vpop.eup %9643 }
0x1211   :  { %7547 = vst [vmem:[%s14507_s12 + $0x30] sm:$0xf] %v9644_v58 }
0x1212   :  { %v9646_v35 = vpop.eup %9645 }
0x1213   :  { %7548 = vst [vmem:[%s14507_s12 + $0x38] sm:$0xf] %v9646_v35 }
0x123c   :  { %v7391_v19 = vpop.f32.mrf.mxu1  ;;  %v7434_v36 = vpop.f32.mrf.mxu0 }
0x123d   :  { %v7435_v21 = vadd.f32 %v7434_v36, %v7391_v19 }
0x123e   :  { %v7393_v22 = vpop.f32.mrf.mxu1  ;;  %v7436_v10 = vpop.f32.mrf.mxu0 }
0x123f   :  { %9647 = vtanh.f32 %v7435_v21  ;;  %v7437_v38 = vadd.f32 %v7436_v10, %v7393_v22 }
0x1240   :  { %v7395_v56 = vpop.f32.mrf.mxu1  ;;  %v7438_v57 = vpop.f32.mrf.mxu0 }
0x1241   :  { %9649 = vtanh.f32 %v7437_v38  ;;  %v7439_v28 = vadd.f32 %v7438_v57, %v7395_v56 }
0x1242   :  { %v7397_v30 = vpop.f32.mrf.mxu1  ;;  %v7440_v51 = vpop.f32.mrf.mxu0 }
0x1243   :  { %9651 = vtanh.f32 %v7439_v28  ;;  %v7441_v50 = vadd.f32 %v7440_v51, %v7397_v30 }
0x1245   :  { %9653 = vtanh.f32 %v7441_v50 }
0x124c   :  { %v9648_v32 = vpop.eup %9647 }
0x124d   :  { %7543 = vst [vmem:[%s14507_s12 + $0x10] sm:$0xff] %v9648_v32 }
0x124e   :  { %v9650_v16 = vpop.eup %9649 }
0x124f   :  { %7544 = vst [vmem:[%s14507_s12 + $0x18] sm:$0xff] %v9650_v16 }
0x1250   :  { %v9652_v63 = vpop.eup %9651 }
0x1251   :  { %7549 = vst [vmem:[%s14507_s12 + $0x40] sm:$0xf] %v9652_v63 }
0x1252   :  { %v9654_v42 = vpop.eup %9653 }
0x1253   :  { %7550 = vst [vmem:[%s14507_s12 + $0x48] sm:$0xf] %v9654_v42 }
0x127c   :  { %v7477_v25 = vpop.f32.mrf.mxu1  ;;  %v7520_v44 = vpop.f32.mrf.mxu0 }
0x127d   :  { %v7521_v7 = vadd.f32 %v7520_v44, %v7477_v25 }
0x127e   :  { %v7479_v43 = vpop.f32.mrf.mxu1  ;;  %v7522_v8 = vpop.f32.mrf.mxu0 }
0x127f   :  { %9655 = vtanh.f32 %v7521_v7  ;;  %v7523_v46 = vadd.f32 %v7522_v8, %v7479_v43 }
0x1280   :  { %v7481_v6 = vpop.f32.mrf.mxu1  ;;  %v7524_v60 = vpop.f32.mrf.mxu0 }
0x1281   :  { %9657 = vtanh.f32 %v7523_v46  ;;  %v7525_v59 = vadd.f32 %v7524_v60, %v7481_v6 }
0x1282   :  { %v7483_v5 = vpop.f32.mrf.mxu1  ;;  %v7526_v20 = vpop.f32.mrf.mxu0 }
0x1283   :  { %9659 = vtanh.f32 %v7525_v59  ;;  %v7527_v14 = vadd.f32 %v7526_v20, %v7483_v5 }
0x1284   :  { %v7627_v26 = vpop.f32.mrf.mxu1  ;;  %v7682_v24 = vpop.f32.mrf.mxu0 }
0x1285   :  { %9661 = vtanh.f32 %v7527_v14  ;;  %v7683_v55 = vadd.f32 %v7682_v24, %v7627_v26 }
0x1286   :  { %v9144_v4 = vpop.f32.mrf.mxu1  ;;  %v9152_v34 = vpop.f32.mrf.mxu0 }
0x1287   :  { %v7693_v52 = vadd.f32 %v8781_v2, %v7683_v55 }
0x1288   :  { %v7630_v39 = vpop.f32.mrf.mxu1  ;;  %v7685_v27 = vpop.f32.mrf.mxu0 }
0x1289   :  { %v7694_v3 = vpack.c.bf16 %v7693_v52, %v7693_v52 }
0x128a   :  { %v9145_v9 = vpop.f32.mrf.mxu1  ;;  %v9153_v40 = vpop.f32.mrf.mxu0 }
0x128b   :  { %9163 = vmatmul.mubr.msk.bf16.vlgmr.msra.gmra.mxu1 %vm7724_vm8, %v7694_v3 }
0x128c   :  { %v9656_v47 = vpop.eup %9655 }
0x128d   :  { %7545 = vst [vmem:[%s14507_s12 + $0x20] sm:$0xff] %v9656_v47 }
0x128e   :  { %v9658_v62 = vpop.eup %9657 }
0x128f   :  { %7546 = vst [vmem:[%s14507_s12 + $0x28] sm:$0xff] %v9658_v62 }
0x1290   :  { %v9660_v41 = vpop.eup %9659 }
0x1291   :  { %7551 = vst [vmem:[%s14507_s12 + $0x50] sm:$0xf] %v9660_v41 }
0x1292   :  { %v9662_v37 = vpop.eup %9661 }
0x1293   :  { %7552 = vst [vmem:[%s14507_s12 + $0x58] sm:$0xf] %v9662_v37 }
0x134b   :  { %v7762_v13 = vpop.f32.mrf.mxu1 }
0x134c   :  { %v7763_v61 = vadd.f32 %v8782_v48, %v7762_v13 }
0x134d   :  { %v9164_v15 = vpop.f32.mrf.mxu1 }
0x134e   :  { %v7768_v53 = vpack.c.bf16 %v7763_v61, %v7763_v61 }
0x134f   :  { %v7765_v45 = vpop.f32.mrf.mxu1 }
0x1350   :  { %9175 = vmatmul.mubr.msk.bf16.vlgmr.msra.gmra.mxu0 %vm7724_vm8, %v7768_v53 }
0x1351   :  { %v9165_v29 = vpop.f32.mrf.mxu1 }
0x1410   :  { %v7835_v54 = vpop.f32.mrf.mxu0 }
0x1411   :  { %v7836_v12 = vadd.f32 %v8788_v31, %v7835_v54 }
0x1412   :  { %v9176_v1 = vpop.f32.mrf.mxu0 }
0x1413   :  { %7842 = vst.msk [vmem:[%s14508_s13] sm:$0x3] %vm7841_vm11, %v7836_v12 }
0x1414   :  { %v7838_v33 = vpop.f32.mrf.mxu0 }
0x1416   :  { %v9177_v49 = vpop.f32.mrf.mxu0 }
0x1417   :  { %7866 = vsyncmov [#allocation4] }
0x141a   :  { %s7867_s9 = vpop.sfrf %7866 }
0x141b   :  { %p8794_p0 = scmp.ne.s32.totalorder %s7867_s9, 0 }
0x141d   :  { %7871 = shalt.err (%p8794_p0)  }
0x141e   :  { %7873 = vsyncmov [#allocation4 + $0x1] }
0x1421   :  { %s7874_s10 = vpop.sfrf %7873 }
0x1422   :  { %p8795_p1 = scmp.ne.s32.totalorder %s7874_s10, 0 }
0x1424   :  { %7878 = shalt.err (%p8795_p1)  }

</bundles_post_ra>
